<compile_context>
chip_gen: v7x
topology: tpu7x:2x2x1
jax: 0.10.0
libtpu: 0.0.40
codegen_flags: <defaults>
</compile_context>

<pallas_src>
import jax
import jax.numpy as jnp
from jax import lax
from jax.experimental import pallas as pl
from jax.experimental.pallas import tpu as pltpu

LN_EPS = 1e-5                     # torch.nn.LayerNorm default
MATMUL_DTYPE = jnp.bfloat16       # MXU operand dtype (accumulation is f32).
                                  # Set to jnp.float32 for an exact-f32 path.


# ---------------------------------------------------------------------------
# the Pallas kernel: full Decoder21 forward on a block of batch rows
# ---------------------------------------------------------------------------
def decoder21_kernel(x_ref,               # [TM, 2F]  input slab [real | imag] (MATMUL_DTYPE)
                     wb_ref,              # [5, 2F, 2F] block-complex weights (MATMUL_DTYPE)
                     lnsum_ref,           # [2F, 2F] f32 block-diag ones: per-half sum+broadcast
                     pair_ref,            # [2F, 2F] f32 identity + half-swap permutation
                     g_ref, b_ref,        # [4, 1, 2F] f32 LayerNorm gamma / beta ([real|imag])
                     th_ref,              # SMEM [4] f32 soft-threshold thetas
                     o_ref):              # [TM, 2F] f32 output slab [real | imag]
    two_f = g_ref.shape[-1]
    inv_f = 2.0 / two_f                                  # == 1 / F

    lnsum = lnsum_ref[...]                               # VMEM resident, tiny
    pair = pair_ref[...]

    def cmatmul(x, k):
        # one MXU matmul per complex linear layer (bf16 operands, f32 acc)
        return jnp.dot(x.astype(wb_ref.dtype), wb_ref[k],
                       preferred_element_type=jnp.float32)

    def layernorm(y, k):
        # Per-half mean and mean-of-squares, reduced AND broadcast back to all
        # 2F lanes in one dot each on the idle MXU (0/1 block-diag matrix).
        mu = jnp.dot(y, lnsum, preferred_element_type=jnp.float32) * inv_f
        ms = jnp.dot(y * y, lnsum, preferred_element_type=jnp.float32) * inv_f
        var = jnp.maximum(ms - mu * mu, 0.0)             # guard f32 cancellation
        return (y - mu) * lax.rsqrt(var + LN_EPS) * g_ref[k] + b_ref[k]

    def soft_threshold(y, k):
        # sq[:, j] = yr^2 + yi^2 on every lane via (identity + half-swap) matmul.
        sq = jnp.dot(y * y, pair, preferred_element_type=jnp.float32)
        inv = lax.rsqrt(sq)                              # EUP slot; no divides
        # relu(|x| - theta) / |x|; |x| == 0 still yields NaN, matching torch.
        scale = jnp.maximum(sq * inv - th_ref[k], 0.0) * inv
        return y * scale

    def cv_resblock(x, w0, ln0, th0):
        y = cmatmul(x, w0)                               # CVLinear
        y = layernorm(y, ln0)                            # CVLayerNorm
        y = soft_threshold(y, th0)                       # CVSoftThreshold
        y = cmatmul(y, w0 + 1)                           # CVLinear
        y = layernorm(y, ln0 + 1) + x.astype(jnp.float32)   # CVLayerNorm + residual
        return soft_threshold(y, th0 + 1)                # outer CVSoftThreshold

    x = x_ref[...]
    x = cv_resblock(x, 0, 0, 0)                          # CVResblock #1
    x = cv_resblock(x, 2, 2, 2)                          # CVResblock #2
    o_ref[...] = cmatmul(x, 4)                           # final CVLinear (lane-dense store)


def decoder21_pallas(xr, xi, params, *, block_rows=256):
    wr, wi, gr, br, gi, bi, th = params
    n, f = xr.shape

    # block-complex weights: [xr | xi] @ [[Wr, Wi], [-Wi, Wr]] = [yr | yi]
    wb = jnp.concatenate(
        [jnp.concatenate([wr, wi], axis=-1),
         jnp.concatenate([-wi, wr], axis=-1)], axis=-2).astype(MATMUL_DTYPE)

    # pre-concatenated LayerNorm params: [4, 1, 2F] ([real | imag])
    g_cat = jnp.concatenate([gr, gi], axis=-1)
    b_cat = jnp.concatenate([br, bi], axis=-1)

    # constant 0/1 helper matrices (exact in any MXU pass decomposition)
    half = jnp.arange(2 * f) < f
    lnsum = (half[:, None] == half[None, :]).astype(jnp.float32)        # block-diag ones
    idx = jnp.arange(2 * f)
    pair = ((idx[:, None] == idx[None, :]) |
            (idx[:, None] == (idx[None, :] + f) % (2 * f))).astype(jnp.float32)

    # lane-dense input slab, pre-cast to the MXU operand dtype (halves input DMA)
    x_cat = jnp.concatenate([xr, xi], axis=-1).astype(MATMUL_DTYPE)

    tm = min(block_rows, n)
    if n % tm != 0:
        raise ValueError("batch must be a multiple of block_rows")
    # keep >= 2 grid steps so both v7x TensorCores get work on the parallel axis
    if n // tm == 1 and tm % 16 == 0:
        tm //= 2

    const2 = lambda i: (0, 0)
    const3 = lambda i: (0, 0, 0)

    out = pl.pallas_call(
        decoder21_kernel,
        out_shape=jax.ShapeDtypeStruct((n, 2 * f), jnp.float32),
        grid=(n // tm,),
        in_specs=[
            pl.BlockSpec((tm, 2 * f), lambda i: (i, 0)),        # x rows (bf16)
            pl.BlockSpec((5, 2 * f, 2 * f), const3),            # block-complex weights
            pl.BlockSpec((2 * f, 2 * f), const2),               # LN sum/broadcast matrix
            pl.BlockSpec((2 * f, 2 * f), const2),               # |x|^2 pairing matrix
            pl.BlockSpec((4, 1, 2 * f), const3),                # gamma [real|imag]
            pl.BlockSpec((4, 1, 2 * f), const3),                # beta  [real|imag]
            pl.BlockSpec(memory_space=pltpu.MemorySpace.SMEM),  # thetas
        ],
        out_specs=pl.BlockSpec((tm, 2 * f), lambda i: (i, 0)),
        compiler_params=pltpu.CompilerParams(
            dimension_semantics=("parallel",)),                 # megacore / 2-TC shard
    )(x_cat, wb, lnsum, pair, g_cat, b_cat, th)

    return out[:, :f], out[:, f:]


# ---------------------------------------------------------------------------
# pure-JAX reference (mirrors the PyTorch forward semantics exactly;
# matmul_dtype lets us check both the kernel's bf16-operand path and f32)
# ---------------------------------------------------------------------------
def decoder21_ref(xr, xi, params, matmul_dtype=jnp.float32):
    wr, wi, gr, br, gi, bi, th = params

    def mm(a, w):
        return jnp.dot(a.astype(matmul_dtype), w.astype(matmul_dtype),
                       preferred_element_type=jnp.float32)

    def clin(xr, xi, k):
        ac = mm(xr, wr[k]); bd = mm(xi, wi[k])
        ad = mm(xr, wi[k]); bc = mm(xi, wr[k])
        return ac - bd, ad + bc

    def ln(x, g, b):
        mu = x.mean(-1, keepdims=True)
        var = ((x - mu) ** 2).mean(-1, keepdims=True)
        return (x - mu) / jnp.sqrt(var + LN_EPS) * g + b

    def st(xr, xi, t):
        a = jnp.sqrt(xr * xr + xi * xi)
        bmag = jnp.maximum(a - t, 0.0)
        return xr / a * bmag, xi / a * bmag

    def resblock(xr, xi, w0, l0, t0):
        idr, idi = xr, xi
        xr, xi = clin(xr, xi, w0)
        xr, xi = ln(xr, gr[l0], br[l0]), ln(xi, gi[l0], bi[l0])
        xr, xi = st(xr, xi, th[t0])
        xr, xi = clin(xr, xi, w0 + 1)
        xr, xi = ln(xr, gr[l0 + 1], br[l0 + 1]), ln(xi, gi[l0 + 1], bi[l0 + 1])
        return st(xr + idr, xi + idi, th[t0 + 1])

    xr, xi = resblock(xr, xi, 0, 0, 0)
    xr, xi = resblock(xr, xi, 2, 2, 2)
    return clin(xr, xi, 4)


# ---------------------------------------------------------------------------
# deterministic synthetic parameters (shapes follow the module __init__)
# ---------------------------------------------------------------------------
def make_params(key, f):
    ks = jax.random.split(key, 7)
    scale = 1.0 / jnp.sqrt(jnp.float32(f))
    # 5 CVLinear layers, each real & imag weight stored as [in, out] (== W.T)
    wr = jax.random.uniform(ks[0], (5, f, f), jnp.float32, -scale, scale)
    wi = jax.random.uniform(ks[1], (5, f, f), jnp.float32, -scale, scale)
    # 4 CVLayerNorm layers (gamma ~ 1, beta ~ 0 plus small deterministic noise)
    gr = 1.0 + 0.05 * jax.random.normal(ks[2], (4, 1, f), jnp.float32)
    br = 0.05 * jax.random.normal(ks[3], (4, 1, f), jnp.float32)
    gi = 1.0 + 0.05 * jax.random.normal(ks[4], (4, 1, f), jnp.float32)
    bi = 0.05 * jax.random.normal(ks[5], (4, 1, f), jnp.float32)
    # 4 CVSoftThreshold thetas (small positive so the threshold is non-trivial)
    th = 0.05 * jax.random.uniform(ks[6], (4,), jnp.float32)
    return wr, wi, gr, br, gi, bi, th


if __name__ == "__main__":
    N, F = 512, 32   # batch rows (grid = 2 blocks of 256 -> both v7x TCs busy)
    key = jax.random.PRNGKey(0)
    kx, kp = jax.random.split(key)
    kxr, kxi = jax.random.split(kx)
    x_real = jax.random.normal(kxr, (N, F), jnp.float32)
    x_imag = jax.random.normal(kxi, (N, F), jnp.float32)
    params = make_params(kp, F)

    out_r, out_i = decoder21_pallas(x_real, x_imag, params, block_rows=256)
    out_r, out_i = jax.block_until_ready((out_r, out_i))
    assert out_r.shape == (N, F) and out_i.shape == (N, F)

    # (1) implementation check against a reference using the same MXU operand
    #     precision as the kernel (input rounded to the operand dtype once, as
    #     the kernel does) — catches any real math/layout bug.
    xr_q = x_real.astype(MATMUL_DTYPE).astype(jnp.float32)
    xi_q = x_imag.astype(MATMUL_DTYPE).astype(jnp.float32)
    ref_r, ref_i = decoder21_ref(xr_q, xi_q, params, matmul_dtype=MATMUL_DTYPE)
    assert jnp.allclose(out_r, ref_r, atol=1e-2, rtol=1e-2)
    assert jnp.allclose(out_i, ref_i, atol=1e-2, rtol=1e-2)

    # (2) semantics check against the full-f32 module math: bf16 MXU-operand
    #     rounding across the 5-matmul chain stays small in relative L2.
    f32_r, f32_i = decoder21_ref(x_real, x_imag, params, matmul_dtype=jnp.float32)
    num = jnp.sqrt(jnp.sum((out_r - f32_r) ** 2) + jnp.sum((out_i - f32_i) ** 2))
    den = jnp.sqrt(jnp.sum(f32_r ** 2) + jnp.sum(f32_i ** 2))
    assert float(num / den) < 3e-2

    # final complex output (as torch would return complex64)
    _ = jax.block_until_ready(out_r + 1j * out_i)
    print("KERNEL_OK")
</pallas_src>

<mosaic_0001>
module attributes {stable_mosaic.version = 11 : i64} {
  func.func @decoder21_kernel(%arg0: i32, %arg1: memref<256x64xbf16, #tpu.memory_space<vmem>>, %arg2: memref<5x64x64xbf16, #tpu.memory_space<vmem>>, %arg3: memref<64x64xf32, #tpu.memory_space<vmem>>, %arg4: memref<64x64xf32, #tpu.memory_space<vmem>>, %arg5: memref<4x1x64xf32, #tpu.memory_space<vmem>>, %arg6: memref<4x1x64xf32, #tpu.memory_space<vmem>>, %arg7: memref<4xf32, #tpu.memory_space<smem>>, %arg8: memref<256x64xf32, #tpu.memory_space<vmem>>) attributes {dimension_semantics = [#tpu.dimension_semantics<parallel>], iteration_bounds = array<i64: 2>, scalar_prefetch = 0 : i64, scratch_operands = 0 : i64, tpu.core_type = #tpu.core_type<tc>, window_params = [{transform_indices = @transform_0, window_bounds = array<i64: 256, 64>}, {pipeline_mode = #tpu.pipeline_mode<synchronous>, transform_indices = @transform_1, window_bounds = array<i64: 5, 64, 64>}, {pipeline_mode = #tpu.pipeline_mode<synchronous>, transform_indices = @transform_2, window_bounds = array<i64: 64, 64>}, {pipeline_mode = #tpu.pipeline_mode<synchronous>, transform_indices = @transform_3, window_bounds = array<i64: 64, 64>}, {pipeline_mode = #tpu.pipeline_mode<synchronous>, transform_indices = @transform_4, window_bounds = array<i64: 4, 1, 64>}, {pipeline_mode = #tpu.pipeline_mode<synchronous>, transform_indices = @transform_5, window_bounds = array<i64: 4, 1, 64>}, {transform_indices = @transform_6, window_bounds = array<i64: 4>}, {transform_indices = @transform_7, window_bounds = array<i64: 256, 64>}]} {
    %c0 = arith.constant 0 : index
    %c0_0 = arith.constant 0 : index
    %0 = vector.load %arg3[%c0, %c0_0] : memref<64x64xf32, #tpu.memory_space<vmem>>, vector<64x64xf32>
    %c0_1 = arith.constant 0 : index
    %c0_2 = arith.constant 0 : index
    %1 = vector.load %arg4[%c0_1, %c0_2] : memref<64x64xf32, #tpu.memory_space<vmem>>, vector<64x64xf32>
    %c0_3 = arith.constant 0 : index
    %c0_4 = arith.constant 0 : index
    %2 = vector.load %arg1[%c0_3, %c0_4] : memref<256x64xbf16, #tpu.memory_space<vmem>>, vector<256x64xbf16>
    %c0_5 = arith.constant 0 : index
    %c0_6 = arith.constant 0 : index
    %c0_7 = arith.constant 0 : index
    %3 = vector.load %arg2[%c0_5, %c0_6, %c0_7] : memref<5x64x64xbf16, #tpu.memory_space<vmem>>, vector<1x64x64xbf16>
    %4 = vector.shape_cast %3 : vector<1x64x64xbf16> to vector<64x64xbf16>
    %cst = arith.constant dense<0.000000e+00> : vector<256x64xf32>
    %5 = tpu.matmul %2, %4, %cst {dimension_numbers = #tpu.dot_dimension_numbers<[1], [0], [0], [1], [0, 0, 1, 1], [], []>} : vector<256x64xbf16>, vector<64x64xbf16>, vector<256x64xf32> -> vector<256x64xf32>
    %cst_8 = arith.constant dense<0.000000e+00> : vector<256x64xf32>
    %6 = tpu.matmul %5, %0, %cst_8 {dimension_numbers = #tpu.dot_dimension_numbers<[1], [0], [0], [1], [0, 0, 1, 1], [], []>} : vector<256x64xf32>, vector<64x64xf32>, vector<256x64xf32> -> vector<256x64xf32>
    %cst_9 = arith.constant 3.125000e-02 : f32
    %7 = vector.broadcast %cst_9 : f32 to vector<256x64xf32>
    %8 = arith.mulf %6, %7 : vector<256x64xf32>
    %9 = arith.mulf %5, %5 : vector<256x64xf32>
    %cst_10 = arith.constant dense<0.000000e+00> : vector<256x64xf32>
    %10 = tpu.matmul %9, %0, %cst_10 {dimension_numbers = #tpu.dot_dimension_numbers<[1], [0], [0], [1], [0, 0, 1, 1], [], []>} : vector<256x64xf32>, vector<64x64xf32>, vector<256x64xf32> -> vector<256x64xf32>
    %cst_11 = arith.constant 3.125000e-02 : f32
    %11 = vector.broadcast %cst_11 : f32 to vector<256x64xf32>
    %12 = arith.mulf %10, %11 : vector<256x64xf32>
    %13 = arith.mulf %8, %8 : vector<256x64xf32>
    %14 = arith.subf %12, %13 : vector<256x64xf32>
    %cst_12 = arith.constant 0.000000e+00 : f32
    %15 = vector.broadcast %cst_12 : f32 to vector<256x64xf32>
    %16 = arith.maximumf %14, %15 : vector<256x64xf32>
    %17 = arith.subf %5, %8 : vector<256x64xf32>
    %cst_13 = arith.constant 9.99999974E-6 : f32
    %18 = vector.broadcast %cst_13 : f32 to vector<256x64xf32>
    %19 = arith.addf %16, %18 : vector<256x64xf32>
    %20 = math.rsqrt %19 : vector<256x64xf32>
    %21 = arith.mulf %17, %20 : vector<256x64xf32>
    %c0_14 = arith.constant 0 : index
    %c0_15 = arith.constant 0 : index
    %c0_16 = arith.constant 0 : index
    %22 = vector.load %arg5[%c0_14, %c0_15, %c0_16] : memref<4x1x64xf32, #tpu.memory_space<vmem>>, vector<1x1x64xf32>
    %23 = vector.shape_cast %22 : vector<1x1x64xf32> to vector<1x64xf32>
    %24 = vector.broadcast %23 : vector<1x64xf32> to vector<256x64xf32>
    %25 = arith.mulf %21, %24 : vector<256x64xf32>
    %c0_17 = arith.constant 0 : index
    %c0_18 = arith.constant 0 : index
    %c0_19 = arith.constant 0 : index
    %26 = vector.load %arg6[%c0_17, %c0_18, %c0_19] : memref<4x1x64xf32, #tpu.memory_space<vmem>>, vector<1x1x64xf32>
    %27 = vector.shape_cast %26 : vector<1x1x64xf32> to vector<1x64xf32>
    %28 = vector.broadcast %27 : vector<1x64xf32> to vector<256x64xf32>
    %29 = arith.addf %25, %28 : vector<256x64xf32>
    %30 = arith.mulf %29, %29 : vector<256x64xf32>
    %cst_20 = arith.constant dense<0.000000e+00> : vector<256x64xf32>
    %31 = tpu.matmul %30, %1, %cst_20 {dimension_numbers = #tpu.dot_dimension_numbers<[1], [0], [0], [1], [0, 0, 1, 1], [], []>} : vector<256x64xf32>, vector<64x64xf32>, vector<256x64xf32> -> vector<256x64xf32>
    %32 = math.rsqrt %31 : vector<256x64xf32>
    %33 = arith.mulf %31, %32 : vector<256x64xf32>
    %c0_21 = arith.constant 0 : index
    %34 = memref.load %arg7[%c0_21] : memref<4xf32, #tpu.memory_space<smem>>
    %35 = vector.broadcast %34 : f32 to vector<256x64xf32>
    %36 = arith.subf %33, %35 : vector<256x64xf32>
    %cst_22 = arith.constant 0.000000e+00 : f32
    %37 = vector.broadcast %cst_22 : f32 to vector<256x64xf32>
    %38 = arith.maximumf %36, %37 : vector<256x64xf32>
    %39 = arith.mulf %38, %32 : vector<256x64xf32>
    %40 = arith.mulf %29, %39 : vector<256x64xf32>
    %41 = arith.truncf %40 : vector<256x64xf32> to vector<256x64xbf16>
    %c1 = arith.constant 1 : index
    %c0_23 = arith.constant 0 : index
    %c0_24 = arith.constant 0 : index
    %42 = vector.load %arg2[%c1, %c0_23, %c0_24] : memref<5x64x64xbf16, #tpu.memory_space<vmem>>, vector<1x64x64xbf16>
    %43 = vector.shape_cast %42 : vector<1x64x64xbf16> to vector<64x64xbf16>
    %cst_25 = arith.constant dense<0.000000e+00> : vector<256x64xf32>
    %44 = tpu.matmul %41, %43, %cst_25 {dimension_numbers = #tpu.dot_dimension_numbers<[1], [0], [0], [1], [0, 0, 1, 1], [], []>} : vector<256x64xbf16>, vector<64x64xbf16>, vector<256x64xf32> -> vector<256x64xf32>
    %cst_26 = arith.constant dense<0.000000e+00> : vector<256x64xf32>
    %45 = tpu.matmul %44, %0, %cst_26 {dimension_numbers = #tpu.dot_dimension_numbers<[1], [0], [0], [1], [0, 0, 1, 1], [], []>} : vector<256x64xf32>, vector<64x64xf32>, vector<256x64xf32> -> vector<256x64xf32>
    %cst_27 = arith.constant 3.125000e-02 : f32
    %46 = vector.broadcast %cst_27 : f32 to vector<256x64xf32>
    %47 = arith.mulf %45, %46 : vector<256x64xf32>
    %48 = arith.mulf %44, %44 : vector<256x64xf32>
    %cst_28 = arith.constant dense<0.000000e+00> : vector<256x64xf32>
    %49 = tpu.matmul %48, %0, %cst_28 {dimension_numbers = #tpu.dot_dimension_numbers<[1], [0], [0], [1], [0, 0, 1, 1], [], []>} : vector<256x64xf32>, vector<64x64xf32>, vector<256x64xf32> -> vector<256x64xf32>
    %cst_29 = arith.constant 3.125000e-02 : f32
    %50 = vector.broadcast %cst_29 : f32 to vector<256x64xf32>
    %51 = arith.mulf %49, %50 : vector<256x64xf32>
    %52 = arith.mulf %47, %47 : vector<256x64xf32>
    %53 = arith.subf %51, %52 : vector<256x64xf32>
    %cst_30 = arith.constant 0.000000e+00 : f32
    %54 = vector.broadcast %cst_30 : f32 to vector<256x64xf32>
    %55 = arith.maximumf %53, %54 : vector<256x64xf32>
    %56 = arith.subf %44, %47 : vector<256x64xf32>
    %cst_31 = arith.constant 9.99999974E-6 : f32
    %57 = vector.broadcast %cst_31 : f32 to vector<256x64xf32>
    %58 = arith.addf %55, %57 : vector<256x64xf32>
    %59 = math.rsqrt %58 : vector<256x64xf32>
    %60 = arith.mulf %56, %59 : vector<256x64xf32>
    %c1_32 = arith.constant 1 : index
    %c0_33 = arith.constant 0 : index
    %c0_34 = arith.constant 0 : index
    %61 = vector.load %arg5[%c1_32, %c0_33, %c0_34] : memref<4x1x64xf32, #tpu.memory_space<vmem>>, vector<1x1x64xf32>
    %62 = vector.shape_cast %61 : vector<1x1x64xf32> to vector<1x64xf32>
    %63 = vector.broadcast %62 : vector<1x64xf32> to vector<256x64xf32>
    %64 = arith.mulf %60, %63 : vector<256x64xf32>
    %c1_35 = arith.constant 1 : index
    %c0_36 = arith.constant 0 : index
    %c0_37 = arith.constant 0 : index
    %65 = vector.load %arg6[%c1_35, %c0_36, %c0_37] : memref<4x1x64xf32, #tpu.memory_space<vmem>>, vector<1x1x64xf32>
    %66 = vector.shape_cast %65 : vector<1x1x64xf32> to vector<1x64xf32>
    %67 = vector.broadcast %66 : vector<1x64xf32> to vector<256x64xf32>
    %68 = arith.addf %64, %67 : vector<256x64xf32>
    %69 = arith.extf %2 : vector<256x64xbf16> to vector<256x64xf32>
    %70 = arith.addf %68, %69 : vector<256x64xf32>
    %71 = arith.mulf %70, %70 : vector<256x64xf32>
    %cst_38 = arith.constant dense<0.000000e+00> : vector<256x64xf32>
    %72 = tpu.matmul %71, %1, %cst_38 {dimension_numbers = #tpu.dot_dimension_numbers<[1], [0], [0], [1], [0, 0, 1, 1], [], []>} : vector<256x64xf32>, vector<64x64xf32>, vector<256x64xf32> -> vector<256x64xf32>
    %73 = math.rsqrt %72 : vector<256x64xf32>
    %74 = arith.mulf %72, %73 : vector<256x64xf32>
    %c1_39 = arith.constant 1 : index
    %75 = memref.load %arg7[%c1_39] : memref<4xf32, #tpu.memory_space<smem>>
    %76 = vector.broadcast %75 : f32 to vector<256x64xf32>
    %77 = arith.subf %74, %76 : vector<256x64xf32>
    %cst_40 = arith.constant 0.000000e+00 : f32
    %78 = vector.broadcast %cst_40 : f32 to vector<256x64xf32>
    %79 = arith.maximumf %77, %78 : vector<256x64xf32>
    %80 = arith.mulf %79, %73 : vector<256x64xf32>
    %81 = arith.mulf %70, %80 : vector<256x64xf32>
    %82 = arith.truncf %81 : vector<256x64xf32> to vector<256x64xbf16>
    %c2 = arith.constant 2 : index
    %c0_41 = arith.constant 0 : index
    %c0_42 = arith.constant 0 : index
    %83 = vector.load %arg2[%c2, %c0_41, %c0_42] : memref<5x64x64xbf16, #tpu.memory_space<vmem>>, vector<1x64x64xbf16>
    %84 = vector.shape_cast %83 : vector<1x64x64xbf16> to vector<64x64xbf16>
    %cst_43 = arith.constant dense<0.000000e+00> : vector<256x64xf32>
    %85 = tpu.matmul %82, %84, %cst_43 {dimension_numbers = #tpu.dot_dimension_numbers<[1], [0], [0], [1], [0, 0, 1, 1], [], []>} : vector<256x64xbf16>, vector<64x64xbf16>, vector<256x64xf32> -> vector<256x64xf32>
    %cst_44 = arith.constant dense<0.000000e+00> : vector<256x64xf32>
    %86 = tpu.matmul %85, %0, %cst_44 {dimension_numbers = #tpu.dot_dimension_numbers<[1], [0], [0], [1], [0, 0, 1, 1], [], []>} : vector<256x64xf32>, vector<64x64xf32>, vector<256x64xf32> -> vector<256x64xf32>
    %cst_45 = arith.constant 3.125000e-02 : f32
    %87 = vector.broadcast %cst_45 : f32 to vector<256x64xf32>
    %88 = arith.mulf %86, %87 : vector<256x64xf32>
    %89 = arith.mulf %85, %85 : vector<256x64xf32>
    %cst_46 = arith.constant dense<0.000000e+00> : vector<256x64xf32>
    %90 = tpu.matmul %89, %0, %cst_46 {dimension_numbers = #tpu.dot_dimension_numbers<[1], [0], [0], [1], [0, 0, 1, 1], [], []>} : vector<256x64xf32>, vector<64x64xf32>, vector<256x64xf32> -> vector<256x64xf32>
    %cst_47 = arith.constant 3.125000e-02 : f32
    %91 = vector.broadcast %cst_47 : f32 to vector<256x64xf32>
    %92 = arith.mulf %90, %91 : vector<256x64xf32>
    %93 = arith.mulf %88, %88 : vector<256x64xf32>
    %94 = arith.subf %92, %93 : vector<256x64xf32>
    %cst_48 = arith.constant 0.000000e+00 : f32
    %95 = vector.broadcast %cst_48 : f32 to vector<256x64xf32>
    %96 = arith.maximumf %94, %95 : vector<256x64xf32>
    %97 = arith.subf %85, %88 : vector<256x64xf32>
    %cst_49 = arith.constant 9.99999974E-6 : f32
    %98 = vector.broadcast %cst_49 : f32 to vector<256x64xf32>
    %99 = arith.addf %96, %98 : vector<256x64xf32>
    %100 = math.rsqrt %99 : vector<256x64xf32>
    %101 = arith.mulf %97, %100 : vector<256x64xf32>
    %c2_50 = arith.constant 2 : index
    %c0_51 = arith.constant 0 : index
    %c0_52 = arith.constant 0 : index
    %102 = vector.load %arg5[%c2_50, %c0_51, %c0_52] : memref<4x1x64xf32, #tpu.memory_space<vmem>>, vector<1x1x64xf32>
    %103 = vector.shape_cast %102 : vector<1x1x64xf32> to vector<1x64xf32>
    %104 = vector.broadcast %103 : vector<1x64xf32> to vector<256x64xf32>
    %105 = arith.mulf %101, %104 : vector<256x64xf32>
    %c2_53 = arith.constant 2 : index
    %c0_54 = arith.constant 0 : index
    %c0_55 = arith.constant 0 : index
    %106 = vector.load %arg6[%c2_53, %c0_54, %c0_55] : memref<4x1x64xf32, #tpu.memory_space<vmem>>, vector<1x1x64xf32>
    %107 = vector.shape_cast %106 : vector<1x1x64xf32> to vector<1x64xf32>
    %108 = vector.broadcast %107 : vector<1x64xf32> to vector<256x64xf32>
    %109 = arith.addf %105, %108 : vector<256x64xf32>
    %110 = arith.mulf %109, %109 : vector<256x64xf32>
    %cst_56 = arith.constant dense<0.000000e+00> : vector<256x64xf32>
    %111 = tpu.matmul %110, %1, %cst_56 {dimension_numbers = #tpu.dot_dimension_numbers<[1], [0], [0], [1], [0, 0, 1, 1], [], []>} : vector<256x64xf32>, vector<64x64xf32>, vector<256x64xf32> -> vector<256x64xf32>
    %112 = math.rsqrt %111 : vector<256x64xf32>
    %113 = arith.mulf %111, %112 : vector<256x64xf32>
    %c2_57 = arith.constant 2 : index
    %114 = memref.load %arg7[%c2_57] : memref<4xf32, #tpu.memory_space<smem>>
    %115 = vector.broadcast %114 : f32 to vector<256x64xf32>
    %116 = arith.subf %113, %115 : vector<256x64xf32>
    %cst_58 = arith.constant 0.000000e+00 : f32
    %117 = vector.broadcast %cst_58 : f32 to vector<256x64xf32>
    %118 = arith.maximumf %116, %117 : vector<256x64xf32>
    %119 = arith.mulf %118, %112 : vector<256x64xf32>
    %120 = arith.mulf %109, %119 : vector<256x64xf32>
    %121 = arith.truncf %120 : vector<256x64xf32> to vector<256x64xbf16>
    %c3 = arith.constant 3 : index
    %c0_59 = arith.constant 0 : index
    %c0_60 = arith.constant 0 : index
    %122 = vector.load %arg2[%c3, %c0_59, %c0_60] : memref<5x64x64xbf16, #tpu.memory_space<vmem>>, vector<1x64x64xbf16>
    %123 = vector.shape_cast %122 : vector<1x64x64xbf16> to vector<64x64xbf16>
    %cst_61 = arith.constant dense<0.000000e+00> : vector<256x64xf32>
    %124 = tpu.matmul %121, %123, %cst_61 {dimension_numbers = #tpu.dot_dimension_numbers<[1], [0], [0], [1], [0, 0, 1, 1], [], []>} : vector<256x64xbf16>, vector<64x64xbf16>, vector<256x64xf32> -> vector<256x64xf32>
    %cst_62 = arith.constant dense<0.000000e+00> : vector<256x64xf32>
    %125 = tpu.matmul %124, %0, %cst_62 {dimension_numbers = #tpu.dot_dimension_numbers<[1], [0], [0], [1], [0, 0, 1, 1], [], []>} : vector<256x64xf32>, vector<64x64xf32>, vector<256x64xf32> -> vector<256x64xf32>
    %cst_63 = arith.constant 3.125000e-02 : f32
    %126 = vector.broadcast %cst_63 : f32 to vector<256x64xf32>
    %127 = arith.mulf %125, %126 : vector<256x64xf32>
    %128 = arith.mulf %124, %124 : vector<256x64xf32>
    %cst_64 = arith.constant dense<0.000000e+00> : vector<256x64xf32>
    %129 = tpu.matmul %128, %0, %cst_64 {dimension_numbers = #tpu.dot_dimension_numbers<[1], [0], [0], [1], [0, 0, 1, 1], [], []>} : vector<256x64xf32>, vector<64x64xf32>, vector<256x64xf32> -> vector<256x64xf32>
    %cst_65 = arith.constant 3.125000e-02 : f32
    %130 = vector.broadcast %cst_65 : f32 to vector<256x64xf32>
    %131 = arith.mulf %129, %130 : vector<256x64xf32>
    %132 = arith.mulf %127, %127 : vector<256x64xf32>
    %133 = arith.subf %131, %132 : vector<256x64xf32>
    %cst_66 = arith.constant 0.000000e+00 : f32
    %134 = vector.broadcast %cst_66 : f32 to vector<256x64xf32>
    %135 = arith.maximumf %133, %134 : vector<256x64xf32>
    %136 = arith.subf %124, %127 : vector<256x64xf32>
    %cst_67 = arith.constant 9.99999974E-6 : f32
    %137 = vector.broadcast %cst_67 : f32 to vector<256x64xf32>
    %138 = arith.addf %135, %137 : vector<256x64xf32>
    %139 = math.rsqrt %138 : vector<256x64xf32>
    %140 = arith.mulf %136, %139 : vector<256x64xf32>
    %c3_68 = arith.constant 3 : index
    %c0_69 = arith.constant 0 : index
    %c0_70 = arith.constant 0 : index
    %141 = vector.load %arg5[%c3_68, %c0_69, %c0_70] : memref<4x1x64xf32, #tpu.memory_space<vmem>>, vector<1x1x64xf32>
    %142 = vector.shape_cast %141 : vector<1x1x64xf32> to vector<1x64xf32>
    %143 = vector.broadcast %142 : vector<1x64xf32> to vector<256x64xf32>
    %144 = arith.mulf %140, %143 : vector<256x64xf32>
    %c3_71 = arith.constant 3 : index
    %c0_72 = arith.constant 0 : index
    %c0_73 = arith.constant 0 : index
    %145 = vector.load %arg6[%c3_71, %c0_72, %c0_73] : memref<4x1x64xf32, #tpu.memory_space<vmem>>, vector<1x1x64xf32>
    %146 = vector.shape_cast %145 : vector<1x1x64xf32> to vector<1x64xf32>
    %147 = vector.broadcast %146 : vector<1x64xf32> to vector<256x64xf32>
    %148 = arith.addf %144, %147 : vector<256x64xf32>
    %149 = arith.addf %148, %81 : vector<256x64xf32>
    %150 = arith.mulf %149, %149 : vector<256x64xf32>
    %cst_74 = arith.constant dense<0.000000e+00> : vector<256x64xf32>
    %151 = tpu.matmul %150, %1, %cst_74 {dimension_numbers = #tpu.dot_dimension_numbers<[1], [0], [0], [1], [0, 0, 1, 1], [], []>} : vector<256x64xf32>, vector<64x64xf32>, vector<256x64xf32> -> vector<256x64xf32>
    %152 = math.rsqrt %151 : vector<256x64xf32>
    %153 = arith.mulf %151, %152 : vector<256x64xf32>
    %c3_75 = arith.constant 3 : index
    %154 = memref.load %arg7[%c3_75] : memref<4xf32, #tpu.memory_space<smem>>
    %155 = vector.broadcast %154 : f32 to vector<256x64xf32>
    %156 = arith.subf %153, %155 : vector<256x64xf32>
    %cst_76 = arith.constant 0.000000e+00 : f32
    %157 = vector.broadcast %cst_76 : f32 to vector<256x64xf32>
    %158 = arith.maximumf %156, %157 : vector<256x64xf32>
    %159 = arith.mulf %158, %152 : vector<256x64xf32>
    %160 = arith.mulf %149, %159 : vector<256x64xf32>
    %161 = arith.truncf %160 : vector<256x64xf32> to vector<256x64xbf16>
    %c4 = arith.constant 4 : index
    %c0_77 = arith.constant 0 : index
    %c0_78 = arith.constant 0 : index
    %162 = vector.load %arg2[%c4, %c0_77, %c0_78] : memref<5x64x64xbf16, #tpu.memory_space<vmem>>, vector<1x64x64xbf16>
    %163 = vector.shape_cast %162 : vector<1x64x64xbf16> to vector<64x64xbf16>
    %cst_79 = arith.constant dense<0.000000e+00> : vector<256x64xf32>
    %164 = tpu.matmul %161, %163, %cst_79 {dimension_numbers = #tpu.dot_dimension_numbers<[1], [0], [0], [1], [0, 0, 1, 1], [], []>} : vector<256x64xbf16>, vector<64x64xbf16>, vector<256x64xf32> -> vector<256x64xf32>
    %c0_80 = arith.constant 0 : index
    %c0_81 = arith.constant 0 : index
    %165 = vector.load %arg8[%c0_80, %c0_81] : memref<256x64xf32, #tpu.memory_space<vmem>>, vector<256x64xf32>
    tpu.vector_store %arg8[%c0_80, %c0_81], %164 {strides = array<i32>} : memref<256x64xf32, #tpu.memory_space<vmem>>, vector<256x64xf32>,
    return
  }
  func.func @transform_0(%arg0: i32) -> (i32, i32) {
    %c0_i32 = arith.constant 0 : i32
    %c0_i32_0 = arith.constant 0 : i32
    return %arg0, %c0_i32 : i32, i32
  }
  func.func @transform_1(%arg0: i32) -> (i32, i32, i32) {
    %c0_i32 = arith.constant 0 : i32
    %c0_i32_0 = arith.constant 0 : i32
    %c0_i32_1 = arith.constant 0 : i32
    %c0_i32_2 = arith.constant 0 : i32
    return %c0_i32, %c0_i32_0, %c0_i32_1 : i32, i32, i32
  }
  func.func @transform_2(%arg0: i32) -> (i32, i32) {
    %c0_i32 = arith.constant 0 : i32
    %c0_i32_0 = arith.constant 0 : i32
    %c0_i32_1 = arith.constant 0 : i32
    return %c0_i32, %c0_i32_0 : i32, i32
  }
  func.func @transform_3(%arg0: i32) -> (i32, i32) {
    %c0_i32 = arith.constant 0 : i32
    %c0_i32_0 = arith.constant 0 : i32
    %c0_i32_1 = arith.constant 0 : i32
    return %c0_i32, %c0_i32_0 : i32, i32
  }
  func.func @transform_4(%arg0: i32) -> (i32, i32, i32) {
    %c0_i32 = arith.constant 0 : i32
    %c0_i32_0 = arith.constant 0 : i32
    %c0_i32_1 = arith.constant 0 : i32
    %c0_i32_2 = arith.constant 0 : i32
    return %c0_i32, %c0_i32_0, %c0_i32_1 : i32, i32, i32
  }
  func.func @transform_5(%arg0: i32) -> (i32, i32, i32) {
    %c0_i32 = arith.constant 0 : i32
    %c0_i32_0 = arith.constant 0 : i32
    %c0_i32_1 = arith.constant 0 : i32
    %c0_i32_2 = arith.constant 0 : i32
    return %c0_i32, %c0_i32_0, %c0_i32_1 : i32, i32, i32
  }
  func.func @transform_6(%arg0: i32) -> i32 {
    %c0_i32 = arith.constant 0 : i32
    %c0_i32_0 = arith.constant 0 : i32
    return %c0_i32 : i32
  }
  func.func @transform_7(%arg0: i32) -> (i32, i32) {
    %c0_i32 = arith.constant 0 : i32
    %c0_i32_0 = arith.constant 0 : i32
    return %arg0, %c0_i32 : i32, i32
  }
}

</mosaic_0001>

<bundles_post_ra>
// kernel: tpu_custom_call.1
= control target key start
LH: loop header
LB: loop body
LE: loop exit
PB: predicated region body
PF: predicated region fallthrough
CT: control target
= control target key end

     0   :  { %12 = vsyncpa [#allocation3], 0  ;;  %s11226_s24 = smov 0   ;;  %s15325_s0 = inlined_call_operand.vmem [shape: bf16[512,64], index: 0, kind: input, shape index: {}]   ;;  %s15326_s1 = inlined_call_operand.vmem [shape: bf16[5,64,64], index: 1, kind: input, shape index: {}]   ;;  %s15327_s2 = inlined_call_operand.vmem [shape: f32[64,64], index: 2, kind: input, shape index: {}]   ;;  %s15328_s3 = inlined_call_operand.vmem [shape: f32[64,64], index: 3, kind: input, shape index: {}]   ;;  %s15329_s4 = inlined_call_operand.vmem [shape: f32[4,1,64], index: 4, kind: input, shape index: {}]   ;;  %s15330_s5 = inlined_call_operand.vmem [shape: f32[4,1,64], index: 5, kind: input, shape index: {}]   ;;  %s15331_s6 = inlined_call_operand.vmem [shape: f32[4], index: 6, kind: input, shape index: {}]   ;;  %s15332_s7 = inlined_call_operand.vmem [shape: f32[512,64], index: 7, kind: output, shape index: {}]  }
   0x1 LB: > { %s8249_s25 = sadd.s32 4294967295, %s11183_s24   ;;  %p8251_p0 = scmp.ge.s32.totalorder %s11183_s24, 1  ;;  %s11183_s24 = sphi %s11226_s24, %s18_s24  }
   0x2   : > { %p201_p1 = scmp.lt.s32.totalorder %s11183_s24, 3  ;;  %s229_s28 = sshll.u32 %s15331_s6, 4  ;;  %s230_s28 = int_to_ptr.vmem [resolvable:$true] %s229_s28 }
   0x3   : > { %p11241_p3 = scmp.eq.s32.totalorder %s8249_s25, 0  ;;  %s11158_s8 = scalar_lea.vmem %s230_s28, 16 }
   0x4   : > { %p11237_p2 = pnand %p8251_p0, %p201_p1  ;;  %p11159_p6 = scmp.ne.s32.totalorder %s230_s28, %s11158_s8 }
   0x5   : > { %p11166_p10 = scmp.lt.s32.totalorder %s230_s28, %s230_s28  ;;  %p11167_p11 = scmp.lt.s32.totalorder %s11158_s8, %s11158_s8 }
   0x6   : > { %p10563_p4 = pneg %p11237_p2 }
   0x7   : > { %p11168_p12 = por %p11167_p11, %p11166_p10 }
   0x8   : > { %p10564_p5 = pnand %p11241_p3, %p10563_p4 }
   0xa   : > { %p11160_p7 = pneg %p10564_p5 }
   0xc   : > { %p11161_p8 = pnand %p11160_p7, %p11159_p6 }
   0xe   : > { %p11162_p9 = pneg %p11161_p8 }
  0x10   : > { %p11169_p13 = pnand %p11168_p12, %p11162_p9 }
  0x12   : > { %11172 = shalt.err (!%p11169_p13)
}
  0x13   : > { %s11185_s9 = smov [#allocation2]   ;;  %251 = sbr.rel (%p11237_p2) target bundleno = 3214 (0xc8e), region = 48 }
  0x14   : > { %10566 = dma.vmem_to_smem (!%p10564_p5), %s230_s28, 16, %s11185_s9, [#allocation3]  }
  0x1a   : > { %11178 = dma.done.wait (%p11241_p3), [#allocation3], 16  }
  0x1b   : > { %11180 = vsyncadd (%p11241_p3), [#allocation3], 4294967280 }
  0x1c   : > { %257 = sfence }
  0x1d   : > { %v10578_v0 = vld [vmem:[%s15326_s1] sm:$0xff]   ;;  %s8256_s12 = sshll.u32 %s8249_s25, 5  ;;  %v10579_v1 = vld [vmem:[%s15326_s1 + $0x8] sm:$0xff]   ;;  %v10580_v2 = vld [vmem:[%s15326_s1 + $0x10] sm:$0xff]   ;;  %vm457_vm0 = vcmask 523264   ;;  %s2124_s28 = sld [smem:[#allocation2]] }
  0x1e   : > { %p285_p0 = scmp.lt.s32.totalorder %s8256_s12, 63  ;;  %9391 = vmatprep.subr.bf16.mxu0 %v10578_v0  ;;  %10551 = vmatprep.subr.bf16.mxu1 %v10578_v0  ;;  %v10581_v4 = vld [vmem:[%s15326_s1 + $0x18] sm:$0xff]   ;;  %v297_v5 = vld [vmem:[%s15327_s2] sm:$0xff]  ;;  %v298_v6 = vld [vmem:[%s15327_s2 + $0x8] sm:$0xff]  ;;  %s8522_s18 = sld [smem:[#allocation2 + $0x1]] }
  0x1f   : > { %9392 = vmatpush3.bf16.msra.mxu0 %v10578_v0  ;;  %10555 = vmatpush3.bf16.msra.mxu1 %v10578_v0  ;;  %v11288_v12 = vpack.c.bf16 %v298_v6, %v297_v5  ;;  %v299_v13 = vld [vmem:[%s15327_s2 + $0x10] sm:$0xff]  ;;  %v300_v14 = vld [vmem:[%s15327_s2 + $0x18] sm:$0xff]  ;;  %v301_v15 = vld [vmem:[%s15327_s2 + $0x20] sm:$0xff]  ;;  %s8651_s10 = sld [smem:[#allocation2 + $0x2]]  ;;  %s8780_s25 = sld [smem:[#allocation2 + $0x3]] }
  0x20   : > { %s15854_s12 = smov (!%p285_p0, %s8256_s12), 63  ;;  %9393 = vmatprep.subr.bf16.mxu0 %v10579_v1  ;;  %10552 = vmatprep.subr.bf16.mxu1 %v10579_v1  ;;  %v302_v16 = vld [vmem:[%s15327_s2 + $0x28] sm:$0xff]  ;;  %v11307_v19 = vpack.c.bf16 %v300_v14, %v299_v13  ;;  %v303_v22 = vld [vmem:[%s15327_s2 + $0x30] sm:$0xff]  ;;  %v304_v24 = vld [vmem:[%s15327_s2 + $0x38] sm:$0xff] }
  0x21   : > { %s8257_s17 = sshll.u32 %s15854_s12, 2  ;;  %15490 = vst [vmem:[#allocation5_spill] sm:$0xff] %v11288_v12  ;;  %v11322_v23 = vpack.c.bf16 %v302_v16, %v301_v15  ;;  %v11331_v25 = vpack.c.bf16 %v304_v24, %v303_v22  ;;  %v305_v32 = vld [vmem:[%s15328_s3] sm:$0xff]  ;;  %v306_v33 = vld [vmem:[%s15328_s3 + $0x8] sm:$0xff]  ;;  %v307_v35 = vld [vmem:[%s15328_s3 + $0x10] sm:$0xff]  ;;  %s8259_s26 = sshll.u32 %s15854_s12, 3 }
  0x22   : > { %s11270_s20 = scalar_lea.vmem %s15325_s0, %s8257_s17  ;;  %15491 = vst [vmem:[#allocation6_spill] sm:$0xff] %v11307_v19  ;;  %v11361_v34 = vpack.c.bf16 %v306_v33, %v305_v32  ;;  %v308_v36 = vld [vmem:[%s15328_s3 + $0x18] sm:$0xff]  ;;  %v309_v48 = vld [vmem:[%s15328_s3 + $0x20] sm:$0xff]  ;;  %v310_v49 = vld [vmem:[%s15328_s3 + $0x28] sm:$0xff]  ;;  %s15256_s29 = scalar_lea.vmem %s15332_s7, %s8259_s26 }
  0x23   : > { %9394 = vmatpush3.bf16.msra.mxu0 %v10579_v1  ;;  %v313_v3 = vld [vmem:[%s11270_s20] sm:$0xff]   ;;  %10556 = vmatpush3.bf16.msra.mxu1 %v10579_v1  ;;  %v315_v7 = vld [vmem:[%s11270_s20 + $0x8] sm:$0xff]   ;;  %v317_v8 = vld [vmem:[%s11270_s20 + $0x10] sm:$0xff]   ;;  %15492 = vst [vmem:[#allocation7_spill] sm:$0xff] %v11322_v23  ;;  %v11386_v44 = vpack.c.bf16 %v308_v36, %v307_v35  ;;  %v11411_v51 = vpack.c.bf16 %v310_v49, %v309_v48 }
  0x24   : > { %9395 = vmatprep.subr.bf16.mxu0 %v10580_v2  ;;  %10553 = vmatprep.subr.bf16.mxu1 %v10580_v2  ;;  %v329_v9 = vld [vmem:[%s11270_s20 + $0x40] sm:$0xff]   ;;  %v331_v10 = vld [vmem:[%s11270_s20 + $0x48] sm:$0xff]   ;;  %v333_v11 = vld [vmem:[%s11270_s20 + $0x50] sm:$0xff]   ;;  %15493 = vst [vmem:[#allocation8_spill] sm:$0xff] %v11331_v25 }
  0x25   : > { %9399 = vmatprep.mubr.msk.bf16.mxu0 %vm457_vm0, %v313_v3  ;;  %9415 = vmatprep.mubr.msk.bf16.mxu1 %vm457_vm0, %v329_v9  ;;  %v319_v17 = vld [vmem:[%s11270_s20 + $0x18] sm:$0xff]   ;;  %v321_v20 = vld [vmem:[%s11270_s20 + $0x20] sm:$0xff]   ;;  %v323_v26 = vld [vmem:[%s11270_s20 + $0x28] sm:$0xff]   ;;  %15494 = vst [vmem:[#allocation9_spill] sm:$0xff] %v11361_v34 }
  0x26   : > { %v335_v18 = vld [vmem:[%s11270_s20 + $0x58] sm:$0xff]   ;;  %v337_v21 = vld [vmem:[%s11270_s20 + $0x60] sm:$0xff]   ;;  %v339_v27 = vld [vmem:[%s11270_s20 + $0x68] sm:$0xff]   ;;  %15495 = vst [vmem:[#allocation10_spill] sm:$0xff] %v11386_v44 }
  0x27   : > { %9396 = vmatpush3.bf16.msra.mxu0 %v10580_v2  ;;  %10557 = vmatpush3.bf16.msra.mxu1 %v10580_v2  ;;  %v325_v28 = vld [vmem:[%s11270_s20 + $0x30] sm:$0xff]   ;;  %v327_v30 = vld [vmem:[%s11270_s20 + $0x38] sm:$0xff]   ;;  %15496 = vst [vmem:[#allocation11_spill] sm:$0xff] %v11411_v51 }
  0x28   : > { %9397 = vmatprep.subr.bf16.mxu0 %v10581_v4  ;;  %10554 = vmatprep.subr.bf16.mxu1 %v10581_v4  ;;  %v341_v29 = vld [vmem:[%s11270_s20 + $0x70] sm:$0xff]   ;;  %v343_v31 = vld [vmem:[%s11270_s20 + $0x78] sm:$0xff]  }
  0x2b   : > { %9398 = vmatpush3.bf16.msra.mxu0 %v10581_v4  ;;  %10558 = vmatpush3.bf16.msra.mxu1 %v10581_v4 }
  0x2c   : > { %10360 = vmatprep.subr.bf16.mxu1 %v11288_v12  ;;  %10376 = vmatprep.subr.bf16.mxu0 %v11288_v12 }
  0x2e   : > { %9400 = vmatmul.mubr.msk.bf16.vlgmr.msra.gmra.mrb[0].mxu0 %vm457_vm0, %v315_v7  ;;  %9416 = vmatmul.mubr.msk.bf16.vlgmr.msra.gmra.mrb[0].mxu1 %vm457_vm0, %v331_v10 }
  0x2f   : > { %9403 = vmatprep.mubr.msk.bf16.mxu0 %vm457_vm0, %v317_v8  ;;  %9419 = vmatprep.mubr.msk.bf16.mxu1 %vm457_vm0, %v333_v11 }
  0x30   : > { %10362 = vmatpush3.bf16.msra.mxu1 %v11288_v12  ;;  %10378 = vmatpush3.bf16.msra.mxu0 %v11288_v12 }
  0x31   : > { %10364 = vmatprep.subr.bf16.mxu1 %v11307_v19  ;;  %10380 = vmatprep.subr.bf16.mxu0 %v11307_v19 }
  0x34   : > { %10366 = vmatpush3.bf16.msra.mxu1 %v11307_v19  ;;  %10382 = vmatpush3.bf16.msra.mxu0 %v11307_v19 }
  0x35   : > { %10368 = vmatprep.subr.bf16.mxu1 %v11322_v23  ;;  %10384 = vmatprep.subr.bf16.mxu0 %v11322_v23 }
  0x36   : > { %9404 = vmatmul.mubr.msk.bf16.gmra.mrb[4].mxu0 %vm457_vm0, %v319_v17  ;;  %9420 = vmatmul.mubr.msk.bf16.gmra.mrb[4].mxu1 %vm457_vm0, %v335_v18 }
  0x37   : > { %9407 = vmatprep.mubr.msk.bf16.mxu0 %vm457_vm0, %v321_v20  ;;  %9423 = vmatprep.mubr.msk.bf16.mxu1 %vm457_vm0, %v337_v21 }
  0x38   : > { %10370 = vmatpush3.bf16.msra.mxu1 %v11322_v23  ;;  %10386 = vmatpush3.bf16.msra.mxu0 %v11322_v23 }
  0x39   : > { %10372 = vmatprep.subr.bf16.mxu1 %v11331_v25  ;;  %10388 = vmatprep.subr.bf16.mxu0 %v11331_v25 }
  0x3c   : > { %10374 = vmatpush3.bf16.msra.mxu1 %v11331_v25  ;;  %10390 = vmatpush3.bf16.msra.mxu0 %v11331_v25 }
  0x3d   : > { %10392 = vmatprep.subr.bf16.mxu1 %v11361_v34 }
  0x3e   : > { %9408 = vmatmul.mubr.msk.bf16.gmra.mrb[8].mxu0 %vm457_vm0, %v323_v26  ;;  %9424 = vmatmul.mubr.msk.bf16.gmra.mrb[8].mxu1 %vm457_vm0, %v339_v27 }
  0x3f   : > { %9411 = vmatprep.mubr.msk.bf16.mxu0 %vm457_vm0, %v325_v28  ;;  %9427 = vmatprep.mubr.msk.bf16.mxu1 %vm457_vm0, %v341_v29 }
  0x46   : > { %9412 = vmatmul.mubr.msk.bf16.gmra.mrb[12].mxu0 %vm457_vm0, %v327_v30  ;;  %9428 = vmatmul.mubr.msk.bf16.gmra.mrb[12].mxu1 %vm457_vm0, %v343_v31 }
 0x101   : > { %v11370_v37 = vpop.f32.mrb[0].mxu0  ;;  %v11372_v38 = vpop.f32.mrb[0].mxu1 }
 0x102   : > { %v11374_v39 = vpop.f32.mrb[1].mxu0  ;;  %v11376_v40 = vpop.f32.mrb[1].mxu1  ;;  %v1022_v50 = vmul.f32 %v11370_v37, %v11370_v37  ;;  %v1038_v31 = vmul.f32 %v11372_v38, %v11372_v38 }
 0x103   : > { %v11378_v41 = vpop.f32.mrb[2].mxu0  ;;  %9447 = vmatprep.mubr.msk.f32.mxu1 %vm457_vm0, %v11374_v39  ;;  %v1020_v42 = vmul.f32 %v11374_v39, %v11374_v39  ;;  %v11384_v43 = vpop.f32.mrb[2].mxu1  ;;  %v1036_v28 = vmul.f32 %v11376_v40, %v11376_v40 }
 0x104   : > { %v11388_v45 = vpop.f32.mrb[3].mxu0  ;;  %v11390_v46 = vpop.f32.mrb[3].mxu1  ;;  %v1023_v53 = vmul.f32 %v11378_v41, %v11378_v41  ;;  %v1039_v33 = vmul.f32 %v11384_v43, %v11384_v43 }
 0x105   : > { %v1021_v47 = vmul.f32 %v11388_v45, %v11388_v45  ;;  %9448 = vmatmul.mubr.msk.f32.vlgmr.msra.gmra.mrb[16].mxu1 %vm457_vm0, %v11388_v45  ;;  %9511 = vmatprep.mubr.msk.f32.mxu0 %vm457_vm0, %v1020_v42  ;;  %v1037_v30 = vmul.f32 %v11390_v46, %v11390_v46 }
 0x106   : > { %9450 = vmatprep.mubr.msk.f32.mxu1 %vm457_vm0, %v11370_v37  ;;  %10394 = vmatpush3.bf16.msra.mxu1 %v11361_v34 }
 0x107   : > { %9512 = vmatmul.mubr.msk.f32.vlgmr.msra.gmra.mrb[16].mxu0 %vm457_vm0, %v1021_v47  ;;  %10396 = vmatprep.subr.bf16.mxu1 %v11386_v44 }
 0x108   : > { %9514 = vmatprep.mubr.msk.f32.mxu0 %vm457_vm0, %v1022_v50 }
 0x109   : > { %v11413_v52 = vpop.f32.mrb[4].mxu0  ;;  %9451 = vmatmul.mubr.msk.f32.gmra.mrb[18].mxu1 %vm457_vm0, %v11378_v41  ;;  %v11419_v54 = vpop.f32.mrb[4].mxu1 }
 0x10a   : > { %v11421_v55 = vpop.f32.mrb[5].mxu0  ;;  %v11423_v56 = vpop.f32.mrb[5].mxu1  ;;  %10398 = vmatpush3.bf16.msra.mxu1 %v11386_v44  ;;  %v1026_v63 = vmul.f32 %v11413_v52, %v11413_v52  ;;  %v1042_v36 = vmul.f32 %v11419_v54, %v11419_v54 }
 0x10b   : > { %v11426_v57 = vpop.f32.mrb[6].mxu0  ;;  %9453 = vmatprep.mubr.msk.f32.mxu1 %vm457_vm0, %v11421_v55  ;;  %9515 = vmatmul.mubr.msk.f32.gmra.mrb[18].mxu0 %vm457_vm0, %v1023_v53  ;;  %v1024_v58 = vmul.f32 %v11421_v55, %v11421_v55  ;;  %v11433_v59 = vpop.f32.mrb[6].mxu1  ;;  %v1040_v32 = vmul.f32 %v11423_v56, %v11423_v56 }
 0x10c   : > { %v11435_v60 = vpop.f32.mrb[7].mxu0  ;;  %v11437_v61 = vpop.f32.mrb[7].mxu1  ;;  %10400 = vmatprep.subr.bf16.mxu1 %v11411_v51  ;;  %v1027_v1 = vmul.f32 %v11426_v57, %v11426_v57  ;;  %v1043_v47 = vmul.f32 %v11433_v59, %v11433_v59 }
 0x10d   : > { %9454 = vmatmul.mubr.msk.f32.gmra.mrb[20].mxu1 %vm457_vm0, %v11435_v60  ;;  %9517 = vmatprep.mubr.msk.f32.mxu0 %vm457_vm0, %v1024_v58  ;;  %v1025_v62 = vmul.f32 %v11435_v60, %v11435_v60  ;;  %v1041_v35 = vmul.f32 %v11437_v61, %v11437_v61 }
 0x10e   : > { %9456 = vmatprep.mubr.msk.f32.mxu1 %vm457_vm0, %v11413_v52  ;;  %10402 = vmatpush3.bf16.msra.mxu1 %v11411_v51 }
 0x10f   : > { %9518 = vmatmul.mubr.msk.f32.gmra.mrb[20].mxu0 %vm457_vm0, %v1025_v62 }
 0x110   : > { %9520 = vmatprep.mubr.msk.f32.mxu0 %vm457_vm0, %v1026_v63 }
 0x111   : > { %v11452_v0 = vpop.f32.mrb[8].mxu0  ;;  %9457 = vmatmul.mubr.msk.f32.gmra.mrb[22].mxu1 %vm457_vm0, %v11426_v57  ;;  %v11458_v2 = vpop.f32.mrb[8].mxu1 }
 0x112   : > { %15497 = vst [vmem:[#allocation12_spill] sm:$0xff] %v11452_v0  ;;  %15498 = vst [vmem:[#allocation13_spill] sm:$0xff] %v11458_v2  ;;  %v11460_v3 = vpop.f32.mrb[9].mxu0  ;;  %v11462_v4 = vpop.f32.mrb[9].mxu1  ;;  %v1030_v11 = vmul.f32 %v11452_v0, %v11452_v0  ;;  %v1046_v49 = vmul.f32 %v11458_v2, %v11458_v2 }
 0x113   : > { %15499 = vst [vmem:[#allocation14_spill] sm:$0xff] %v11462_v4  ;;  %v11464_v5 = vpop.f32.mrb[10].mxu0  ;;  %9459 = vmatprep.mubr.msk.f32.mxu1 %vm457_vm0, %v11460_v3  ;;  %9521 = vmatmul.mubr.msk.f32.gmra.mrb[22].mxu0 %vm457_vm0, %v1027_v1  ;;  %v1028_v6 = vmul.f32 %v11460_v3, %v11460_v3  ;;  %v11471_v7 = vpop.f32.mrb[10].mxu1  ;;  %v1044_v42 = vmul.f32 %v11462_v4, %v11462_v4  ;;  %v311_v1 = vld [vmem:[%s15328_s3 + $0x30] sm:$0xff] }
 0x114   : > { %15500 = vst [vmem:[#allocation15_spill] sm:$0xff] %v11464_v5  ;;  %15501 = vst [vmem:[#allocation16_spill] sm:$0xff] %v11471_v7  ;;  %v11473_v8 = vpop.f32.mrb[11].mxu0  ;;  %v11475_v9 = vpop.f32.mrb[11].mxu1  ;;  %v1031_v14 = vmul.f32 %v11464_v5, %v11464_v5  ;;  %v1047_v53 = vmul.f32 %v11471_v7, %v11471_v7 }
 0x115   : > { %15502 = vst [vmem:[#allocation17_spill] sm:$0xff] %v11475_v9  ;;  %9460 = vmatmul.mubr.msk.f32.gmra.mrb[24].mxu1 %vm457_vm0, %v11473_v8  ;;  %9523 = vmatprep.mubr.msk.f32.mxu0 %vm457_vm0, %v1028_v6  ;;  %v1029_v10 = vmul.f32 %v11473_v8, %v11473_v8  ;;  %v1045_v48 = vmul.f32 %v11475_v9, %v11475_v9  ;;  %v312_v6 = vld [vmem:[%s15328_s3 + $0x38] sm:$0xff] }
 0x116   : > { %9462 = vmatprep.mubr.msk.f32.mxu1 %vm457_vm0, %v11452_v0 }
 0x117   : > { %9524 = vmatmul.mubr.msk.f32.gmra.mrb[24].mxu0 %vm457_vm0, %v1029_v10  ;;  %v11615_v10 = vpack.c.bf16 %v312_v6, %v311_v1 }
 0x118   : > { %9526 = vmatprep.mubr.msk.f32.mxu0 %vm457_vm0, %v1030_v11  ;;  %v10598_v11 = vld [vmem:[%s15326_s1 + $0x20] sm:$0xff]  }
 0x119   : > { %v11488_v13 = vpop.f32.mrb[12].mxu0  ;;  %9463 = vmatmul.mubr.msk.f32.gmra.mrb[26].mxu1 %vm457_vm0, %v11464_v5  ;;  %v11494_v15 = vpop.f32.mrb[12].mxu1  ;;  %15509 = vst [vmem:[#allocation24_spill] sm:$0xff] %v11615_v10  ;;  %10404 = vmatprep.subr.bf16.mxu1 %v11615_v10 }
 0x11a   : > { %15503 = vst [vmem:[#allocation18_spill] sm:$0xff] %v11494_v15  ;;  %v11496_v16 = vpop.f32.mrb[13].mxu0  ;;  %v11498_v17 = vpop.f32.mrb[13].mxu1  ;;  %v1034_v27 = vmul.f32 %v11488_v13, %v11488_v13  ;;  %v1050_v62 = vmul.f32 %v11494_v15, %v11494_v15  ;;  %10406 = vmatpush3.bf16.msra.mxu1 %v11615_v10  ;;  %9623 = vmatprep.subr.bf16.mxu0 %v10598_v11 }
 0x11b   : > { %15504 = vst [vmem:[#allocation19_spill] sm:$0xff] %v11498_v17  ;;  %v11500_v18 = vpop.f32.mrb[14].mxu0  ;;  %9465 = vmatprep.mubr.msk.f32.mxu1 %vm457_vm0, %v11496_v16  ;;  %9527 = vmatmul.mubr.msk.f32.gmra.mrb[26].mxu0 %vm457_vm0, %v1031_v14  ;;  %v1032_v20 = vmul.f32 %v11496_v16, %v11496_v16  ;;  %v11507_v21 = vpop.f32.mrb[14].mxu1  ;;  %v1048_v50 = vmul.f32 %v11498_v17, %v11498_v17  ;;  %v10599_v14 = vld [vmem:[%s15326_s1 + $0x28] sm:$0xff]  }
 0x11c   : > { %15505 = vst [vmem:[#allocation20_spill] sm:$0xff] %v11500_v18  ;;  %15506 = vst [vmem:[#allocation21_spill] sm:$0xff] %v11507_v21  ;;  %v11509_v22 = vpop.f32.mrb[15].mxu0  ;;  %v11511_v24 = vpop.f32.mrb[15].mxu1  ;;  %v1035_v29 = vmul.f32 %v11500_v18, %v11500_v18  ;;  %v1051_v63 = vmul.f32 %v11507_v21, %v11507_v21  ;;  %10408 = vmatprep.subr.bf16.mxu1 %v11288_v12  ;;  %9624 = vmatpush3.bf16.msra.mxu0 %v10598_v11 }
 0x11d   : > { %15507 = vst [vmem:[#allocation22_spill] sm:$0xff] %v11509_v22  ;;  %15508 = vst [vmem:[#allocation23_spill] sm:$0xff] %v11511_v24  ;;  %9466 = vmatmul.mubr.msk.f32.gmra.mrb[28].mxu1 %vm457_vm0, %v11509_v22  ;;  %9529 = vmatprep.mubr.msk.f32.mxu0 %vm457_vm0, %v1032_v20  ;;  %v1033_v26 = vmul.f32 %v11509_v22, %v11509_v22  ;;  %v1049_v58 = vmul.f32 %v11511_v24, %v11511_v24  ;;  %v10600_v20 = vld [vmem:[%s15326_s1 + $0x30] sm:$0xff]  }
 0x11e   : > { %9468 = vmatprep.mubr.msk.f32.mxu1 %vm457_vm0, %v11488_v13  ;;  %9625 = vmatprep.subr.bf16.mxu0 %v10599_v14 }
 0x11f   : > { %9530 = vmatmul.mubr.msk.f32.gmra.mrb[28].mxu0 %vm457_vm0, %v1033_v26 }
 0x120   : > { %9532 = vmatprep.mubr.msk.f32.mxu0 %vm457_vm0, %v1034_v27  ;;  %9626 = vmatpush3.bf16.msra.mxu0 %v10599_v14 }
 0x121   : > { %9469 = vmatmul.mubr.msk.f32.gmra.mrb[30].mxu1 %vm457_vm0, %v11500_v18  ;;  %9627 = vmatprep.subr.bf16.mxu0 %v10600_v20 }
 0x122   : > { %9471 = vmatprep.mubr.msk.f32.mxu1 %vm457_vm0, %v11376_v40 }
 0x123   : > { %9533 = vmatmul.mubr.msk.f32.gmra.mrb[30].mxu0 %vm457_vm0, %v1035_v29 }
 0x124   : > { %9535 = vmatprep.mubr.msk.f32.mxu0 %vm457_vm0, %v1036_v28  ;;  %9628 = vmatpush3.bf16.msra.mxu0 %v10600_v20 }
 0x125   : > { %9472 = vmatmul.mubr.msk.f32.gmra.mrb[32].mxu1 %vm457_vm0, %v11390_v46 }
 0x126   : > { %9474 = vmatprep.mubr.msk.f32.mxu1 %vm457_vm0, %v11372_v38 }
 0x127   : > { %9536 = vmatmul.mubr.msk.f32.gmra.mrb[32].mxu0 %vm457_vm0, %v1037_v30 }
 0x128   : > { %9538 = vmatprep.mubr.msk.f32.mxu0 %vm457_vm0, %v1038_v31 }
 0x129   : > { %9475 = vmatmul.mubr.msk.f32.gmra.mrb[34].mxu1 %vm457_vm0, %v11384_v43 }
 0x12a   : > { %9477 = vmatprep.mubr.msk.f32.mxu1 %vm457_vm0, %v11423_v56 }
 0x12b   : > { %9539 = vmatmul.mubr.msk.f32.gmra.mrb[34].mxu0 %vm457_vm0, %v1039_v33 }
 0x12c   : > { %9541 = vmatprep.mubr.msk.f32.mxu0 %vm457_vm0, %v1040_v32 }
 0x12d   : > { %9478 = vmatmul.mubr.msk.f32.gmra.mrb[36].mxu1 %vm457_vm0, %v11437_v61 }
 0x12e   : > { %9480 = vmatprep.mubr.msk.f32.mxu1 %vm457_vm0, %v11419_v54 }
 0x12f   : > { %9542 = vmatmul.mubr.msk.f32.gmra.mrb[36].mxu0 %vm457_vm0, %v1041_v35 }
 0x130   : > { %9544 = vmatprep.mubr.msk.f32.mxu0 %vm457_vm0, %v1042_v36 }
 0x131   : > { %9481 = vmatmul.mubr.msk.f32.gmra.mrb[38].mxu1 %vm457_vm0, %v11433_v59 }
 0x132   : > { %9483 = vmatprep.mubr.msk.f32.mxu1 %vm457_vm0, %v11462_v4 }
 0x133   : > { %9545 = vmatmul.mubr.msk.f32.gmra.mrb[38].mxu0 %vm457_vm0, %v1043_v47 }
 0x134   : > { %9547 = vmatprep.mubr.msk.f32.mxu0 %vm457_vm0, %v1044_v42 }
 0x135   : > { %9484 = vmatmul.mubr.msk.f32.gmra.mrb[40].mxu1 %vm457_vm0, %v11475_v9 }
 0x136   : > { %9486 = vmatprep.mubr.msk.f32.mxu1 %vm457_vm0, %v11458_v2 }
 0x137   : > { %9548 = vmatmul.mubr.msk.f32.gmra.mrb[40].mxu0 %vm457_vm0, %v1045_v48 }
 0x138   : > { %9550 = vmatprep.mubr.msk.f32.mxu0 %vm457_vm0, %v1046_v49 }
 0x139   : > { %9487 = vmatmul.mubr.msk.f32.gmra.mrb[42].mxu1 %vm457_vm0, %v11471_v7 }
 0x13a   : > { %9489 = vmatprep.mubr.msk.f32.mxu1 %vm457_vm0, %v11498_v17 }
 0x13b   : > { %9551 = vmatmul.mubr.msk.f32.gmra.mrb[42].mxu0 %vm457_vm0, %v1047_v53 }
 0x13c   : > { %9553 = vmatprep.mubr.msk.f32.mxu0 %vm457_vm0, %v1048_v50 }
 0x13d   : > { %9490 = vmatmul.mubr.msk.f32.gmra.mrb[44].mxu1 %vm457_vm0, %v11511_v24 }
 0x13e   : > { %9492 = vmatprep.mubr.msk.f32.mxu1 %vm457_vm0, %v11494_v15 }
 0x13f   : > { %9554 = vmatmul.mubr.msk.f32.gmra.mrb[44].mxu0 %vm457_vm0, %v1049_v58 }
 0x140   : > { %9556 = vmatprep.mubr.msk.f32.mxu0 %vm457_vm0, %v1050_v62 }
 0x141   : > { %9493 = vmatmul.mubr.msk.f32.gmra.mrb[46].mxu1 %vm457_vm0, %v11507_v21 }
 0x143   : > { %9557 = vmatmul.mubr.msk.f32.gmra.mrb[46].mxu0 %vm457_vm0, %v1051_v63 }
 0x1d8   : > { %v9449_v26 = vpop.f32.mrb[16].mxu1 }
 0x1d9   : > { %v11629_v27 = vmul.f32 0.03125, %v9449_v26  ;;  %v829_v28 = vpop.f32.mrb[17].mxu1 }
 0x1da   : > { %v11631_v29 = vmul.f32 0.03125, %v829_v28  ;;  %v9513_v30 = vpop.f32.mrb[16].mxu0 }
 0x1db   : > { %v1406_v31 = vmul.f32 %v11629_v27, %v11629_v27  ;;  %v1374_v33 = vmul.f32 0.03125, %v9513_v30  ;;  %v1214_v35 = vpop.f32.mrb[17].mxu0 }
 0x1dc   : > { %v1405_v36 = vmul.f32 %v11631_v29, %v11631_v29  ;;  %v1373_v47 = vmul.f32 0.03125, %v1214_v35  ;;  %v9452_v48 = vpop.f32.mrb[18].mxu1 }
 0x1dd   : > { %v1438_v49 = vsub.f32 %v1374_v33, %v1406_v31  ;;  %v11641_v50 = vmul.f32 0.03125, %v9452_v48  ;;  %v839_v53 = vpop.f32.mrb[19].mxu1 }
 0x1de   : > { %v1437_v58 = vsub.f32 %v1373_v47, %v1405_v36  ;;  %v11643_v62 = vmul.f32 0.03125, %v839_v53  ;;  %v9516_v63 = vpop.f32.mrb[18].mxu0 }
 0x1df   : > { %v1470_v1 = vmax.f32 %v1438_v49, 0.0  ;;  %v1408_v6 = vmul.f32 %v11641_v50, %v11641_v50  ;;  %v1376_v14 = vmul.f32 0.03125, %v9516_v63  ;;  %v1224_v20 = vpop.f32.mrb[19].mxu0 }
 0x1e0   : > { %v1469_v26 = vmax.f32 %v1437_v58, 0.0  ;;  %v1407_v28 = vmul.f32 %v11643_v62, %v11643_v62  ;;  %v1375_v31 = vmul.f32 0.03125, %v1224_v20  ;;  %v9455_v33 = vpop.f32.mrb[20].mxu1 }
 0x1e1   : > { %v1534_v35 = vadd.f32 1e-05, %v1470_v1  ;;  %v1440_v36 = vsub.f32 %v1376_v14, %v1408_v6  ;;  %v11653_v47 = vmul.f32 0.03125, %v9455_v33  ;;  %v849_v48 = vpop.f32.mrb[21].mxu1 }
 0x1e2   : > { %v1533_v49 = vadd.f32 1e-05, %v1469_v26  ;;  %v1439_v53 = vsub.f32 %v1375_v31, %v1407_v28  ;;  %v11655_v42 = vmul.f32 0.03125, %v849_v48  ;;  %v9519_v63 = vpop.f32.mrb[20].mxu0 }
 0x1e3   : > { %10630 = vrsqrt.f32 %v1534_v35  ;;  %v1472_v58 = vmax.f32 %v1440_v36, 0.0  ;;  %v1410_v11 = vmul.f32 %v11653_v47, %v11653_v47  ;;  %v1234_v20 = vpop.f32.mrb[21].mxu0  ;;  %v1378_v28 = vmul.f32 0.03125, %v9519_v63 }
 0x1e4   : > { %v1471_v32 = vmax.f32 %v1439_v53, 0.0  ;;  %v1409_v1 = vmul.f32 %v11655_v42, %v11655_v42  ;;  %v9458_v14 = vpop.f32.mrb[22].mxu1  ;;  %v1377_v31 = vmul.f32 0.03125, %v1234_v20  ;;  %10632 = vrsqrt.f32 %v1533_v49 }
 0x1e5   : > { %v1536_v26 = vadd.f32 1e-05, %v1472_v58  ;;  %v11665_v33 = vmul.f32 0.03125, %v9458_v14  ;;  %v859_v35 = vpop.f32.mrb[23].mxu1  ;;  %v1442_v30 = vsub.f32 %v1378_v28, %v1410_v11 }
 0x1e6   : > { %v1535_v36 = vadd.f32 1e-05, %v1471_v32  ;;  %v11667_v48 = vmul.f32 0.03125, %v859_v35  ;;  %v9522_v10 = vpop.f32.mrb[22].mxu0  ;;  %v1441_v53 = vsub.f32 %v1377_v31, %v1409_v1 }
 0x1e7   : > { %v1412_v51 = vmul.f32 %v11665_v33, %v11665_v33  ;;  %v1244_v44 = vpop.f32.mrb[23].mxu0  ;;  %10634 = vrsqrt.f32 %v1536_v26  ;;  %v1474_v14 = vmax.f32 %v1442_v30, 0.0  ;;  %v1380_v49 = vmul.f32 0.03125, %v9522_v10 }
 0x1e8   : > { %v1411_v63 = vmul.f32 %v11667_v48, %v11667_v48  ;;  %v9461_v20 = vpop.f32.mrb[24].mxu1  ;;  %v1473_v35 = vmax.f32 %v1441_v53, 0.0  ;;  %v1379_v11 = vmul.f32 0.03125, %v1244_v44  ;;  %10636 = vrsqrt.f32 %v1535_v36 }
 0x1e9   : > { %v869_v1 = vpop.f32.mrb[25].mxu1  ;;  %v11677_v28 = vmul.f32 0.03125, %v9461_v20  ;;  %v1538_v6 = vadd.f32 1e-05, %v1474_v14  ;;  %v1444_v15 = vsub.f32 %v1380_v49, %v1412_v51  ;;  %v11692_v51 = vld [vmem:[%s15329_s4] ss:$0 sm:$0xff]  ;;  %v15511_v49 = vsub.f32 %v11388_v45, %v11629_v27 }
 0x1ea   : > { %v11679_v31 = vmul.f32 0.03125, %v869_v1  ;;  %v9525_v26 = vpop.f32.mrb[24].mxu0  ;;  %v1537_v58 = vadd.f32 1e-05, %v1473_v35  ;;  %v1443_v21 = vsub.f32 %v1379_v11, %v1411_v63  ;;  %v11700_v1 = vld [vmem:[%s15330_s5] ss:$0 sm:$0xff] }
 0x1eb   : > { %15510 = vst [vmem:[#allocation25_spill] sm:$0xff] %v11677_v28  ;;  %v1254_v17 = vpop.f32.mrb[25].mxu0  ;;  %v1414_v32 = vmul.f32 %v11677_v28, %v11677_v28  ;;  %10638 = vrsqrt.f32 %v1538_v6  ;;  %v1476_v63 = vmax.f32 %v1444_v15, 0.0  ;;  %v1382_v14 = vmul.f32 0.03125, %v9525_v26 }
 0x1ec   : > { %v1413_v44 = vmul.f32 %v11679_v31, %v11679_v31  ;;  %v9464_v36 = vpop.f32.mrb[26].mxu1  ;;  %v1475_v20 = vmax.f32 %v1443_v21, 0.0  ;;  %10640 = vrsqrt.f32 %v1537_v58  ;;  %v1381_v30 = vmul.f32 0.03125, %v1254_v17 }
 0x1ed   : > { %v10631_v53 = vpop.eup %10630  ;;  %v879_v35 = vpop.f32.mrb[27].mxu1  ;;  %v11702_v10 = vmul.f32 0.03125, %v9464_v36  ;;  %v1540_v2 = vadd.f32 1e-05, %v1476_v63  ;;  %v1446_v15 = vsub.f32 %v1382_v14, %v1414_v32 }
 0x1ee   : > { %v1598_v11 = vmul.f32 %v10631_v53, %v15511_v49  ;;  %v9528_v24 = vpop.f32.mrb[26].mxu0  ;;  %v1539_v6 = vadd.f32 1e-05, %v1475_v20  ;;  %v11704_v21 = vmul.f32 0.03125, %v879_v35  ;;  %v1445_v45 = vsub.f32 %v1381_v30, %v1413_v44  ;;  %v10633_v17 = vpop.eup %10632 }
 0x1ef   : > { %15512 = vst [vmem:[#allocation26_spill] sm:$0xff] %v11702_v10  ;;  %v1264_v26 = vpop.f32.mrb[27].mxu0  ;;  %v1416_v27 = vmul.f32 %v11702_v10, %v11702_v10  ;;  %10642 = vrsqrt.f32 %v1540_v2  ;;  %v1478_v36 = vmax.f32 %v1446_v15, 0.0  ;;  %v1384_v35 = vmul.f32 0.03125, %v9528_v24 }
 0x1f0   : > { %15513 = vst [vmem:[#allocation27_spill] sm:$0xff] %v11704_v21  ;;  %v1637_v7 = vmul.f32 %v11692_v51, %v1598_v11  ;;  %v9467_v58 = vpop.f32.mrb[28].mxu1  ;;  %v1415_v63 = vmul.f32 %v11704_v21, %v11704_v21  ;;  %10644 = vrsqrt.f32 %v1539_v6  ;;  %v1477_v44 = vmax.f32 %v1445_v45, 0.0 }
 0x1f1   : > { %v889_v20 = vpop.f32.mrb[29].mxu1  ;;  %v11715_v14 = vpop.eup %10634  ;;  %v1542_v11 = vadd.f32 1e-05, %v1478_v36  ;;  %v1383_v53 = vmul.f32 0.03125, %v1264_v26  ;;  %v11720_v2 = vmul.f32 0.03125, %v9467_v58  ;;  %v1448_v4 = vsub.f32 %v1384_v35, %v1416_v27 }
 0x1f2   : > { %v11718_v30 = vadd.f32 %v11700_v1, %v1637_v7  ;;  %v9531_v49 = vpop.f32.mrb[28].mxu0  ;;  %v11722_v15 = vmul.f32 0.03125, %v889_v20  ;;  %v11724_v5 = vpop.eup %10636  ;;  %v1541_v32 = vadd.f32 1e-05, %v1477_v44 }
 0x1f3   : > { %15515 = vst [vmem:[#allocation29_spill] sm:$0xff] %v11720_v2  ;;  %v1274_v10 = vpop.f32.mrb[29].mxu0  ;;  %v1386_v21 = vmul.f32 0.03125, %v9531_v49  ;;  %10646 = vrsqrt.f32 %v1542_v11  ;;  %v1447_v7 = vsub.f32 %v1383_v53, %v1415_v63  ;;  %v1418_v24 = vmul.f32 %v11720_v2, %v11720_v2 }
 0x1f4   : > { %15514 = vst [vmem:[#allocation28_spill] sm:$0xff] %v11718_v30  ;;  %v1385_v0 = vmul.f32 0.03125, %v1274_v10  ;;  %v9470_v9 = vpop.f32.mrb[30].mxu1  ;;  %10648 = vrsqrt.f32 %v1541_v32  ;;  %v1480_v45 = vmax.f32 %v1448_v4, 0.0  ;;  %v1417_v58 = vmul.f32 %v11722_v15, %v11722_v15 }
 0x1f5   : > { %v899_v26 = vpop.f32.mrb[31].mxu1  ;;  %v11734_v10 = vpop.eup %10638  ;;  %v1479_v20 = vmax.f32 %v1447_v7, 0.0  ;;  %v1450_v53 = vsub.f32 %v1386_v21, %v1418_v24  ;;  %v11736_v63 = vmul.f32 0.03125, %v9470_v9 }
 0x1f6   : > { %v9534_v36 = vpop.f32.mrb[30].mxu0  ;;  %v11738_v44 = vmul.f32 0.03125, %v899_v26  ;;  %v11740_v49 = vpop.eup %10640  ;;  %v1544_v32 = vadd.f32 1e-05, %v1480_v45  ;;  %v1449_v4 = vsub.f32 %v1385_v0, %v1417_v58  ;;  %v1708_v0 = vmul.f32 %v11718_v30, %v11718_v30 }
 0x1f7   : > { %15516 = vst [vmem:[#allocation30_spill] sm:$0xff] %v11736_v63  ;;  %v1284_v35 = vpop.f32.mrb[31].mxu0  ;;  %v1388_v11 = vmul.f32 0.03125, %v9534_v36  ;;  %v1543_v22 = vadd.f32 1e-05, %v1479_v20  ;;  %v1482_v28 = vmax.f32 %v1450_v53, 0.0  ;;  %v1420_v27 = vmul.f32 %v11736_v63, %v11736_v63 }
 0x1f8   : > { %15517 = vst [vmem:[#allocation31_spill] sm:$0xff] %v11738_v44  ;;  %v1387_v6 = vmul.f32 0.03125, %v1284_v35  ;;  %v9473_v2 = vpop.f32.mrb[32].mxu1  ;;  %10650 = vrsqrt.f32 %v1544_v32  ;;  %v1481_v7 = vmax.f32 %v1449_v4, 0.0  ;;  %v1419_v24 = vmul.f32 %v11738_v44, %v11738_v44 }
 0x1f9   : > { %v909_v9 = vpop.f32.mrb[33].mxu1  ;;  %v11750_v45 = vpop.eup %10642  ;;  %10652 = vrsqrt.f32 %v1543_v22  ;;  %v1546_v58 = vadd.f32 1e-05, %v1482_v28  ;;  %v1452_v36 = vsub.f32 %v1388_v11, %v1420_v27  ;;  %v15518_v20 = vsub.f32 %v11374_v39, %v11631_v29 }
 0x1fa   : > { %v9537_v26 = vpop.f32.mrb[32].mxu0  ;;  %v11755_v21 = vpop.eup %10644  ;;  %v1545_v32 = vadd.f32 1e-05, %v1481_v7  ;;  %v1451_v4 = vsub.f32 %v1387_v6, %v1419_v24  ;;  %v11757_v63 = vmul.f32 0.03125, %v9473_v2  ;;  %v11762_v28 = vmul.f32 0.03125, %v909_v9 }
 0x1fb   : > { %v1597_v53 = vmul.f32 %v10633_v17, %v15518_v20  ;;  %v1294_v35 = vpop.f32.mrb[33].mxu0  ;;  %10654 = vrsqrt.f32 %v1546_v58  ;;  %v1484_v44 = vmax.f32 %v1452_v36, 0.0  ;;  %v15522_v24 = vsub.f32 %v11378_v41, %v11641_v50 }
 0x1fc   : > { %15519 = vst [vmem:[#allocation32_spill] sm:$0xff] %v11757_v63  ;;  %v9476_v18 = vpop.f32.mrb[34].mxu1  ;;  %10656 = vrsqrt.f32 %v1545_v32  ;;  %v1483_v39 = vmax.f32 %v1451_v4, 0.0  ;;  %v1422_v29 = vmul.f32 %v11757_v63, %v11757_v63  ;;  %v1421_v9 = vmul.f32 %v11762_v28, %v11762_v28 }
 0x1fd   : > { %v1636_v22 = vmul.f32 %v11692_v51, %v1597_v53  ;;  %v919_v27 = vpop.f32.mrb[35].mxu1  ;;  %v11768_v6 = vpop.eup %10646  ;;  %v1548_v11 = vadd.f32 1e-05, %v1484_v44  ;;  %v1390_v53 = vmul.f32 0.03125, %v9537_v26  ;;  %v1389_v32 = vmul.f32 0.03125, %v1294_v35 }
 0x1fe   : > { %v9540_v2 = vpop.f32.mrb[34].mxu0  ;;  %v11777_v36 = vpop.eup %10648  ;;  %v1547_v20 = vadd.f32 1e-05, %v1483_v39  ;;  %v15521_v4 = vsub.f32 %v11370_v37, %v11643_v62  ;;  %v11785_v30 = vmul.f32 0.03125, %v9476_v18  ;;  %v1600_v63 = vmul.f32 %v11715_v14, %v15522_v24 }
 0x1ff   : > { %v11771_v7 = vadd.f32 %v11700_v1, %v1636_v22  ;;  %v1304_v58 = vpop.f32.mrb[35].mxu0  ;;  %10658 = vrsqrt.f32 %v1548_v11  ;;  %v1454_v26 = vsub.f32 %v1390_v53, %v1422_v29  ;;  %v1453_v35 = vsub.f32 %v1389_v32, %v1421_v9 }
 0x200   : > { %v1599_v44 = vmul.f32 %v11724_v5, %v15521_v4  ;;  %v9479_v17 = vpop.f32.mrb[36].mxu1  ;;  %10660 = vrsqrt.f32 %v1547_v20  ;;  %v1424_v5 = vmul.f32 %v11785_v30, %v11785_v30  ;;  %v1639_v11 = vmul.f32 %v11692_v51, %v1600_v63 }
 0x201   : > { %15520 = vst [vmem:[#allocation33_spill] sm:$0xff] %v11771_v7  ;;  %v1707_v22 = vmul.f32 %v11771_v7, %v11771_v7  ;;  %v929_v39 = vpop.f32.mrb[37].mxu1  ;;  %v11798_v41 = vmul.f32 0.03125, %v919_v27  ;;  %v1486_v29 = vmax.f32 %v1454_v26, 0.0  ;;  %v1485_v9 = vmax.f32 %v1453_v35, 0.0 }
 0x202   : > { %v1638_v37 = vmul.f32 %v11692_v51, %v1599_v44  ;;  %v9543_v62 = vpop.f32.mrb[36].mxu0  ;;  %v11800_v14 = vpop.eup %10650  ;;  %v1392_v20 = vmul.f32 0.03125, %v9540_v2  ;;  %v11809_v4 = vadd.f32 %v11700_v1, %v1639_v11  ;;  %v1391_v44 = vmul.f32 0.03125, %v1304_v58 }
 0x203   : > { %9575 = vmatprep.mubr.msk.f32.mxu1 %vm457_vm0, %v1707_v22  ;;  %v1314_v50 = vpop.f32.mrb[37].mxu0  ;;  %v11806_v32 = vpop.eup %10652  ;;  %v1423_v63 = vmul.f32 %v11798_v41, %v11798_v41  ;;  %v1550_v22 = vadd.f32 1e-05, %v1486_v29  ;;  %v1549_v26 = vadd.f32 1e-05, %v1485_v9  ;;  %v15525_v58 = vsub.f32 %v11421_v55, %v11655_v42 }
 0x204   : > { %9576 = vmatmul.mubr.msk.f32.vlgmr.msra.gmra.mrb[48].mxu1 %vm457_vm0, %v1708_v0  ;;  %v11804_v24 = vadd.f32 %v11700_v1, %v1638_v37  ;;  %v9482_v53 = vpop.f32.mrb[38].mxu1  ;;  %15524 = vst [vmem:[#allocation35_spill] sm:$0xff] %v11809_v4  ;;  %v1456_v35 = vsub.f32 %v1392_v20, %v1424_v5  ;;  %v1710_v18 = vmul.f32 %v11809_v4, %v11809_v4  ;;  %v11827_v29 = vmul.f32 0.03125, %v9479_v17 }
 0x205   : > { %v939_v0 = vpop.f32.mrb[39].mxu1  ;;  %10410 = vmatpush3.bf16.msra.mxu1 %v11288_v12  ;;  %v11819_v11 = vpop.eup %10654  ;;  %v1455_v7 = vsub.f32 %v1391_v44, %v1423_v63  ;;  %v1601_v27 = vmul.f32 %v11740_v49, %v15525_v58  ;;  %10662 = vrsqrt.f32 %v1550_v22  ;;  %v15526_v20 = vsub.f32 %v11435_v60, %v11653_v47 }
 0x206   : > { %15523 = vst [vmem:[#allocation34_spill] sm:$0xff] %v11804_v24  ;;  %v1709_v2 = vmul.f32 %v11804_v24, %v11804_v24  ;;  %v9546_v37 = vpop.f32.mrb[38].mxu0  ;;  %10412 = vmatprep.subr.bf16.mxu1 %v11307_v19  ;;  %v11829_v12 = vpop.eup %10656  ;;  %v1488_v5 = vmax.f32 %v1456_v35, 0.0  ;;  %v11836_v63 = vmul.f32 0.03125, %v929_v39  ;;  %10664 = vrsqrt.f32 %v1549_v26 }
 0x207   : > { %v1324_v9 = vpop.f32.mrb[39].mxu0  ;;  %v1602_v24 = vmul.f32 %v11734_v10, %v15526_v20  ;;  %v1487_v55 = vmax.f32 %v1455_v7, 0.0  ;;  %v1640_v42 = vmul.f32 %v11692_v51, %v1601_v27  ;;  %v1426_v49 = vmul.f32 %v11827_v29, %v11827_v29 }
 0x208   : > { %9578 = vmatprep.mubr.msk.f32.mxu1 %vm457_vm0, %v1709_v2  ;;  %v11838_v44 = vpop.f32.mrb[40].mxu1  ;;  %v1552_v22 = vadd.f32 1e-05, %v1488_v5  ;;  %v1425_v10 = vmul.f32 %v11836_v63, %v11836_v63  ;;  %v1394_v2 = vmul.f32 0.03125, %v9543_v62  ;;  %v1393_v5 = vmul.f32 0.03125, %v1314_v50 }
 0x209   : > { %9579 = vmatmul.mubr.msk.f32.gmra.mrb[50].mxu1 %vm457_vm0, %v1710_v18  ;;  %v11844_v17 = vpop.f32.mrb[41].mxu1  ;;  %v1641_v47 = vmul.f32 %v11692_v51, %v1602_v24  ;;  %v11854_v7 = vpop.eup %10658  ;;  %v1551_v18 = vadd.f32 1e-05, %v1487_v55  ;;  %v11857_v27 = vadd.f32 %v11700_v1, %v1640_v42  ;;  %v15529_v20 = vsub.f32 %v11413_v52, %v11667_v48 }
 0x20a   : > { %v11851_v39 = vpop.f32.mrb[40].mxu0  ;;  %10414 = vmatpush3.bf16.msra.mxu1 %v11307_v19  ;;  %v11864_v24 = vpop.eup %10660  ;;  %10666 = vrsqrt.f32 %v1552_v22  ;;  %v1458_v60 = vsub.f32 %v1394_v2, %v1426_v49  ;;  %v11877_v26 = vmul.f32 0.03125, %v9482_v53  ;;  %v1457_v50 = vsub.f32 %v1393_v5, %v1425_v10 }
 0x20b   : > { %15527 = vst [vmem:[#allocation36_spill] sm:$0xff] %v11857_v27  ;;  %v11861_v35 = vpop.f32.mrb[41].mxu0  ;;  %10416 = vmatprep.subr.bf16.mxu1 %v11322_v23  ;;  %v11867_v58 = vadd.f32 %v11700_v1, %v1641_v47  ;;  %v1603_v55 = vmul.f32 %v11755_v21, %v15529_v20  ;;  %10668 = vrsqrt.f32 %v1551_v18  ;;  %v1711_v62 = vmul.f32 %v11857_v27, %v11857_v27 }
 0x20c   : > { %v11873_v42 = vpop.f32.mrb[42].mxu1  ;;  %v15530_v52 = vsub.f32 %v11426_v57, %v11665_v33  ;;  %v1490_v53 = vmax.f32 %v1458_v60, 0.0  ;;  %v1428_v49 = vmul.f32 %v11877_v26, %v11877_v26  ;;  %v11896_v18 = vmul.f32 0.03125, %v939_v0 }
 0x20d   : > { %15528 = vst [vmem:[#allocation37_spill] sm:$0xff] %v11867_v58  ;;  %v11879_v19 = vpop.f32.mrb[43].mxu1  ;;  %v1712_v22 = vmul.f32 %v11867_v58, %v11867_v58  ;;  %v1642_v47 = vmul.f32 %v11692_v51, %v1603_v55  ;;  %9581 = vmatprep.mubr.msk.f32.mxu1 %vm457_vm0, %v1711_v62  ;;  %v1489_v57 = vmax.f32 %v1457_v50, 0.0  ;;  %v1396_v60 = vmul.f32 0.03125, %v9546_v37 }
 0x20e   : > { %v1604_v48 = vmul.f32 %v11750_v45, %v15530_v52  ;;  %v11888_v21 = vpop.f32.mrb[42].mxu0  ;;  %10418 = vmatpush3.bf16.msra.mxu1 %v11322_v23  ;;  %v1554_v20 = vadd.f32 1e-05, %v1490_v53  ;;  %v1427_v0 = vmul.f32 %v11896_v18, %v11896_v18  ;;  %v1395_v62 = vmul.f32 0.03125, %v1324_v9 }
 0x20f   : > { %v11898_v2 = vpop.f32.mrb[43].mxu0  ;;  %10420 = vmatprep.subr.bf16.mxu1 %v11331_v25  ;;  %9582 = vmatmul.mubr.msk.f32.gmra.mrb[52].mxu1 %vm457_vm0, %v1712_v22  ;;  %v11903_v33 = vadd.f32 %v11700_v1, %v1642_v47  ;;  %v11914_v22 = vpop.eup %10662  ;;  %v1553_v50 = vadd.f32 1e-05, %v1489_v57  ;;  %v15533_v55 = vsub.f32 %v11460_v3, %v11679_v31  ;;  %v11931_v23 = vmul.f32 0.03125, %v11838_v44 }
 0x210   : > { %v1643_v45 = vmul.f32 %v11692_v51, %v1604_v48  ;;  %v11906_v5 = vpop.f32.mrb[44].mxu1  ;;  %v1460_v48 = vsub.f32 %v1396_v60, %v1428_v49  ;;  %v11924_v10 = vpop.eup %10664  ;;  %10670 = vrsqrt.f32 %v1554_v20  ;;  %v1459_v9 = vsub.f32 %v1395_v62, %v1427_v0  ;;  %v15534_v60 = vld [vmem:[#allocation25_spill] sm:$0xff] }
 0x211   : > { %15531 = vst [vmem:[#allocation38_spill] sm:$0xff] %v11903_v33  ;;  %v11912_v52 = vpop.f32.mrb[45].mxu1  ;;  %v1713_v47 = vmul.f32 %v11903_v33, %v11903_v33  ;;  %v1605_v57 = vmul.f32 %v11777_v36, %v15533_v55  ;;  %10672 = vrsqrt.f32 %v1553_v50  ;;  %v15535_v20 = vsub.f32 %v11473_v8, %v15534_v60  ;;  %v15536_v55 = vld [vmem:[#allocation17_spill] sm:$0xff] }
 0x212   : > { %v11919_v37 = vadd.f32 %v11700_v1, %v1643_v45  ;;  %v11921_v53 = vpop.f32.mrb[44].mxu0  ;;  %10422 = vmatpush3.bf16.msra.mxu1 %v11331_v25  ;;  %v1492_v45 = vmax.f32 %v1460_v48, 0.0  ;;  %v1491_v36 = vmax.f32 %v1459_v9, 0.0  ;;  %v1430_v0 = vmul.f32 %v11931_v23, %v11931_v23  ;;  %v15538_v25 = vld [vmem:[#allocation12_spill] sm:$0xff] }
 0x213   : > { %v11933_v33 = vpop.f32.mrb[45].mxu0  ;;  %10440 = vmatprep.subr.bf16.mxu1 %v11361_v34  ;;  %9584 = vmatprep.mubr.msk.f32.mxu1 %vm457_vm0, %v1713_v47  ;;  %v1606_v3 = vmul.f32 %v11768_v6, %v15535_v20  ;;  %v1644_v44 = vmul.f32 %v11692_v51, %v1605_v57  ;;  %v11957_v48 = vmul.f32 0.03125, %v11844_v17  ;;  %v1398_v9 = vmul.f32 0.03125, %v11851_v39 }
 0x214   : > { %15532 = vst [vmem:[#allocation39_spill] sm:$0xff] %v11919_v37  ;;  %v1714_v49 = vmul.f32 %v11919_v37, %v11919_v37  ;;  %v11943_v31 = vpop.f32.mrb[46].mxu1  ;;  %v11952_v47 = vpop.eup %10666  ;;  %v1556_v8 = vadd.f32 1e-05, %v1492_v45  ;;  %v1555_v20 = vadd.f32 1e-05, %v1491_v36 }
 0x215   : > { %v11950_v50 = vpop.f32.mrb[47].mxu1  ;;  %v1645_v6 = vmul.f32 %v11692_v51, %v1606_v3  ;;  %v11962_v60 = vpop.eup %10668  ;;  %v11965_v62 = vadd.f32 %v11700_v1, %v1644_v44  ;;  %v1397_v34 = vmul.f32 0.03125, %v11861_v35  ;;  %v1429_v39 = vmul.f32 %v11957_v48, %v11957_v48  ;;  %v15541_v36 = vld [vmem:[#allocation14_spill] sm:$0xff] }
 0x216   : > { %9585 = vmatmul.mubr.msk.f32.gmra.mrb[54].mxu1 %vm457_vm0, %v1714_v49  ;;  %v11960_v57 = vpop.f32.mrb[46].mxu0  ;;  %v15539_v49 = vld [vmem:[#allocation27_spill] sm:$0xff]  ;;  %10674 = vrsqrt.f32 %v1556_v8  ;;  %v1462_v27 = vsub.f32 %v1398_v9, %v1430_v0  ;;  %v11998_v0 = vmul.f32 0.03125, %v11879_v19  ;;  %v1400_v9 = vmul.f32 0.03125, %v11888_v21 }
 0x217   : > { %15537 = vst [vmem:[#allocation25_spill] sm:$0xff] %v11965_v62  ;;  %v15540_v45 = vsub.f32 %v15538_v25, %v15539_v49  ;;  %v11972_v37 = vpop.f32.mrb[47].mxu0  ;;  %v11975_v17 = vadd.f32 %v11700_v1, %v1645_v6  ;;  %10676 = vrsqrt.f32 %v1555_v20  ;;  %v1715_v35 = vmul.f32 %v11965_v62, %v11965_v62  ;;  %v15542_v49 = vld [vmem:[#allocation15_spill] sm:$0xff]  ;;  %v15550_v62 = vld [vmem:[#allocation29_spill] sm:$0xff] }
 0x218   : > { %v1461_v8 = vsub.f32 %v1397_v34, %v1429_v39  ;;  %v11987_v6 = vmul.f32 0.03125, %v11873_v42  ;;  %v1494_v20 = vmax.f32 %v1462_v27, 0.0  ;;  %v1431_v21 = vmul.f32 %v11998_v0, %v11998_v0 }
 0x219   : > { %v1607_v3 = vmul.f32 %v11806_v32, %v15540_v45  ;;  %v1716_v32 = vmul.f32 %v11975_v17, %v11975_v17  ;;  %v15543_v45 = vld [vmem:[#allocation26_spill] sm:$0xff]  ;;  %9587 = vmatprep.mubr.msk.f32.mxu1 %vm457_vm0, %v1715_v35  ;;  %v15547_v35 = vld [vmem:[#allocation13_spill] sm:$0xff] }
 0x21a   : > { %v15544_v58 = vsub.f32 %v15542_v49, %v15543_v45  ;;  %v1493_v34 = vmax.f32 %v1461_v8, 0.0  ;;  %v1432_v42 = vmul.f32 %v11987_v6, %v11987_v6  ;;  %v12007_v27 = vpop.eup %10670  ;;  %v1558_v39 = vadd.f32 1e-05, %v1494_v20 }
 0x21b   : > { %v1646_v25 = vmul.f32 %v11692_v51, %v1607_v3  ;;  %9588 = vmatmul.mubr.msk.f32.gmra.mrb[56].mxu1 %vm457_vm0, %v1716_v32  ;;  %v15546_v3 = vld [vmem:[#allocation16_spill] sm:$0xff]  ;;  %v12015_v32 = vpop.eup %10672  ;;  %v15548_v20 = vsub.f32 %v11496_v16, %v11722_v15 }
 0x21c   : > { %v1608_v4 = vmul.f32 %v11800_v14, %v15544_v58  ;;  %v1557_v8 = vadd.f32 1e-05, %v1493_v34  ;;  %v1464_v45 = vsub.f32 %v1400_v9, %v1432_v42  ;;  %10678 = vrsqrt.f32 %v1558_v39 }
 0x21d   : > { %v11995_v44 = vadd.f32 %v11700_v1, %v1646_v25  ;;  %v1609_v14 = vmul.f32 %v11829_v12, %v15548_v20  ;;  %v15549_v25 = vld [vmem:[#allocation22_spill] sm:$0xff]  ;;  %v15552_v12 = vld [vmem:[#allocation23_spill] sm:$0xff] }
 0x21e   : > { %v1647_v58 = vmul.f32 %v11692_v51, %v1608_v4  ;;  %v1399_v4 = vmul.f32 0.03125, %v11898_v2  ;;  %v15551_v34 = vsub.f32 %v15549_v25, %v15550_v62  ;;  %10680 = vrsqrt.f32 %v1557_v8  ;;  %v15553_v20 = vld [vmem:[#allocation31_spill] sm:$0xff] }
 0x21f   : > { %15545 = vst [vmem:[#allocation17_spill] sm:$0xff] %v11995_v44  ;;  %v1717_v19 = vmul.f32 %v11995_v44, %v11995_v44  ;;  %v12027_v44 = vmul.f32 0.03125, %v11906_v5  ;;  %v1496_v9 = vmax.f32 %v1464_v45, 0.0  ;;  %v1648_v39 = vmul.f32 %v11692_v51, %v1609_v14 }
 0x220   : > { %v12018_v49 = vadd.f32 %v11700_v1, %v1647_v58  ;;  %v1610_v58 = vmul.f32 %v11819_v11, %v15551_v34  ;;  %v1463_v42 = vsub.f32 %v1399_v4, %v1431_v21  ;;  %v12045_v25 = vmul.f32 0.03125, %v11912_v52 }
 0x221   : > { %9590 = vmatprep.mubr.msk.f32.mxu1 %vm457_vm0, %v1717_v19  ;;  %v1434_v16 = vmul.f32 %v12027_v44, %v12027_v44  ;;  %v12041_v19 = vpop.eup %10674  ;;  %v1560_v11 = vadd.f32 1e-05, %v1496_v9  ;;  %v1402_v21 = vmul.f32 0.03125, %v11921_v53  ;;  %v12051_v8 = vadd.f32 %v11700_v1, %v1648_v39 }
 0x222   : > { %v1718_v2 = vmul.f32 %v12018_v49, %v12018_v49  ;;  %v1649_v5 = vmul.f32 %v11692_v51, %v1610_v58  ;;  %v1495_v62 = vmax.f32 %v1463_v42, 0.0  ;;  %v12048_v14 = vpop.eup %10676  ;;  %v1401_v4 = vmul.f32 0.03125, %v11933_v33 }
 0x223   : > { %v15554_v34 = vsub.f32 %v11488_v13, %v15553_v20  ;;  %10682 = vrsqrt.f32 %v1560_v11  ;;  %v1433_v53 = vmul.f32 %v12045_v25, %v12045_v25  ;;  %v1719_v42 = vmul.f32 %v12051_v8, %v12051_v8  ;;  %v15556_v11 = vld [vmem:[#allocation20_spill] sm:$0xff] }
 0x224   : > { %9591 = vmatmul.mubr.msk.f32.gmra.mrb[58].mxu1 %vm457_vm0, %v1718_v2  ;;  %v12054_v45 = vadd.f32 %v11700_v1, %v1649_v5  ;;  %v1559_v52 = vadd.f32 1e-05, %v1495_v62  ;;  %v15555_v2 = vld [vmem:[#allocation19_spill] sm:$0xff]  ;;  %v1466_v33 = vsub.f32 %v1402_v21, %v1434_v16  ;;  %v15557_v62 = vld [vmem:[#allocation30_spill] sm:$0xff]  ;;  %v12082_v16 = vmul.f32 0.03125, %v11950_v50 }
 0x225   : > { %v1611_v58 = vmul.f32 %v11864_v24, %v15554_v34  ;;  %v1465_v13 = vsub.f32 %v1401_v4, %v1433_v53  ;;  %v12071_v24 = vmul.f32 0.03125, %v11943_v31  ;;  %v15558_v20 = vsub.f32 %v15556_v11, %v15557_v62  ;;  %9593 = vmatprep.mubr.msk.f32.mxu1 %vm457_vm0, %v1719_v42 }
 0x226   : > { %v1720_v39 = vmul.f32 %v12054_v45, %v12054_v45  ;;  %10684 = vrsqrt.f32 %v1559_v52  ;;  %v1498_v9 = vmax.f32 %v1466_v33, 0.0  ;;  %v1404_v21 = vmul.f32 0.03125, %v11960_v57  ;;  %v10679_v53 = vpop.eup %10678  ;;  %v15561_v57 = vld [vmem:[#allocation18_spill] sm:$0xff] }
 0x227   : > { %v1650_v5 = vmul.f32 %v11692_v51, %v1611_v58  ;;  %v1612_v34 = vmul.f32 %v11854_v7, %v15558_v20  ;;  %v1497_v31 = vmax.f32 %v1465_v13, 0.0  ;;  %v1436_v4 = vmul.f32 %v12071_v24, %v12071_v24  ;;  %v15560_v58 = vld [vmem:[#allocation21_spill] sm:$0xff]  ;;  %v15563_v7 = vld [vmem:[#allocation32_spill] sm:$0xff] }
 0x228   : > { %9594 = vmatmul.mubr.msk.f32.gmra.mrb[60].mxu1 %vm457_vm0, %v1720_v39  ;;  %v1562_v42 = vadd.f32 1e-05, %v1498_v9  ;;  %v1435_v50 = vmul.f32 %v12082_v16, %v12082_v16  ;;  %v1403_v20 = vmul.f32 0.03125, %v11972_v37  ;;  %v15562_v9 = vsub.f32 %v11376_v40, %v11762_v28 }
 0x229   : > { %v12079_v15 = vadd.f32 %v11700_v1, %v1650_v5  ;;  %v1651_v52 = vmul.f32 %v11692_v51, %v1612_v34  ;;  %v10681_v5 = vpop.eup %10680  ;;  %v1561_v13 = vadd.f32 1e-05, %v1497_v31  ;;  %v1468_v62 = vsub.f32 %v1404_v21, %v1436_v4 }
 0x22a   : > { %10686 = vrsqrt.f32 %v1562_v42  ;;  %v1613_v34 = vmul.f32 %v11924_v10, %v15562_v9  ;;  %v15565_v31 = vsub.f32 %v11372_v38, %v11798_v41  ;;  %v15568_v42 = vsub.f32 %v11437_v61, %v11827_v29 }
 0x22b   : > { %15559 = vst [vmem:[#allocation12_spill] sm:$0xff] %v12079_v15  ;;  %v1721_v33 = vmul.f32 %v12079_v15, %v12079_v15  ;;  %v12098_v11 = vadd.f32 %v11700_v1, %v1651_v52  ;;  %v15564_v15 = vsub.f32 %v11390_v46, %v15563_v7  ;;  %10688 = vrsqrt.f32 %v1561_v13 }
 0x22c   : > { %v1615_v21 = vmul.f32 %v11962_v60, %v15565_v31  ;;  %v1500_v4 = vmax.f32 %v1468_v62, 0.0  ;;  %v1467_v52 = vsub.f32 %v1403_v20, %v1435_v50  ;;  %v1652_v40 = vmul.f32 %v11692_v51, %v1613_v34 }
 0x22d   : > { %9596 = vmatprep.mubr.msk.f32.mxu1 %vm457_vm0, %v1721_v33  ;;  %v1614_v39 = vmul.f32 %v11914_v22, %v15564_v15  ;;  %v1722_v37 = vmul.f32 %v12098_v11, %v12098_v11  ;;  %v15566_v46 = vsub.f32 %v11384_v43, %v11785_v30  ;;  %v10683_v38 = vpop.eup %10682  ;;  %v15567_v15 = vsub.f32 %v11423_v56, %v11836_v63 }
 0x22e   : > { %v1654_v10 = vmul.f32 %v11692_v51, %v1615_v21  ;;  %v1564_v41 = vadd.f32 1e-05, %v1500_v4  ;;  %v1499_v60 = vmax.f32 %v1467_v52, 0.0  ;;  %v1618_v33 = vmul.f32 %v12007_v27, %v15568_v42 }
 0x22f   : > { %v1653_v28 = vmul.f32 %v11692_v51, %v1614_v39  ;;  %v1616_v22 = vmul.f32 %v11952_v47, %v15566_v46  ;;  %9597 = vmatmul.mubr.msk.f32.gmra.mrb[62].mxu1 %vm457_vm0, %v1722_v37  ;;  %v1617_v7 = vmul.f32 %v12015_v32, %v15567_v15  ;;  %v12133_v50 = vadd.f32 %v11700_v1, %v1652_v40 }
 0x230   : > { %v12139_v30 = vadd.f32 %v11700_v1, %v1654_v10  ;;  %v10685_v39 = vpop.eup %10684  ;;  %10690 = vrsqrt.f32 %v1564_v41  ;;  %v1563_v56 = vadd.f32 1e-05, %v1499_v60  ;;  %v1657_v32 = vmul.f32 %v11692_v51, %v1618_v33 }
 0x231   : > { %v12136_v43 = vadd.f32 %v11700_v1, %v1653_v28  ;;  %v1655_v47 = vmul.f32 %v11692_v51, %v1616_v22  ;;  %v1656_v63 = vmul.f32 %v11692_v51, %v1617_v7  ;;  %v1723_v61 = vmul.f32 %v12133_v50, %v12133_v50 }
 0x232   : > { %v1725_v27 = vmul.f32 %v12139_v30, %v12139_v30  ;;  %10692 = vrsqrt.f32 %v1563_v56  ;;  %v15569_v20 = vsub.f32 %v11419_v54, %v11896_v18  ;;  %v15570_v34 = vsub.f32 %v11433_v59, %v11877_v26 }
 0x233   : > { %v1724_v29 = vmul.f32 %v12136_v43, %v12136_v43  ;;  %v12151_v13 = vadd.f32 %v11700_v1, %v1655_v47  ;;  %v12154_v62 = vadd.f32 %v11700_v1, %v1656_v63  ;;  %9599 = vmatprep.mubr.msk.f32.mxu1 %vm457_vm0, %v1723_v61  ;;  %v15571_v21 = vsub.f32 %v15541_v36, %v11957_v48 }
 0x234   : > { %v1619_v9 = vmul.f32 %v12048_v14, %v15569_v20  ;;  %v1620_v31 = vmul.f32 %v12041_v19, %v15570_v34  ;;  %v15572_v4 = vsub.f32 %v15536_v55, %v11931_v23  ;;  %v15573_v18 = vsub.f32 %v15547_v35, %v11998_v0  ;;  %v10687_v40 = vpop.eup %10686 }
 0x235   : > { %v1621_v37 = vmul.f32 %v10681_v5, %v15571_v21  ;;  %9600 = vmatmul.mubr.msk.f32.gmra.mrb[64].mxu1 %vm457_vm0, %v1724_v29  ;;  %v1727_v59 = vmul.f32 %v12154_v62, %v12154_v62  ;;  %v12180_v26 = vadd.f32 %v11700_v1, %v1657_v32  ;;  %v15574_v55 = vsub.f32 %v15546_v3, %v11987_v6  ;;  %v10689_v36 = vpop.eup %10688 }
 0x236   : > { %v1622_v52 = vmul.f32 %v10679_v53, %v15572_v4  ;;  %v1658_v54 = vmul.f32 %v11692_v51, %v1619_v9  ;;  %v1623_v14 = vmul.f32 %v10685_v39, %v15573_v18  ;;  %9602 = vmatprep.mubr.msk.f32.mxu1 %vm457_vm0, %v1725_v27  ;;  %v1726_v0 = vmul.f32 %v12151_v13, %v12151_v13  ;;  %v15579_v4 = vld [vmem:[#allocation5_spill] sm:$0xff] }
 0x237   : > { %v1660_v23 = vmul.f32 %v11692_v51, %v1621_v37  ;;  %v1624_v48 = vmul.f32 %v10683_v38, %v15574_v55  ;;  %v1659_v19 = vmul.f32 %v11692_v51, %v1620_v31  ;;  %v15575_v53 = vsub.f32 %v15552_v12, %v12027_v44  ;;  %v10601_v37 = vld [vmem:[%s15326_s1 + $0x38] sm:$0xff]  }
 0x238   : > { %v12189_v35 = vadd.f32 %v11700_v1, %v1658_v54  ;;  %v15576_v28 = vsub.f32 %v15555_v2, %v12045_v25  ;;  %v1662_v46 = vmul.f32 %v11692_v51, %v1623_v14  ;;  %v1728_v44 = vmul.f32 %v12180_v26, %v12180_v26  ;;  %9629 = vmatprep.subr.bf16.mxu0 %v10601_v37 }
 0x239   : > { %v1626_v5 = vmul.f32 %v10687_v40, %v15575_v53  ;;  %9603 = vmatmul.mubr.msk.f32.gmra.mrb[66].mxu1 %vm457_vm0, %v1726_v0  ;;  %v12203_v10 = vadd.f32 %v11700_v1, %v1660_v23  ;;  %v12209_v12 = vadd.f32 %v11700_v1, %v1659_v19  ;;  %v1661_v25 = vmul.f32 %v11692_v51, %v1622_v52 }
 0x23a   : > { %v1625_v6 = vmul.f32 %v10689_v36, %v15576_v28  ;;  %9605 = vmatprep.mubr.msk.f32.mxu1 %vm457_vm0, %v1727_v59  ;;  %v1729_v3 = vmul.f32 %v12189_v35, %v12189_v35  ;;  %v10691_v22 = vpop.eup %10690  ;;  %v15577_v2 = vsub.f32 %v15560_v58, %v12071_v24  ;;  %v12220_v15 = vadd.f32 %v11700_v1, %v1662_v46 }
 0x23b   : > { %v1731_v60 = vmul.f32 %v12203_v10, %v12203_v10  ;;  %v15578_v42 = vsub.f32 %v15561_v57, %v12082_v16  ;;  %v1730_v24 = vmul.f32 %v12209_v12, %v12209_v12  ;;  %v12229_v58 = vadd.f32 %v11700_v1, %v1661_v25  ;;  %9630 = vmatpush3.bf16.msra.mxu0 %v10601_v37 }
 0x23c   : > { %v1628_v38 = vmul.f32 %v10691_v22, %v15577_v2  ;;  %v10693_v41 = vpop.eup %10692  ;;  %v1664_v7 = vmul.f32 %v11692_v51, %v1625_v6  ;;  %v1663_v47 = vmul.f32 %v11692_v51, %v1624_v48  ;;  %v1733_v39 = vmul.f32 %v12220_v15, %v12220_v15  ;;  %10424 = vmatprep.subr.bf16.mxu0 %v15579_v4 }
 0x23d   : > { %9606 = vmatmul.mubr.msk.f32.gmra.mrb[68].mxu1 %vm457_vm0, %v1728_v44  ;;  %v1627_v33 = vmul.f32 %v10693_v41, %v15578_v42  ;;  %v1732_v57 = vmul.f32 %v12229_v58, %v12229_v58  ;;  %v1665_v61 = vmul.f32 %v11692_v51, %v1626_v5  ;;  %v12277_v40 = vstv %s2124_s28  ;;  %v15580_v41 = vld [vmem:[#allocation28_spill] sm:$0xff]  ;;  %v15581_v42 = vld [vmem:[#allocation33_spill] sm:$0xff] }
 0x23e   : > { %9608 = vmatprep.mubr.msk.f32.mxu1 %vm457_vm0, %v1729_v3  ;;  %v12237_v56 = vadd.f32 %v11700_v1, %v1664_v7  ;;  %v12243_v63 = vadd.f32 %v11700_v1, %v1663_v47  ;;  %v1667_v9 = vmul.f32 %v11692_v51, %v1628_v38 }
 0x23f   : > { %v1666_v16 = vmul.f32 %v11692_v51, %v1627_v33  ;;  %v12256_v20 = vadd.f32 %v11700_v1, %v1665_v61 }
 0x240   : > { %v1735_v29 = vmul.f32 %v12237_v56, %v12237_v56  ;;  %v1734_v32 = vmul.f32 %v12243_v63, %v12243_v63  ;;  %v12266_v21 = vadd.f32 %v11700_v1, %v1667_v9 }
 0x241   : > { %9609 = vmatmul.mubr.msk.f32.gmra.mrb[70].mxu1 %vm457_vm0, %v1730_v24  ;;  %v12251_v27 = vadd.f32 %v11700_v1, %v1666_v16  ;;  %v1736_v31 = vmul.f32 %v12256_v20, %v12256_v20 }
 0x242   : > { %9611 = vmatprep.mubr.msk.f32.mxu1 %vm457_vm0, %v1731_v60  ;;  %v1738_v51 = vmul.f32 %v12266_v21, %v12266_v21 }
 0x243   : > { %v1737_v34 = vmul.f32 %v12251_v27, %v12251_v27 }
 0x245   : > { %9612 = vmatmul.mubr.msk.f32.gmra.mrb[72].mxu1 %vm457_vm0, %v1732_v57 }
 0x246   : > { %9614 = vmatprep.mubr.msk.f32.mxu1 %vm457_vm0, %v1733_v39 }
 0x249   : > { %9615 = vmatmul.mubr.msk.f32.gmra.mrb[74].mxu1 %vm457_vm0, %v1734_v32 }
 0x24a   : > { %9617 = vmatprep.mubr.msk.f32.mxu1 %vm457_vm0, %v1735_v29 }
 0x24d   : > { %9618 = vmatmul.mubr.msk.f32.gmra.mrb[76].mxu1 %vm457_vm0, %v1736_v31 }
 0x24e   : > { %9620 = vmatprep.mubr.msk.f32.mxu1 %vm457_vm0, %v1737_v34  ;;  %v15582_v34 = vld [vmem:[#allocation35_spill] sm:$0xff] }
 0x251   : > { %9621 = vmatmul.mubr.msk.f32.gmra.mrb[78].mxu1 %vm457_vm0, %v1738_v51 }
 0x2d7   : > { %v9577_v52 = vpop.f32.mrb[48].mxu1 }
 0x2d8   : > { %10694 = vrsqrt.f32 %v9577_v52  ;;  %v1901_v1 = vpop.f32.mrb[49].mxu1 }
 0x2d9   : > { %10696 = vrsqrt.f32 %v1901_v1 }
 0x2dc   : > { %v9580_v54 = vpop.f32.mrb[50].mxu1 }
 0x2dd   : > { %10698 = vrsqrt.f32 %v9580_v54  ;;  %v1911_v18 = vpop.f32.mrb[51].mxu1 }
 0x2de   : > { %10700 = vrsqrt.f32 %v1911_v18 }
 0x2e2   : > { %v10695_v14 = vpop.eup %10694  ;;  %v9583_v55 = vpop.f32.mrb[52].mxu1 }
 0x2e3   : > { %v10697_v59 = vpop.eup %10696  ;;  %v2093_v23 = vmul.f32 %v10695_v14, %v9577_v52  ;;  %10702 = vrsqrt.f32 %v9583_v55  ;;  %v1921_v36 = vpop.f32.mrb[53].mxu1  ;;  %v15583_v52 = vld [vmem:[#allocation34_spill] sm:$0xff] }
 0x2e4   : > { %v2092_v48 = vmul.f32 %v10697_v59, %v1901_v1  ;;  %10704 = vrsqrt.f32 %v1921_v36 }
 0x2e5   : > { %v2127_v0 = vsub.f32 %v2093_v23, %v12277_v40 }
 0x2e6   : > { %v2126_v19 = vsub.f32 %v2092_v48, %v12277_v40 }
 0x2e7   : > { %v10699_v53 = vpop.eup %10698  ;;  %v2159_v5 = vmax.f32 %v2127_v0, 0.0 }
 0x2e8   : > { %v10701_v28 = vpop.eup %10700  ;;  %v2158_v6 = vmax.f32 %v2126_v19, 0.0  ;;  %v2095_v3 = vmul.f32 %v10699_v53, %v9580_v54 }
 0x2e9   : > { %v2191_v46 = vmul.f32 %v10695_v14, %v2159_v5  ;;  %v2094_v22 = vmul.f32 %v10701_v28, %v1911_v18  ;;  %v9586_v44 = vpop.f32.mrb[54].mxu1 }
 0x2ea   : > { %v2190_v25 = vmul.f32 %v10697_v59, %v2158_v6  ;;  %v2129_v2 = vsub.f32 %v2095_v3, %v12277_v40  ;;  %10706 = vrsqrt.f32 %v9586_v44  ;;  %v1931_v38 = vpop.f32.mrb[55].mxu1  ;;  %v15584_v6 = vld [vmem:[#allocation37_spill] sm:$0xff] }
 0x2eb   : > { %v2223_v60 = vmul.f32 %v2191_v46, %v15580_v41  ;;  %v2128_v7 = vsub.f32 %v2094_v22, %v12277_v40  ;;  %10708 = vrsqrt.f32 %v1931_v38  ;;  %v15585_v22 = vld [vmem:[#allocation6_spill] sm:$0xff] }
 0x2ec   : > { %v2222_v33 = vmul.f32 %v2190_v25, %v15581_v42  ;;  %v2161_v24 = vmax.f32 %v2129_v2, 0.0  ;;  %v15586_v25 = vld [vmem:[#allocation36_spill] sm:$0xff] }
 0x2ed   : > { %v2160_v47 = vmax.f32 %v2128_v7, 0.0  ;;  %v10703_v39 = vpop.eup %10702 }
 0x2ee   : > { %v2193_v16 = vmul.f32 %v10699_v53, %v2161_v24  ;;  %v2254_v57 = vpack.c.bf16 %v2223_v60, %v2222_v33  ;;  %v10705_v61 = vpop.eup %10704  ;;  %v2097_v32 = vmul.f32 %v10703_v39, %v9583_v55  ;;  %v9589_v9 = vpop.f32.mrb[56].mxu1 }
 0x2ef   : > { %v2192_v29 = vmul.f32 %v10701_v28, %v2160_v47  ;;  %v2096_v51 = vmul.f32 %v10705_v61, %v1921_v36  ;;  %10710 = vrsqrt.f32 %v9589_v9  ;;  %v1941_v37 = vpop.f32.mrb[57].mxu1 }
 0x2f0   : > { %v2225_v31 = vmul.f32 %v2193_v16, %v15582_v34  ;;  %9631 = vmatprep.mubr.msk.bf16.mxu0 %vm457_vm0, %v2254_v57  ;;  %v2131_v54 = vsub.f32 %v2097_v32, %v12277_v40  ;;  %10712 = vrsqrt.f32 %v1941_v37 }
 0x2f1   : > { %v2224_v1 = vmul.f32 %v2192_v29, %v15583_v52  ;;  %v2130_v18 = vsub.f32 %v2096_v51, %v12277_v40  ;;  %v15588_v29 = vld [vmem:[#allocation39_spill] sm:$0xff] }
 0x2f2   : > { %v2163_v59 = vmax.f32 %v2131_v54, 0.0 }
 0x2f3   : > { %v2255_v14 = vpack.c.bf16 %v2225_v31, %v2224_v1  ;;  %v2162_v48 = vmax.f32 %v2130_v18, 0.0  ;;  %v15589_v31 = vld [vmem:[#allocation38_spill] sm:$0xff]  ;;  %v15590_v1 = vld [vmem:[#allocation8_spill] sm:$0xff] }
 0x2f4   : > { %v10707_v23 = vpop.eup %10706  ;;  %v2195_v0 = vmul.f32 %v10703_v39, %v2163_v59  ;;  %v15587_v39 = vld [vmem:[#allocation7_spill] sm:$0xff] }
 0x2f5   : > { %v10709_v55 = vpop.eup %10708  ;;  %v2099_v19 = vmul.f32 %v10707_v23, %v9586_v44  ;;  %9632 = vmatmul.mubr.msk.bf16.vlgmr.msra.gmra.mrb[48].mxu0 %vm457_vm0, %v2255_v14  ;;  %v2194_v36 = vmul.f32 %v10705_v61, %v2162_v48 }
 0x2f6   : > { %v2098_v5 = vmul.f32 %v10709_v55, %v1931_v38  ;;  %10426 = vmatpush3.bf16.msra.mxu0 %v15579_v4  ;;  %v2227_v3 = vmul.f32 %v2195_v0, %v15584_v6  ;;  %v15591_v6 = vld [vmem:[#allocation25_spill] sm:$0xff] }
 0x2f7   : > { %v9592_v53 = vpop.f32.mrb[58].mxu1  ;;  %v2133_v46 = vsub.f32 %v2099_v19, %v12277_v40  ;;  %10428 = vmatprep.subr.bf16.mxu0 %v15585_v22  ;;  %v2226_v2 = vmul.f32 %v2194_v36, %v15586_v25 }
 0x2f8   : > { %10714 = vrsqrt.f32 %v9592_v53  ;;  %v1951_v28 = vpop.f32.mrb[59].mxu1  ;;  %v2132_v44 = vsub.f32 %v2098_v5, %v12277_v40 }
 0x2f9   : > { %10716 = vrsqrt.f32 %v1951_v28  ;;  %v2165_v41 = vmax.f32 %v2133_v46, 0.0  ;;  %v10711_v60 = vpop.eup %10710  ;;  %v2256_v42 = vpack.c.bf16 %v2227_v3, %v2226_v2 }
 0x2fa   : > { %v2164_v7 = vmax.f32 %v2132_v44, 0.0  ;;  %10430 = vmatpush3.bf16.msra.mxu0 %v15585_v22  ;;  %v10713_v38 = vpop.eup %10712  ;;  %v2101_v24 = vmul.f32 %v10711_v60, %v9589_v9 }
 0x2fb   : > { %v2197_v33 = vmul.f32 %v10707_v23, %v2165_v41  ;;  %v9595_v47 = vpop.f32.mrb[60].mxu1  ;;  %10432 = vmatprep.subr.bf16.mxu0 %v15587_v39  ;;  %v2100_v57 = vmul.f32 %v10713_v38, %v1941_v37  ;;  %9635 = vmatprep.mubr.msk.bf16.mxu0 %vm457_vm0, %v2256_v42 }
 0x2fc   : > { %v2196_v16 = vmul.f32 %v10709_v55, %v2164_v7  ;;  %10718 = vrsqrt.f32 %v9595_v47  ;;  %v1961_v61 = vpop.f32.mrb[61].mxu1  ;;  %v2135_v34 = vsub.f32 %v2101_v24, %v12277_v40 }
 0x2fd   : > { %v2229_v32 = vmul.f32 %v2197_v33, %v15588_v29  ;;  %10720 = vrsqrt.f32 %v1961_v61  ;;  %v2134_v52 = vsub.f32 %v2100_v57, %v12277_v40 }
 0x2fe   : > { %v2228_v51 = vmul.f32 %v2196_v16, %v15589_v31  ;;  %10434 = vmatpush3.bf16.msra.mxu0 %v15587_v39  ;;  %v2167_v9 = vmax.f32 %v2135_v34, 0.0  ;;  %v15592_v16 = vld [vmem:[#allocation17_spill] sm:$0xff] }
 0x2ff   : > { %10436 = vmatprep.subr.bf16.mxu0 %v15590_v1  ;;  %v2166_v37 = vmax.f32 %v2134_v52, 0.0 }
 0x300   : > { %v2257_v18 = vpack.c.bf16 %v2229_v32, %v2228_v51  ;;  %v2199_v59 = vmul.f32 %v10711_v60, %v2167_v9 }
 0x301   : > { %v2198_v55 = vmul.f32 %v10713_v38, %v2166_v37 }
 0x302   : > { %v10715_v54 = vpop.eup %10714  ;;  %v9598_v48 = vpop.f32.mrb[62].mxu1  ;;  %9636 = vmatmul.mubr.msk.bf16.gmra.mrb[52].mxu0 %vm457_vm0, %v2257_v18  ;;  %v2231_v36 = vmul.f32 %v2199_v59, %v11975_v17 }
 0x303   : > { %v10717_v14 = vpop.eup %10716  ;;  %v2103_v23 = vmul.f32 %v10715_v54, %v9592_v53  ;;  %10722 = vrsqrt.f32 %v9598_v48  ;;  %v1971_v19 = vpop.f32.mrb[63].mxu1  ;;  %10438 = vmatpush3.bf16.msra.mxu0 %v15590_v1  ;;  %v2230_v3 = vmul.f32 %v2198_v55, %v15591_v6 }
 0x304   : > { %v2102_v0 = vmul.f32 %v10717_v14, %v1951_v28  ;;  %10724 = vrsqrt.f32 %v1971_v19 }
 0x305   : > { %v2137_v5 = vsub.f32 %v2103_v23, %v12277_v40  ;;  %v2258_v44 = vpack.c.bf16 %v2231_v36, %v2230_v3 }
 0x306   : > { %v2136_v46 = vsub.f32 %v2102_v0, %v12277_v40  ;;  %v10719_v53 = vpop.eup %10718 }
 0x307   : > { %v2169_v25 = vmax.f32 %v2137_v5, 0.0  ;;  %v10721_v28 = vpop.eup %10720  ;;  %v2105_v60 = vmul.f32 %v10719_v53, %v9595_v47  ;;  %9639 = vmatprep.mubr.msk.bf16.mxu0 %vm457_vm0, %v2258_v44 }
 0x308   : > { %v2168_v2 = vmax.f32 %v2136_v46, 0.0  ;;  %v9601_v7 = vpop.f32.mrb[64].mxu1  ;;  %v2104_v38 = vmul.f32 %v10721_v28, %v1961_v61 }
 0x309   : > { %v2201_v41 = vmul.f32 %v10715_v54, %v2169_v25  ;;  %10726 = vrsqrt.f32 %v9601_v7  ;;  %v1981_v17 = vpop.f32.mrb[65].mxu1  ;;  %v2139_v24 = vsub.f32 %v2105_v60, %v12277_v40 }
 0x30a   : > { %v2200_v42 = vmul.f32 %v10717_v14, %v2168_v2  ;;  %10728 = vrsqrt.f32 %v1981_v17  ;;  %v2138_v29 = vsub.f32 %v2104_v38, %v12277_v40 }
 0x30b   : > { %v2233_v33 = vmul.f32 %v2201_v41, %v12018_v49  ;;  %v2171_v32 = vmax.f32 %v2139_v24, 0.0  ;;  %v15593_v41 = vld [vmem:[#allocation12_spill] sm:$0xff] }
 0x30c   : > { %v2232_v57 = vmul.f32 %v2200_v42, %v15592_v16  ;;  %v9604_v34 = vpop.f32.mrb[66].mxu1  ;;  %v2170_v47 = vmax.f32 %v2138_v29, 0.0 }
 0x30d   : > { %v10723_v31 = vpop.eup %10722  ;;  %10730 = vrsqrt.f32 %v9604_v34  ;;  %v1991_v51 = vpop.f32.mrb[67].mxu1  ;;  %v2203_v9 = vmul.f32 %v10719_v53, %v2171_v32 }
 0x30e   : > { %v2259_v61 = vpack.c.bf16 %v2233_v33, %v2232_v57  ;;  %v10725_v52 = vpop.eup %10724  ;;  %v2107_v54 = vmul.f32 %v10723_v31, %v9598_v48  ;;  %10732 = vrsqrt.f32 %v1991_v51  ;;  %v2202_v37 = vmul.f32 %v10721_v28, %v2170_v47 }
 0x30f   : > { %v2106_v49 = vmul.f32 %v10725_v52, %v1971_v19  ;;  %v2235_v18 = vmul.f32 %v2203_v9, %v12054_v45 }
 0x310   : > { %9640 = vmatmul.mubr.msk.bf16.gmra.mrb[56].mxu0 %vm457_vm0, %v2259_v61  ;;  %v2141_v14 = vsub.f32 %v2107_v54, %v12277_v40  ;;  %v9607_v59 = vpop.f32.mrb[68].mxu1  ;;  %v2234_v23 = vmul.f32 %v2202_v37, %v12051_v8 }
 0x311   : > { %v2140_v55 = vsub.f32 %v2106_v49, %v12277_v40  ;;  %10734 = vrsqrt.f32 %v9607_v59  ;;  %v2001_v0 = vpop.f32.mrb[69].mxu1 }
 0x312   : > { %v2173_v36 = vmax.f32 %v2141_v14, 0.0  ;;  %10736 = vrsqrt.f32 %v2001_v0  ;;  %v2260_v6 = vpack.c.bf16 %v2235_v18, %v2234_v23 }
 0x313   : > { %v10727_v5 = vpop.eup %10726  ;;  %v2172_v48 = vmax.f32 %v2140_v55, 0.0 }
 0x314   : > { %v10729_v3 = vpop.eup %10728  ;;  %v2205_v19 = vmul.f32 %v10723_v31, %v2173_v36  ;;  %v2109_v46 = vmul.f32 %v10727_v5, %v9601_v7  ;;  %v9610_v25 = vpop.f32.mrb[70].mxu1  ;;  %9643 = vmatprep.mubr.msk.bf16.mxu0 %vm457_vm0, %v2260_v6 }
 0x315   : > { %v2204_v53 = vmul.f32 %v10725_v52, %v2172_v48  ;;  %v2108_v45 = vmul.f32 %v10729_v3, %v1981_v17  ;;  %10738 = vrsqrt.f32 %v9610_v25  ;;  %v2011_v2 = vpop.f32.mrb[71].mxu1 }
 0x316   : > { %v2237_v8 = vmul.f32 %v2205_v19, %v12098_v11  ;;  %v2143_v44 = vsub.f32 %v2109_v46, %v12277_v40  ;;  %10740 = vrsqrt.f32 %v2011_v2 }
 0x317   : > { %v10731_v28 = vpop.eup %10730  ;;  %v2236_v60 = vmul.f32 %v2204_v53, %v15593_v41  ;;  %v2142_v42 = vsub.f32 %v2108_v45, %v12277_v40 }
 0x318   : > { %v10733_v38 = vpop.eup %10732  ;;  %v2175_v33 = vmax.f32 %v2143_v44, 0.0  ;;  %v2111_v7 = vmul.f32 %v10731_v28, %v9604_v34  ;;  %v9613_v24 = vpop.f32.mrb[72].mxu1 }
 0x319   : > { %v2174_v16 = vmax.f32 %v2142_v42, 0.0  ;;  %v2110_v17 = vmul.f32 %v10733_v38, %v1991_v51  ;;  %10742 = vrsqrt.f32 %v9613_v24  ;;  %v2021_v57 = vpop.f32.mrb[73].mxu1  ;;  %v2261_v29 = vpack.c.bf16 %v2237_v8, %v2236_v60 }
 0x31a   : > { %v2207_v32 = vmul.f32 %v10727_v5, %v2175_v33  ;;  %v2145_v11 = vsub.f32 %v2111_v7, %v12277_v40  ;;  %10744 = vrsqrt.f32 %v2021_v57 }
 0x31b   : > { %v10735_v31 = vpop.eup %10734  ;;  %v2206_v47 = vmul.f32 %v10729_v3, %v2174_v16  ;;  %v2144_v61 = vsub.f32 %v2110_v17, %v12277_v40  ;;  %9644 = vmatmul.mubr.msk.bf16.gmra.mrb[60].mxu0 %vm457_vm0, %v2261_v29 }
 0x31c   : > { %v10737_v52 = vpop.eup %10736  ;;  %v2239_v9 = vmul.f32 %v2207_v32, %v12136_v43  ;;  %v2177_v34 = vmax.f32 %v2145_v11, 0.0  ;;  %v2113_v54 = vmul.f32 %v10735_v31, %v9607_v59  ;;  %v9616_v37 = vpop.f32.mrb[74].mxu1 }
 0x31d   : > { %v2238_v51 = vmul.f32 %v2206_v47, %v12133_v50  ;;  %v2176_v49 = vmax.f32 %v2144_v61, 0.0  ;;  %v2112_v18 = vmul.f32 %v10737_v52, %v2001_v0  ;;  %10746 = vrsqrt.f32 %v9616_v37  ;;  %v2031_v14 = vpop.f32.mrb[75].mxu1 }
 0x31e   : > { %v2209_v23 = vmul.f32 %v10731_v28, %v2177_v34  ;;  %v2147_v55 = vsub.f32 %v2113_v54, %v12277_v40  ;;  %10748 = vrsqrt.f32 %v2031_v14 }
 0x31f   : > { %v10739_v36 = vpop.eup %10738  ;;  %v2208_v5 = vmul.f32 %v10733_v38, %v2176_v49  ;;  %v2146_v48 = vsub.f32 %v2112_v18, %v12277_v40  ;;  %v2262_v6 = vpack.c.bf16 %v2239_v9, %v2238_v51 }
 0x320   : > { %v10741_v3 = vpop.eup %10740  ;;  %v2241_v43 = vmul.f32 %v2209_v23, %v12151_v13  ;;  %v2179_v59 = vmax.f32 %v2147_v55, 0.0  ;;  %v2115_v19 = vmul.f32 %v10739_v36, %v9610_v25  ;;  %v9619_v46 = vpop.f32.mrb[76].mxu1 }
 0x321   : > { %v2240_v50 = vmul.f32 %v2208_v5, %v12139_v30  ;;  %v2178_v0 = vmax.f32 %v2146_v48, 0.0  ;;  %v2114_v53 = vmul.f32 %v10741_v3, %v2011_v2  ;;  %10750 = vrsqrt.f32 %v9619_v46  ;;  %v2041_v45 = vpop.f32.mrb[77].mxu1  ;;  %9647 = vmatprep.mubr.msk.bf16.mxu0 %vm457_vm0, %v2262_v6 }
 0x322   : > { %v2211_v8 = vmul.f32 %v10735_v31, %v2179_v59  ;;  %v2149_v44 = vsub.f32 %v2115_v19, %v12277_v40  ;;  %10752 = vrsqrt.f32 %v2041_v45 }
 0x323   : > { %v10743_v28 = vpop.eup %10742  ;;  %v2210_v41 = vmul.f32 %v10737_v52, %v2178_v0  ;;  %v2148_v60 = vsub.f32 %v2114_v53, %v12277_v40  ;;  %v2263_v13 = vpack.c.bf16 %v2241_v43, %v2240_v50 }
 0x324   : > { %v10745_v42 = vpop.eup %10744  ;;  %v2243_v25 = vmul.f32 %v2211_v8, %v12180_v26  ;;  %v2181_v38 = vmax.f32 %v2149_v44, 0.0  ;;  %v2117_v30 = vmul.f32 %v10743_v28, %v9613_v24  ;;  %v9622_v33 = vpop.f32.mrb[78].mxu1 }
 0x325   : > { %v2242_v2 = vmul.f32 %v2210_v41, %v12154_v62  ;;  %v2180_v7 = vmax.f32 %v2148_v60, 0.0  ;;  %v2116_v16 = vmul.f32 %v10745_v42, %v2021_v57  ;;  %10754 = vrsqrt.f32 %v9622_v33  ;;  %v2051_v17 = vpop.f32.mrb[79].mxu1  ;;  %9648 = vmatmul.mubr.msk.bf16.gmra.mrb[64].mxu0 %vm457_vm0, %v2263_v13 }
 0x326   : > { %v2213_v29 = vmul.f32 %v10739_v36, %v2181_v38  ;;  %v2151_v32 = vsub.f32 %v2117_v30, %v12277_v40  ;;  %10756 = vrsqrt.f32 %v2051_v17 }
 0x327   : > { %v10747_v11 = vpop.eup %10746  ;;  %v2212_v31 = vmul.f32 %v10741_v3, %v2180_v7  ;;  %v2150_v47 = vsub.f32 %v2116_v16, %v12277_v40  ;;  %v2264_v26 = vpack.c.bf16 %v2243_v25, %v2242_v2 }
 0x328   : > { %v10749_v61 = vpop.eup %10748  ;;  %v2245_v24 = vmul.f32 %v2213_v29, %v12209_v12  ;;  %v2183_v52 = vmax.f32 %v2151_v32, 0.0  ;;  %v2119_v62 = vmul.f32 %v10747_v11, %v9616_v37  ;;  %v15594_v32 = vld [vmem:[#allocation9_spill] sm:$0xff] }
 0x329   : > { %v2244_v57 = vmul.f32 %v2212_v31, %v12189_v35  ;;  %v2182_v9 = vmax.f32 %v2150_v47, 0.0  ;;  %v2118_v34 = vmul.f32 %v10749_v61, %v2031_v14  ;;  %9651 = vmatprep.mubr.msk.bf16.mxu0 %vm457_vm0, %v2264_v26  ;;  %v15596_v47 = vld [vmem:[#allocation11_spill] sm:$0xff] }
 0x32a   : > { %v2215_v54 = vmul.f32 %v10743_v28, %v2183_v52  ;;  %v2153_v51 = vsub.f32 %v2119_v62, %v12277_v40 }
 0x32b   : > { %v10751_v49 = vpop.eup %10750  ;;  %v2214_v18 = vmul.f32 %v10745_v42, %v2182_v9  ;;  %v2152_v23 = vsub.f32 %v2118_v34, %v12277_v40  ;;  %v2265_v55 = vpack.c.bf16 %v2245_v24, %v2244_v57  ;;  %v15597_v24 = vld [vmem:[#allocation24_spill] sm:$0xff] }
 0x32c   : > { %v10753_v36 = vpop.eup %10752  ;;  %v2247_v5 = vmul.f32 %v2215_v54, %v12229_v58  ;;  %v2185_v12 = vmax.f32 %v2153_v51, 0.0  ;;  %v2121_v48 = vmul.f32 %v10751_v49, %v9619_v46 }
 0x32d   : > { %v2246_v37 = vmul.f32 %v2214_v18, %v12203_v10  ;;  %v2184_v35 = vmax.f32 %v2152_v23, 0.0  ;;  %v2120_v6 = vmul.f32 %v10753_v36, %v2041_v45  ;;  %9652 = vmatmul.mubr.msk.bf16.gmra.mrb[68].mxu0 %vm457_vm0, %v2265_v55 }
 0x32e   : > { %v2217_v14 = vmul.f32 %v10747_v11, %v2185_v12  ;;  %v2155_v3 = vsub.f32 %v2121_v48, %v12277_v40  ;;  %v15595_v11 = vld [vmem:[#allocation10_spill] sm:$0xff] }
 0x32f   : > { %v10755_v43 = vpop.eup %10754  ;;  %v2216_v59 = vmul.f32 %v10749_v61, %v2184_v35  ;;  %v2154_v19 = vsub.f32 %v2120_v6, %v12277_v40  ;;  %v2266_v50 = vpack.c.bf16 %v2247_v5, %v2246_v37 }
 0x330   : > { %v10757_v0 = vpop.eup %10756  ;;  %v2249_v53 = vmul.f32 %v2217_v14, %v12243_v63  ;;  %v2187_v58 = vmax.f32 %v2155_v3, 0.0  ;;  %v2123_v8 = vmul.f32 %v10755_v43, %v9622_v33 }
 0x331   : > { %v2248_v46 = vmul.f32 %v2216_v59, %v12220_v15  ;;  %v2186_v10 = vmax.f32 %v2154_v19, 0.0  ;;  %v2122_v44 = vmul.f32 %v10757_v0, %v2051_v17  ;;  %9655 = vmatprep.mubr.msk.bf16.mxu0 %vm457_vm0, %v2266_v50 }
 0x332   : > { %v2219_v45 = vmul.f32 %v10751_v49, %v2187_v58  ;;  %v2157_v28 = vsub.f32 %v2123_v8, %v12277_v40 }
 0x333   : > { %v2218_v41 = vmul.f32 %v10753_v36, %v2186_v10  ;;  %v2156_v60 = vsub.f32 %v2122_v44, %v12277_v40  ;;  %v2267_v13 = vpack.c.bf16 %v2249_v53, %v2248_v46 }
 0x334   : > { %v2251_v42 = vmul.f32 %v2219_v45, %v12256_v20  ;;  %v2189_v25 = vmax.f32 %v2157_v28, 0.0 }
 0x335   : > { %v2250_v63 = vmul.f32 %v2218_v41, %v12237_v56  ;;  %v2188_v38 = vmax.f32 %v2156_v60, 0.0  ;;  %9656 = vmatmul.mubr.msk.bf16.gmra.mrb[72].mxu0 %vm457_vm0, %v2267_v13 }
 0x336   : > { %v2221_v15 = vmul.f32 %v10755_v43, %v2189_v25 }
 0x337   : > { %v2220_v30 = vmul.f32 %v10757_v0, %v2188_v38  ;;  %v2268_v33 = vpack.c.bf16 %v2251_v42, %v2250_v63 }
 0x338   : > { %v2253_v2 = vmul.f32 %v2221_v15, %v12266_v21 }
 0x339   : > { %v2252_v7 = vmul.f32 %v2220_v30, %v12251_v27  ;;  %9659 = vmatprep.mubr.msk.bf16.mxu0 %vm457_vm0, %v2268_v33 }
 0x33b   : > { %v2269_v16 = vpack.c.bf16 %v2253_v2, %v2252_v7 }
 0x33d   : > { %9660 = vmatmul.mubr.msk.bf16.gmra.mrb[76].mxu0 %vm457_vm0, %v2269_v16 }
 0x3c8   : > { %v12366_v40 = vpop.f32.mrb[48].mxu0 }
 0x3c9   : > { %v12368_v20 = vpop.f32.mrb[49].mxu0  ;;  %v2867_v29 = vmul.f32 %v12366_v40, %v12366_v40 }
 0x3ca   : > { %v2865_v56 = vmul.f32 %v12368_v20, %v12368_v20  ;;  %v12372_v17 = vpop.f32.mrb[50].mxu0  ;;  %9679 = vmatprep.mubr.msk.f32.mxu1 %vm457_vm0, %v12368_v20 }
 0x3cb   : > { %v12376_v21 = vpop.f32.mrb[51].mxu0  ;;  %v2868_v31 = vmul.f32 %v12372_v17, %v12372_v17 }
 0x3cc   : > { %v2866_v27 = vmul.f32 %v12376_v21, %v12376_v21  ;;  %9680 = vmatmul.mubr.msk.f32.vlgmr.msra.gmra.mrb[80].mxu1 %vm457_vm0, %v12376_v21  ;;  %9743 = vmatprep.mubr.msk.f32.mxu0 %vm457_vm0, %v2865_v56 }
 0x3cd   : > { %9682 = vmatprep.mubr.msk.f32.mxu1 %vm457_vm0, %v12366_v40  ;;  %10442 = vmatpush3.bf16.msra.mxu1 %v15594_v32 }
 0x3ce   : > { %9744 = vmatmul.mubr.msk.f32.vlgmr.msra.gmra.mrb[80].mxu0 %vm457_vm0, %v2866_v27  ;;  %10444 = vmatprep.subr.bf16.mxu1 %v15595_v11 }
 0x3cf   : > { %9746 = vmatprep.mubr.msk.f32.mxu0 %vm457_vm0, %v2867_v29 }
 0x3d0   : > { %9683 = vmatmul.mubr.msk.f32.gmra.mrb[82].mxu1 %vm457_vm0, %v12372_v17 }
 0x3d1   : > { %10446 = vmatpush3.bf16.msra.mxu1 %v15595_v11 }
 0x3d2   : > { %9747 = vmatmul.mubr.msk.f32.gmra.mrb[82].mxu0 %vm457_vm0, %v2868_v31  ;;  %10448 = vmatprep.subr.bf16.mxu1 %v15596_v47 }
 0x3d5   : > { %v12398_v26 = vpop.f32.mrb[52].mxu0  ;;  %10450 = vmatpush3.bf16.msra.mxu1 %v15596_v47 }
 0x3d6   : > { %v12401_v61 = vpop.f32.mrb[53].mxu0  ;;  %10452 = vmatprep.subr.bf16.mxu1 %v15597_v24  ;;  %v2871_v34 = vmul.f32 %v12398_v26, %v12398_v26 }
 0x3d7   : > { %v2869_v52 = vmul.f32 %v12401_v61, %v12401_v61  ;;  %v12406_v62 = vpop.f32.mrb[54].mxu0  ;;  %9685 = vmatprep.mubr.msk.f32.mxu1 %vm457_vm0, %v12401_v61 }
 0x3d8   : > { %v12410_v57 = vpop.f32.mrb[55].mxu0  ;;  %v2872_v54 = vmul.f32 %v12406_v62, %v12406_v62 }
 0x3d9   : > { %v2870_v9 = vmul.f32 %v12410_v57, %v12410_v57  ;;  %9686 = vmatmul.mubr.msk.f32.gmra.mrb[84].mxu1 %vm457_vm0, %v12410_v57  ;;  %9749 = vmatprep.mubr.msk.f32.mxu0 %vm457_vm0, %v2869_v52 }
 0x3da   : > { %9688 = vmatprep.mubr.msk.f32.mxu1 %vm457_vm0, %v12398_v26  ;;  %10454 = vmatpush3.bf16.msra.mxu1 %v15597_v24 }
 0x3db   : > { %9750 = vmatmul.mubr.msk.f32.gmra.mrb[84].mxu0 %vm457_vm0, %v2870_v9  ;;  %10456 = vmatprep.subr.bf16.mxu1 %v15579_v4 }
 0x3dc   : > { %9752 = vmatprep.mubr.msk.f32.mxu0 %vm457_vm0, %v2871_v34 }
 0x3dd   : > { %9689 = vmatmul.mubr.msk.f32.gmra.mrb[86].mxu1 %vm457_vm0, %v12406_v62 }
 0x3df   : > { %9753 = vmatmul.mubr.msk.f32.gmra.mrb[86].mxu0 %vm457_vm0, %v2872_v54 }
 0x3e3   : > { %v12430_v51 = vpop.f32.mrb[56].mxu0 }
 0x3e4   : > { %v12432_v49 = vpop.f32.mrb[57].mxu0  ;;  %v2875_v5 = vmul.f32 %v12430_v51, %v12430_v51 }
 0x3e5   : > { %v2873_v18 = vmul.f32 %v12432_v49, %v12432_v49  ;;  %v12436_v23 = vpop.f32.mrb[58].mxu0  ;;  %9691 = vmatprep.mubr.msk.f32.mxu1 %vm457_vm0, %v12432_v49 }
 0x3e6   : > { %v12440_v55 = vpop.f32.mrb[59].mxu0  ;;  %v2876_v12 = vmul.f32 %v12436_v23, %v12436_v23 }
 0x3e7   : > { %v2874_v36 = vmul.f32 %v12440_v55, %v12440_v55  ;;  %9692 = vmatmul.mubr.msk.f32.gmra.mrb[88].mxu1 %vm457_vm0, %v12440_v55  ;;  %9755 = vmatprep.mubr.msk.f32.mxu0 %vm457_vm0, %v2873_v18 }
 0x3e8   : > { %9694 = vmatprep.mubr.msk.f32.mxu1 %vm457_vm0, %v12430_v51 }
 0x3e9   : > { %9756 = vmatmul.mubr.msk.f32.gmra.mrb[88].mxu0 %vm457_vm0, %v2874_v36 }
 0x3ea   : > { %9758 = vmatprep.mubr.msk.f32.mxu0 %vm457_vm0, %v2875_v5 }
 0x3eb   : > { %9695 = vmatmul.mubr.msk.f32.gmra.mrb[90].mxu1 %vm457_vm0, %v12436_v23 }
 0x3ed   : > { %9759 = vmatmul.mubr.msk.f32.gmra.mrb[90].mxu0 %vm457_vm0, %v2876_v12 }
 0x3ee   : > { %v12458_v48 = vpop.f32.mrb[60].mxu0 }
 0x3ef   : > { %v12460_v37 = vpop.f32.mrb[61].mxu0  ;;  %v2879_v43 = vmul.f32 %v12458_v48, %v12458_v48 }
 0x3f0   : > { %v2877_v35 = vmul.f32 %v12460_v37, %v12460_v37  ;;  %v12464_v6 = vpop.f32.mrb[62].mxu0  ;;  %9697 = vmatprep.mubr.msk.f32.mxu1 %vm457_vm0, %v12460_v37 }
 0x3f1   : > { %v12468_v14 = vpop.f32.mrb[63].mxu0  ;;  %v2880_v59 = vmul.f32 %v12464_v6, %v12464_v6 }
 0x3f2   : > { %v2878_v3 = vmul.f32 %v12468_v14, %v12468_v14  ;;  %9698 = vmatmul.mubr.msk.f32.gmra.mrb[92].mxu1 %vm457_vm0, %v12468_v14  ;;  %9761 = vmatprep.mubr.msk.f32.mxu0 %vm457_vm0, %v2877_v35 }
 0x3f3   : > { %9700 = vmatprep.mubr.msk.f32.mxu1 %vm457_vm0, %v12458_v48 }
 0x3f4   : > { %9762 = vmatmul.mubr.msk.f32.gmra.mrb[92].mxu0 %vm457_vm0, %v2878_v3 }
 0x3f5   : > { %9764 = vmatprep.mubr.msk.f32.mxu0 %vm457_vm0, %v2879_v43 }
 0x3f6   : > { %9701 = vmatmul.mubr.msk.f32.gmra.mrb[94].mxu1 %vm457_vm0, %v12464_v6 }
 0x3f8   : > { %v12485_v19 = vpop.f32.mrb[64].mxu0  ;;  %9765 = vmatmul.mubr.msk.f32.gmra.mrb[94].mxu0 %vm457_vm0, %v2880_v59 }
 0x3f9   : > { %v12488_v50 = vpop.f32.mrb[65].mxu0  ;;  %v2883_v46 = vmul.f32 %v12485_v19, %v12485_v19 }
 0x3fa   : > { %v2881_v0 = vmul.f32 %v12488_v50, %v12488_v50  ;;  %v12492_v53 = vpop.f32.mrb[66].mxu0  ;;  %9703 = vmatprep.mubr.msk.f32.mxu1 %vm457_vm0, %v12488_v50 }
 0x3fb   : > { %v12496_v58 = vpop.f32.mrb[67].mxu0  ;;  %v2884_v10 = vmul.f32 %v12492_v53, %v12492_v53 }
 0x3fc   : > { %v2882_v8 = vmul.f32 %v12496_v58, %v12496_v58  ;;  %9704 = vmatmul.mubr.msk.f32.gmra.mrb[96].mxu1 %vm457_vm0, %v12496_v58  ;;  %9767 = vmatprep.mubr.msk.f32.mxu0 %vm457_vm0, %v2881_v0 }
 0x3fd   : > { %9706 = vmatprep.mubr.msk.f32.mxu1 %vm457_vm0, %v12485_v19 }
 0x3fe   : > { %9768 = vmatmul.mubr.msk.f32.gmra.mrb[96].mxu0 %vm457_vm0, %v2882_v8  ;;  %v10602_v8 = vld [vmem:[%s15326_s1 + $0x40] sm:$0xff]  }
 0x3ff   : > { %9770 = vmatprep.mubr.msk.f32.mxu0 %vm457_vm0, %v2883_v46  ;;  %v10603_v46 = vld [vmem:[%s15326_s1 + $0x48] sm:$0xff]   ;;  %9855 = vmatprep.subr.bf16.mxu0 %v10602_v8 }
 0x400   : > { %v12511_v44 = vpop.f32.mrb[68].mxu0  ;;  %9707 = vmatmul.mubr.msk.f32.gmra.mrb[98].mxu1 %vm457_vm0, %v12492_v53  ;;  %9856 = vmatpush3.bf16.msra.mxu0 %v10602_v8 }
 0x401   : > { %v12515_v45 = vpop.f32.mrb[69].mxu0  ;;  %v2887_v42 = vmul.f32 %v12511_v44, %v12511_v44  ;;  %9857 = vmatprep.subr.bf16.mxu0 %v10603_v46 }
 0x402   : > { %v2885_v28 = vmul.f32 %v12515_v45, %v12515_v45  ;;  %v12519_v41 = vpop.f32.mrb[70].mxu0  ;;  %9709 = vmatprep.mubr.msk.f32.mxu1 %vm457_vm0, %v12515_v45  ;;  %9771 = vmatmul.mubr.msk.f32.gmra.mrb[98].mxu0 %vm457_vm0, %v2884_v10 }
 0x403   : > { %v12524_v60 = vpop.f32.mrb[71].mxu0  ;;  %v2888_v25 = vmul.f32 %v12519_v41, %v12519_v41 }
 0x404   : > { %v2886_v13 = vmul.f32 %v12524_v60, %v12524_v60  ;;  %9710 = vmatmul.mubr.msk.f32.gmra.mrb[100].mxu1 %vm457_vm0, %v12524_v60  ;;  %9773 = vmatprep.mubr.msk.f32.mxu0 %vm457_vm0, %v2885_v28 }
 0x405   : > { %9712 = vmatprep.mubr.msk.f32.mxu1 %vm457_vm0, %v12511_v44  ;;  %9858 = vmatpush3.bf16.msra.mxu0 %v10603_v46  ;;  %v12674_v46 = vld [vmem:[%s11270_s20 + $0x40] sm:$0xff]  }
 0x406   : > { %9774 = vmatmul.mubr.msk.f32.gmra.mrb[100].mxu0 %vm457_vm0, %v2886_v13  ;;  %15608 = vst [vmem:[#allocation19_spill] sm:$0xff] %v12674_v46  ;;  %v12694_v46 = vld [vmem:[%s11270_s20 + $0x50] sm:$0xff]  }
 0x407   : > { %9776 = vmatprep.mubr.msk.f32.mxu0 %vm457_vm0, %v2887_v42  ;;  %15610 = vst [vmem:[#allocation30_spill] sm:$0xff] %v12694_v46 }
 0x408   : > { %v12539_v63 = vpop.f32.mrb[72].mxu0  ;;  %9713 = vmatmul.mubr.msk.f32.gmra.mrb[102].mxu1 %vm457_vm0, %v12519_v41 }
 0x409   : > { %15598 = vst [vmem:[#allocation27_spill] sm:$0xff] %v12539_v63  ;;  %v12543_v38 = vpop.f32.mrb[73].mxu0  ;;  %v2891_v7 = vmul.f32 %v12539_v63, %v12539_v63 }
 0x40a   : > { %v2889_v15 = vmul.f32 %v12543_v38, %v12543_v38  ;;  %v12547_v30 = vpop.f32.mrb[74].mxu0  ;;  %9715 = vmatprep.mubr.msk.f32.mxu1 %vm457_vm0, %v12543_v38  ;;  %9777 = vmatmul.mubr.msk.f32.gmra.mrb[102].mxu0 %vm457_vm0, %v2888_v25  ;;  %v12617_v25 = vld [vmem:[%s11270_s20] sm:$0xff]  }
 0x40b   : > { %15599 = vst [vmem:[#allocation14_spill] sm:$0xff] %v12547_v30  ;;  %v12552_v33 = vpop.f32.mrb[75].mxu0  ;;  %v2892_v16 = vmul.f32 %v12547_v30, %v12547_v30 }
 0x40c   : > { %v2890_v2 = vmul.f32 %v12552_v33, %v12552_v33  ;;  %9716 = vmatmul.mubr.msk.f32.gmra.mrb[104].mxu1 %vm457_vm0, %v12552_v33  ;;  %9779 = vmatprep.mubr.msk.f32.mxu0 %vm457_vm0, %v2889_v15 }
 0x40d   : > { %9718 = vmatprep.mubr.msk.f32.mxu1 %vm457_vm0, %v12539_v63  ;;  %v12724_v63 = vld [vmem:[%s11270_s20 + $0x60] sm:$0xff]  }
 0x40e   : > { %9780 = vmatmul.mubr.msk.f32.gmra.mrb[104].mxu0 %vm457_vm0, %v2890_v2 }
 0x40f   : > { %9782 = vmatprep.mubr.msk.f32.mxu0 %vm457_vm0, %v2891_v7 }
 0x410   : > { %v12567_v56 = vpop.f32.mrb[76].mxu0  ;;  %9719 = vmatmul.mubr.msk.f32.gmra.mrb[106].mxu1 %vm457_vm0, %v12547_v30  ;;  %v12730_v30 = vld [vmem:[%s15330_s5 + $0x1] ss:$0 sm:$0xff] }
 0x411   : > { %15600 = vst [vmem:[#allocation15_spill] sm:$0xff] %v12567_v56  ;;  %v12571_v27 = vpop.f32.mrb[77].mxu0  ;;  %v2895_v34 = vmul.f32 %v12567_v56, %v12567_v56 }
 0x412   : > { %15601 = vst [vmem:[#allocation26_spill] sm:$0xff] %v12571_v27  ;;  %v2893_v29 = vmul.f32 %v12571_v27, %v12571_v27  ;;  %v12575_v31 = vpop.f32.mrb[78].mxu0  ;;  %9721 = vmatprep.mubr.msk.f32.mxu1 %vm457_vm0, %v12571_v27  ;;  %9783 = vmatmul.mubr.msk.f32.gmra.mrb[106].mxu0 %vm457_vm0, %v2892_v16 }
 0x413   : > { %15602 = vst [vmem:[#allocation16_spill] sm:$0xff] %v12575_v31  ;;  %v12580_v52 = vpop.f32.mrb[79].mxu0  ;;  %v2896_v54 = vmul.f32 %v12575_v31, %v12575_v31 }
 0x414   : > { %15603 = vst [vmem:[#allocation13_spill] sm:$0xff] %v12580_v52  ;;  %v2894_v9 = vmul.f32 %v12580_v52, %v12580_v52  ;;  %9722 = vmatmul.mubr.msk.f32.gmra.mrb[108].mxu1 %vm457_vm0, %v12580_v52  ;;  %9785 = vmatprep.mubr.msk.f32.mxu0 %vm457_vm0, %v2893_v29  ;;  %v12642_v29 = vld [vmem:[%s11270_s20 + $0x10] sm:$0xff]  }
 0x415   : > { %9724 = vmatprep.mubr.msk.f32.mxu1 %vm457_vm0, %v12567_v56 }
 0x416   : > { %9786 = vmatmul.mubr.msk.f32.gmra.mrb[108].mxu0 %vm457_vm0, %v2894_v9  ;;  %v12624_v9 = vld [vmem:[%s11270_s20 + $0x8] sm:$0xff]  }
 0x417   : > { %9788 = vmatprep.mubr.msk.f32.mxu0 %vm457_vm0, %v2895_v34  ;;  %v12652_v34 = vld [vmem:[%s11270_s20 + $0x20] sm:$0xff]  }
 0x418   : > { %9725 = vmatmul.mubr.msk.f32.gmra.mrb[110].mxu1 %vm457_vm0, %v12575_v31  ;;  %15604 = vst [vmem:[#allocation22_spill] sm:$0xff] %v12652_v34  ;;  %v12701_v31 = vld [vmem:[%s11270_s20 + $0x58] sm:$0xff]  }
 0x419   : > { %15611 = vst [vmem:[#allocation21_spill] sm:$0xff] %v12701_v31 }
 0x41a   : > { %9789 = vmatmul.mubr.msk.f32.gmra.mrb[110].mxu0 %vm457_vm0, %v2896_v54 }
 0x49f   : > { %v9681_v18 = vpop.f32.mrb[80].mxu1 }
 0x4a0   : > { %v12598_v36 = vmul.f32 0.03125, %v9681_v18  ;;  %v2674_v5 = vpop.f32.mrb[81].mxu1 }
 0x4a1   : > { %v12600_v12 = vmul.f32 0.03125, %v2674_v5  ;;  %v9745_v35 = vpop.f32.mrb[80].mxu0 }
 0x4a2   : > { %v3251_v3 = vmul.f32 %v12598_v36, %v12598_v36  ;;  %v3219_v59 = vmul.f32 0.03125, %v9745_v35  ;;  %v3059_v0 = vpop.f32.mrb[81].mxu0 }
 0x4a3   : > { %v3250_v10 = vmul.f32 %v12600_v12, %v12600_v12  ;;  %v3218_v13 = vmul.f32 0.03125, %v3059_v0  ;;  %v9684_v42 = vpop.f32.mrb[82].mxu1 }
 0x4a4   : > { %v3283_v2 = vsub.f32 %v3219_v59, %v3251_v3  ;;  %v12620_v7 = vmul.f32 0.03125, %v9684_v42  ;;  %v2684_v16 = vpop.f32.mrb[83].mxu1 }
 0x4a5   : > { %v3282_v54 = vsub.f32 %v3218_v13, %v3250_v10  ;;  %v12627_v18 = vmul.f32 0.03125, %v2684_v16  ;;  %v9748_v5 = vpop.f32.mrb[82].mxu0  ;;  %v10604_v10 = vld [vmem:[%s15326_s1 + $0x50] sm:$0xff]  }
 0x4a6   : > { %v3315_v35 = vmax.f32 %v3283_v2, 0.0  ;;  %v3253_v3 = vmul.f32 %v12620_v7, %v12620_v7  ;;  %v3221_v0 = vmul.f32 0.03125, %v9748_v5  ;;  %v3069_v42 = vpop.f32.mrb[83].mxu0  ;;  %9859 = vmatprep.subr.bf16.mxu0 %v10604_v10 }
 0x4a7   : > { %v3314_v13 = vmax.f32 %v3282_v54, 0.0  ;;  %v3252_v8 = vmul.f32 %v12627_v18, %v12627_v18  ;;  %v3220_v16 = vmul.f32 0.03125, %v3069_v42  ;;  %v12647_v54 = vld [vmem:[%s11270_s20 + $0x18] sm:$0xff]   ;;  %9860 = vmatpush3.bf16.msra.mxu0 %v10604_v10 }
 0x4a8   : > { %v3379_v15 = vadd.f32 1e-05, %v3315_v35  ;;  %v3285_v59 = vsub.f32 %v3221_v0, %v3253_v3  ;;  %v12657_v0 = vld [vmem:[%s11270_s20 + $0x28] sm:$0xff]   ;;  %v12667_v42 = vld [vmem:[%s11270_s20 + $0x38] sm:$0xff]  }
 0x4a9   : > { %v3378_v24 = vadd.f32 1e-05, %v3314_v13  ;;  %v3284_v47 = vsub.f32 %v3220_v16, %v3252_v8  ;;  %15605 = vst [vmem:[#allocation29_spill] sm:$0xff] %v12657_v0  ;;  %v12662_v8 = vld [vmem:[%s11270_s20 + $0x30] sm:$0xff]   ;;  %15607 = vst [vmem:[#allocation31_spill] sm:$0xff] %v12667_v42  ;;  %v12685_v3 = vld [vmem:[%s11270_s20 + $0x48] sm:$0xff]  }
 0x4aa   : > { %10758 = vrsqrt.f32 %v3379_v15  ;;  %v3317_v35 = vmax.f32 %v3285_v59, 0.0  ;;  %15606 = vst [vmem:[#allocation23_spill] sm:$0xff] %v12662_v8  ;;  %15609 = vst [vmem:[#allocation20_spill] sm:$0xff] %v12685_v3  ;;  %v12713_v16 = vld [vmem:[%s15329_s4 + $0x1] ss:$0 sm:$0xff] }
 0x4ab   : > { %10760 = vrsqrt.f32 %v3378_v24  ;;  %v3316_v13 = vmax.f32 %v3284_v47, 0.0 }
 0x4ac   : > { %v3381_v15 = vadd.f32 1e-05, %v3317_v35  ;;  %v9687_v59 = vpop.f32.mrb[84].mxu1 }
 0x4ad   : > { %v3380_v43 = vadd.f32 1e-05, %v3316_v13  ;;  %v12671_v24 = vmul.f32 0.03125, %v9687_v59  ;;  %v2694_v47 = vpop.f32.mrb[85].mxu1 }
 0x4ae   : > { %10762 = vrsqrt.f32 %v3381_v15  ;;  %v12678_v35 = vmul.f32 0.03125, %v2694_v47  ;;  %v9751_v2 = vpop.f32.mrb[84].mxu0 }
 0x4af   : > { %10764 = vrsqrt.f32 %v3380_v43  ;;  %v3255_v28 = vmul.f32 %v12671_v24, %v12671_v24  ;;  %v3223_v10 = vmul.f32 0.03125, %v9751_v2  ;;  %v3079_v59 = vpop.f32.mrb[85].mxu0 }
 0x4b0   : > { %v3254_v15 = vmul.f32 %v12678_v35, %v12678_v35  ;;  %v3222_v43 = vmul.f32 0.03125, %v3079_v59  ;;  %v9690_v5 = vpop.f32.mrb[86].mxu1 }
 0x4b1   : > { %v3287_v2 = vsub.f32 %v3223_v10, %v3255_v28  ;;  %v12697_v42 = vmul.f32 0.03125, %v9690_v5  ;;  %v2704_v56 = vpop.f32.mrb[87].mxu1 }
 0x4b2   : > { %v3286_v27 = vsub.f32 %v3222_v43, %v3254_v15  ;;  %v12704_v47 = vmul.f32 0.03125, %v2704_v56  ;;  %v9754_v59 = vpop.f32.mrb[86].mxu0 }
 0x4b3   : > { %v3319_v52 = vmax.f32 %v3287_v2, 0.0  ;;  %v3257_v11 = vmul.f32 %v12697_v42, %v12697_v42  ;;  %v3225_v5 = vmul.f32 0.03125, %v9754_v59  ;;  %v3089_v10 = vpop.f32.mrb[87].mxu0  ;;  %v15612_v59 = vsub.f32 %v12376_v21, %v12598_v36 }
 0x4b4   : > { %v10759_v13 = vpop.eup %10758  ;;  %v3318_v15 = vmax.f32 %v3286_v27, 0.0  ;;  %v3256_v56 = vmul.f32 %v12704_v47, %v12704_v47  ;;  %v3224_v2 = vmul.f32 0.03125, %v3089_v10  ;;  %v15613_v10 = vsub.f32 %v12368_v20, %v12600_v12 }
 0x4b5   : > { %v10761_v8 = vpop.eup %10760  ;;  %v3443_v46 = vmul.f32 %v10759_v13, %v15612_v59  ;;  %v3383_v3 = vadd.f32 1e-05, %v3319_v52  ;;  %v3289_v0 = vsub.f32 %v3225_v5, %v3257_v11  ;;  %v12738_v13 = vld [vmem:[%s11270_s20 + $0x68] sm:$0xff]  }
 0x4b6   : > { %v3442_v43 = vmul.f32 %v10761_v8, %v15613_v10  ;;  %v3382_v28 = vadd.f32 1e-05, %v3318_v15  ;;  %v3288_v31 = vsub.f32 %v3224_v2, %v3256_v56  ;;  %15614 = vst [vmem:[#allocation18_spill] sm:$0xff] %v12738_v13  ;;  %v15615_v8 = vsub.f32 %v12372_v17, %v12620_v7 }
 0x4b7   : > { %v3483_v52 = vmul.f32 %v12713_v16, %v3443_v46  ;;  %10766 = vrsqrt.f32 %v3383_v3  ;;  %v3321_v11 = vmax.f32 %v3289_v0, 0.0  ;;  %v15616_v56 = vsub.f32 %v12366_v40, %v12627_v18 }
 0x4b8   : > { %v10763_v36 = vpop.eup %10762  ;;  %10768 = vrsqrt.f32 %v3382_v28  ;;  %v3320_v59 = vmax.f32 %v3288_v31, 0.0  ;;  %v3482_v34 = vmul.f32 %v12713_v16, %v3442_v43 }
 0x4b9   : > { %v10765_v20 = vpop.eup %10764  ;;  %v3523_v12 = vadd.f32 %v12730_v30, %v3483_v52  ;;  %v3445_v15 = vmul.f32 %v10763_v36, %v15615_v8  ;;  %v3385_v46 = vadd.f32 1e-05, %v3321_v11  ;;  %v15617_v8 = vunpack.c.l.bf16 %v12617_v25 }
 0x4ba   : > { %v9693_v27 = vpop.f32.mrb[88].mxu1  ;;  %v3444_v2 = vmul.f32 %v10765_v20, %v15616_v56  ;;  %v3384_v28 = vadd.f32 1e-05, %v3320_v59  ;;  %v3522_v43 = vadd.f32 %v12730_v30, %v3482_v34 }
 0x4bb   : > { %v12746_v3 = vmul.f32 0.03125, %v9693_v27  ;;  %v2714_v0 = vpop.f32.mrb[89].mxu1  ;;  %10770 = vrsqrt.f32 %v3385_v46 }
 0x4bc   : > { %v12751_v31 = vmul.f32 0.03125, %v2714_v0  ;;  %v9757_v10 = vpop.f32.mrb[88].mxu0  ;;  %10772 = vrsqrt.f32 %v3384_v28  ;;  %v12766_v46 = vadd.f32 %v15617_v8, %v3522_v43  ;;  %v15619_v0 = vunpack.c.h.bf16 %v12617_v25 }
 0x4bd   : > { %v3259_v52 = vmul.f32 %v12746_v3, %v12746_v3  ;;  %v3227_v7 = vmul.f32 0.03125, %v9757_v10  ;;  %v3099_v27 = vpop.f32.mrb[89].mxu0  ;;  %v3484_v21 = vmul.f32 %v12713_v16, %v3444_v2 }
 0x4be   : > { %v3258_v40 = vmul.f32 %v12751_v31, %v12751_v31  ;;  %v3226_v11 = vmul.f32 0.03125, %v3099_v27  ;;  %v9696_v36 = vpop.f32.mrb[90].mxu1  ;;  %15618 = vst [vmem:[#allocation32_spill] sm:$0xff] %v12766_v46  ;;  %v12770_v56 = vadd.f32 %v15619_v0, %v3523_v12  ;;  %v3485_v27 = vmul.f32 %v12713_v16, %v3445_v15 }
 0x4bf   : > { %v3291_v59 = vsub.f32 %v3227_v7, %v3259_v52  ;;  %v12762_v34 = vmul.f32 0.03125, %v9696_v36  ;;  %v2724_v20 = vpop.f32.mrb[91].mxu1  ;;  %v3524_v13 = vadd.f32 %v12730_v30, %v3484_v21 }
 0x4c0   : > { %v3290_v28 = vsub.f32 %v3226_v11, %v3258_v40  ;;  %v12772_v10 = vmul.f32 0.03125, %v2724_v20  ;;  %v9760_v5 = vpop.f32.mrb[90].mxu0  ;;  %v3619_v0 = vmul.f32 %v12770_v56, %v12770_v56 }
 0x4c1   : > { %v3323_v52 = vmax.f32 %v3291_v59, 0.0  ;;  %v3261_v7 = vmul.f32 %v12762_v34, %v12762_v34  ;;  %v3229_v36 = vmul.f32 0.03125, %v9760_v5  ;;  %v3109_v8 = vpop.f32.mrb[91].mxu0  ;;  %v10767_v2 = vpop.eup %10766  ;;  %v3618_v59 = vmul.f32 %v12766_v46, %v12766_v46 }
 0x4c2   : > { %v3322_v25 = vmax.f32 %v3290_v28, 0.0  ;;  %v3260_v12 = vmul.f32 %v12772_v10, %v12772_v10  ;;  %v3228_v11 = vmul.f32 0.03125, %v3109_v8  ;;  %v10769_v43 = vpop.eup %10768  ;;  %v15620_v5 = vsub.f32 %v12410_v57, %v12671_v24 }
 0x4c3   : > { %v3387_v20 = vadd.f32 1e-05, %v3323_v52  ;;  %v3293_v15 = vsub.f32 %v3229_v36, %v3261_v7  ;;  %v15621_v8 = vsub.f32 %v12401_v61, %v12678_v35  ;;  %9807 = vmatprep.mubr.msk.f32.mxu1 %vm457_vm0, %v3618_v59  ;;  %v3525_v36 = vadd.f32 %v12730_v30, %v3485_v27 }
 0x4c4   : > { %v3447_v28 = vmul.f32 %v10767_v2, %v15620_v5  ;;  %v3386_v18 = vadd.f32 1e-05, %v3322_v25  ;;  %v3292_v17 = vsub.f32 %v3228_v11, %v3260_v12  ;;  %9808 = vmatmul.mubr.msk.f32.vlgmr.msra.gmra.mrb[112].mxu1 %vm457_vm0, %v3619_v0  ;;  %v15622_v57 = vunpack.c.l.bf16 %v12624_v9 }
 0x4c5   : > { %v3446_v52 = vmul.f32 %v10769_v43, %v15621_v8  ;;  %10774 = vrsqrt.f32 %v3387_v20  ;;  %v3325_v7 = vmax.f32 %v3293_v15, 0.0  ;;  %v9699_v46 = vpop.f32.mrb[92].mxu1  ;;  %v10771_v25 = vpop.eup %10770  ;;  %v15623_v12 = vunpack.c.h.bf16 %v12624_v9  ;;  %10458 = vmatpush3.bf16.msra.mxu1 %v15579_v4 }
 0x4c6   : > { %10776 = vrsqrt.f32 %v3386_v18  ;;  %v3324_v40 = vmax.f32 %v3292_v17, 0.0  ;;  %v12800_v24 = vadd.f32 %v15622_v57, %v3524_v13  ;;  %v3487_v21 = vmul.f32 %v12713_v16, %v3447_v28  ;;  %v2734_v43 = vpop.f32.mrb[93].mxu1  ;;  %v10773_v18 = vpop.eup %10772  ;;  %10460 = vmatprep.subr.bf16.mxu1 %v15585_v22 }
 0x4c7   : > { %v3389_v61 = vadd.f32 1e-05, %v3325_v7  ;;  %v12803_v35 = vmul.f32 0.03125, %v9699_v46  ;;  %v12807_v11 = vadd.f32 %v15623_v12, %v3525_v36  ;;  %v3486_v17 = vmul.f32 %v12713_v16, %v3446_v52  ;;  %v9763_v46 = vpop.f32.mrb[92].mxu0 }
 0x4c8   : > { %v15624_v13 = vsub.f32 %v12406_v62, %v12697_v42  ;;  %v3388_v2 = vadd.f32 1e-05, %v3324_v40  ;;  %v12816_v20 = vmul.f32 0.03125, %v2734_v43  ;;  %v3620_v15 = vmul.f32 %v12800_v24, %v12800_v24  ;;  %v3119_v42 = vpop.f32.mrb[93].mxu0 }
 0x4c9   : > { %v15625_v9 = vsub.f32 %v12398_v26, %v12704_v47  ;;  %10778 = vrsqrt.f32 %v3389_v61  ;;  %v3263_v0 = vmul.f32 %v12803_v35, %v12803_v35  ;;  %v3359_v62 = vsub.f32 %v12468_v14, %v12803_v35  ;;  %v9702_v8 = vpop.f32.mrb[94].mxu1  ;;  %10462 = vmatpush3.bf16.msra.mxu1 %v15585_v22 }
 0x4ca   : > { %v12814_v27 = vmul.f32 %v10771_v25, %v15624_v13  ;;  %10780 = vrsqrt.f32 %v3388_v2  ;;  %v3262_v40 = vmul.f32 %v12816_v20, %v12816_v20  ;;  %v3231_v28 = vmul.f32 0.03125, %v9763_v46  ;;  %9810 = vmatprep.mubr.msk.f32.mxu1 %vm457_vm0, %v3620_v15  ;;  %v2744_v52 = vpop.f32.mrb[95].mxu1  ;;  %10464 = vmatprep.subr.bf16.mxu1 %v15587_v39 }
 0x4cb   : > { %v3448_v59 = vmul.f32 %v10773_v18, %v15625_v9  ;;  %v3230_v26 = vmul.f32 0.03125, %v3119_v42  ;;  %v12833_v47 = vmul.f32 0.03125, %v9702_v8  ;;  %v3621_v7 = vmul.f32 %v12807_v11, %v12807_v11  ;;  %v9766_v61 = vpop.f32.mrb[94].mxu0 }
 0x4cc   : > { %v3526_v36 = vadd.f32 %v12730_v30, %v3486_v17  ;;  %v3295_v57 = vsub.f32 %v3231_v28, %v3263_v0  ;;  %v12839_v25 = vmul.f32 0.03125, %v2744_v52  ;;  %v3527_v43 = vadd.f32 %v12730_v30, %v3487_v21  ;;  %v3129_v46 = vpop.f32.mrb[95].mxu0 }
 0x4cd   : > { %v3488_v12 = vmul.f32 %v12713_v16, %v3448_v59  ;;  %v3294_v18 = vsub.f32 %v3230_v26, %v3262_v40  ;;  %v3265_v13 = vmul.f32 %v12833_v47, %v12833_v47  ;;  %v3233_v17 = vmul.f32 0.03125, %v9766_v61  ;;  %9811 = vmatmul.mubr.msk.f32.gmra.mrb[114].mxu1 %vm457_vm0, %v3621_v7 }
 0x4ce   : > { %v3327_v15 = vmax.f32 %v3295_v57, 0.0  ;;  %v3264_v9 = vmul.f32 %v12839_v25, %v12839_v25  ;;  %v3232_v59 = vmul.f32 0.03125, %v3129_v46  ;;  %v15626_v28 = vunpack.c.l.bf16 %v12642_v29  ;;  %10466 = vmatpush3.bf16.msra.mxu1 %v15587_v39 }
 0x4cf   : > { %v10775_v0 = vpop.eup %10774  ;;  %v3326_v42 = vmax.f32 %v3294_v18, 0.0  ;;  %v3297_v40 = vsub.f32 %v3233_v17, %v3265_v13  ;;  %v15628_v26 = vunpack.c.h.bf16 %v12642_v29  ;;  %v15629_v57 = vsub.f32 %v12440_v55, %v12746_v3  ;;  %v9705_v18 = vpop.f32.mrb[96].mxu1  ;;  %10468 = vmatprep.subr.bf16.mxu1 %v15590_v1 }
 0x4d0   : > { %v12855_v8 = vadd.f32 %v15626_v28, %v3526_v36  ;;  %v10777_v7 = vpop.eup %10776  ;;  %v3391_v46 = vadd.f32 1e-05, %v3327_v15  ;;  %v3296_v21 = vsub.f32 %v3232_v59, %v3264_v9  ;;  %v3528_v13 = vadd.f32 %v12730_v30, %v3488_v12 }
 0x4d1   : > { %v12859_v52 = vadd.f32 %v15628_v26, %v3527_v43  ;;  %v12865_v61 = vmul.f32 %v10775_v0, %v15629_v57  ;;  %v15630_v29 = vsub.f32 %v12432_v49, %v12751_v31  ;;  %v3390_v43 = vadd.f32 1e-05, %v3326_v42  ;;  %v2754_v26 = vpop.f32.mrb[97].mxu1  ;;  %v9769_v15 = vpop.f32.mrb[96].mxu0 }
 0x4d2   : > { %15627 = vst [vmem:[#allocation28_spill] sm:$0xff] %v12855_v8  ;;  %v3329_v17 = vmax.f32 %v3297_v40, 0.0  ;;  %v12874_v28 = vmul.f32 0.03125, %v9705_v18  ;;  %10782 = vrsqrt.f32 %v3391_v46  ;;  %v3328_v55 = vmax.f32 %v3296_v21, 0.0  ;;  %v3139_v0 = vpop.f32.mrb[97].mxu0  ;;  %10470 = vmatpush3.bf16.msra.mxu1 %v15590_v1 }
 0x4d3   : > { %v12872_v36 = vmul.f32 %v10777_v7, %v15630_v29  ;;  %v12876_v3 = vmul.f32 0.03125, %v2754_v26  ;;  %v3622_v12 = vmul.f32 %v12855_v8, %v12855_v8  ;;  %v10779_v9 = vpop.eup %10778  ;;  %10784 = vrsqrt.f32 %v3390_v43  ;;  %v9708_v18 = vpop.f32.mrb[98].mxu1  ;;  %10488 = vmatprep.subr.bf16.mxu1 %v15594_v32 }
 0x4d4   : > { %v3393_v59 = vadd.f32 1e-05, %v3329_v17  ;;  %v3267_v49 = vmul.f32 %v12874_v28, %v12874_v28  ;;  %v10781_v42 = vpop.eup %10780  ;;  %v15631_v21 = vsub.f32 %v12436_v23, %v12762_v34  ;;  %v3392_v7 = vadd.f32 1e-05, %v3328_v55  ;;  %v2764_v17 = vpop.f32.mrb[99].mxu1 }
 0x4d5   : > { %v3266_v57 = vmul.f32 %v12876_v3, %v12876_v3  ;;  %9813 = vmatprep.mubr.msk.f32.mxu1 %vm457_vm0, %v3622_v12  ;;  %v15632_v29 = vsub.f32 %v12430_v51, %v12772_v10  ;;  %v3235_v23 = vmul.f32 0.03125, %v9769_v15  ;;  %v3234_v34 = vmul.f32 0.03125, %v3139_v0 }
 0x4d6   : > { %v12888_v40 = vmul.f32 %v10779_v9, %v15631_v21  ;;  %10786 = vrsqrt.f32 %v3393_v59  ;;  %v12901_v26 = vmul.f32 0.03125, %v9708_v18  ;;  %v12903_v55 = vmul.f32 0.03125, %v2764_v17  ;;  %v9772_v9 = vpop.f32.mrb[98].mxu0 }
 0x4d7   : > { %v12899_v43 = vmul.f32 %v10781_v42, %v15632_v29  ;;  %10788 = vrsqrt.f32 %v3392_v7  ;;  %v3623_v12 = vmul.f32 %v12859_v52, %v12859_v52  ;;  %v3299_v21 = vsub.f32 %v3235_v23, %v3267_v49  ;;  %v3149_v2 = vpop.f32.mrb[99].mxu0  ;;  %v9711_v49 = vpop.f32.mrb[100].mxu1 }
 0x4d8   : > { %v3298_v46 = vsub.f32 %v3234_v34, %v3266_v57  ;;  %v3237_v31 = vmul.f32 0.03125, %v9772_v9  ;;  %v15633_v51 = vunpack.c.l.bf16 %v12647_v54  ;;  %v3269_v15 = vmul.f32 %v12901_v26, %v12901_v26  ;;  %v2774_v29 = vpop.f32.mrb[101].mxu1 }
 0x4d9   : > { %v3268_v0 = vmul.f32 %v12903_v55, %v12903_v55  ;;  %9814 = vmatmul.mubr.msk.f32.gmra.mrb[116].mxu1 %vm457_vm0, %v3623_v12  ;;  %v3331_v7 = vmax.f32 %v3299_v21, 0.0  ;;  %v3236_v18 = vmul.f32 0.03125, %v3149_v2  ;;  %v12922_v34 = vmul.f32 0.03125, %v2774_v29  ;;  %v9775_v17 = vpop.f32.mrb[100].mxu0 }
 0x4da   : > { %v12909_v10 = vadd.f32 %v15633_v51, %v3528_v13  ;;  %v3330_v57 = vmax.f32 %v3298_v46, 0.0  ;;  %v12920_v13 = vmul.f32 0.03125, %v9711_v49  ;;  %v3301_v23 = vsub.f32 %v3237_v31, %v3269_v15  ;;  %v3159_v2 = vpop.f32.mrb[101].mxu0 }
 0x4db   : > { %v3489_v51 = vmul.f32 %v12713_v16, %v12814_v27  ;;  %v3395_v42 = vadd.f32 1e-05, %v3331_v7  ;;  %v3300_v5 = vsub.f32 %v3236_v18, %v3268_v0  ;;  %v3270_v15 = vmul.f32 %v12922_v34, %v12922_v34  ;;  %v9714_v29 = vpop.f32.mrb[102].mxu1 }
 0x4dc   : > { %15634 = vst [vmem:[#allocation33_spill] sm:$0xff] %v12909_v10  ;;  %v3624_v9 = vmul.f32 %v12909_v10, %v12909_v10  ;;  %v3394_v59 = vadd.f32 1e-05, %v3330_v57  ;;  %v3271_v46 = vmul.f32 %v12920_v13, %v12920_v13  ;;  %v10783_v12 = vpop.eup %10782  ;;  %v3333_v21 = vmax.f32 %v3301_v23, 0.0  ;;  %v2784_v18 = vpop.f32.mrb[103].mxu1 }
 0x4dd   : > { %v10785_v27 = vpop.eup %10784  ;;  %v12940_v0 = vmul.f32 %v10783_v12, %v3359_v62  ;;  %10790 = vrsqrt.f32 %v3395_v42  ;;  %v3332_v7 = vmax.f32 %v3300_v5, 0.0  ;;  %v3239_v57 = vmul.f32 0.03125, %v9775_v17  ;;  %v9778_v10 = vpop.f32.mrb[102].mxu0 }
 0x4de   : > { %9816 = vmatprep.mubr.msk.f32.mxu1 %vm457_vm0, %v3624_v9  ;;  %v15635_v23 = vsub.f32 %v12460_v37, %v12816_v20  ;;  %10792 = vrsqrt.f32 %v3394_v59  ;;  %v3397_v49 = vadd.f32 1e-05, %v3333_v21  ;;  %v3238_v32 = vmul.f32 0.03125, %v3159_v2  ;;  %v3169_v35 = vpop.f32.mrb[103].mxu0 }
 0x4df   : > { %v3396_v1 = vadd.f32 1e-05, %v3332_v7  ;;  %v3303_v8 = vsub.f32 %v3239_v57, %v3271_v46  ;;  %v12947_v39 = vmul.f32 0.03125, %v9714_v29  ;;  %v12949_v14 = vmul.f32 0.03125, %v2784_v18  ;;  %v9717_v59 = vpop.f32.mrb[104].mxu1 }
 0x4e0   : > { %v12945_v31 = vmul.f32 %v10785_v27, %v15635_v23  ;;  %v10787_v9 = vpop.eup %10786  ;;  %v15636_v5 = vsub.f32 %v12464_v6, %v12833_v47  ;;  %10794 = vrsqrt.f32 %v3397_v49  ;;  %v3302_v37 = vsub.f32 %v3238_v32, %v3270_v15  ;;  %v2794_v21 = vpop.f32.mrb[105].mxu1  ;;  %v15650_v6 = vld [vmem:[#allocation29_spill] sm:$0xff] }
 0x4e1   : > { %v10789_v62 = vpop.eup %10788  ;;  %v3241_v20 = vmul.f32 0.03125, %v9778_v10  ;;  %v15637_v17 = vsub.f32 %v12458_v48, %v12839_v25  ;;  %10796 = vrsqrt.f32 %v3396_v1  ;;  %v3335_v46 = vmax.f32 %v3303_v8, 0.0  ;;  %v9781_v10 = vpop.f32.mrb[104].mxu0 }
 0x4e2   : > { %v12954_v42 = vmul.f32 %v10787_v9, %v15636_v5  ;;  %v3273_v12 = vmul.f32 %v12947_v39, %v12947_v39  ;;  %v3334_v29 = vmax.f32 %v3302_v37, 0.0  ;;  %v3272_v32 = vmul.f32 %v12949_v14, %v12949_v14  ;;  %v3179_v15 = vpop.f32.mrb[105].mxu0 }
 0x4e3   : > { %v12959_v2 = vmul.f32 %v10789_v62, %v15637_v17  ;;  %v3399_v48 = vadd.f32 1e-05, %v3335_v46  ;;  %v3529_v1 = vadd.f32 %v12730_v30, %v3489_v51  ;;  %v3240_v8 = vmul.f32 0.03125, %v3169_v35  ;;  %v9720_v18 = vpop.f32.mrb[106].mxu1 }
 0x4e4   : > { %v3305_v25 = vsub.f32 %v3241_v20, %v3273_v12  ;;  %v3398_v49 = vadd.f32 1e-05, %v3334_v29  ;;  %v12970_v27 = vmul.f32 0.03125, %v9717_v59  ;;  %v12972_v7 = vmul.f32 0.03125, %v2794_v21  ;;  %v2804_v37 = vpop.f32.mrb[107].mxu1 }
 0x4e5   : > { %v3490_v57 = vmul.f32 %v12713_v16, %v12872_v36  ;;  %10798 = vrsqrt.f32 %v3399_v48  ;;  %v15638_v9 = vunpack.c.h.bf16 %v12647_v54  ;;  %v3304_v5 = vsub.f32 %v3240_v8, %v3272_v32  ;;  %v9784_v36 = vpop.f32.mrb[106].mxu0 }
 0x4e6   : > { %v3337_v23 = vmax.f32 %v3305_v25, 0.0  ;;  %10800 = vrsqrt.f32 %v3398_v49  ;;  %v3275_v51 = vmul.f32 %v12970_v27, %v12970_v27  ;;  %v3274_v20 = vmul.f32 %v12972_v7, %v12972_v7  ;;  %v3189_v21 = vpop.f32.mrb[107].mxu0 }
 0x4e7   : > { %v12978_v62 = vadd.f32 %v15638_v9, %v3529_v1  ;;  %v10791_v59 = vpop.eup %10790  ;;  %v3336_v46 = vmax.f32 %v3304_v5, 0.0  ;;  %v15639_v32 = vsub.f32 %v12496_v58, %v12874_v28  ;;  %v3530_v25 = vadd.f32 %v12730_v30, %v3490_v57  ;;  %v9723_v49 = vpop.f32.mrb[108].mxu1 }
 0x4e8   : > { %v3401_v17 = vadd.f32 1e-05, %v3337_v23  ;;  %v10793_v29 = vpop.eup %10792  ;;  %v3243_v1 = vmul.f32 0.03125, %v9781_v10  ;;  %v3491_v8 = vmul.f32 %v12713_v16, %v12865_v61  ;;  %v15640_v23 = vsub.f32 %v12488_v50, %v12876_v3  ;;  %v2814_v58 = vpop.f32.mrb[109].mxu1 }
 0x4e9   : > { %v3625_v54 = vmul.f32 %v12978_v62, %v12978_v62  ;;  %v12993_v48 = vmul.f32 %v10791_v59, %v15639_v32  ;;  %v3400_v5 = vadd.f32 1e-05, %v3336_v46  ;;  %v3242_v12 = vmul.f32 0.03125, %v3179_v15  ;;  %v15641_v59 = vld [vmem:[#allocation22_spill] sm:$0xff]  ;;  %v9787_v47 = vpop.f32.mrb[108].mxu0 }
 0x4ea   : > { %v13001_v9 = vmul.f32 %v10793_v29, %v15640_v23  ;;  %10802 = vrsqrt.f32 %v3401_v17  ;;  %v10795_v28 = vpop.eup %10794  ;;  %v15642_v32 = vunpack.c.l.bf16 %v15641_v59  ;;  %v3307_v10 = vsub.f32 %v3243_v1, %v3275_v51  ;;  %v3199_v46 = vpop.f32.mrb[109].mxu0 }
 0x4eb   : > { %9817 = vmatmul.mubr.msk.f32.gmra.mrb[118].mxu1 %vm457_vm0, %v3625_v54  ;;  %v3531_v61 = vadd.f32 %v12730_v30, %v3491_v8  ;;  %v13009_v35 = vmul.f32 0.03125, %v9720_v18  ;;  %v10797_v50 = vpop.eup %10796  ;;  %v15643_v3 = vsub.f32 %v12492_v53, %v12901_v26  ;;  %10804 = vrsqrt.f32 %v3400_v5  ;;  %v9726_v53 = vpop.f32.mrb[110].mxu1 }
 0x4ec   : > { %v13006_v57 = vadd.f32 %v15642_v32, %v3530_v25  ;;  %v3306_v15 = vsub.f32 %v3242_v12, %v3274_v20  ;;  %v13016_v54 = vmul.f32 0.03125, %v2804_v37  ;;  %v15644_v29 = vsub.f32 %v12485_v19, %v12903_v55  ;;  %v15646_v20 = vld [vmem:[#allocation14_spill] sm:$0xff]  ;;  %v2824_v55 = vpop.f32.mrb[111].mxu1 }
 0x4ed   : > { %v13014_v17 = vmul.f32 %v10795_v28, %v15643_v3  ;;  %v3339_v25 = vmax.f32 %v3307_v10, 0.0  ;;  %v15645_v1 = vunpack.c.h.bf16 %v15641_v59  ;;  %v3277_v37 = vmul.f32 %v13009_v35, %v13009_v35  ;;  %v15647_v28 = vld [vmem:[#allocation27_spill] sm:$0xff]  ;;  %v13042_v10 = vpop.f32.mrb[110].mxu0 }
 0x4ee   : > { %v13021_v51 = vmul.f32 %v10797_v50, %v15644_v29  ;;  %v3626_v18 = vmul.f32 %v13006_v57, %v13006_v57  ;;  %v3338_v26 = vmax.f32 %v3306_v15, 0.0  ;;  %v3276_v19 = vmul.f32 %v13016_v54, %v13016_v54 }
 0x4ef   : > { %v13027_v8 = vadd.f32 %v15645_v1, %v3531_v61  ;;  %v3403_v23 = vadd.f32 1e-05, %v3339_v25  ;;  %v3492_v32 = vmul.f32 %v12713_v16, %v12899_v43  ;;  %v10799_v61 = vpop.eup %10798  ;;  %v3245_v3 = vmul.f32 0.03125, %v9784_v36 }
 0x4f0   : > { %9819 = vmatprep.mubr.msk.f32.mxu1 %vm457_vm0, %v3626_v18  ;;  %v3402_v50 = vadd.f32 1e-05, %v3338_v26  ;;  %v3493_v15 = vmul.f32 %v12713_v16, %v12888_v40  ;;  %v3244_v29 = vmul.f32 0.03125, %v3189_v21  ;;  %v13046_v18 = vpop.f32.mrb[111].mxu0  ;;  %v10801_v25 = vpop.eup %10800  ;;  %v15648_v1 = vsub.f32 %v12524_v60, %v12920_v13 }
 0x4f1   : > { %v3627_v5 = vmul.f32 %v13027_v8, %v13027_v8  ;;  %10806 = vrsqrt.f32 %v3403_v23  ;;  %v3532_v43 = vadd.f32 %v12730_v30, %v3492_v32  ;;  %v13055_v59 = vmul.f32 0.03125, %v9723_v49  ;;  %v15652_v49 = vld [vmem:[#allocation13_spill] sm:$0xff] }
 0x4f2   : > { %v13051_v12 = vmul.f32 %v10799_v61, %v15648_v1  ;;  %v15649_v36 = vsub.f32 %v12515_v45, %v12922_v34  ;;  %10808 = vrsqrt.f32 %v3402_v50  ;;  %v3309_v21 = vsub.f32 %v3245_v3, %v3277_v37 }
 0x4f3   : > { %9820 = vmatmul.mubr.msk.f32.gmra.mrb[120].mxu1 %vm457_vm0, %v3627_v5  ;;  %v3533_v26 = vadd.f32 %v12730_v30, %v3493_v15  ;;  %v15651_v60 = vunpack.c.l.bf16 %v15650_v6  ;;  %v3308_v23 = vsub.f32 %v3244_v29, %v3276_v19  ;;  %v3279_v5 = vmul.f32 %v13055_v59, %v13055_v59 }
 0x4f4   : > { %v13060_v40 = vmul.f32 %v10801_v25, %v15649_v36  ;;  %v3375_v32 = vsub.f32 %v15652_v49, %v13055_v59  ;;  %v10803_v61 = vpop.eup %10802  ;;  %v3341_v1 = vmax.f32 %v3309_v21, 0.0  ;;  %v15653_v45 = vunpack.c.h.bf16 %v15650_v6 }
 0x4f5   : > { %v13065_v13 = vadd.f32 %v15651_v60, %v3532_v43  ;;  %v13075_v37 = vmul.f32 0.03125, %v2814_v58  ;;  %v3494_v50 = vmul.f32 %v12713_v16, %v12945_v31  ;;  %v15654_v19 = vsub.f32 %v12519_v41, %v12947_v39  ;;  %v10805_v43 = vpop.eup %10804  ;;  %v15655_v31 = vld [vmem:[#allocation26_spill] sm:$0xff] }
 0x4f6   : > { %v13073_v34 = vadd.f32 %v15653_v45, %v3533_v26  ;;  %v3340_v29 = vmax.f32 %v3308_v23, 0.0  ;;  %v3247_v25 = vmul.f32 0.03125, %v9787_v47  ;;  %v3405_v36 = vadd.f32 1e-05, %v3341_v1  ;;  %v15657_v45 = vld [vmem:[#allocation23_spill] sm:$0xff] }
 0x4f7   : > { %v13082_v3 = vmul.f32 %v10803_v61, %v15654_v19  ;;  %v3628_v15 = vmul.f32 %v13065_v13, %v13065_v13  ;;  %v3278_v58 = vmul.f32 %v13075_v37, %v13075_v37  ;;  %v3374_v21 = vsub.f32 %v15655_v31, %v13075_v37  ;;  %v15683_v31 = vld [vmem:[#allocation18_spill] sm:$0xff] }
 0x4f8   : > { %v3629_v6 = vmul.f32 %v13073_v34, %v13073_v34  ;;  %v15656_v39 = vsub.f32 %v12511_v44, %v12949_v14  ;;  %v3404_v26 = vadd.f32 1e-05, %v3340_v29  ;;  %v3534_v47 = vadd.f32 %v12730_v30, %v3494_v50 }
 0x4f9   : > { %9822 = vmatprep.mubr.msk.f32.mxu1 %vm457_vm0, %v3628_v15  ;;  %v3311_v60 = vsub.f32 %v3247_v25, %v3279_v5  ;;  %10810 = vrsqrt.f32 %v3405_v36  ;;  %v3495_v23 = vmul.f32 %v12713_v16, %v12940_v0  ;;  %v3246_v61 = vmul.f32 0.03125, %v3199_v46  ;;  %v15659_v25 = vld [vmem:[#allocation16_spill] sm:$0xff] }
 0x4fa   : > { %v13095_v41 = vmul.f32 %v10805_v43, %v15656_v39  ;;  %9823 = vmatmul.mubr.msk.f32.gmra.mrb[122].mxu1 %vm457_vm0, %v3629_v6  ;;  %v13102_v1 = vmul.f32 0.03125, %v9726_v53  ;;  %10812 = vrsqrt.f32 %v3404_v26  ;;  %v15658_v44 = vunpack.c.l.bf16 %v15657_v45 }
 0x4fb   : > { %v3343_v19 = vmax.f32 %v3311_v60, 0.0  ;;  %v13108_v15 = vmul.f32 0.03125, %v2824_v55  ;;  %v3535_v50 = vadd.f32 %v12730_v30, %v3495_v23  ;;  %v3310_v5 = vsub.f32 %v3246_v61, %v3278_v58  ;;  %v10807_v46 = vpop.eup %10806  ;;  %v15660_v55 = vld [vmem:[#allocation15_spill] sm:$0xff] }
 0x4fc   : > { %v13106_v14 = vadd.f32 %v15658_v44, %v3534_v47  ;;  %v3281_v29 = vmul.f32 %v13102_v1, %v13102_v1  ;;  %v3377_v0 = vsub.f32 %v15659_v25, %v13102_v1  ;;  %v10809_v39 = vpop.eup %10808  ;;  %v15661_v58 = vsub.f32 %v12552_v33, %v12970_v27 }
 0x4fd   : > { %v3407_v43 = vadd.f32 1e-05, %v3343_v19  ;;  %v3280_v36 = vmul.f32 %v13108_v15, %v13108_v15  ;;  %v15662_v47 = vunpack.c.h.bf16 %v15657_v45  ;;  %v3342_v23 = vmax.f32 %v3310_v5, 0.0 }
 0x4fe   : > { %v3630_v53 = vmul.f32 %v13106_v14, %v13106_v14  ;;  %v3467_v26 = vmul.f32 %v10807_v46, %v15661_v58  ;;  %v3496_v61 = vmul.f32 %v12713_v16, %v12959_v2  ;;  %v15663_v44 = vsub.f32 %v12543_v38, %v12972_v7 }
 0x4ff   : > { %v13126_v60 = vadd.f32 %v15662_v47, %v3535_v50  ;;  %10814 = vrsqrt.f32 %v3407_v43  ;;  %v3249_v6 = vmul.f32 0.03125, %v13042_v10  ;;  %v3497_v33 = vmul.f32 %v12713_v16, %v12954_v42  ;;  %v15664_v42 = vld [vmem:[#allocation31_spill] sm:$0xff] }
 0x500   : > { %v3466_v19 = vmul.f32 %v10809_v39, %v15663_v44  ;;  %9825 = vmatprep.mubr.msk.f32.mxu1 %vm457_vm0, %v3630_v53  ;;  %v3406_v45 = vadd.f32 1e-05, %v3342_v23  ;;  %v3536_v50 = vadd.f32 %v12730_v30, %v3496_v61  ;;  %v3248_v2 = vmul.f32 0.03125, %v13046_v18 }
 0x501   : > { %v3631_v27 = vmul.f32 %v13126_v60, %v13126_v60  ;;  %v3313_v5 = vsub.f32 %v3249_v6, %v3281_v29  ;;  %v3537_v38 = vadd.f32 %v12730_v30, %v3497_v33  ;;  %v3498_v7 = vmul.f32 %v12713_v16, %v13001_v9 }
 0x502   : > { %v3499_v10 = vmul.f32 %v12713_v16, %v12993_v48  ;;  %10816 = vrsqrt.f32 %v3406_v45  ;;  %v15665_v46 = vunpack.c.l.bf16 %v15664_v42  ;;  %v3312_v43 = vsub.f32 %v3248_v2, %v3280_v36 }
 0x503   : > { %9826 = vmatmul.mubr.msk.f32.gmra.mrb[124].mxu1 %vm457_vm0, %v3631_v27  ;;  %v3500_v18 = vmul.f32 %v12713_v16, %v13021_v51  ;;  %v3345_v29 = vmax.f32 %v3313_v5, 0.0  ;;  %v15666_v6 = vunpack.c.h.bf16 %v15664_v42  ;;  %v3538_v9 = vadd.f32 %v12730_v30, %v3498_v7  ;;  %v10811_v58 = vpop.eup %10810 }
 0x504   : > { %v13149_v53 = vadd.f32 %v15665_v46, %v3536_v50  ;;  %v3539_v48 = vadd.f32 %v12730_v30, %v3499_v10  ;;  %v3344_v23 = vmax.f32 %v3312_v43, 0.0  ;;  %v3501_v36 = vmul.f32 %v12713_v16, %v13014_v17  ;;  %v10813_v51 = vpop.eup %10812  ;;  %v15668_v50 = vld [vmem:[#allocation19_spill] sm:$0xff] }
 0x505   : > { %v13155_v39 = vadd.f32 %v15666_v6, %v3537_v38  ;;  %v3540_v61 = vadd.f32 %v12730_v30, %v3500_v18  ;;  %v15667_v44 = vsub.f32 %v15646_v20, %v13009_v35  ;;  %v3409_v27 = vadd.f32 1e-05, %v3345_v29  ;;  %v15672_v35 = vld [vmem:[#allocation20_spill] sm:$0xff] }
 0x506   : > { %v3632_v47 = vmul.f32 %v13149_v53, %v13149_v53  ;;  %v15669_v2 = vunpack.c.l.bf16 %v15668_v50  ;;  %v15670_v38 = vsub.f32 %v15647_v28, %v13016_v54  ;;  %v3408_v17 = vadd.f32 1e-05, %v3344_v23 }
 0x507   : > { %v3469_v33 = vmul.f32 %v10811_v58, %v15667_v44  ;;  %v3633_v45 = vmul.f32 %v13155_v39, %v13155_v39  ;;  %v15671_v10 = vunpack.c.h.bf16 %v15668_v50  ;;  %v15673_v20 = vunpack.c.l.bf16 %v15672_v35 }
 0x508   : > { %v13171_v5 = vadd.f32 %v15669_v2, %v3538_v9  ;;  %v3468_v7 = vmul.f32 %v10813_v51, %v15670_v38  ;;  %9828 = vmatprep.mubr.msk.f32.mxu1 %vm457_vm0, %v3632_v47  ;;  %10818 = vrsqrt.f32 %v3409_v27  ;;  %v3541_v54 = vadd.f32 %v12730_v30, %v3501_v36  ;;  %v15675_v27 = vld [vmem:[#allocation30_spill] sm:$0xff] }
 0x509   : > { %v13179_v42 = vadd.f32 %v15671_v10, %v3539_v48  ;;  %v13183_v46 = vadd.f32 %v15673_v20, %v3540_v61  ;;  %9829 = vmatmul.mubr.msk.f32.gmra.mrb[126].mxu1 %vm457_vm0, %v3633_v45  ;;  %v3502_v28 = vmul.f32 %v12713_v16, %v13060_v40  ;;  %10820 = vrsqrt.f32 %v3408_v17  ;;  %v10815_v9 = vpop.eup %10814  ;;  %v15678_v10 = vld [vmem:[#allocation21_spill] sm:$0xff] }
 0x50a   : > { %v3634_v43 = vmul.f32 %v13171_v5, %v13171_v5  ;;  %v3503_v6 = vmul.f32 %v12713_v16, %v13051_v12  ;;  %v15674_v48 = vunpack.c.h.bf16 %v15672_v35  ;;  %v3504_v40 = vmul.f32 %v12713_v16, %v13095_v41 }
 0x50b   : > { %v3635_v18 = vmul.f32 %v13179_v42, %v13179_v42  ;;  %v3636_v29 = vmul.f32 %v13183_v46, %v13183_v46  ;;  %v3542_v47 = vadd.f32 %v12730_v30, %v3502_v28  ;;  %v3505_v23 = vmul.f32 %v12713_v16, %v13082_v3 }
 0x50c   : > { %9831 = vmatprep.mubr.msk.f32.mxu1 %vm457_vm0, %v3634_v43  ;;  %v13200_v58 = vadd.f32 %v15674_v48, %v3541_v54  ;;  %v3471_v61 = vmul.f32 %v10815_v9, %v3375_v32  ;;  %v3543_v12 = vadd.f32 %v12730_v30, %v3503_v6  ;;  %v3506_v36 = vmul.f32 %v12713_v16, %v3466_v19  ;;  %v10817_v49 = vpop.eup %10816  ;;  %v11156_v6 = vld [vmem:[%s11270_s20 + $0x70] sm:$0xff]  }
 0x50d   : > { %v3507_v51 = vmul.f32 %v12713_v16, %v3467_v26  ;;  %9832 = vmatmul.mubr.msk.f32.gmra.mrb[128].mxu1 %vm457_vm0, %v3635_v18  ;;  %v15676_v41 = vunpack.c.l.bf16 %v15675_v27  ;;  %v3544_v3 = vadd.f32 %v12730_v30, %v3504_v40  ;;  %v3545_v59 = vadd.f32 %v12730_v30, %v3505_v23 }
 0x50e   : > { %v3637_v44 = vmul.f32 %v13200_v58, %v13200_v58  ;;  %9834 = vmatprep.mubr.msk.f32.mxu1 %vm457_vm0, %v3636_v29  ;;  %v15677_v32 = vunpack.c.h.bf16 %v15675_v27  ;;  %v3546_v19 = vadd.f32 %v12730_v30, %v3506_v36  ;;  %v3508_v2 = vmul.f32 %v12713_v16, %v3468_v7 }
 0x50f   : > { %v13218_v45 = vadd.f32 %v15676_v41, %v3542_v47  ;;  %v3547_v50 = vadd.f32 %v12730_v30, %v3507_v51  ;;  %v3470_v38 = vmul.f32 %v10817_v49, %v3374_v21  ;;  %v15679_v35 = vunpack.c.l.bf16 %v15678_v10 }
 0x510   : > { %v13225_v26 = vadd.f32 %v15677_v32, %v3543_v12  ;;  %v15680_v43 = vunpack.c.h.bf16 %v15678_v10  ;;  %v15681_v28 = vunpack.c.l.bf16 %v12724_v63  ;;  %v15682_v7 = vunpack.c.h.bf16 %v12724_v63 }
 0x511   : > { %v3638_v17 = vmul.f32 %v13218_v45, %v13218_v45  ;;  %v13237_v20 = vadd.f32 %v15679_v35, %v3544_v3  ;;  %v3548_v37 = vadd.f32 %v12730_v30, %v3508_v2  ;;  %v3581_v21 = vunpack.c.h.bf16 %v15683_v31  ;;  %9835 = vmatmul.mubr.msk.f32.gmra.mrb[130].mxu1 %vm457_vm0, %v3637_v44 }
 0x512   : > { %v13241_v54 = vadd.f32 %v15680_v43, %v3545_v59  ;;  %v13245_v18 = vadd.f32 %v15681_v28, %v3546_v19  ;;  %v13249_v29 = vadd.f32 %v15682_v7, %v3547_v50  ;;  %v3582_v9 = vunpack.c.l.bf16 %v11156_v6  ;;  %v10819_v51 = vpop.eup %10818  ;;  %v11157_v50 = vld [vmem:[%s11270_s20 + $0x78] sm:$0xff]  }
 0x513   : > { %v3509_v48 = vmul.f32 %v12713_v16, %v3469_v33  ;;  %v3510_v47 = vmul.f32 %v12713_v16, %v3470_v38  ;;  %v3583_v40 = vunpack.c.h.bf16 %v11156_v6  ;;  %9837 = vmatprep.mubr.msk.f32.mxu1 %vm457_vm0, %v3638_v17  ;;  %v3640_v63 = vmul.f32 %v13237_v20, %v13237_v20  ;;  %v10821_v41 = vpop.eup %10820  ;;  %v10605_v6 = vld [vmem:[%s15326_s1 + $0x58] sm:$0xff]  }
 0x514   : > { %v15684_v23 = vunpack.c.l.bf16 %v15683_v31  ;;  %v3511_v36 = vmul.f32 %v12713_v16, %v3471_v61  ;;  %v3639_v44 = vmul.f32 %v13225_v26, %v13225_v26  ;;  %v3473_v3 = vmul.f32 %v10819_v51, %v3377_v0  ;;  %9861 = vmatprep.subr.bf16.mxu0 %v10605_v6 }
 0x515   : > { %v3549_v33 = vadd.f32 %v12730_v30, %v3509_v48  ;;  %v3550_v27 = vadd.f32 %v12730_v30, %v3510_v47  ;;  %v15685_v49 = vsub.f32 %v15660_v55, %v13108_v15  ;;  %v3585_v2 = vunpack.c.h.bf16 %v11157_v50  ;;  %9862 = vmatpush3.bf16.msra.mxu0 %v10605_v6 }
 0x516   : > { %v13262_v12 = vadd.f32 %v15684_v23, %v3548_v37  ;;  %v3551_v59 = vadd.f32 %v12730_v30, %v3511_v36  ;;  %9838 = vmatmul.mubr.msk.f32.gmra.mrb[132].mxu1 %vm457_vm0, %v3639_v44  ;;  %v3642_v1 = vmul.f32 %v13245_v18, %v13245_v18  ;;  %v3513_v0 = vmul.f32 %v12713_v16, %v3473_v3 }
 0x517   : > { %v3472_v32 = vmul.f32 %v10821_v41, %v15685_v49  ;;  %v13277_v61 = vadd.f32 %v3581_v21, %v3549_v33  ;;  %v13279_v19 = vadd.f32 %v3582_v9, %v3550_v27  ;;  %9840 = vmatprep.mubr.msk.f32.mxu1 %vm457_vm0, %v3640_v63  ;;  %v3584_v38 = vunpack.c.l.bf16 %v11157_v50  ;;  %10472 = vmatprep.subr.bf16.mxu0 %v15579_v4 }
 0x518   : > { %v13285_v25 = vadd.f32 %v3583_v40, %v3551_v59  ;;  %v3641_v15 = vmul.f32 %v13241_v54, %v13241_v54  ;;  %v3553_v17 = vadd.f32 %v12730_v30, %v3513_v0  ;;  %v3644_v35 = vmul.f32 %v13262_v12, %v13262_v12 }
 0x519   : > { %v3512_v55 = vmul.f32 %v12713_v16, %v3472_v32  ;;  %v3643_v28 = vmul.f32 %v13249_v29, %v13249_v29  ;;  %v3646_v16 = vmul.f32 %v13279_v19, %v13279_v19  ;;  %v13324_v23 = vstv %s8522_s18 }
 0x51a   : > { %9841 = vmatmul.mubr.msk.f32.gmra.mrb[134].mxu1 %vm457_vm0, %v3641_v15  ;;  %v13297_v43 = vadd.f32 %v3585_v2, %v3553_v17  ;;  %v3647_v31 = vmul.f32 %v13285_v25, %v13285_v25 }
 0x51b   : > { %v3552_v10 = vadd.f32 %v12730_v30, %v3512_v55  ;;  %9843 = vmatprep.mubr.msk.f32.mxu1 %vm457_vm0, %v3642_v1  ;;  %v3645_v30 = vmul.f32 %v13277_v61, %v13277_v61  ;;  %v15687_v55 = vld [vmem:[#allocation32_spill] sm:$0xff] }
 0x51c   : > { %v3649_v21 = vmul.f32 %v13297_v43, %v13297_v43 }
 0x51d   : > { %v13301_v7 = vadd.f32 %v3584_v38, %v3552_v10 }
 0x51e   : > { %9844 = vmatmul.mubr.msk.f32.gmra.mrb[136].mxu1 %vm457_vm0, %v3643_v28 }
 0x51f   : > { %9846 = vmatprep.mubr.msk.f32.mxu1 %vm457_vm0, %v3644_v35  ;;  %v3648_v37 = vmul.f32 %v13301_v7, %v13301_v7 }
 0x522   : > { %9847 = vmatmul.mubr.msk.f32.gmra.mrb[138].mxu1 %vm457_vm0, %v3645_v30 }
 0x523   : > { %9849 = vmatprep.mubr.msk.f32.mxu1 %vm457_vm0, %v3646_v16 }
 0x526   : > { %9850 = vmatmul.mubr.msk.f32.gmra.mrb[140].mxu1 %vm457_vm0, %v3647_v31 }
 0x527   : > { %9852 = vmatprep.mubr.msk.f32.mxu1 %vm457_vm0, %v3648_v37 }
 0x52a   : > { %9853 = vmatmul.mubr.msk.f32.gmra.mrb[142].mxu1 %vm457_vm0, %v3649_v21 }
 0x597   : > { %v9809_v9 = vpop.f32.mrb[112].mxu1 }
 0x598   : > { %10822 = vrsqrt.f32 %v9809_v9  ;;  %v3812_v48 = vpop.f32.mrb[113].mxu1 }
 0x599   : > { %10824 = vrsqrt.f32 %v3812_v48 }
 0x5a0   : > { %v9812_v47 = vpop.f32.mrb[114].mxu1 }
 0x5a1   : > { %10826 = vrsqrt.f32 %v9812_v47  ;;  %v3822_v40 = vpop.f32.mrb[115].mxu1 }
 0x5a2   : > { %10828 = vrsqrt.f32 %v3822_v40  ;;  %v10823_v63 = vpop.eup %10822 }
 0x5a3   : > { %v10825_v36 = vpop.eup %10824  ;;  %v4004_v51 = vmul.f32 %v10823_v63, %v9809_v9 }
 0x5a4   : > { %v4003_v44 = vmul.f32 %v10825_v36, %v3812_v48 }
 0x5a5   : > { %v4038_v33 = vsub.f32 %v4004_v51, %v13324_v23 }
 0x5a6   : > { %v4037_v27 = vsub.f32 %v4003_v44, %v13324_v23 }
 0x5a7   : > { %v4070_v41 = vmax.f32 %v4038_v33, 0.0 }
 0x5a8   : > { %v4069_v3 = vmax.f32 %v4037_v27, 0.0 }
 0x5a9   : > { %v4102_v49 = vmul.f32 %v10823_v63, %v4070_v41 }
 0x5aa   : > { %v4101_v2 = vmul.f32 %v10825_v36, %v4069_v3  ;;  %v15692_v3 = vld [vmem:[#allocation7_spill] sm:$0xff] }
 0x5ab   : > { %v10827_v59 = vpop.eup %10826  ;;  %v13329_v38 = vmul.f32 %v4102_v49, %v12770_v56 }
 0x5ac   : > { %v9815_v32 = vpop.f32.mrb[116].mxu1  ;;  %v10829_v50 = vpop.eup %10828  ;;  %v4006_v1 = vmul.f32 %v10827_v59, %v9812_v47  ;;  %v13332_v17 = vmul.f32 %v4101_v2, %v15687_v55  ;;  %v15695_v2 = vld [vmem:[#allocation8_spill] sm:$0xff] }
 0x5ad   : > { %10830 = vrsqrt.f32 %v9815_v32  ;;  %v3832_v0 = vpop.f32.mrb[117].mxu1  ;;  %15686 = vst [vmem:[#allocation35_spill] sm:$0xff] %v13329_v38  ;;  %v4005_v15 = vmul.f32 %v10829_v50, %v3822_v40 }
 0x5ae   : > { %10832 = vrsqrt.f32 %v3832_v0  ;;  %15688 = vst [vmem:[#allocation34_spill] sm:$0xff] %v13332_v17  ;;  %v4040_v10 = vsub.f32 %v4006_v1, %v13324_v23  ;;  %v4165_v16 = vpack.c.bf16 %v13329_v38, %v13332_v17 }
 0x5af   : > { %v4039_v35 = vsub.f32 %v4005_v15, %v13324_v23 }
 0x5b0   : > { %v4072_v28 = vmax.f32 %v4040_v10, 0.0  ;;  %9863 = vmatprep.mubr.msk.bf16.mxu0 %vm457_vm0, %v4165_v16 }
 0x5b1   : > { %v4071_v30 = vmax.f32 %v4039_v35, 0.0 }
 0x5b2   : > { %v4104_v37 = vmul.f32 %v10827_v59, %v4072_v28  ;;  %v15693_v59 = vld [vmem:[#allocation28_spill] sm:$0xff] }
 0x5b3   : > { %v4103_v31 = vmul.f32 %v10829_v50, %v4071_v30 }
 0x5b4   : > { %v13340_v56 = vmul.f32 %v4104_v37, %v12807_v11 }
 0x5b5   : > { %v13343_v21 = vmul.f32 %v4103_v31, %v12800_v24 }
 0x5b6   : > { %15689 = vst [vmem:[#allocation37_spill] sm:$0xff] %v13340_v56 }
 0x5b7   : > { %15690 = vst [vmem:[#allocation36_spill] sm:$0xff] %v13343_v21  ;;  %v10831_v6 = vpop.eup %10830  ;;  %v4166_v48 = vpack.c.bf16 %v13340_v56, %v13343_v21 }
 0x5b8   : > { %v10833_v9 = vpop.eup %10832  ;;  %v4008_v47 = vmul.f32 %v10831_v6, %v9815_v32 }
 0x5b9   : > { %v4007_v40 = vmul.f32 %v10833_v9, %v3832_v0  ;;  %9864 = vmatmul.mubr.msk.bf16.vlgmr.msra.gmra.mrb[112].mxu0 %vm457_vm0, %v4166_v48 }
 0x5ba   : > { %v4042_v63 = vsub.f32 %v4008_v47, %v13324_v23  ;;  %10474 = vmatpush3.bf16.msra.mxu0 %v15579_v4 }
 0x5bb   : > { %v4041_v36 = vsub.f32 %v4007_v40, %v13324_v23  ;;  %10476 = vmatprep.subr.bf16.mxu0 %v15585_v22 }
 0x5bc   : > { %v4074_v11 = vmax.f32 %v4042_v63, 0.0 }
 0x5bd   : > { %v4073_v24 = vmax.f32 %v4041_v36, 0.0  ;;  %v15697_v36 = vld [vmem:[#allocation33_spill] sm:$0xff] }
 0x5be   : > { %v9818_v51 = vpop.f32.mrb[118].mxu1  ;;  %v4106_v44 = vmul.f32 %v10831_v6, %v4074_v11  ;;  %10478 = vmatpush3.bf16.msra.mxu0 %v15585_v22 }
 0x5bf   : > { %10834 = vrsqrt.f32 %v9818_v51  ;;  %v3842_v33 = vpop.f32.mrb[119].mxu1  ;;  %v4105_v27 = vmul.f32 %v10833_v9, %v4073_v24  ;;  %10480 = vmatprep.subr.bf16.mxu0 %v15692_v3 }
 0x5c0   : > { %10836 = vrsqrt.f32 %v3842_v33  ;;  %v13354_v41 = vmul.f32 %v4106_v44, %v12859_v52 }
 0x5c1   : > { %v13358_v49 = vmul.f32 %v4105_v27, %v15693_v59 }
 0x5c2   : > { %15691 = vst [vmem:[#allocation39_spill] sm:$0xff] %v13354_v41  ;;  %10482 = vmatpush3.bf16.msra.mxu0 %v15692_v3 }
 0x5c3   : > { %15694 = vst [vmem:[#allocation38_spill] sm:$0xff] %v13358_v49  ;;  %v4167_v32 = vpack.c.bf16 %v13354_v41, %v13358_v49  ;;  %10484 = vmatprep.subr.bf16.mxu0 %v15695_v2 }
 0x5c5   : > { %9867 = vmatprep.mubr.msk.bf16.mxu0 %vm457_vm0, %v4167_v32 }
 0x5c6   : > { %v9821_v50 = vpop.f32.mrb[120].mxu1  ;;  %10486 = vmatpush3.bf16.msra.mxu0 %v15695_v2 }
 0x5c7   : > { %10838 = vrsqrt.f32 %v9821_v50  ;;  %v3852_v1 = vpop.f32.mrb[121].mxu1 }
 0x5c8   : > { %10840 = vrsqrt.f32 %v3852_v1 }
 0x5c9   : > { %v10835_v52 = vpop.eup %10834 }
 0x5ca   : > { %v10837_v0 = vpop.eup %10836  ;;  %v4010_v15 = vmul.f32 %v10835_v52, %v9818_v51 }
 0x5cb   : > { %v4009_v55 = vmul.f32 %v10837_v0, %v3842_v33 }
 0x5cc   : > { %v4044_v10 = vsub.f32 %v4010_v15, %v13324_v23 }
 0x5cd   : > { %v9824_v35 = vpop.f32.mrb[122].mxu1  ;;  %v4043_v28 = vsub.f32 %v4009_v55, %v13324_v23 }
 0x5ce   : > { %10842 = vrsqrt.f32 %v9824_v35  ;;  %v3862_v16 = vpop.f32.mrb[123].mxu1  ;;  %v4076_v30 = vmax.f32 %v4044_v10, 0.0 }
 0x5cf   : > { %10844 = vrsqrt.f32 %v3862_v16  ;;  %v4075_v37 = vmax.f32 %v4043_v28, 0.0 }
 0x5d0   : > { %v4108_v6 = vmul.f32 %v10835_v52, %v4076_v30 }
 0x5d1   : > { %v10839_v31 = vpop.eup %10838  ;;  %v4107_v48 = vmul.f32 %v10837_v0, %v4075_v37 }
 0x5d2   : > { %v10841_v9 = vpop.eup %10840  ;;  %v4012_v47 = vmul.f32 %v10839_v31, %v9821_v50  ;;  %v13369_v40 = vmul.f32 %v4108_v6, %v12978_v62 }
 0x5d3   : > { %v4011_v63 = vmul.f32 %v10841_v9, %v3852_v1  ;;  %v13372_v11 = vmul.f32 %v4107_v48, %v15697_v36 }
 0x5d4   : > { %15696 = vst [vmem:[#allocation25_spill] sm:$0xff] %v13369_v40  ;;  %v4046_v24 = vsub.f32 %v4012_v47, %v13324_v23 }
 0x5d5   : > { %15698 = vst [vmem:[#allocation17_spill] sm:$0xff] %v13372_v11  ;;  %v4045_v51 = vsub.f32 %v4011_v63, %v13324_v23  ;;  %v4168_v59 = vpack.c.bf16 %v13369_v40, %v13372_v11 }
 0x5d6   : > { %v9827_v44 = vpop.f32.mrb[124].mxu1  ;;  %v4078_v33 = vmax.f32 %v4046_v24, 0.0 }
 0x5d7   : > { %10846 = vrsqrt.f32 %v9827_v44  ;;  %v3872_v27 = vpop.f32.mrb[125].mxu1  ;;  %v4077_v32 = vmax.f32 %v4045_v51, 0.0  ;;  %9868 = vmatmul.mubr.msk.bf16.gmra.mrb[116].mxu0 %vm457_vm0, %v4168_v59 }
 0x5d8   : > { %10848 = vrsqrt.f32 %v3872_v27  ;;  %v10843_v50 = vpop.eup %10842  ;;  %v4110_v62 = vmul.f32 %v10839_v31, %v4078_v33 }
 0x5d9   : > { %v10845_v1 = vpop.eup %10844  ;;  %v4109_v52 = vmul.f32 %v10841_v9, %v4077_v32  ;;  %v4014_v0 = vmul.f32 %v10843_v50, %v9824_v35 }
 0x5da   : > { %v13380_v15 = vmul.f32 %v4110_v62, %v13027_v8  ;;  %v4013_v55 = vmul.f32 %v10845_v1, %v3862_v16 }
 0x5db   : > { %v13383_v28 = vmul.f32 %v4109_v52, %v13006_v57  ;;  %v4048_v30 = vsub.f32 %v4014_v0, %v13324_v23 }
 0x5dc   : > { %15699 = vst [vmem:[#allocation12_spill] sm:$0xff] %v13380_v15  ;;  %v9830_v10 = vpop.f32.mrb[126].mxu1  ;;  %v4047_v6 = vsub.f32 %v4013_v55, %v13324_v23 }
 0x5dd   : > { %15700 = vst [vmem:[#allocation22_spill] sm:$0xff] %v13383_v28  ;;  %10850 = vrsqrt.f32 %v9830_v10  ;;  %v3882_v37 = vpop.f32.mrb[127].mxu1  ;;  %v4080_v31 = vmax.f32 %v4048_v30, 0.0  ;;  %v4169_v9 = vpack.c.bf16 %v13380_v15, %v13383_v28 }
 0x5de   : > { %10852 = vrsqrt.f32 %v3882_v37  ;;  %v4079_v35 = vmax.f32 %v4047_v6, 0.0 }
 0x5df   : > { %v4112_v8 = vmul.f32 %v10843_v50, %v4080_v31  ;;  %9871 = vmatprep.mubr.msk.bf16.mxu0 %vm457_vm0, %v4169_v9 }
 0x5e0   : > { %v9833_v48 = vpop.f32.mrb[128].mxu1  ;;  %v4111_v47 = vmul.f32 %v10845_v1, %v4079_v35 }
 0x5e1   : > { %10854 = vrsqrt.f32 %v9833_v48  ;;  %v3892_v16 = vpop.f32.mrb[129].mxu1  ;;  %v10847_v57 = vpop.eup %10846  ;;  %v13391_v36 = vmul.f32 %v4112_v8, %v13073_v34 }
 0x5e2   : > { %10856 = vrsqrt.f32 %v3892_v16  ;;  %v10849_v63 = vpop.eup %10848  ;;  %v4016_v24 = vmul.f32 %v10847_v57, %v9827_v44  ;;  %v13394_v51 = vmul.f32 %v4111_v47, %v13065_v13 }
 0x5e3   : > { %15701 = vst [vmem:[#allocation14_spill] sm:$0xff] %v13391_v36  ;;  %v4015_v33 = vmul.f32 %v10849_v63, %v3872_v27 }
 0x5e4   : > { %15702 = vst [vmem:[#allocation27_spill] sm:$0xff] %v13394_v51  ;;  %v9836_v59 = vpop.f32.mrb[130].mxu1  ;;  %v4050_v32 = vsub.f32 %v4016_v24, %v13324_v23  ;;  %v4170_v1 = vpack.c.bf16 %v13391_v36, %v13394_v51 }
 0x5e5   : > { %10858 = vrsqrt.f32 %v9836_v59  ;;  %v3902_v50 = vpop.f32.mrb[131].mxu1  ;;  %v4049_v62 = vsub.f32 %v4015_v33, %v13324_v23 }
 0x5e6   : > { %10860 = vrsqrt.f32 %v3902_v50  ;;  %v4082_v0 = vmax.f32 %v4050_v32, 0.0  ;;  %9872 = vmatmul.mubr.msk.bf16.gmra.mrb[120].mxu0 %vm457_vm0, %v4170_v1 }
 0x5e7   : > { %v10851_v52 = vpop.eup %10850  ;;  %v4081_v55 = vmax.f32 %v4049_v62, 0.0 }
 0x5e8   : > { %v10853_v34 = vpop.eup %10852  ;;  %v4018_v44 = vmul.f32 %v10851_v52, %v9830_v10  ;;  %v4114_v13 = vmul.f32 %v10847_v57, %v4082_v0 }
 0x5e9   : > { %v9839_v30 = vpop.f32.mrb[132].mxu1  ;;  %v4017_v27 = vmul.f32 %v10853_v34, %v3882_v37  ;;  %v4113_v31 = vmul.f32 %v10849_v63, %v4081_v55 }
 0x5ea   : > { %10862 = vrsqrt.f32 %v9839_v30  ;;  %v3912_v6 = vpop.f32.mrb[133].mxu1  ;;  %v4052_v9 = vsub.f32 %v4018_v44, %v13324_v23  ;;  %v13403_v8 = vmul.f32 %v4114_v13, %v13126_v60 }
 0x5eb   : > { %10864 = vrsqrt.f32 %v3912_v6  ;;  %v10855_v35 = vpop.eup %10854  ;;  %v4051_v47 = vsub.f32 %v4017_v27, %v13324_v23  ;;  %v13407_v10 = vmul.f32 %v4113_v31, %v13106_v14 }
 0x5ec   : > { %15703 = vst [vmem:[#allocation29_spill] sm:$0xff] %v13403_v8  ;;  %v10857_v24 = vpop.eup %10856  ;;  %v4084_v33 = vmax.f32 %v4052_v9, 0.0  ;;  %v4020_v32 = vmul.f32 %v10855_v35, %v9833_v48 }
 0x5ed   : > { %15704 = vst [vmem:[#allocation13_spill] sm:$0xff] %v13407_v10  ;;  %v9842_v57 = vpop.f32.mrb[134].mxu1  ;;  %v4083_v37 = vmax.f32 %v4051_v47, 0.0  ;;  %v4019_v62 = vmul.f32 %v10857_v24, %v3892_v16  ;;  %v4171_v60 = vpack.c.bf16 %v13403_v8, %v13407_v10 }
 0x5ee   : > { %10866 = vrsqrt.f32 %v9842_v57  ;;  %v3922_v63 = vpop.f32.mrb[135].mxu1  ;;  %v4116_v1 = vmul.f32 %v10851_v52, %v4084_v33  ;;  %v4054_v0 = vsub.f32 %v4020_v32, %v13324_v23 }
 0x5ef   : > { %10868 = vrsqrt.f32 %v3922_v63  ;;  %v10859_v55 = vpop.eup %10858  ;;  %v4115_v44 = vmul.f32 %v10853_v34, %v4083_v37  ;;  %v4053_v13 = vsub.f32 %v4019_v62, %v13324_v23  ;;  %9875 = vmatprep.mubr.msk.bf16.mxu0 %vm457_vm0, %v4171_v60 }
 0x5f0   : > { %v10861_v14 = vpop.eup %10860  ;;  %v13414_v27 = vmul.f32 %v4116_v1, %v13155_v39  ;;  %v4086_v48 = vmax.f32 %v4054_v0, 0.0  ;;  %v4022_v31 = vmul.f32 %v10859_v55, %v9836_v59 }
 0x5f1   : > { %v9845_v16 = vpop.f32.mrb[136].mxu1  ;;  %v13418_v52 = vmul.f32 %v4115_v44, %v13149_v53  ;;  %v4085_v9 = vmax.f32 %v4053_v13, 0.0  ;;  %v4021_v47 = vmul.f32 %v10861_v14, %v3902_v50 }
 0x5f2   : > { %15705 = vst [vmem:[#allocation26_spill] sm:$0xff] %v13414_v27  ;;  %10870 = vrsqrt.f32 %v9845_v16  ;;  %v3932_v33 = vpop.f32.mrb[137].mxu1  ;;  %v4118_v32 = vmul.f32 %v10855_v35, %v4086_v48  ;;  %v4056_v34 = vsub.f32 %v4022_v31, %v13324_v23 }
 0x5f3   : > { %15706 = vst [vmem:[#allocation23_spill] sm:$0xff] %v13418_v52  ;;  %10872 = vrsqrt.f32 %v3932_v33  ;;  %v4117_v62 = vmul.f32 %v10857_v24, %v4085_v9  ;;  %v4055_v39 = vsub.f32 %v4021_v47, %v13324_v23  ;;  %v4172_v59 = vpack.c.bf16 %v13414_v27, %v13418_v52 }
 0x5f4   : > { %v10863_v37 = vpop.eup %10862  ;;  %v13425_v0 = vmul.f32 %v4118_v32, %v13179_v42  ;;  %v4088_v53 = vmax.f32 %v4056_v34, 0.0 }
 0x5f5   : > { %v10865_v1 = vpop.eup %10864  ;;  %v4024_v60 = vmul.f32 %v10863_v37, %v9839_v30  ;;  %v9848_v50 = vpop.f32.mrb[138].mxu1  ;;  %v13428_v44 = vmul.f32 %v4117_v62, %v13171_v5  ;;  %v4087_v35 = vmax.f32 %v4055_v39, 0.0  ;;  %9876 = vmatmul.mubr.msk.bf16.gmra.mrb[124].mxu0 %vm457_vm0, %v4172_v59 }
 0x5f6   : > { %15707 = vst [vmem:[#allocation16_spill] sm:$0xff] %v13425_v0  ;;  %v4023_v13 = vmul.f32 %v10865_v1, %v3912_v6  ;;  %10874 = vrsqrt.f32 %v9848_v50  ;;  %v3942_v48 = vpop.f32.mrb[139].mxu1  ;;  %v4120_v24 = vmul.f32 %v10859_v55, %v4088_v53 }
 0x5f7   : > { %15708 = vst [vmem:[#allocation15_spill] sm:$0xff] %v13428_v44  ;;  %v4058_v31 = vsub.f32 %v4024_v60, %v13324_v23  ;;  %10876 = vrsqrt.f32 %v3942_v48  ;;  %v4119_v47 = vmul.f32 %v10861_v14, %v4087_v35  ;;  %v4173_v30 = vpack.c.bf16 %v13425_v0, %v13428_v44 }
 0x5f8   : > { %v10867_v9 = vpop.eup %10866  ;;  %v4057_v42 = vsub.f32 %v4023_v13, %v13324_v23  ;;  %v13436_v5 = vmul.f32 %v4120_v24, %v13200_v58 }
 0x5f9   : > { %v10869_v32 = vpop.eup %10868  ;;  %v4090_v6 = vmax.f32 %v4058_v31, 0.0  ;;  %v4026_v34 = vmul.f32 %v10867_v9, %v9842_v57  ;;  %v9851_v62 = vpop.f32.mrb[140].mxu1  ;;  %v13439_v39 = vmul.f32 %v4119_v47, %v13183_v46  ;;  %9879 = vmatprep.mubr.msk.bf16.mxu0 %vm457_vm0, %v4173_v30 }
 0x5fa   : > { %15709 = vst [vmem:[#allocation31_spill] sm:$0xff] %v13436_v5  ;;  %v4089_v55 = vmax.f32 %v4057_v42, 0.0  ;;  %v4025_v59 = vmul.f32 %v10869_v32, %v3922_v63  ;;  %10878 = vrsqrt.f32 %v9851_v62  ;;  %v3952_v53 = vpop.f32.mrb[141].mxu1 }
 0x5fb   : > { %15710 = vst [vmem:[#allocation19_spill] sm:$0xff] %v13439_v39  ;;  %v4122_v14 = vmul.f32 %v10863_v37, %v4090_v6  ;;  %v4060_v60 = vsub.f32 %v4026_v34, %v13324_v23  ;;  %10880 = vrsqrt.f32 %v3952_v53  ;;  %v4174_v57 = vpack.c.bf16 %v13436_v5, %v13439_v39 }
 0x5fc   : > { %v10871_v35 = vpop.eup %10870  ;;  %v4121_v13 = vmul.f32 %v10865_v1, %v4089_v55  ;;  %v4059_v58 = vsub.f32 %v4025_v59, %v13324_v23 }
 0x5fd   : > { %v10873_v24 = vpop.eup %10872  ;;  %v13447_v46 = vmul.f32 %v4122_v14, %v13225_v26  ;;  %v4092_v63 = vmax.f32 %v4060_v60, 0.0  ;;  %v4028_v31 = vmul.f32 %v10871_v35, %v9845_v16  ;;  %v9854_v47 = vpop.f32.mrb[142].mxu1  ;;  %9880 = vmatmul.mubr.msk.bf16.gmra.mrb[128].mxu0 %vm457_vm0, %v4174_v57 }
 0x5fe   : > { %v13450_v42 = vmul.f32 %v4121_v13, %v13218_v45  ;;  %v4091_v37 = vmax.f32 %v4059_v58, 0.0  ;;  %v4027_v30 = vmul.f32 %v10873_v24, %v3932_v33  ;;  %10882 = vrsqrt.f32 %v9854_v47  ;;  %v3962_v6 = vpop.f32.mrb[143].mxu1 }
 0x5ff   : > { %15711 = vst [vmem:[#allocation20_spill] sm:$0xff] %v13447_v46  ;;  %v4124_v1 = vmul.f32 %v10867_v9, %v4092_v63  ;;  %v4062_v34 = vsub.f32 %v4028_v31, %v13324_v23  ;;  %10884 = vrsqrt.f32 %v3962_v6 }
 0x600   : > { %15712 = vst [vmem:[#allocation30_spill] sm:$0xff] %v13450_v42  ;;  %v10875_v55 = vpop.eup %10874  ;;  %v4123_v59 = vmul.f32 %v10869_v32, %v4091_v37  ;;  %v4061_v26 = vsub.f32 %v4027_v30, %v13324_v23  ;;  %v4175_v16 = vpack.c.bf16 %v13447_v46, %v13450_v42 }
 0x601   : > { %v10877_v14 = vpop.eup %10876  ;;  %v13458_v45 = vmul.f32 %v4124_v1, %v13241_v54  ;;  %v4094_v33 = vmax.f32 %v4062_v34, 0.0  ;;  %v4030_v60 = vmul.f32 %v10875_v55, %v9848_v50 }
 0x602   : > { %v13461_v13 = vmul.f32 %v4123_v59, %v13237_v20  ;;  %v4093_v9 = vmax.f32 %v4061_v26, 0.0  ;;  %v4029_v58 = vmul.f32 %v10877_v14, %v3942_v48  ;;  %9883 = vmatprep.mubr.msk.bf16.mxu0 %vm457_vm0, %v4175_v16 }
 0x603   : > { %15713 = vst [vmem:[#allocation21_spill] sm:$0xff] %v13458_v45  ;;  %v4126_v57 = vmul.f32 %v10871_v35, %v4094_v33  ;;  %v4064_v32 = vsub.f32 %v4030_v60, %v13324_v23 }
 0x604   : > { %15714 = vst [vmem:[#allocation18_spill] sm:$0xff] %v13461_v13  ;;  %v10879_v63 = vpop.eup %10878  ;;  %v4125_v31 = vmul.f32 %v10873_v24, %v4093_v9  ;;  %v4063_v37 = vsub.f32 %v4029_v58, %v13324_v23  ;;  %v4176_v54 = vpack.c.bf16 %v13458_v45, %v13461_v13 }
 0x605   : > { %v10881_v30 = vpop.eup %10880  ;;  %v13469_v50 = vmul.f32 %v4126_v57, %v13249_v29  ;;  %v4096_v20 = vmax.f32 %v4064_v32, 0.0  ;;  %v4032_v1 = vmul.f32 %v10879_v63, %v9851_v62 }
 0x606   : > { %v13472_v48 = vmul.f32 %v4125_v31, %v13245_v18  ;;  %v4095_v34 = vmax.f32 %v4063_v37, 0.0  ;;  %v4031_v35 = vmul.f32 %v10881_v30, %v3952_v53  ;;  %9884 = vmatmul.mubr.msk.bf16.gmra.mrb[132].mxu0 %vm457_vm0, %v4176_v54 }
 0x607   : > { %15715 = vst [vmem:[#allocation32_spill] sm:$0xff] %v13469_v50  ;;  %v4128_v59 = vmul.f32 %v10875_v55, %v4096_v20  ;;  %v4066_v24 = vsub.f32 %v4032_v1, %v13324_v23 }
 0x608   : > { %15716 = vst [vmem:[#allocation28_spill] sm:$0xff] %v13472_v48  ;;  %v10883_v26 = vpop.eup %10882  ;;  %v4127_v16 = vmul.f32 %v10877_v14, %v4095_v34  ;;  %v4065_v33 = vsub.f32 %v4031_v35, %v13324_v23  ;;  %v4177_v29 = vpack.c.bf16 %v13469_v50, %v13472_v48 }
 0x609   : > { %v10885_v60 = vpop.eup %10884  ;;  %v13480_v62 = vmul.f32 %v4128_v59, %v13277_v61  ;;  %v4098_v18 = vmax.f32 %v4066_v24, 0.0  ;;  %v4034_v9 = vmul.f32 %v10883_v26, %v9854_v47  ;;  %v15723_v24 = vld [vmem:[#allocation9_spill] sm:$0xff] }
 0x60a   : > { %v13483_v53 = vmul.f32 %v4127_v16, %v13262_v12  ;;  %v4097_v58 = vmax.f32 %v4065_v33, 0.0  ;;  %v4033_v55 = vmul.f32 %v10885_v60, %v3962_v6  ;;  %9887 = vmatprep.mubr.msk.bf16.mxu0 %vm457_vm0, %v4177_v29  ;;  %v15725_v33 = vld [vmem:[#allocation11_spill] sm:$0xff]  ;;  %v15726_v29 = vld [vmem:[#allocation24_spill] sm:$0xff] }
 0x60b   : > { %15717 = vst [vmem:[#allocation33_spill] sm:$0xff] %v13480_v62  ;;  %v4130_v57 = vmul.f32 %v10879_v63, %v4098_v18  ;;  %v4068_v14 = vsub.f32 %v4034_v9, %v13324_v23 }
 0x60c   : > { %15718 = vst [vmem:[#allocation40_spill] sm:$0xff] %v13483_v53  ;;  %v4129_v32 = vmul.f32 %v10881_v30, %v4097_v58  ;;  %v4067_v31 = vsub.f32 %v4033_v55, %v13324_v23  ;;  %v4178_v37 = vpack.c.bf16 %v13480_v62, %v13483_v53 }
 0x60d   : > { %v13491_v61 = vmul.f32 %v4130_v57, %v13285_v25  ;;  %v4100_v47 = vmax.f32 %v4068_v14, 0.0 }
 0x60e   : > { %v13494_v12 = vmul.f32 %v4129_v32, %v13279_v19  ;;  %v4099_v54 = vmax.f32 %v4067_v31, 0.0  ;;  %9888 = vmatmul.mubr.msk.bf16.gmra.mrb[136].mxu0 %vm457_vm0, %v4178_v37 }
 0x60f   : > { %15719 = vst [vmem:[#allocation41_spill] sm:$0xff] %v13491_v61  ;;  %v4132_v6 = vmul.f32 %v10883_v26, %v4100_v47  ;;  %v15724_v26 = vld [vmem:[#allocation10_spill] sm:$0xff] }
 0x610   : > { %15720 = vst [vmem:[#allocation42_spill] sm:$0xff] %v13494_v12  ;;  %v4131_v63 = vmul.f32 %v10885_v60, %v4099_v54  ;;  %v4179_v30 = vpack.c.bf16 %v13491_v61, %v13494_v12 }
 0x611   : > { %v13500_v23 = vmul.f32 %v4132_v6, %v13297_v43 }
 0x612   : > { %v13503_v20 = vmul.f32 %v4131_v63, %v13301_v7  ;;  %9891 = vmatprep.mubr.msk.bf16.mxu0 %vm457_vm0, %v4179_v30 }
 0x613   : > { %15721 = vst [vmem:[#allocation43_spill] sm:$0xff] %v13500_v23 }
 0x614   : > { %15722 = vst [vmem:[#allocation44_spill] sm:$0xff] %v13503_v20  ;;  %v4180_v19 = vpack.c.bf16 %v13500_v23, %v13503_v20 }
 0x616   : > { %9892 = vmatmul.mubr.msk.bf16.gmra.mrb[140].mxu0 %vm457_vm0, %v4180_v19 }
 0x68c   : > { %v13509_v25 = vpop.f32.mrb[112].mxu0 }
 0x68d   : > { %v13511_v1 = vpop.f32.mrb[113].mxu0  ;;  %v4778_v59 = vmul.f32 %v13509_v25, %v13509_v25 }
 0x68e   : > { %v4776_v34 = vmul.f32 %v13511_v1, %v13511_v1  ;;  %v13515_v35 = vpop.f32.mrb[114].mxu0  ;;  %9911 = vmatprep.mubr.msk.f32.mxu1 %vm457_vm0, %v13511_v1 }
 0x68f   : > { %v13519_v43 = vpop.f32.mrb[115].mxu0  ;;  %v4779_v16 = vmul.f32 %v13515_v35, %v13515_v35 }
 0x690   : > { %v4777_v7 = vmul.f32 %v13519_v43, %v13519_v43  ;;  %9912 = vmatmul.mubr.msk.f32.vlgmr.msra.gmra.mrb[144].mxu1 %vm457_vm0, %v13519_v43  ;;  %9975 = vmatprep.mubr.msk.f32.mxu0 %vm457_vm0, %v4776_v34 }
 0x691   : > { %9914 = vmatprep.mubr.msk.f32.mxu1 %vm457_vm0, %v13509_v25  ;;  %10490 = vmatpush3.bf16.msra.mxu1 %v15723_v24 }
 0x692   : > { %9976 = vmatmul.mubr.msk.f32.vlgmr.msra.gmra.mrb[144].mxu0 %vm457_vm0, %v4777_v7  ;;  %10492 = vmatprep.subr.bf16.mxu1 %v15724_v26 }
 0x693   : > { %9978 = vmatprep.mubr.msk.f32.mxu0 %vm457_vm0, %v4778_v59 }
 0x694   : > { %9915 = vmatmul.mubr.msk.f32.gmra.mrb[146].mxu1 %vm457_vm0, %v13515_v35 }
 0x695   : > { %10494 = vmatpush3.bf16.msra.mxu1 %v15724_v26 }
 0x696   : > { %9979 = vmatmul.mubr.msk.f32.gmra.mrb[146].mxu0 %vm457_vm0, %v4779_v16  ;;  %10496 = vmatprep.subr.bf16.mxu1 %v15725_v33 }
 0x699   : > { %10498 = vmatpush3.bf16.msra.mxu1 %v15725_v33 }
 0x69a   : > { %10500 = vmatprep.subr.bf16.mxu1 %v15726_v29 }
 0x69d   : > { %10502 = vmatpush3.bf16.msra.mxu1 %v15726_v29 }
 0x69e   : > { %10504 = vmatprep.subr.bf16.mxu1 %v15579_v4 }
 0x6aa   : > { %v13545_v60 = vpop.f32.mrb[116].mxu0 }
 0x6ab   : > { %v13547_v18 = vpop.f32.mrb[117].mxu0  ;;  %v4782_v14 = vmul.f32 %v13545_v60, %v13545_v60 }
 0x6ac   : > { %v4780_v9 = vmul.f32 %v13547_v18, %v13547_v18  ;;  %v13551_v58 = vpop.f32.mrb[118].mxu0  ;;  %9917 = vmatprep.mubr.msk.f32.mxu1 %vm457_vm0, %v13547_v18 }
 0x6ad   : > { %v13555_v55 = vpop.f32.mrb[119].mxu0  ;;  %v4783_v32 = vmul.f32 %v13551_v58, %v13551_v58 }
 0x6ae   : > { %v4781_v57 = vmul.f32 %v13555_v55, %v13555_v55  ;;  %9918 = vmatmul.mubr.msk.f32.gmra.mrb[148].mxu1 %vm457_vm0, %v13555_v55  ;;  %9981 = vmatprep.mubr.msk.f32.mxu0 %vm457_vm0, %v4780_v9 }
 0x6af   : > { %9920 = vmatprep.mubr.msk.f32.mxu1 %vm457_vm0, %v13545_v60 }
 0x6b0   : > { %9982 = vmatmul.mubr.msk.f32.gmra.mrb[148].mxu0 %vm457_vm0, %v4781_v57 }
 0x6b1   : > { %9984 = vmatprep.mubr.msk.f32.mxu0 %vm457_vm0, %v4782_v14 }
 0x6b2   : > { %9921 = vmatmul.mubr.msk.f32.gmra.mrb[150].mxu1 %vm457_vm0, %v13551_v58 }
 0x6b4   : > { %9985 = vmatmul.mubr.msk.f32.gmra.mrb[150].mxu0 %vm457_vm0, %v4783_v32 }
 0x6b9   : > { %v13573_v31 = vpop.f32.mrb[120].mxu0 }
 0x6ba   : > { %v13575_v37 = vpop.f32.mrb[121].mxu0  ;;  %v4786_v30 = vmul.f32 %v13573_v31, %v13573_v31 }
 0x6bb   : > { %v4784_v47 = vmul.f32 %v13575_v37, %v13575_v37  ;;  %v13579_v54 = vpop.f32.mrb[122].mxu0  ;;  %9923 = vmatprep.mubr.msk.f32.mxu1 %vm457_vm0, %v13575_v37 }
 0x6bc   : > { %v13583_v6 = vpop.f32.mrb[123].mxu0  ;;  %v4787_v19 = vmul.f32 %v13579_v54, %v13579_v54 }
 0x6bd   : > { %v4785_v63 = vmul.f32 %v13583_v6, %v13583_v6  ;;  %9924 = vmatmul.mubr.msk.f32.gmra.mrb[152].mxu1 %vm457_vm0, %v13583_v6  ;;  %9987 = vmatprep.mubr.msk.f32.mxu0 %vm457_vm0, %v4784_v47 }
 0x6be   : > { %9926 = vmatprep.mubr.msk.f32.mxu1 %vm457_vm0, %v13573_v31 }
 0x6bf   : > { %9988 = vmatmul.mubr.msk.f32.gmra.mrb[152].mxu0 %vm457_vm0, %v4785_v63 }
 0x6c0   : > { %9990 = vmatprep.mubr.msk.f32.mxu0 %vm457_vm0, %v4786_v30 }
 0x6c1   : > { %9927 = vmatmul.mubr.msk.f32.gmra.mrb[154].mxu1 %vm457_vm0, %v13579_v54 }
 0x6c3   : > { %9991 = vmatmul.mubr.msk.f32.gmra.mrb[154].mxu0 %vm457_vm0, %v4787_v19 }
 0x6c8   : > { %v13601_v34 = vpop.f32.mrb[124].mxu0 }
 0x6c9   : > { %v13603_v7 = vpop.f32.mrb[125].mxu0  ;;  %v4790_v14 = vmul.f32 %v13601_v34, %v13601_v34 }
 0x6ca   : > { %v4788_v59 = vmul.f32 %v13603_v7, %v13603_v7  ;;  %v13607_v16 = vpop.f32.mrb[126].mxu0  ;;  %9929 = vmatprep.mubr.msk.f32.mxu1 %vm457_vm0, %v13603_v7 }
 0x6cb   : > { %v13611_v9 = vpop.f32.mrb[127].mxu0  ;;  %v4791_v32 = vmul.f32 %v13607_v16, %v13607_v16 }
 0x6cc   : > { %v4789_v57 = vmul.f32 %v13611_v9, %v13611_v9  ;;  %9930 = vmatmul.mubr.msk.f32.gmra.mrb[156].mxu1 %vm457_vm0, %v13611_v9  ;;  %9993 = vmatprep.mubr.msk.f32.mxu0 %vm457_vm0, %v4788_v59 }
 0x6cd   : > { %9932 = vmatprep.mubr.msk.f32.mxu1 %vm457_vm0, %v13601_v34 }
 0x6ce   : > { %9994 = vmatmul.mubr.msk.f32.gmra.mrb[156].mxu0 %vm457_vm0, %v4789_v57 }
 0x6cf   : > { %9996 = vmatprep.mubr.msk.f32.mxu0 %vm457_vm0, %v4790_v14 }
 0x6d0   : > { %v13626_v47 = vpop.f32.mrb[128].mxu0  ;;  %9933 = vmatmul.mubr.msk.f32.gmra.mrb[158].mxu1 %vm457_vm0, %v13607_v16 }
 0x6d1   : > { %v13630_v63 = vpop.f32.mrb[129].mxu0  ;;  %v4794_v14 = vmul.f32 %v13626_v47, %v13626_v47 }
 0x6d2   : > { %v4792_v30 = vmul.f32 %v13630_v63, %v13630_v63  ;;  %v13634_v19 = vpop.f32.mrb[130].mxu0  ;;  %9935 = vmatprep.mubr.msk.f32.mxu1 %vm457_vm0, %v13630_v63  ;;  %9997 = vmatmul.mubr.msk.f32.gmra.mrb[158].mxu0 %vm457_vm0, %v4791_v32 }
 0x6d3   : > { %v13639_v59 = vpop.f32.mrb[131].mxu0  ;;  %v4795_v32 = vmul.f32 %v13634_v19, %v13634_v19 }
 0x6d4   : > { %v4793_v57 = vmul.f32 %v13639_v59, %v13639_v59  ;;  %9936 = vmatmul.mubr.msk.f32.gmra.mrb[160].mxu1 %vm457_vm0, %v13639_v59  ;;  %9999 = vmatprep.mubr.msk.f32.mxu0 %vm457_vm0, %v4792_v30 }
 0x6d5   : > { %9938 = vmatprep.mubr.msk.f32.mxu1 %vm457_vm0, %v13626_v47 }
 0x6d6   : > { %10000 = vmatmul.mubr.msk.f32.gmra.mrb[160].mxu0 %vm457_vm0, %v4793_v57 }
 0x6d7   : > { %10002 = vmatprep.mubr.msk.f32.mxu0 %vm457_vm0, %v4794_v14 }
 0x6d8   : > { %9939 = vmatmul.mubr.msk.f32.gmra.mrb[162].mxu1 %vm457_vm0, %v13634_v19 }
 0x6d9   : > { %v13654_v23 = vpop.f32.mrb[132].mxu0 }
 0x6da   : > { %v13658_v61 = vpop.f32.mrb[133].mxu0  ;;  %10003 = vmatmul.mubr.msk.f32.gmra.mrb[162].mxu0 %vm457_vm0, %v4795_v32  ;;  %v4798_v62 = vmul.f32 %v13654_v23, %v13654_v23 }
 0x6db   : > { %v4796_v30 = vmul.f32 %v13658_v61, %v13658_v61  ;;  %v13662_v20 = vpop.f32.mrb[134].mxu0  ;;  %9941 = vmatprep.mubr.msk.f32.mxu1 %vm457_vm0, %v13658_v61 }
 0x6dc   : > { %15727 = vst [vmem:[#allocation45_spill] sm:$0xff] %v13662_v20  ;;  %v13667_v57 = vpop.f32.mrb[135].mxu0  ;;  %v4799_v32 = vmul.f32 %v13662_v20, %v13662_v20 }
 0x6dd   : > { %v4797_v14 = vmul.f32 %v13667_v57, %v13667_v57  ;;  %9942 = vmatmul.mubr.msk.f32.gmra.mrb[164].mxu1 %vm457_vm0, %v13667_v57  ;;  %10005 = vmatprep.mubr.msk.f32.mxu0 %vm457_vm0, %v4796_v30 }
 0x6de   : > { %9944 = vmatprep.mubr.msk.f32.mxu1 %vm457_vm0, %v13654_v23 }
 0x6df   : > { %10006 = vmatmul.mubr.msk.f32.gmra.mrb[164].mxu0 %vm457_vm0, %v4797_v14 }
 0x6e0   : > { %10008 = vmatprep.mubr.msk.f32.mxu0 %vm457_vm0, %v4798_v62 }
 0x6e1   : > { %v13682_v12 = vpop.f32.mrb[136].mxu0  ;;  %9945 = vmatmul.mubr.msk.f32.gmra.mrb[166].mxu1 %vm457_vm0, %v13662_v20 }
 0x6e2   : > { %v13686_v50 = vpop.f32.mrb[137].mxu0  ;;  %v4802_v45 = vmul.f32 %v13682_v12, %v13682_v12 }
 0x6e3   : > { %v4800_v30 = vmul.f32 %v13686_v50, %v13686_v50  ;;  %v13690_v53 = vpop.f32.mrb[138].mxu0  ;;  %9947 = vmatprep.mubr.msk.f32.mxu1 %vm457_vm0, %v13686_v50  ;;  %10009 = vmatmul.mubr.msk.f32.gmra.mrb[166].mxu0 %vm457_vm0, %v4799_v32 }
 0x6e4   : > { %15728 = vst [vmem:[#allocation46_spill] sm:$0xff] %v13690_v53  ;;  %v13695_v62 = vpop.f32.mrb[139].mxu0  ;;  %v4803_v32 = vmul.f32 %v13690_v53, %v13690_v53 }
 0x6e5   : > { %v4801_v14 = vmul.f32 %v13695_v62, %v13695_v62  ;;  %9948 = vmatmul.mubr.msk.f32.gmra.mrb[168].mxu1 %vm457_vm0, %v13695_v62  ;;  %10011 = vmatprep.mubr.msk.f32.mxu0 %vm457_vm0, %v4800_v30 }
 0x6e6   : > { %9950 = vmatprep.mubr.msk.f32.mxu1 %vm457_vm0, %v13682_v12 }
 0x6e7   : > { %10012 = vmatmul.mubr.msk.f32.gmra.mrb[168].mxu0 %vm457_vm0, %v4801_v14 }
 0x6e8   : > { %10014 = vmatprep.mubr.msk.f32.mxu0 %vm457_vm0, %v4802_v45 }
 0x6e9   : > { %v13710_v48 = vpop.f32.mrb[140].mxu0  ;;  %9951 = vmatmul.mubr.msk.f32.gmra.mrb[170].mxu1 %vm457_vm0, %v13690_v53 }
 0x6ea   : > { %v13714_v46 = vpop.f32.mrb[141].mxu0  ;;  %v4806_v42 = vmul.f32 %v13710_v48, %v13710_v48 }
 0x6eb   : > { %v4804_v30 = vmul.f32 %v13714_v46, %v13714_v46  ;;  %v13718_v13 = vpop.f32.mrb[142].mxu0  ;;  %9953 = vmatprep.mubr.msk.f32.mxu1 %vm457_vm0, %v13714_v46  ;;  %10015 = vmatmul.mubr.msk.f32.gmra.mrb[170].mxu0 %vm457_vm0, %v4803_v32 }
 0x6ec   : > { %v13723_v45 = vpop.f32.mrb[143].mxu0  ;;  %v4807_v32 = vmul.f32 %v13718_v13, %v13718_v13 }
 0x6ed   : > { %v4805_v14 = vmul.f32 %v13723_v45, %v13723_v45  ;;  %9954 = vmatmul.mubr.msk.f32.gmra.mrb[172].mxu1 %vm457_vm0, %v13723_v45  ;;  %10017 = vmatprep.mubr.msk.f32.mxu0 %vm457_vm0, %v4804_v30 }
 0x6ee   : > { %9956 = vmatprep.mubr.msk.f32.mxu1 %vm457_vm0, %v13710_v48 }
 0x6ef   : > { %10018 = vmatmul.mubr.msk.f32.gmra.mrb[172].mxu0 %vm457_vm0, %v4805_v14 }
 0x6f0   : > { %10020 = vmatprep.mubr.msk.f32.mxu0 %vm457_vm0, %v4806_v42 }
 0x6f1   : > { %9957 = vmatmul.mubr.msk.f32.gmra.mrb[174].mxu1 %vm457_vm0, %v13718_v13 }
 0x6f3   : > { %10021 = vmatmul.mubr.msk.f32.gmra.mrb[174].mxu0 %vm457_vm0, %v4807_v32 }
 0x763   : > { %v9913_v5 = vpop.f32.mrb[144].mxu1 }
 0x764   : > { %v4745_v30 = vmul.f32 0.03125, %v9913_v5  ;;  %v4585_v39 = vpop.f32.mrb[145].mxu1 }
 0x765   : > { %v4744_v0 = vmul.f32 0.03125, %v4585_v39  ;;  %v9977_v44 = vpop.f32.mrb[144].mxu0 }
 0x766   : > { %v5162_v27 = vmul.f32 %v4745_v30, %v4745_v30  ;;  %v5258_v52 = vsub.f32 %v13519_v43, %v4745_v30  ;;  %v5130_v8 = vmul.f32 0.03125, %v9977_v44  ;;  %v4970_v14 = vpop.f32.mrb[145].mxu0 }
 0x767   : > { %v5161_v10 = vmul.f32 %v4744_v0, %v4744_v0  ;;  %v5257_v42 = vsub.f32 %v13511_v1, %v4744_v0  ;;  %v5129_v36 = vmul.f32 0.03125, %v4970_v14  ;;  %v9916_v51 = vpop.f32.mrb[146].mxu1 }
 0x768   : > { %v5194_v15 = vsub.f32 %v5130_v8, %v5162_v27  ;;  %v4747_v28 = vmul.f32 0.03125, %v9916_v51  ;;  %v4595_v11 = vpop.f32.mrb[147].mxu1 }
 0x769   : > { %v5193_v40 = vsub.f32 %v5129_v36, %v5161_v10  ;;  %v4746_v32 = vmul.f32 0.03125, %v4595_v11  ;;  %v9980_v49 = vpop.f32.mrb[146].mxu0  ;;  %v13762_v10 = vld [vmem:[%s15330_s5 + $0x2] ss:$0 sm:$0xff] }
 0x76a   : > { %v5226_v5 = vmax.f32 %v5194_v15, 0.0  ;;  %v5164_v41 = vmul.f32 %v4747_v28, %v4747_v28  ;;  %v5260_v39 = vsub.f32 %v13515_v35, %v4747_v28  ;;  %v5132_v21 = vmul.f32 0.03125, %v9980_v49  ;;  %v4980_v56 = vpop.f32.mrb[147].mxu0  ;;  %v10606_v15 = vld [vmem:[%s15326_s1 + $0x60] sm:$0xff]   ;;  %v10607_v49 = vld [vmem:[%s15326_s1 + $0x68] sm:$0xff]  }
 0x76b   : > { %v5225_v43 = vmax.f32 %v5193_v40, 0.0  ;;  %v5163_v44 = vmul.f32 %v4746_v32, %v4746_v32  ;;  %v5259_v30 = vsub.f32 %v13509_v25, %v4746_v32  ;;  %v5131_v17 = vmul.f32 0.03125, %v4980_v56  ;;  %10087 = vmatprep.subr.bf16.mxu0 %v10606_v15 }
 0x76c   : > { %v5290_v0 = vadd.f32 1e-05, %v5226_v5  ;;  %v5196_v1 = vsub.f32 %v5132_v21, %v5164_v41  ;;  %10088 = vmatpush3.bf16.msra.mxu0 %v10606_v15  ;;  %v13757_v21 = vld [vmem:[%s15329_s4 + $0x2] ss:$0 sm:$0xff] }
 0x76d   : > { %v5289_v14 = vadd.f32 1e-05, %v5225_v43  ;;  %v5195_v8 = vsub.f32 %v5131_v17, %v5163_v44  ;;  %10089 = vmatprep.subr.bf16.mxu0 %v10607_v49  ;;  %v10608_v17 = vld [vmem:[%s15326_s1 + $0x70] sm:$0xff]  }
 0x76e   : > { %10886 = vrsqrt.f32 %v5290_v0  ;;  %v5228_v51 = vmax.f32 %v5196_v1, 0.0 }
 0x76f   : > { %10888 = vrsqrt.f32 %v5289_v14  ;;  %v5227_v11 = vmax.f32 %v5195_v8, 0.0 }
 0x770   : > { %v5292_v36 = vadd.f32 1e-05, %v5228_v51  ;;  %10090 = vmatpush3.bf16.msra.mxu0 %v10607_v49 }
 0x771   : > { %v5291_v40 = vadd.f32 1e-05, %v5227_v11  ;;  %10091 = vmatprep.subr.bf16.mxu0 %v10608_v17 }
 0x772   : > { %10890 = vrsqrt.f32 %v5292_v36 }
 0x773   : > { %10892 = vrsqrt.f32 %v5291_v40 }
 0x774   : > { %10092 = vmatpush3.bf16.msra.mxu0 %v10608_v17 }
 0x778   : > { %v10887_v56 = vpop.eup %10886 }
 0x779   : > { %v10889_v41 = vpop.eup %10888  ;;  %v5354_v28 = vmul.f32 %v10887_v56, %v5258_v52 }
 0x77a   : > { %v5353_v27 = vmul.f32 %v10889_v41, %v5257_v42 }
 0x77b   : > { %v5394_v25 = vmul.f32 %v13757_v21, %v5354_v28 }
 0x77c   : > { %v10891_v35 = vpop.eup %10890  ;;  %v5393_v32 = vmul.f32 %v13757_v21, %v5353_v27 }
 0x77d   : > { %v10893_v5 = vpop.eup %10892  ;;  %v13767_v43 = vadd.f32 %v13762_v10, %v5394_v25  ;;  %v5356_v44 = vmul.f32 %v10891_v35, %v5260_v39 }
 0x77e   : > { %v13770_v0 = vadd.f32 %v13762_v10, %v5393_v32  ;;  %v5355_v52 = vmul.f32 %v10893_v5, %v5259_v30 }
 0x77f   : > { %15729 = vst [vmem:[#allocation47_spill] sm:$0xff] %v13767_v43  ;;  %v5396_v14 = vmul.f32 %v13757_v21, %v5356_v44  ;;  %v5466_v39 = vmul.f32 %v13767_v43, %v13767_v43 }
 0x780   : > { %15730 = vst [vmem:[#allocation48_spill] sm:$0xff] %v13770_v0  ;;  %v5465_v51 = vmul.f32 %v13770_v0, %v13770_v0  ;;  %v5395_v11 = vmul.f32 %v13757_v21, %v5355_v52 }
 0x781   : > { %v9919_v1 = vpop.f32.mrb[148].mxu1  ;;  %v13783_v49 = vadd.f32 %v13762_v10, %v5396_v14 }
 0x782   : > { %v13773_v8 = vmul.f32 0.03125, %v9919_v1  ;;  %v4605_v42 = vpop.f32.mrb[149].mxu1  ;;  %10039 = vmatprep.mubr.msk.f32.mxu1 %vm457_vm0, %v5465_v51  ;;  %v13791_v41 = vadd.f32 %v13762_v10, %v5395_v11 }
 0x783   : > { %v13778_v36 = vmul.f32 0.03125, %v4605_v42  ;;  %v9983_v15 = vpop.f32.mrb[148].mxu0  ;;  %15731 = vst [vmem:[#allocation49_spill] sm:$0xff] %v13783_v49  ;;  %10040 = vmatmul.mubr.msk.f32.vlgmr.msra.gmra.mrb[176].mxu1 %vm457_vm0, %v5466_v39  ;;  %v5468_v51 = vmul.f32 %v13783_v49, %v13783_v49 }
 0x784   : > { %v5166_v30 = vmul.f32 %v13773_v8, %v13773_v8  ;;  %v5134_v17 = vmul.f32 0.03125, %v9983_v15  ;;  %v4990_v56 = vpop.f32.mrb[149].mxu0  ;;  %15732 = vst [vmem:[#allocation50_spill] sm:$0xff] %v13791_v41  ;;  %v5467_v52 = vmul.f32 %v13791_v41, %v13791_v41  ;;  %10506 = vmatpush3.bf16.msra.mxu1 %v15579_v4 }
 0x785   : > { %v5165_v28 = vmul.f32 %v13778_v36, %v13778_v36  ;;  %v5133_v25 = vmul.f32 0.03125, %v4990_v56  ;;  %v9922_v35 = vpop.f32.mrb[150].mxu1  ;;  %10508 = vmatprep.subr.bf16.mxu1 %v15585_v22 }
 0x786   : > { %v5198_v32 = vsub.f32 %v5134_v17, %v5166_v30  ;;  %v13798_v5 = vmul.f32 0.03125, %v9922_v35  ;;  %v4615_v44 = vpop.f32.mrb[151].mxu1  ;;  %10042 = vmatprep.mubr.msk.f32.mxu1 %vm457_vm0, %v5467_v52 }
 0x787   : > { %v5197_v1 = vsub.f32 %v5133_v25, %v5165_v28  ;;  %v13803_v14 = vmul.f32 0.03125, %v4615_v44  ;;  %v9986_v42 = vpop.f32.mrb[150].mxu0  ;;  %10043 = vmatmul.mubr.msk.f32.gmra.mrb[178].mxu1 %vm457_vm0, %v5468_v51 }
 0x788   : > { %v5230_v11 = vmax.f32 %v5198_v32, 0.0  ;;  %v5168_v15 = vmul.f32 %v13798_v5, %v13798_v5  ;;  %v5136_v30 = vmul.f32 0.03125, %v9986_v42  ;;  %v5000_v17 = vpop.f32.mrb[151].mxu0  ;;  %10510 = vmatpush3.bf16.msra.mxu1 %v15585_v22 }
 0x789   : > { %v5229_v56 = vmax.f32 %v5197_v1, 0.0  ;;  %v5167_v28 = vmul.f32 %v13803_v14, %v13803_v14  ;;  %v5135_v35 = vmul.f32 0.03125, %v5000_v17  ;;  %10512 = vmatprep.subr.bf16.mxu1 %v15692_v3 }
 0x78a   : > { %v5294_v32 = vadd.f32 1e-05, %v5230_v11  ;;  %v5200_v44 = vsub.f32 %v5136_v30, %v5168_v15 }
 0x78b   : > { %v5293_v40 = vadd.f32 1e-05, %v5229_v56  ;;  %v5199_v39 = vsub.f32 %v5135_v35, %v5167_v28 }
 0x78c   : > { %10894 = vrsqrt.f32 %v5294_v32  ;;  %v5232_v52 = vmax.f32 %v5200_v44, 0.0  ;;  %10514 = vmatpush3.bf16.msra.mxu1 %v15692_v3 }
 0x78d   : > { %10896 = vrsqrt.f32 %v5293_v40  ;;  %v5231_v1 = vmax.f32 %v5199_v39, 0.0  ;;  %10516 = vmatprep.subr.bf16.mxu1 %v15695_v2 }
 0x78e   : > { %v5296_v42 = vadd.f32 1e-05, %v5232_v52 }
 0x78f   : > { %v5295_v27 = vadd.f32 1e-05, %v5231_v1 }
 0x790   : > { %v9925_v25 = vpop.f32.mrb[152].mxu1  ;;  %10898 = vrsqrt.f32 %v5296_v42  ;;  %10518 = vmatpush3.bf16.msra.mxu1 %v15695_v2 }
 0x791   : > { %v13822_v51 = vmul.f32 0.03125, %v9925_v25  ;;  %v4625_v11 = vpop.f32.mrb[153].mxu1  ;;  %10900 = vrsqrt.f32 %v5295_v27  ;;  %10536 = vmatprep.subr.bf16.mxu1 %v15723_v24  ;;  %v15734_v25 = vsub.f32 %v13555_v55, %v13773_v8  ;;  %v15738_v8 = vsub.f32 %v13545_v60, %v13803_v14 }
 0x792   : > { %v13824_v15 = vmul.f32 0.03125, %v4625_v11  ;;  %v9989_v30 = vpop.f32.mrb[152].mxu0 }
 0x793   : > { %v5170_v17 = vmul.f32 %v13822_v51, %v13822_v51  ;;  %v5138_v39 = vmul.f32 0.03125, %v9989_v30  ;;  %v5010_v56 = vpop.f32.mrb[153].mxu0 }
 0x794   : > { %v5169_v28 = vmul.f32 %v13824_v15, %v13824_v15  ;;  %v5137_v27 = vmul.f32 0.03125, %v5010_v56  ;;  %v9928_v35 = vpop.f32.mrb[154].mxu1 }
 0x795   : > { %v5202_v32 = vsub.f32 %v5138_v39, %v5170_v17  ;;  %v13836_v44 = vmul.f32 0.03125, %v9928_v35  ;;  %v4635_v52 = vpop.f32.mrb[155].mxu1 }
 0x796   : > { %v5201_v1 = vsub.f32 %v5137_v27, %v5169_v28  ;;  %v13838_v42 = vmul.f32 0.03125, %v4635_v52  ;;  %v9992_v11 = vpop.f32.mrb[154].mxu0  ;;  %v10895_v30 = vpop.eup %10894 }
 0x797   : > { %v5234_v40 = vmax.f32 %v5202_v32, 0.0  ;;  %v5172_v38 = vmul.f32 %v13836_v44, %v13836_v44  ;;  %v5140_v56 = vmul.f32 0.03125, %v9992_v11  ;;  %v5020_v29 = vpop.f32.mrb[155].mxu0  ;;  %v10897_v33 = vpop.eup %10896  ;;  %v15733_v32 = vsub.f32 %v13547_v18, %v13778_v36 }
 0x798   : > { %v5233_v26 = vmax.f32 %v5201_v1, 0.0  ;;  %v5171_v17 = vmul.f32 %v13838_v42, %v13838_v42  ;;  %v5139_v28 = vmul.f32 0.03125, %v5020_v29  ;;  %v5358_v11 = vmul.f32 %v10895_v30, %v15734_v25 }
 0x799   : > { %v5298_v27 = vadd.f32 1e-05, %v5234_v40  ;;  %v5204_v35 = vsub.f32 %v5140_v56, %v5172_v38  ;;  %v5357_v52 = vmul.f32 %v10897_v33, %v15733_v32  ;;  %v15735_v38 = vsub.f32 %v13551_v58, %v13798_v5 }
 0x79a   : > { %v5297_v24 = vadd.f32 1e-05, %v5233_v26  ;;  %v5203_v2 = vsub.f32 %v5139_v28, %v5171_v17  ;;  %v10899_v1 = vpop.eup %10898  ;;  %v5398_v41 = vmul.f32 %v13757_v21, %v5358_v11 }
 0x79b   : > { %v5236_v3 = vmax.f32 %v5204_v35, 0.0  ;;  %v5397_v22 = vmul.f32 %v13757_v21, %v5357_v52  ;;  %v10901_v39 = vpop.eup %10900  ;;  %10902 = vrsqrt.f32 %v5298_v27  ;;  %v5360_v18 = vmul.f32 %v10899_v1, %v15735_v38 }
 0x79c   : > { %v5235_v29 = vmax.f32 %v5203_v2, 0.0  ;;  %v13863_v26 = vadd.f32 %v13762_v10, %v5398_v41  ;;  %v5359_v40 = vmul.f32 %v10901_v39, %v15738_v8  ;;  %10904 = vrsqrt.f32 %v5297_v24 }
 0x79d   : > { %v5300_v33 = vadd.f32 1e-05, %v5236_v3  ;;  %v13860_v55 = vadd.f32 %v13762_v10, %v5397_v22  ;;  %v5400_v5 = vmul.f32 %v13757_v21, %v5360_v18 }
 0x79e   : > { %15737 = vst [vmem:[#allocation52_spill] sm:$0xff] %v13863_v26  ;;  %v5299_v25 = vadd.f32 1e-05, %v5235_v29  ;;  %v5470_v56 = vmul.f32 %v13863_v26, %v13863_v26  ;;  %v5399_v35 = vmul.f32 %v13757_v21, %v5359_v40 }
 0x79f   : > { %v9931_v36 = vpop.f32.mrb[156].mxu1  ;;  %15736 = vst [vmem:[#allocation51_spill] sm:$0xff] %v13860_v55  ;;  %10906 = vrsqrt.f32 %v5300_v33  ;;  %v5469_v22 = vmul.f32 %v13860_v55, %v13860_v55  ;;  %v13896_v33 = vadd.f32 %v13762_v10, %v5400_v5 }
 0x7a0   : > { %v13868_v30 = vmul.f32 0.03125, %v9931_v36  ;;  %v4645_v2 = vpop.f32.mrb[157].mxu1  ;;  %10908 = vrsqrt.f32 %v5299_v25  ;;  %v13893_v18 = vadd.f32 %v13762_v10, %v5399_v35 }
 0x7a1   : > { %v13870_v58 = vmul.f32 0.03125, %v4645_v2  ;;  %v9995_v3 = vpop.f32.mrb[156].mxu0  ;;  %10045 = vmatprep.mubr.msk.f32.mxu1 %vm457_vm0, %v5469_v22  ;;  %15740 = vst [vmem:[#allocation54_spill] sm:$0xff] %v13896_v33  ;;  %v5472_v40 = vmul.f32 %v13896_v33, %v13896_v33 }
 0x7a2   : > { %v5174_v41 = vmul.f32 %v13868_v30, %v13868_v30  ;;  %v5142_v24 = vmul.f32 0.03125, %v9995_v3  ;;  %v5030_v14 = vpop.f32.mrb[157].mxu0  ;;  %10046 = vmatmul.mubr.msk.f32.gmra.mrb[180].mxu1 %vm457_vm0, %v5470_v56  ;;  %15739 = vst [vmem:[#allocation53_spill] sm:$0xff] %v13893_v18  ;;  %v5471_v35 = vmul.f32 %v13893_v18, %v13893_v18 }
 0x7a3   : > { %v5173_v17 = vmul.f32 %v13870_v58, %v13870_v58  ;;  %v5141_v28 = vmul.f32 0.03125, %v5030_v14  ;;  %v9934_v27 = vpop.f32.mrb[158].mxu1 }
 0x7a4   : > { %v5206_v32 = vsub.f32 %v5142_v24, %v5174_v41  ;;  %v13887_v52 = vmul.f32 0.03125, %v9934_v27  ;;  %v4655_v11 = vpop.f32.mrb[159].mxu1  ;;  %10048 = vmatprep.mubr.msk.f32.mxu1 %vm457_vm0, %v5471_v35 }
 0x7a5   : > { %v5205_v1 = vsub.f32 %v5141_v28, %v5173_v17  ;;  %v13890_v29 = vmul.f32 0.03125, %v4655_v11  ;;  %v9998_v38 = vpop.f32.mrb[158].mxu0  ;;  %v10903_v5 = vpop.eup %10902 }
 0x7a6   : > { %v5238_v36 = vmax.f32 %v5206_v32, 0.0  ;;  %v5176_v8 = vmul.f32 %v13887_v52, %v13887_v52  ;;  %v5144_v25 = vmul.f32 0.03125, %v9998_v38  ;;  %v5040_v2 = vpop.f32.mrb[159].mxu0  ;;  %v10905_v41 = vpop.eup %10904  ;;  %10049 = vmatmul.mubr.msk.f32.gmra.mrb[182].mxu1 %vm457_vm0, %v5472_v40 }
 0x7a7   : > { %v5237_v3 = vmax.f32 %v5205_v1, 0.0  ;;  %v5175_v22 = vmul.f32 %v13890_v29, %v13890_v29  ;;  %v5143_v24 = vmul.f32 0.03125, %v5040_v2  ;;  %v9937_v14 = vpop.f32.mrb[160].mxu1 }
 0x7a8   : > { %v5302_v56 = vadd.f32 1e-05, %v5238_v36  ;;  %v5208_v17 = vsub.f32 %v5144_v25, %v5176_v8  ;;  %v13906_v28 = vmul.f32 0.03125, %v9937_v14  ;;  %v4665_v27 = vpop.f32.mrb[161].mxu1  ;;  %v15742_v14 = vsub.f32 %v13583_v6, %v13822_v51 }
 0x7a9   : > { %v5301_v32 = vadd.f32 1e-05, %v5237_v3  ;;  %v5207_v11 = vsub.f32 %v5143_v24, %v5175_v22  ;;  %v13910_v1 = vmul.f32 0.03125, %v4665_v27  ;;  %v10001_v38 = vpop.f32.mrb[160].mxu0  ;;  %v13919_v3 = vpop.eup %10906 }
 0x7aa   : > { %10910 = vrsqrt.f32 %v5302_v56  ;;  %v5240_v2 = vmax.f32 %v5208_v17, 0.0  ;;  %v5178_v36 = vmul.f32 %v13906_v28, %v13906_v28  ;;  %v5050_v25 = vpop.f32.mrb[161].mxu0  ;;  %v5146_v27 = vmul.f32 0.03125, %v10001_v38  ;;  %v13936_v26 = vpop.eup %10908 }
 0x7ab   : > { %10912 = vrsqrt.f32 %v5301_v32  ;;  %v5239_v22 = vmax.f32 %v5207_v11, 0.0  ;;  %v5177_v24 = vmul.f32 %v13910_v1, %v13910_v1  ;;  %v9940_v56 = vpop.f32.mrb[162].mxu1  ;;  %v5145_v60 = vmul.f32 0.03125, %v5050_v25 }
 0x7ac   : > { %v5304_v17 = vadd.f32 1e-05, %v5240_v2  ;;  %v13926_v8 = vmul.f32 0.03125, %v9940_v56  ;;  %v4675_v39 = vpop.f32.mrb[163].mxu1  ;;  %v15741_v11 = vsub.f32 %v13575_v37, %v13824_v15  ;;  %v5362_v55 = vmul.f32 %v10903_v5, %v15742_v14 }
 0x7ad   : > { %v5303_v35 = vadd.f32 1e-05, %v5239_v22  ;;  %v13928_v18 = vmul.f32 0.03125, %v4675_v39  ;;  %v10004_v32 = vpop.f32.mrb[162].mxu0  ;;  %v5210_v40 = vsub.f32 %v5146_v27, %v5178_v36  ;;  %v5209_v38 = vsub.f32 %v5145_v60, %v5177_v24 }
 0x7ae   : > { %v5361_v33 = vmul.f32 %v10905_v41, %v15741_v11  ;;  %10914 = vrsqrt.f32 %v5304_v17  ;;  %v5180_v2 = vmul.f32 %v13926_v8, %v13926_v8  ;;  %v5060_v25 = vpop.f32.mrb[163].mxu0  ;;  %v5148_v5 = vmul.f32 0.03125, %v10004_v32 }
 0x7af   : > { %10916 = vrsqrt.f32 %v5303_v35  ;;  %v5179_v37 = vmul.f32 %v13928_v18, %v13928_v18  ;;  %v5242_v15 = vmax.f32 %v5210_v40, 0.0  ;;  %v5241_v41 = vmax.f32 %v5209_v38, 0.0 }
 0x7b0   : > { %v9943_v51 = vpop.f32.mrb[164].mxu1  ;;  %v5147_v36 = vmul.f32 0.03125, %v5060_v25  ;;  %v5401_v56 = vmul.f32 %v13757_v21, %v5361_v33  ;;  %v5402_v17 = vmul.f32 %v13757_v21, %v5362_v55  ;;  %v5212_v11 = vsub.f32 %v5148_v5, %v5180_v2 }
 0x7b1   : > { %v4685_v60 = vpop.f32.mrb[165].mxu1  ;;  %v13946_v22 = vmul.f32 0.03125, %v9943_v51  ;;  %v5306_v27 = vadd.f32 1e-05, %v5242_v15  ;;  %v5305_v35 = vadd.f32 1e-05, %v5241_v41 }
 0x7b2   : > { %v13948_v24 = vmul.f32 0.03125, %v4685_v60  ;;  %v10007_v14 = vpop.f32.mrb[164].mxu0  ;;  %v5211_v39 = vsub.f32 %v5147_v36, %v5179_v37  ;;  %v5244_v55 = vmax.f32 %v5212_v11, 0.0 }
 0x7b3   : > { %15743 = vst [vmem:[#allocation55_spill] sm:$0xff] %v13946_v22  ;;  %v5070_v6 = vpop.f32.mrb[165].mxu0  ;;  %v5182_v40 = vmul.f32 %v13946_v22, %v13946_v22  ;;  %10918 = vrsqrt.f32 %v5306_v27  ;;  %v5150_v37 = vmul.f32 0.03125, %v10007_v14 }
 0x7b4   : > { %v5181_v38 = vmul.f32 %v13948_v24, %v13948_v24  ;;  %v9946_v33 = vpop.f32.mrb[166].mxu1  ;;  %v13960_v51 = vpop.eup %10910  ;;  %v5243_v2 = vmax.f32 %v5211_v39, 0.0  ;;  %10920 = vrsqrt.f32 %v5305_v35  ;;  %v5149_v5 = vmul.f32 0.03125, %v5070_v6 }
 0x7b5   : > { %v4695_v15 = vpop.f32.mrb[167].mxu1  ;;  %v13962_v41 = vpop.eup %10912  ;;  %v13964_v36 = vmul.f32 0.03125, %v9946_v33  ;;  %v5308_v49 = vadd.f32 1e-05, %v5244_v55  ;;  %v5214_v25 = vsub.f32 %v5150_v37, %v5182_v40  ;;  %v13981_v37 = vadd.f32 %v13762_v10, %v5401_v56 }
 0x7b6   : > { %v13966_v60 = vmul.f32 0.03125, %v4695_v15  ;;  %v10010_v32 = vpop.f32.mrb[166].mxu0  ;;  %v5307_v0 = vadd.f32 1e-05, %v5243_v2  ;;  %v5213_v22 = vsub.f32 %v5149_v5, %v5181_v38 }
 0x7b7   : > { %15744 = vst [vmem:[#allocation56_spill] sm:$0xff] %v13964_v36  ;;  %v5152_v43 = vmul.f32 0.03125, %v10010_v32  ;;  %v5080_v4 = vpop.f32.mrb[167].mxu0  ;;  %v5184_v39 = vmul.f32 %v13964_v36, %v13964_v36  ;;  %10922 = vrsqrt.f32 %v5308_v49  ;;  %v5246_v11 = vmax.f32 %v5214_v25, 0.0  ;;  %15745 = vst [vmem:[#allocation57_spill] sm:$0xff] %v13981_v37 }
 0x7b8   : > { %v5183_v6 = vmul.f32 %v13966_v60, %v13966_v60  ;;  %v9949_v27 = vpop.f32.mrb[168].mxu1  ;;  %v13974_v35 = vpop.eup %10914  ;;  %v5151_v32 = vmul.f32 0.03125, %v5080_v4  ;;  %10924 = vrsqrt.f32 %v5307_v0  ;;  %v5245_v55 = vmax.f32 %v5213_v22, 0.0 }
 0x7b9   : > { %v4705_v33 = vpop.f32.mrb[169].mxu1  ;;  %v13978_v38 = vpop.eup %10916  ;;  %v5216_v2 = vsub.f32 %v5152_v43, %v5184_v39  ;;  %v5310_v5 = vadd.f32 1e-05, %v5246_v11  ;;  %v13983_v36 = vmul.f32 0.03125, %v9949_v27  ;;  %v13986_v49 = vadd.f32 %v13762_v10, %v5402_v17 }
 0x7ba   : > { %v10013_v15 = vpop.f32.mrb[168].mxu0  ;;  %v5215_v14 = vsub.f32 %v5151_v32, %v5183_v6  ;;  %v5309_v40 = vadd.f32 1e-05, %v5245_v55  ;;  %v5473_v20 = vmul.f32 %v13981_v37, %v13981_v37  ;;  %v13990_v0 = vmul.f32 0.03125, %v4705_v33 }
 0x7bb   : > { %15746 = vst [vmem:[#allocation58_spill] sm:$0xff] %v13983_v36  ;;  %15747 = vst [vmem:[#allocation59_spill] sm:$0xff] %v13986_v49  ;;  %v5090_v25 = vpop.f32.mrb[169].mxu0  ;;  %v5248_v4 = vmax.f32 %v5216_v2, 0.0  ;;  %10926 = vrsqrt.f32 %v5310_v5  ;;  %v5186_v56 = vmul.f32 %v13983_v36, %v13983_v36  ;;  %v5474_v27 = vmul.f32 %v13986_v49, %v13986_v49 }
 0x7bc   : > { %v9952_v43 = vpop.f32.mrb[170].mxu1  ;;  %v5247_v22 = vmax.f32 %v5215_v14, 0.0  ;;  %10928 = vrsqrt.f32 %v5309_v40  ;;  %10051 = vmatprep.mubr.msk.f32.mxu1 %vm457_vm0, %v5473_v20  ;;  %v5185_v11 = vmul.f32 %v13990_v0, %v13990_v0  ;;  %v5154_v2 = vmul.f32 0.03125, %v10013_v15 }
 0x7bd   : > { %v4715_v6 = vpop.f32.mrb[171].mxu1  ;;  %v5312_v17 = vadd.f32 1e-05, %v5248_v4  ;;  %v14001_v33 = vpop.eup %10918  ;;  %v5153_v5 = vmul.f32 0.03125, %v5090_v25  ;;  %10052 = vmatmul.mubr.msk.f32.gmra.mrb[184].mxu1 %vm457_vm0, %v5474_v27  ;;  %v15748_v20 = vsub.f32 %v13573_v31, %v13838_v42  ;;  %v14012_v37 = vmul.f32 0.03125, %v9952_v43 }
 0x7be   : > { %v10016_v32 = vpop.f32.mrb[170].mxu0  ;;  %v5311_v14 = vadd.f32 1e-05, %v5247_v22  ;;  %v14005_v40 = vpop.eup %10920  ;;  %v15750_v22 = vsub.f32 %v13579_v54, %v13836_v44  ;;  %v5218_v25 = vsub.f32 %v5154_v2, %v5186_v56  ;;  %v14018_v36 = vmul.f32 0.03125, %v4715_v6 }
 0x7bf   : > { %v5100_v39 = vpop.f32.mrb[171].mxu0  ;;  %10930 = vrsqrt.f32 %v5312_v17  ;;  %v5363_v4 = vmul.f32 %v13936_v26, %v15748_v20  ;;  %15749 = vst [vmem:[#allocation60_spill] sm:$0xff] %v14012_v37  ;;  %v5217_v49 = vsub.f32 %v5153_v5, %v5185_v11  ;;  %v5188_v31 = vmul.f32 %v14012_v37, %v14012_v37 }
 0x7c0   : > { %v5364_v55 = vmul.f32 %v13919_v3, %v15750_v22  ;;  %v9955_v15 = vpop.f32.mrb[172].mxu1  ;;  %10932 = vrsqrt.f32 %v5311_v14  ;;  %15751 = vst [vmem:[#allocation61_spill] sm:$0xff] %v14018_v36  ;;  %v5250_v3 = vmax.f32 %v5218_v25, 0.0  ;;  %v5187_v56 = vmul.f32 %v14018_v36, %v14018_v36 }
 0x7c1   : > { %v4725_v17 = vpop.f32.mrb[173].mxu1  ;;  %v5403_v27 = vmul.f32 %v13757_v21, %v5363_v4  ;;  %v14026_v44 = vpop.eup %10922  ;;  %v5249_v43 = vmax.f32 %v5217_v49, 0.0  ;;  %v5155_v20 = vmul.f32 0.03125, %v5100_v39  ;;  %v15752_v25 = vsub.f32 %v13603_v7, %v13870_v58 }
 0x7c2   : > { %v5404_v26 = vmul.f32 %v13757_v21, %v5364_v55  ;;  %v10019_v54 = vpop.f32.mrb[172].mxu0  ;;  %v14032_v14 = vpop.eup %10924  ;;  %v5156_v55 = vmul.f32 0.03125, %v10016_v32  ;;  %v5314_v22 = vadd.f32 1e-05, %v5250_v3  ;;  %v14044_v6 = vmul.f32 0.03125, %v9955_v15 }
 0x7c3   : > { %v5110_v11 = vpop.f32.mrb[173].mxu0  ;;  %v14035_v2 = vadd.f32 %v13762_v10, %v5403_v27  ;;  %v5313_v49 = vadd.f32 1e-05, %v5249_v43  ;;  %v5365_v42 = vmul.f32 %v13962_v41, %v15752_v25  ;;  %v5219_v32 = vsub.f32 %v5155_v20, %v5187_v56 }
 0x7c4   : > { %v14038_v5 = vadd.f32 %v13762_v10, %v5404_v26  ;;  %v9958_v4 = vpop.f32.mrb[174].mxu1  ;;  %v5220_v53 = vsub.f32 %v5156_v55, %v5188_v31  ;;  %10934 = vrsqrt.f32 %v5314_v22  ;;  %v5190_v7 = vmul.f32 %v14044_v6, %v14044_v6 }
 0x7c5   : > { %v4735_v37 = vpop.f32.mrb[175].mxu1  ;;  %v5475_v27 = vmul.f32 %v14035_v2, %v14035_v2  ;;  %v14050_v36 = vpop.eup %10926  ;;  %v5405_v3 = vmul.f32 %v13757_v21, %v5365_v42  ;;  %10936 = vrsqrt.f32 %v5313_v49  ;;  %v5251_v43 = vmax.f32 %v5219_v32, 0.0 }
 0x7c6   : > { %v5476_v26 = vmul.f32 %v14038_v5, %v14038_v5  ;;  %v10022_v39 = vpop.f32.mrb[174].mxu0  ;;  %v14057_v15 = vpop.eup %10928  ;;  %v5252_v31 = vmax.f32 %v5220_v53, 0.0  ;;  %v15753_v56 = vsub.f32 %v13611_v9, %v13868_v30  ;;  %v14068_v20 = vmul.f32 0.03125, %v4725_v17 }
 0x7c7   : > { %v5120_v41 = vpop.f32.mrb[175].mxu0  ;;  %10054 = vmatprep.mubr.msk.f32.mxu1 %vm457_vm0, %v5475_v27  ;;  %v14066_v42 = vadd.f32 %v13762_v10, %v5405_v3  ;;  %v5158_v22 = vmul.f32 0.03125, %v10019_v54  ;;  %v5157_v25 = vmul.f32 0.03125, %v5110_v11  ;;  %v5315_v27 = vadd.f32 1e-05, %v5251_v43 }
 0x7c8   : > { %v5366_v55 = vmul.f32 %v13960_v51, %v15753_v56  ;;  %10055 = vmatmul.mubr.msk.f32.gmra.mrb[186].mxu1 %vm457_vm0, %v5476_v26  ;;  %v5316_v49 = vadd.f32 1e-05, %v5252_v31  ;;  %v15754_v9 = vsub.f32 %v13601_v34, %v13890_v29  ;;  %v5189_v17 = vmul.f32 %v14068_v20, %v14068_v20 }
 0x7c9   : > { %v14070_v58 = vpop.eup %10930  ;;  %v5477_v26 = vmul.f32 %v14066_v42, %v14066_v42  ;;  %v5285_v54 = vsub.f32 %v13714_v46, %v14068_v20  ;;  %v5222_v11 = vsub.f32 %v5158_v22, %v5190_v7  ;;  %v14089_v29 = vmul.f32 0.03125, %v9958_v4 }
 0x7ca   : > { %v5406_v53 = vmul.f32 %v13757_v21, %v5366_v55  ;;  %v5367_v30 = vmul.f32 %v13978_v38, %v15754_v9  ;;  %v14077_v51 = vpop.eup %10932  ;;  %10938 = vrsqrt.f32 %v5316_v49  ;;  %v5221_v3 = vsub.f32 %v5157_v25, %v5189_v17 }
 0x7cb   : > { %10940 = vrsqrt.f32 %v5315_v27  ;;  %10057 = vmatprep.mubr.msk.f32.mxu1 %vm457_vm0, %v5477_v26  ;;  %v5254_v38 = vmax.f32 %v5222_v11, 0.0  ;;  %v15755_v31 = vsub.f32 %v13607_v16, %v13887_v52  ;;  %v5192_v4 = vmul.f32 %v14089_v29, %v14089_v29 }
 0x7cc   : > { %v14086_v32 = vadd.f32 %v13762_v10, %v5406_v53  ;;  %v5407_v34 = vmul.f32 %v13757_v21, %v5367_v30  ;;  %v5288_v55 = vsub.f32 %v13718_v13, %v14089_v29  ;;  %v5253_v49 = vmax.f32 %v5221_v3, 0.0 }
 0x7cd   : > { %v5368_v43 = vmul.f32 %v13974_v35, %v15755_v31  ;;  %v5318_v22 = vadd.f32 1e-05, %v5254_v38  ;;  %v14106_v27 = vmul.f32 0.03125, %v4735_v37  ;;  %v5160_v52 = vmul.f32 0.03125, %v10022_v39 }
 0x7ce   : > { %v5478_v7 = vmul.f32 %v14086_v32, %v14086_v32  ;;  %v14099_v56 = vadd.f32 %v13762_v10, %v5407_v34  ;;  %v5159_v35 = vmul.f32 0.03125, %v5120_v41  ;;  %v15756_v53 = vsub.f32 %v13630_v63, %v13910_v1  ;;  %v10935_v30 = vpop.eup %10934 }
 0x7cf   : > { %v5408_v25 = vmul.f32 %v13757_v21, %v5368_v43  ;;  %10942 = vrsqrt.f32 %v5318_v22  ;;  %v5317_v26 = vadd.f32 1e-05, %v5253_v49  ;;  %v5191_v37 = vmul.f32 %v14106_v27, %v14106_v27  ;;  %v10937_v11 = vpop.eup %10936 }
 0x7d0   : > { %10058 = vmatmul.mubr.msk.f32.gmra.mrb[188].mxu1 %vm457_vm0, %v5478_v7  ;;  %v5479_v16 = vmul.f32 %v14099_v56, %v14099_v56  ;;  %v5369_v9 = vmul.f32 %v14005_v40, %v15756_v53  ;;  %v5287_v39 = vsub.f32 %v13710_v48, %v14106_v27  ;;  %v5224_v41 = vsub.f32 %v5160_v52, %v5192_v4 }
 0x7d1   : > { %v14116_v17 = vadd.f32 %v13762_v10, %v5408_v25  ;;  %v15757_v1 = vsub.f32 %v13639_v59, %v13906_v28  ;;  %10944 = vrsqrt.f32 %v5317_v26  ;;  %v5223_v38 = vsub.f32 %v5159_v35, %v5191_v37 }
 0x7d2   : > { %10060 = vmatprep.mubr.msk.f32.mxu1 %vm457_vm0, %v5479_v16  ;;  %v5409_v63 = vmul.f32 %v13757_v21, %v5369_v9  ;;  %v15758_v3 = vsub.f32 %v13626_v47, %v13928_v18  ;;  %v5256_v43 = vmax.f32 %v5224_v41, 0.0  ;;  %v15759_v59 = vsub.f32 %v13634_v19, %v13926_v8 }
 0x7d3   : > { %v5370_v40 = vmul.f32 %v14001_v33, %v15757_v1  ;;  %v5480_v34 = vmul.f32 %v14116_v17, %v14116_v17  ;;  %v5255_v33 = vmax.f32 %v5223_v38, 0.0  ;;  %v15760_v47 = vsub.f32 %v13658_v61, %v13948_v24 }
 0x7d4   : > { %v5371_v31 = vmul.f32 %v14032_v14, %v15758_v3  ;;  %v14135_v7 = vadd.f32 %v13762_v10, %v5409_v63  ;;  %v5372_v28 = vmul.f32 %v14026_v44, %v15759_v59  ;;  %v15761_v14 = vld [vmem:[#allocation55_spill] sm:$0xff]  ;;  %v10939_v16 = vpop.eup %10938  ;;  %v5320_v52 = vadd.f32 1e-05, %v5256_v43 }
 0x7d5   : > { %v5410_v4 = vmul.f32 %v13757_v21, %v5370_v40  ;;  %10061 = vmatmul.mubr.msk.f32.gmra.mrb[190].mxu1 %vm457_vm0, %v5480_v34  ;;  %v5373_v18 = vmul.f32 %v14057_v15, %v15760_v47  ;;  %v15762_v49 = vsub.f32 %v13667_v57, %v15761_v14  ;;  %v10941_v35 = vpop.eup %10940  ;;  %v5319_v53 = vadd.f32 1e-05, %v5255_v33  ;;  %v15764_v40 = vld [vmem:[#allocation45_spill] sm:$0xff]  ;;  %v15765_v34 = vld [vmem:[#allocation56_spill] sm:$0xff]  ;;  %v15772_v47 = vld [vmem:[#allocation46_spill] sm:$0xff] }
 0x7d6   : > { %v5411_v22 = vmul.f32 %v13757_v21, %v5371_v31  ;;  %v5481_v19 = vmul.f32 %v14135_v7, %v14135_v7  ;;  %v5412_v44 = vmul.f32 %v13757_v21, %v5372_v28  ;;  %10946 = vrsqrt.f32 %v5320_v52  ;;  %v15770_v33 = vld [vmem:[#allocation61_spill] sm:$0xff] }
 0x7d7   : > { %v5374_v25 = vmul.f32 %v14050_v36, %v15762_v49  ;;  %v14155_v8 = vadd.f32 %v13762_v10, %v5410_v4  ;;  %v5413_v24 = vmul.f32 %v13757_v21, %v5373_v18  ;;  %v15763_v9 = vsub.f32 %v13654_v23, %v13966_v60  ;;  %v15768_v4 = vld [vmem:[#allocation58_spill] sm:$0xff]  ;;  %v15773_v18 = vld [vmem:[#allocation60_spill] sm:$0xff] }
 0x7d8   : > { %v14159_v61 = vadd.f32 %v13762_v10, %v5411_v22  ;;  %10063 = vmatprep.mubr.msk.f32.mxu1 %vm457_vm0, %v5481_v19  ;;  %v14167_v15 = vadd.f32 %v13762_v10, %v5412_v44  ;;  %10948 = vrsqrt.f32 %v5319_v53  ;;  %v15766_v38 = vsub.f32 %v15764_v40, %v15765_v34 }
 0x7d9   : > { %v5414_v57 = vmul.f32 %v13757_v21, %v5374_v25  ;;  %v5482_v36 = vmul.f32 %v14155_v8, %v14155_v8  ;;  %v5375_v26 = vmul.f32 %v14077_v51, %v15763_v9  ;;  %v14176_v41 = vadd.f32 %v13762_v10, %v5413_v24  ;;  %v10943_v3 = vpop.eup %10942 }
 0x7da   : > { %v5483_v37 = vmul.f32 %v14159_v61, %v14159_v61  ;;  %v5376_v23 = vmul.f32 %v14070_v58, %v15766_v38  ;;  %v15767_v60 = vsub.f32 %v13686_v50, %v13990_v0  ;;  %v5484_v31 = vmul.f32 %v14167_v15, %v14167_v15 }
 0x7db   : > { %10064 = vmatmul.mubr.msk.f32.gmra.mrb[192].mxu1 %vm457_vm0, %v5482_v36  ;;  %v14180_v63 = vadd.f32 %v13762_v10, %v5414_v57  ;;  %v5415_v1 = vmul.f32 %v13757_v21, %v5375_v26  ;;  %v5485_v43 = vmul.f32 %v14176_v41, %v14176_v41  ;;  %v15769_v59 = vsub.f32 %v13695_v62, %v15768_v4  ;;  %v10945_v25 = vpop.eup %10944 }
 0x7dc   : > { %v5377_v51 = vmul.f32 %v10937_v11, %v15767_v60  ;;  %10066 = vmatprep.mubr.msk.f32.mxu1 %vm457_vm0, %v5483_v37  ;;  %v15771_v58 = vsub.f32 %v13682_v12, %v15770_v33  ;;  %v5416_v0 = vmul.f32 %v13757_v21, %v5376_v23  ;;  %v15774_v14 = vsub.f32 %v15772_v47, %v15773_v18 }
 0x7dd   : > { %v5378_v28 = vmul.f32 %v10935_v30, %v15769_v59  ;;  %v14202_v50 = vadd.f32 %v13762_v10, %v5415_v1  ;;  %v15775_v62 = vsub.f32 %v13723_v45, %v14044_v6  ;;  %v5486_v45 = vmul.f32 %v14180_v63, %v14180_v63 }
 0x7de   : > { %v5379_v22 = vmul.f32 %v10941_v35, %v15771_v58  ;;  %v5417_v11 = vmul.f32 %v13757_v21, %v5377_v51  ;;  %v5380_v49 = vmul.f32 %v10939_v16, %v15774_v14  ;;  %v5381_v16 = vmul.f32 %v10945_v25, %v5285_v54 }
 0x7df   : > { %v5382_v30 = vmul.f32 %v10943_v3, %v15775_v62  ;;  %10067 = vmatmul.mubr.msk.f32.gmra.mrb[194].mxu1 %vm457_vm0, %v5484_v31  ;;  %v5487_v12 = vmul.f32 %v14202_v50, %v14202_v50  ;;  %v14226_v6 = vadd.f32 %v13762_v10, %v5416_v0  ;;  %v5418_v44 = vmul.f32 %v13757_v21, %v5378_v28  ;;  %v10609_v3 = vld [vmem:[%s15326_s1 + $0x78] sm:$0xff]   ;;  %v15776_v31 = vld [vmem:[#allocation5_spill] sm:$0xff] }
 0x7e0   : > { %10069 = vmatprep.mubr.msk.f32.mxu1 %vm457_vm0, %v5485_v43  ;;  %v14217_v52 = vadd.f32 %v13762_v10, %v5417_v11  ;;  %v5419_v19 = vmul.f32 %v13757_v21, %v5379_v22  ;;  %v10947_v35 = vpop.eup %10946  ;;  %v5421_v20 = vmul.f32 %v13757_v21, %v5381_v16  ;;  %v5420_v9 = vmul.f32 %v13757_v21, %v5380_v49 }
 0x7e1   : > { %v5384_v54 = vmul.f32 %v10947_v35, %v5288_v55  ;;  %v5488_v57 = vmul.f32 %v14226_v6, %v14226_v6  ;;  %v14243_v36 = vadd.f32 %v13762_v10, %v5418_v44  ;;  %v5422_v48 = vmul.f32 %v13757_v21, %v5382_v30  ;;  %10093 = vmatprep.subr.bf16.mxu0 %v10609_v3  ;;  %v15777_v44 = vld [vmem:[#allocation47_spill] sm:$0xff] }
 0x7e2   : > { %v10949_v53 = vpop.eup %10948  ;;  %v5489_v24 = vmul.f32 %v14217_v52, %v14217_v52  ;;  %v14234_v46 = vadd.f32 %v13762_v10, %v5419_v19  ;;  %v14254_v29 = vadd.f32 %v13762_v10, %v5421_v20  ;;  %v14260_v1 = vadd.f32 %v13762_v10, %v5420_v9  ;;  %10094 = vmatpush3.bf16.msra.mxu0 %v10609_v3 }
 0x7e3   : > { %10070 = vmatmul.mubr.msk.f32.gmra.mrb[196].mxu1 %vm457_vm0, %v5486_v45  ;;  %v5383_v26 = vmul.f32 %v10949_v53, %v5287_v39  ;;  %v5490_v37 = vmul.f32 %v14243_v36, %v14243_v36  ;;  %v14273_v34 = vadd.f32 %v13762_v10, %v5422_v48  ;;  %v5424_v38 = vmul.f32 %v13757_v21, %v5384_v54 }
 0x7e4   : > { %10072 = vmatprep.mubr.msk.f32.mxu1 %vm457_vm0, %v5487_v12  ;;  %v5491_v13 = vmul.f32 %v14234_v46, %v14234_v46  ;;  %v5493_v27 = vmul.f32 %v14254_v29, %v14254_v29  ;;  %v5492_v40 = vmul.f32 %v14260_v1, %v14260_v1  ;;  %10520 = vmatprep.subr.bf16.mxu0 %v15776_v31  ;;  %v14294_v33 = vstv %s8651_s10 }
 0x7e5   : > { %v5423_v55 = vmul.f32 %v13757_v21, %v5383_v26  ;;  %v5494_v60 = vmul.f32 %v14273_v34, %v14273_v34  ;;  %v14283_v51 = vadd.f32 %v13762_v10, %v5424_v38 }
 0x7e7   : > { %10073 = vmatmul.mubr.msk.f32.gmra.mrb[198].mxu1 %vm457_vm0, %v5488_v57  ;;  %v14268_v39 = vadd.f32 %v13762_v10, %v5423_v55  ;;  %v5496_v21 = vmul.f32 %v14283_v51, %v14283_v51 }
 0x7e8   : > { %10075 = vmatprep.mubr.msk.f32.mxu1 %vm457_vm0, %v5489_v24  ;;  %v15778_v24 = vld [vmem:[#allocation48_spill] sm:$0xff] }
 0x7e9   : > { %v5495_v23 = vmul.f32 %v14268_v39, %v14268_v39 }
 0x7eb   : > { %10076 = vmatmul.mubr.msk.f32.gmra.mrb[200].mxu1 %vm457_vm0, %v5490_v37  ;;  %v15780_v37 = vld [vmem:[#allocation50_spill] sm:$0xff] }
 0x7ec   : > { %10078 = vmatprep.mubr.msk.f32.mxu1 %vm457_vm0, %v5491_v13  ;;  %v15779_v13 = vld [vmem:[#allocation49_spill] sm:$0xff] }
 0x7ef   : > { %10079 = vmatmul.mubr.msk.f32.gmra.mrb[202].mxu1 %vm457_vm0, %v5492_v40 }
 0x7f0   : > { %10081 = vmatprep.mubr.msk.f32.mxu1 %vm457_vm0, %v5493_v27 }
 0x7f3   : > { %10082 = vmatmul.mubr.msk.f32.gmra.mrb[204].mxu1 %vm457_vm0, %v5494_v60 }
 0x7f4   : > { %10084 = vmatprep.mubr.msk.f32.mxu1 %vm457_vm0, %v5495_v23  ;;  %v15781_v23 = vld [vmem:[#allocation6_spill] sm:$0xff] }
 0x7f7   : > { %10085 = vmatmul.mubr.msk.f32.gmra.mrb[206].mxu1 %vm457_vm0, %v5496_v21  ;;  %v15782_v21 = vld [vmem:[#allocation7_spill] sm:$0xff] }
 0x856   : > { %v10041_v43 = vpop.f32.mrb[176].mxu1 }
 0x857   : > { %10950 = vrsqrt.f32 %v10041_v43  ;;  %v5659_v10 = vpop.f32.mrb[177].mxu1 }
 0x858   : > { %10952 = vrsqrt.f32 %v5659_v10 }
 0x85a   : > { %v10044_v4 = vpop.f32.mrb[178].mxu1 }
 0x85b   : > { %10954 = vrsqrt.f32 %v10044_v4  ;;  %v5669_v59 = vpop.f32.mrb[179].mxu1 }
 0x85c   : > { %10956 = vrsqrt.f32 %v5669_v59 }
 0x861   : > { %v10951_v28 = vpop.eup %10950 }
 0x862   : > { %v10953_v58 = vpop.eup %10952  ;;  %v5851_v22 = vmul.f32 %v10951_v28, %v10041_v43 }
 0x863   : > { %v5850_v0 = vmul.f32 %v10953_v58, %v5659_v10  ;;  %v15783_v10 = vld [vmem:[#allocation8_spill] sm:$0xff] }
 0x864   : > { %v5885_v11 = vsub.f32 %v5851_v22, %v14294_v33 }
 0x865   : > { %v10955_v47 = vpop.eup %10954  ;;  %v5884_v18 = vsub.f32 %v5850_v0, %v14294_v33 }
 0x866   : > { %v10957_v14 = vpop.eup %10956  ;;  %v5917_v49 = vmax.f32 %v5885_v11, 0.0  ;;  %v5853_v25 = vmul.f32 %v10955_v47, %v10044_v4 }
 0x867   : > { %v5916_v62 = vmax.f32 %v5884_v18, 0.0  ;;  %v5852_v30 = vmul.f32 %v10957_v14, %v5669_v59 }
 0x868   : > { %v5949_v12 = vmul.f32 %v10951_v28, %v5917_v49  ;;  %v5887_v19 = vsub.f32 %v5853_v25, %v14294_v33  ;;  %v15784_v25 = vld [vmem:[#allocation52_spill] sm:$0xff] }
 0x869   : > { %v5948_v16 = vmul.f32 %v10953_v58, %v5916_v62  ;;  %v5886_v45 = vsub.f32 %v5852_v30, %v14294_v33 }
 0x86a   : > { %v5981_v35 = vmul.f32 %v5949_v12, %v15777_v44  ;;  %v5919_v53 = vmax.f32 %v5887_v19, 0.0  ;;  %v15785_v12 = vld [vmem:[#allocation51_spill] sm:$0xff] }
 0x86b   : > { %v5980_v20 = vmul.f32 %v5948_v16, %v15778_v24  ;;  %v5918_v54 = vmax.f32 %v5886_v45, 0.0 }
 0x86c   : > { %v5951_v57 = vmul.f32 %v10955_v47, %v5919_v53 }
 0x86d   : > { %v5950_v9 = vmul.f32 %v10957_v14, %v5918_v54  ;;  %v6012_v26 = vpack.c.bf16 %v5981_v35, %v5980_v20  ;;  %v15786_v54 = vld [vmem:[#allocation54_spill] sm:$0xff] }
 0x86e   : > { %v5983_v55 = vmul.f32 %v5951_v57, %v15779_v13 }
 0x86f   : > { %v5982_v48 = vmul.f32 %v5950_v9, %v15780_v37  ;;  %10095 = vmatprep.mubr.msk.bf16.mxu0 %vm457_vm0, %v6012_v26  ;;  %v15787_v26 = vld [vmem:[#allocation53_spill] sm:$0xff] }
 0x871   : > { %v6013_v27 = vpack.c.bf16 %v5983_v55, %v5982_v48 }
 0x873   : > { %10096 = vmatmul.mubr.msk.bf16.vlgmr.msra.gmra.mrb[176].mxu0 %vm457_vm0, %v6013_v27 }
 0x874   : > { %10522 = vmatpush3.bf16.msra.mxu0 %v15776_v31 }
 0x875   : > { %v10047_v40 = vpop.f32.mrb[180].mxu1  ;;  %10524 = vmatprep.subr.bf16.mxu0 %v15781_v23 }
 0x876   : > { %10958 = vrsqrt.f32 %v10047_v40  ;;  %v5679_v38 = vpop.f32.mrb[181].mxu1 }
 0x877   : > { %10960 = vrsqrt.f32 %v5679_v38 }
 0x878   : > { %10526 = vmatpush3.bf16.msra.mxu0 %v15781_v23 }
 0x879   : > { %v10050_v60 = vpop.f32.mrb[182].mxu1  ;;  %10528 = vmatprep.subr.bf16.mxu0 %v15782_v21 }
 0x87a   : > { %10962 = vrsqrt.f32 %v10050_v60  ;;  %v5689_v3 = vpop.f32.mrb[183].mxu1 }
 0x87b   : > { %10964 = vrsqrt.f32 %v5689_v3 }
 0x87c   : > { %10530 = vmatpush3.bf16.msra.mxu0 %v15782_v21 }
 0x87d   : > { %10532 = vmatprep.subr.bf16.mxu0 %v15783_v10 }
 0x880   : > { %v10959_v43 = vpop.eup %10958  ;;  %10534 = vmatpush3.bf16.msra.mxu0 %v15783_v10 }
 0x881   : > { %v10961_v4 = vpop.eup %10960  ;;  %v5855_v59 = vmul.f32 %v10959_v43, %v10047_v40 }
 0x882   : > { %v5854_v28 = vmul.f32 %v10961_v4, %v5679_v38 }
 0x883   : > { %v5889_v31 = vsub.f32 %v5855_v59, %v14294_v33 }
 0x884   : > { %v5888_v58 = vsub.f32 %v5854_v28, %v14294_v33  ;;  %v10963_v11 = vpop.eup %10962 }
 0x885   : > { %v5921_v22 = vmax.f32 %v5889_v31, 0.0  ;;  %v10965_v18 = vpop.eup %10964  ;;  %v5857_v49 = vmul.f32 %v10963_v11, %v10050_v60 }
 0x886   : > { %v5920_v0 = vmax.f32 %v5888_v58, 0.0  ;;  %v5856_v30 = vmul.f32 %v10965_v18, %v5689_v3 }
 0x887   : > { %v5953_v47 = vmul.f32 %v10959_v43, %v5921_v22  ;;  %v5891_v16 = vsub.f32 %v5857_v49, %v14294_v33  ;;  %v15788_v22 = vld [vmem:[#allocation59_spill] sm:$0xff] }
 0x888   : > { %v5952_v14 = vmul.f32 %v10961_v4, %v5920_v0  ;;  %v5890_v45 = vsub.f32 %v5856_v30, %v14294_v33 }
 0x889   : > { %v5985_v62 = vmul.f32 %v5953_v47, %v15784_v25  ;;  %v5923_v44 = vmax.f32 %v5891_v16, 0.0  ;;  %v15789_v47 = vld [vmem:[#allocation57_spill] sm:$0xff] }
 0x88a   : > { %v5984_v19 = vmul.f32 %v5952_v14, %v15785_v12  ;;  %v5922_v53 = vmax.f32 %v5890_v45, 0.0 }
 0x88b   : > { %v5955_v24 = vmul.f32 %v10963_v11, %v5923_v44 }
 0x88c   : > { %v6014_v35 = vpack.c.bf16 %v5985_v62, %v5984_v19  ;;  %v5954_v20 = vmul.f32 %v10965_v18, %v5922_v53 }
 0x88d   : > { %v5987_v57 = vmul.f32 %v5955_v24, %v15786_v54 }
 0x88e   : > { %10099 = vmatprep.mubr.msk.bf16.mxu0 %vm457_vm0, %v6014_v35  ;;  %v5986_v13 = vmul.f32 %v5954_v20, %v15787_v26 }
 0x890   : > { %v10053_v9 = vpop.f32.mrb[184].mxu1  ;;  %v6015_v37 = vpack.c.bf16 %v5987_v57, %v5986_v13 }
 0x891   : > { %10966 = vrsqrt.f32 %v10053_v9  ;;  %v5699_v55 = vpop.f32.mrb[185].mxu1 }
 0x892   : > { %10968 = vrsqrt.f32 %v5699_v55  ;;  %10100 = vmatmul.mubr.msk.bf16.gmra.mrb[180].mxu0 %vm457_vm0, %v6015_v37 }
 0x89b   : > { %v10056_v48 = vpop.f32.mrb[186].mxu1  ;;  %v10967_v40 = vpop.eup %10966 }
 0x89c   : > { %10970 = vrsqrt.f32 %v10056_v48  ;;  %v5709_v27 = vpop.f32.mrb[187].mxu1  ;;  %v10969_v38 = vpop.eup %10968  ;;  %v5859_v23 = vmul.f32 %v10967_v40, %v10053_v9 }
 0x89d   : > { %10972 = vrsqrt.f32 %v5709_v27  ;;  %v5858_v60 = vmul.f32 %v10969_v38, %v5699_v55 }
 0x89e   : > { %v5893_v21 = vsub.f32 %v5859_v23, %v14294_v33 }
 0x89f   : > { %v5892_v3 = vsub.f32 %v5858_v60, %v14294_v33 }
 0x8a0   : > { %v5925_v43 = vmax.f32 %v5893_v21, 0.0 }
 0x8a1   : > { %v5924_v4 = vmax.f32 %v5892_v3, 0.0 }
 0x8a2   : > { %v5957_v28 = vmul.f32 %v10967_v40, %v5925_v43 }
 0x8a3   : > { %v10059_v10 = vpop.f32.mrb[188].mxu1  ;;  %v5956_v31 = vmul.f32 %v10969_v38, %v5924_v4 }
 0x8a4   : > { %10974 = vrsqrt.f32 %v10059_v10  ;;  %v5719_v59 = vpop.f32.mrb[189].mxu1  ;;  %v5989_v0 = vmul.f32 %v5957_v28, %v15788_v22 }
 0x8a5   : > { %10976 = vrsqrt.f32 %v5719_v59  ;;  %v5988_v18 = vmul.f32 %v5956_v31, %v15789_v47 }
 0x8a6   : > { %v10971_v58 = vpop.eup %10970 }
 0x8a7   : > { %v10973_v11 = vpop.eup %10972  ;;  %v5861_v14 = vmul.f32 %v10971_v58, %v10056_v48  ;;  %v6016_v12 = vpack.c.bf16 %v5989_v0, %v5988_v18 }
 0x8a8   : > { %v10062_v49 = vpop.f32.mrb[190].mxu1  ;;  %v5860_v25 = vmul.f32 %v10973_v11, %v5709_v27 }
 0x8a9   : > { %10978 = vrsqrt.f32 %v10062_v49  ;;  %v5729_v62 = vpop.f32.mrb[191].mxu1  ;;  %v5895_v30 = vsub.f32 %v5861_v14, %v14294_v33  ;;  %10103 = vmatprep.mubr.msk.bf16.mxu0 %vm457_vm0, %v6016_v12 }
 0x8aa   : > { %10980 = vrsqrt.f32 %v5729_v62  ;;  %v5894_v19 = vsub.f32 %v5860_v25, %v14294_v33 }
 0x8ab   : > { %v5927_v16 = vmax.f32 %v5895_v30, 0.0 }
 0x8ac   : > { %v5926_v45 = vmax.f32 %v5894_v19, 0.0 }
 0x8ad   : > { %v5959_v53 = vmul.f32 %v10971_v58, %v5927_v16 }
 0x8ae   : > { %v10065_v44 = vpop.f32.mrb[192].mxu1  ;;  %v10975_v35 = vpop.eup %10974  ;;  %v5958_v54 = vmul.f32 %v10973_v11, %v5926_v45 }
 0x8af   : > { %10982 = vrsqrt.f32 %v10065_v44  ;;  %v5739_v24 = vpop.f32.mrb[193].mxu1  ;;  %v10977_v20 = vpop.eup %10976  ;;  %v5863_v57 = vmul.f32 %v10975_v35, %v10059_v10  ;;  %v5991_v9 = vmul.f32 %v5959_v53, %v14038_v5 }
 0x8b0   : > { %10984 = vrsqrt.f32 %v5739_v24  ;;  %v5862_v26 = vmul.f32 %v10977_v20, %v5719_v59  ;;  %v5990_v13 = vmul.f32 %v5958_v54, %v14035_v2 }
 0x8b1   : > { %v5897_v55 = vsub.f32 %v5863_v57, %v14294_v33 }
 0x8b2   : > { %v10068_v37 = vpop.f32.mrb[194].mxu1  ;;  %v5896_v48 = vsub.f32 %v5862_v26, %v14294_v33  ;;  %v6017_v23 = vpack.c.bf16 %v5991_v9, %v5990_v13 }
 0x8b3   : > { %10986 = vrsqrt.f32 %v10068_v37  ;;  %v5749_v27 = vpop.f32.mrb[195].mxu1  ;;  %v10979_v40 = vpop.eup %10978  ;;  %v5929_v38 = vmax.f32 %v5897_v55, 0.0 }
 0x8b4   : > { %10988 = vrsqrt.f32 %v5749_v27  ;;  %v10981_v60 = vpop.eup %10980  ;;  %v5928_v21 = vmax.f32 %v5896_v48, 0.0  ;;  %v5865_v3 = vmul.f32 %v10979_v40, %v10062_v49  ;;  %10104 = vmatmul.mubr.msk.bf16.gmra.mrb[184].mxu0 %vm457_vm0, %v6017_v23 }
 0x8b5   : > { %v5961_v43 = vmul.f32 %v10975_v35, %v5929_v38  ;;  %v5864_v10 = vmul.f32 %v10981_v60, %v5729_v62 }
 0x8b6   : > { %v10071_v5 = vpop.f32.mrb[196].mxu1  ;;  %v5960_v2 = vmul.f32 %v10977_v20, %v5928_v21  ;;  %v5899_v4 = vsub.f32 %v5865_v3, %v14294_v33 }
 0x8b7   : > { %10990 = vrsqrt.f32 %v10071_v5  ;;  %v5759_v59 = vpop.f32.mrb[197].mxu1  ;;  %v5993_v28 = vmul.f32 %v5961_v43, %v14086_v32  ;;  %v5898_v31 = vsub.f32 %v5864_v10, %v14294_v33 }
 0x8b8   : > { %10992 = vrsqrt.f32 %v5759_v59  ;;  %v5992_v22 = vmul.f32 %v5960_v2, %v14066_v42  ;;  %v5931_v0 = vmax.f32 %v5899_v4, 0.0 }
 0x8b9   : > { %v10983_v58 = vpop.eup %10982  ;;  %v5930_v47 = vmax.f32 %v5898_v31, 0.0 }
 0x8ba   : > { %v10985_v11 = vpop.eup %10984  ;;  %v5867_v18 = vmul.f32 %v10983_v58, %v10065_v44  ;;  %v10074_v14 = vpop.f32.mrb[198].mxu1  ;;  %v5963_v49 = vmul.f32 %v10979_v40, %v5931_v0  ;;  %v6018_v30 = vpack.c.bf16 %v5993_v28, %v5992_v22 }
 0x8bb   : > { %v5866_v25 = vmul.f32 %v10985_v11, %v5739_v24  ;;  %10994 = vrsqrt.f32 %v10074_v14  ;;  %v5769_v62 = vpop.f32.mrb[199].mxu1  ;;  %v5962_v12 = vmul.f32 %v10981_v60, %v5930_v47 }
 0x8bc   : > { %v5901_v19 = vsub.f32 %v5867_v18, %v14294_v33  ;;  %10996 = vrsqrt.f32 %v5769_v62  ;;  %v5995_v16 = vmul.f32 %v5963_v49, %v14116_v17  ;;  %10107 = vmatprep.mubr.msk.bf16.mxu0 %vm457_vm0, %v6018_v30 }
 0x8bd   : > { %v10987_v32 = vpop.eup %10986  ;;  %v5900_v45 = vsub.f32 %v5866_v25, %v14294_v33  ;;  %v5994_v44 = vmul.f32 %v5962_v12, %v14099_v56 }
 0x8be   : > { %v10989_v42 = vpop.eup %10988  ;;  %v5933_v35 = vmax.f32 %v5901_v19, 0.0  ;;  %v5869_v53 = vmul.f32 %v10987_v32, %v10068_v37  ;;  %v10077_v24 = vpop.f32.mrb[200].mxu1 }
 0x8bf   : > { %v5932_v20 = vmax.f32 %v5900_v45, 0.0  ;;  %v5868_v54 = vmul.f32 %v10989_v42, %v5749_v27  ;;  %10998 = vrsqrt.f32 %v10077_v24  ;;  %v5779_v57 = vpop.f32.mrb[201].mxu1  ;;  %v6019_v13 = vpack.c.bf16 %v5995_v16, %v5994_v44 }
 0x8c0   : > { %v5965_v9 = vmul.f32 %v10983_v58, %v5933_v35  ;;  %v5903_v26 = vsub.f32 %v5869_v53, %v14294_v33  ;;  %11000 = vrsqrt.f32 %v5779_v57 }
 0x8c1   : > { %v10991_v17 = vpop.eup %10990  ;;  %v5964_v55 = vmul.f32 %v10985_v11, %v5932_v20  ;;  %v5902_v48 = vsub.f32 %v5868_v54, %v14294_v33  ;;  %10108 = vmatmul.mubr.msk.bf16.gmra.mrb[188].mxu0 %vm457_vm0, %v6019_v13 }
 0x8c2   : > { %v10993_v40 = vpop.eup %10992  ;;  %v5997_v38 = vmul.f32 %v5965_v9, %v14155_v8  ;;  %v5935_v56 = vmax.f32 %v5903_v26, 0.0  ;;  %v5871_v23 = vmul.f32 %v10991_v17, %v10071_v5  ;;  %v10080_v37 = vpop.f32.mrb[202].mxu1 }
 0x8c3   : > { %v5996_v27 = vmul.f32 %v5964_v55, %v14135_v7  ;;  %v5934_v60 = vmax.f32 %v5902_v48, 0.0  ;;  %v5870_v21 = vmul.f32 %v10993_v40, %v5759_v59  ;;  %11002 = vrsqrt.f32 %v10080_v37  ;;  %v5789_v3 = vpop.f32.mrb[203].mxu1 }
 0x8c4   : > { %v5967_v43 = vmul.f32 %v10987_v32, %v5935_v56  ;;  %v5905_v10 = vsub.f32 %v5871_v23, %v14294_v33  ;;  %11004 = vrsqrt.f32 %v5789_v3 }
 0x8c5   : > { %v10995_v2 = vpop.eup %10994  ;;  %v5966_v4 = vmul.f32 %v10989_v42, %v5934_v60  ;;  %v5904_v28 = vsub.f32 %v5870_v21, %v14294_v33  ;;  %v6020_v8 = vpack.c.bf16 %v5997_v38, %v5996_v27 }
 0x8c6   : > { %v10997_v31 = vpop.eup %10996  ;;  %v5999_v5 = vmul.f32 %v5967_v43, %v14167_v15  ;;  %v5937_v58 = vmax.f32 %v5905_v10, 0.0  ;;  %v5873_v22 = vmul.f32 %v10995_v2, %v10074_v14  ;;  %v10083_v0 = vpop.f32.mrb[204].mxu1 }
 0x8c7   : > { %v5998_v7 = vmul.f32 %v5966_v4, %v14159_v61  ;;  %v5936_v59 = vmax.f32 %v5904_v28, 0.0  ;;  %v5872_v11 = vmul.f32 %v10997_v31, %v5769_v62  ;;  %11006 = vrsqrt.f32 %v10083_v0  ;;  %v5799_v47 = vpop.f32.mrb[205].mxu1  ;;  %10111 = vmatprep.mubr.msk.bf16.mxu0 %vm457_vm0, %v6020_v8 }
 0x8c8   : > { %v5969_v18 = vmul.f32 %v10991_v17, %v5937_v58  ;;  %v5907_v49 = vsub.f32 %v5873_v22, %v14294_v33  ;;  %11008 = vrsqrt.f32 %v5799_v47 }
 0x8c9   : > { %v10999_v25 = vpop.eup %10998  ;;  %v5968_v30 = vmul.f32 %v10993_v40, %v5936_v59  ;;  %v5906_v12 = vsub.f32 %v5872_v11, %v14294_v33  ;;  %v6021_v15 = vpack.c.bf16 %v5999_v5, %v5998_v7 }
 0x8ca   : > { %v11001_v19 = vpop.eup %11000  ;;  %v6001_v14 = vmul.f32 %v5969_v18, %v14180_v63  ;;  %v5939_v32 = vmax.f32 %v5907_v49, 0.0  ;;  %v5875_v61 = vmul.f32 %v10999_v25, %v10077_v24  ;;  %v10086_v16 = vpop.f32.mrb[206].mxu1 }
 0x8cb   : > { %v6000_v62 = vmul.f32 %v5968_v30, %v14176_v41  ;;  %v5938_v45 = vmax.f32 %v5906_v12, 0.0  ;;  %v5874_v42 = vmul.f32 %v11001_v19, %v5779_v57  ;;  %11010 = vrsqrt.f32 %v10086_v16  ;;  %v5809_v44 = vpop.f32.mrb[207].mxu1  ;;  %10112 = vmatmul.mubr.msk.bf16.gmra.mrb[192].mxu0 %vm457_vm0, %v6021_v15 }
 0x8cc   : > { %v5971_v35 = vmul.f32 %v10995_v2, %v5939_v32  ;;  %v5909_v53 = vsub.f32 %v5875_v61, %v14294_v33  ;;  %11012 = vrsqrt.f32 %v5809_v44 }
 0x8cd   : > { %v11003_v20 = vpop.eup %11002  ;;  %v5970_v54 = vmul.f32 %v10997_v31, %v5938_v45  ;;  %v5908_v9 = vsub.f32 %v5874_v42, %v14294_v33  ;;  %v6022_v63 = vpack.c.bf16 %v6001_v14, %v6000_v62  ;;  %v15790_v45 = vld [vmem:[#allocation9_spill] sm:$0xff]  ;;  %v15791_v42 = vld [vmem:[#allocation10_spill] sm:$0xff] }
 0x8ce   : > { %v11005_v26 = vpop.eup %11004  ;;  %v6003_v24 = vmul.f32 %v5971_v35, %v14226_v6  ;;  %v5941_v13 = vmax.f32 %v5909_v53, 0.0  ;;  %v5877_v41 = vmul.f32 %v11003_v20, %v10080_v37  ;;  %v15792_v35 = vld [vmem:[#allocation11_spill] sm:$0xff]  ;;  %v15793_v53 = vld [vmem:[#allocation24_spill] sm:$0xff] }
 0x8cf   : > { %v6002_v57 = vmul.f32 %v5970_v54, %v14202_v50  ;;  %v5940_v17 = vmax.f32 %v5908_v9, 0.0  ;;  %v5876_v55 = vmul.f32 %v11005_v26, %v5789_v3  ;;  %10115 = vmatprep.mubr.msk.bf16.mxu0 %vm457_vm0, %v6022_v63 }
 0x8d0   : > { %v5973_v48 = vmul.f32 %v10999_v25, %v5941_v13  ;;  %v5911_v40 = vsub.f32 %v5877_v41, %v14294_v33 }
 0x8d1   : > { %v11007_v38 = vpop.eup %11006  ;;  %v5972_v56 = vmul.f32 %v11001_v19, %v5940_v17  ;;  %v5910_v23 = vsub.f32 %v5876_v55, %v14294_v33  ;;  %v6023_v27 = vpack.c.bf16 %v6003_v24, %v6002_v57 }
 0x8d2   : > { %v11009_v60 = vpop.eup %11008  ;;  %v6005_v21 = vmul.f32 %v5973_v48, %v14243_v36  ;;  %v5943_v6 = vmax.f32 %v5911_v40, 0.0  ;;  %v5879_v43 = vmul.f32 %v11007_v38, %v10083_v0 }
 0x8d3   : > { %v6004_v37 = vmul.f32 %v5972_v56, %v14217_v52  ;;  %v5942_v50 = vmax.f32 %v5910_v23, 0.0  ;;  %v5878_v10 = vmul.f32 %v11009_v60, %v5799_v47  ;;  %10116 = vmatmul.mubr.msk.bf16.gmra.mrb[196].mxu0 %vm457_vm0, %v6023_v27 }
 0x8d4   : > { %v5975_v3 = vmul.f32 %v11003_v20, %v5943_v6  ;;  %v5913_v2 = vsub.f32 %v5879_v43, %v14294_v33 }
 0x8d5   : > { %v11011_v4 = vpop.eup %11010  ;;  %v5974_v28 = vmul.f32 %v11005_v26, %v5942_v50  ;;  %v5912_v8 = vsub.f32 %v5878_v10, %v14294_v33  ;;  %v6024_v31 = vpack.c.bf16 %v6005_v21, %v6004_v37 }
 0x8d6   : > { %v11013_v5 = vpop.eup %11012  ;;  %v6007_v58 = vmul.f32 %v5975_v3, %v14260_v1  ;;  %v5945_v36 = vmax.f32 %v5913_v2, 0.0  ;;  %v5881_v22 = vmul.f32 %v11011_v4, %v10086_v16 }
 0x8d7   : > { %v6006_v0 = vmul.f32 %v5974_v28, %v14234_v46  ;;  %v5944_v52 = vmax.f32 %v5912_v8, 0.0  ;;  %v5880_v7 = vmul.f32 %v11013_v5, %v5809_v44  ;;  %10119 = vmatprep.mubr.msk.bf16.mxu0 %vm457_vm0, %v6024_v31 }
 0x8d8   : > { %v5977_v59 = vmul.f32 %v11007_v38, %v5945_v36  ;;  %v5915_v11 = vsub.f32 %v5881_v22, %v14294_v33 }
 0x8d9   : > { %v5976_v47 = vmul.f32 %v11009_v60, %v5944_v52  ;;  %v5914_v18 = vsub.f32 %v5880_v7, %v14294_v33  ;;  %v6025_v49 = vpack.c.bf16 %v6007_v58, %v6006_v0 }
 0x8da   : > { %v6009_v25 = vmul.f32 %v5977_v59, %v14273_v34  ;;  %v5947_v30 = vmax.f32 %v5915_v11, 0.0 }
 0x8db   : > { %v6008_v1 = vmul.f32 %v5976_v47, %v14254_v29  ;;  %v5946_v12 = vmax.f32 %v5914_v18, 0.0  ;;  %10120 = vmatmul.mubr.msk.bf16.gmra.mrb[200].mxu0 %vm457_vm0, %v6025_v49 }
 0x8dc   : > { %v5979_v46 = vmul.f32 %v11011_v4, %v5947_v30 }
 0x8dd   : > { %v5978_v15 = vmul.f32 %v11013_v5, %v5946_v12  ;;  %v6026_v19 = vpack.c.bf16 %v6009_v25, %v6008_v1 }
 0x8de   : > { %v6011_v14 = vmul.f32 %v5979_v46, %v14283_v51 }
 0x8df   : > { %v6010_v32 = vmul.f32 %v5978_v15, %v14268_v39  ;;  %10123 = vmatprep.mubr.msk.bf16.mxu0 %vm457_vm0, %v6026_v19 }
 0x8e1   : > { %v6027_v61 = vpack.c.bf16 %v6011_v14, %v6010_v32 }
 0x8e3   : > { %10124 = vmatmul.mubr.msk.bf16.gmra.mrb[204].mxu0 %vm457_vm0, %v6027_v61 }
 0x946   : > { %v14383_v33 = vpop.f32.mrb[176].mxu0 }
 0x947   : > { %v14385_v34 = vpop.f32.mrb[177].mxu0  ;;  %v6625_v62 = vmul.f32 %v14383_v33, %v14383_v33 }
 0x948   : > { %v6623_v29 = vmul.f32 %v14385_v34, %v14385_v34  ;;  %v14389_v16 = vpop.f32.mrb[178].mxu0  ;;  %10143 = vmatprep.mubr.msk.f32.mxu1 %vm457_vm0, %v14385_v34 }
 0x949   : > { %v14393_v51 = vpop.f32.mrb[179].mxu0  ;;  %v6626_v44 = vmul.f32 %v14389_v16, %v14389_v16 }
 0x94a   : > { %v6624_v39 = vmul.f32 %v14393_v51, %v14393_v51  ;;  %10144 = vmatmul.mubr.msk.f32.vlgmr.msra.gmra.mrb[208].mxu1 %vm457_vm0, %v14393_v51  ;;  %10207 = vmatprep.mubr.msk.f32.mxu0 %vm457_vm0, %v6623_v29 }
 0x94b   : > { %10146 = vmatprep.mubr.msk.f32.mxu1 %vm457_vm0, %v14383_v33  ;;  %10538 = vmatpush3.bf16.msra.mxu1 %v15790_v45 }
 0x94c   : > { %10208 = vmatmul.mubr.msk.f32.vlgmr.msra.gmra.mrb[208].mxu0 %vm457_vm0, %v6624_v39  ;;  %10540 = vmatprep.subr.bf16.mxu1 %v15791_v42 }
 0x94d   : > { %10210 = vmatprep.mubr.msk.f32.mxu0 %vm457_vm0, %v6625_v62 }
 0x94e   : > { %10147 = vmatmul.mubr.msk.f32.gmra.mrb[210].mxu1 %vm457_vm0, %v14389_v16 }
 0x94f   : > { %10542 = vmatpush3.bf16.msra.mxu1 %v15791_v42 }
 0x950   : > { %10211 = vmatmul.mubr.msk.f32.gmra.mrb[210].mxu0 %vm457_vm0, %v6626_v44  ;;  %10544 = vmatprep.subr.bf16.mxu1 %v15792_v35 }
 0x953   : > { %10546 = vmatpush3.bf16.msra.mxu1 %v15792_v35 }
 0x954   : > { %10548 = vmatprep.subr.bf16.mxu1 %v15793_v53 }
 0x957   : > { %10550 = vmatpush3.bf16.msra.mxu1 %v15793_v53 }
 0x965   : > { %v14418_v20 = vpop.f32.mrb[180].mxu0 }
 0x966   : > { %v14420_v54 = vpop.f32.mrb[181].mxu0  ;;  %v6629_v13 = vmul.f32 %v14418_v20, %v14418_v20 }
 0x967   : > { %v6627_v9 = vmul.f32 %v14420_v54, %v14420_v54  ;;  %v14424_v63 = vpop.f32.mrb[182].mxu0  ;;  %10149 = vmatprep.mubr.msk.f32.mxu1 %vm457_vm0, %v14420_v54 }
 0x968   : > { %v14428_v26 = vpop.f32.mrb[183].mxu0  ;;  %v6630_v41 = vmul.f32 %v14424_v63, %v14424_v63 }
 0x969   : > { %v6628_v24 = vmul.f32 %v14428_v26, %v14428_v26  ;;  %10150 = vmatmul.mubr.msk.f32.gmra.mrb[212].mxu1 %vm457_vm0, %v14428_v26  ;;  %10213 = vmatprep.mubr.msk.f32.mxu0 %vm457_vm0, %v6627_v9 }
 0x96a   : > { %10152 = vmatprep.mubr.msk.f32.mxu1 %vm457_vm0, %v14418_v20 }
 0x96b   : > { %10214 = vmatmul.mubr.msk.f32.gmra.mrb[212].mxu0 %vm457_vm0, %v6628_v24 }
 0x96c   : > { %10216 = vmatprep.mubr.msk.f32.mxu0 %vm457_vm0, %v6629_v13 }
 0x96d   : > { %10153 = vmatmul.mubr.msk.f32.gmra.mrb[214].mxu1 %vm457_vm0, %v14424_v63 }
 0x96f   : > { %10217 = vmatmul.mubr.msk.f32.gmra.mrb[214].mxu0 %vm457_vm0, %v6630_v41 }
 0x987   : > { %v14446_v57 = vpop.f32.mrb[184].mxu0 }
 0x988   : > { %v14448_v17 = vpop.f32.mrb[185].mxu0  ;;  %v6633_v56 = vmul.f32 %v14446_v57, %v14446_v57 }
 0x989   : > { %v6631_v55 = vmul.f32 %v14448_v17, %v14448_v17  ;;  %v14452_v48 = vpop.f32.mrb[186].mxu0  ;;  %10155 = vmatprep.mubr.msk.f32.mxu1 %vm457_vm0, %v14448_v17 }
 0x98a   : > { %v14456_v40 = vpop.f32.mrb[187].mxu0  ;;  %v6634_v23 = vmul.f32 %v14452_v48, %v14452_v48 }
 0x98b   : > { %v6632_v38 = vmul.f32 %v14456_v40, %v14456_v40  ;;  %10156 = vmatmul.mubr.msk.f32.gmra.mrb[216].mxu1 %vm457_vm0, %v14456_v40  ;;  %10219 = vmatprep.mubr.msk.f32.mxu0 %vm457_vm0, %v6631_v55 }
 0x98c   : > { %10158 = vmatprep.mubr.msk.f32.mxu1 %vm457_vm0, %v14446_v57 }
 0x98d   : > { %10220 = vmatmul.mubr.msk.f32.gmra.mrb[216].mxu0 %vm457_vm0, %v6632_v38 }
 0x98e   : > { %10222 = vmatprep.mubr.msk.f32.mxu0 %vm457_vm0, %v6633_v56 }
 0x98f   : > { %10159 = vmatmul.mubr.msk.f32.gmra.mrb[218].mxu1 %vm457_vm0, %v14452_v48 }
 0x991   : > { %10223 = vmatmul.mubr.msk.f32.gmra.mrb[218].mxu0 %vm457_vm0, %v6634_v23 }
 0x994   : > { %v14474_v27 = vpop.f32.mrb[188].mxu0 }
 0x995   : > { %v14476_v60 = vpop.f32.mrb[189].mxu0  ;;  %v6637_v50 = vmul.f32 %v14474_v27, %v14474_v27 }
 0x996   : > { %v6635_v21 = vmul.f32 %v14476_v60, %v14476_v60  ;;  %v14480_v6 = vpop.f32.mrb[190].mxu0  ;;  %10161 = vmatprep.mubr.msk.f32.mxu1 %vm457_vm0, %v14476_v60 }
 0x997   : > { %v14484_v43 = vpop.f32.mrb[191].mxu0  ;;  %v6638_v10 = vmul.f32 %v14480_v6, %v14480_v6 }
 0x998   : > { %v6636_v37 = vmul.f32 %v14484_v43, %v14484_v43  ;;  %10162 = vmatmul.mubr.msk.f32.gmra.mrb[220].mxu1 %vm457_vm0, %v14484_v43  ;;  %10225 = vmatprep.mubr.msk.f32.mxu0 %vm457_vm0, %v6635_v21 }
 0x999   : > { %10164 = vmatprep.mubr.msk.f32.mxu1 %vm457_vm0, %v14474_v27 }
 0x99a   : > { %10226 = vmatmul.mubr.msk.f32.gmra.mrb[220].mxu0 %vm457_vm0, %v6636_v37 }
 0x99b   : > { %10228 = vmatprep.mubr.msk.f32.mxu0 %vm457_vm0, %v6637_v50 }
 0x99c   : > { %10165 = vmatmul.mubr.msk.f32.gmra.mrb[222].mxu1 %vm457_vm0, %v14480_v6 }
 0x99e   : > { %v14501_v3 = vpop.f32.mrb[192].mxu0  ;;  %10229 = vmatmul.mubr.msk.f32.gmra.mrb[222].mxu0 %vm457_vm0, %v6638_v10 }
 0x99f   : > { %v14503_v2 = vpop.f32.mrb[193].mxu0  ;;  %v6641_v5 = vmul.f32 %v14501_v3, %v14501_v3 }
 0x9a0   : > { %v6639_v4 = vmul.f32 %v14503_v2, %v14503_v2  ;;  %v14508_v28 = vpop.f32.mrb[194].mxu0  ;;  %10167 = vmatprep.mubr.msk.f32.mxu1 %vm457_vm0, %v14503_v2 }
 0x9a1   : > { %v14512_v8 = vpop.f32.mrb[195].mxu0  ;;  %v6642_v58 = vmul.f32 %v14508_v28, %v14508_v28 }
 0x9a2   : > { %v6640_v31 = vmul.f32 %v14512_v8, %v14512_v8  ;;  %10168 = vmatmul.mubr.msk.f32.gmra.mrb[224].mxu1 %vm457_vm0, %v14512_v8  ;;  %10231 = vmatprep.mubr.msk.f32.mxu0 %vm457_vm0, %v6639_v4 }
 0x9a3   : > { %10170 = vmatprep.mubr.msk.f32.mxu1 %vm457_vm0, %v14501_v3 }
 0x9a4   : > { %10232 = vmatmul.mubr.msk.f32.gmra.mrb[224].mxu0 %vm457_vm0, %v6640_v31 }
 0x9a5   : > { %10234 = vmatprep.mubr.msk.f32.mxu0 %vm457_vm0, %v6641_v5 }
 0x9a6   : > { %v14527_v36 = vpop.f32.mrb[196].mxu0  ;;  %10171 = vmatmul.mubr.msk.f32.gmra.mrb[226].mxu1 %vm457_vm0, %v14508_v28 }
 0x9a7   : > { %v14531_v22 = vpop.f32.mrb[197].mxu0  ;;  %v6645_v11 = vmul.f32 %v14527_v36, %v14527_v36 }
 0x9a8   : > { %v6643_v0 = vmul.f32 %v14531_v22, %v14531_v22  ;;  %v14535_v52 = vpop.f32.mrb[198].mxu0  ;;  %10173 = vmatprep.mubr.msk.f32.mxu1 %vm457_vm0, %v14531_v22  ;;  %10235 = vmatmul.mubr.msk.f32.gmra.mrb[226].mxu0 %vm457_vm0, %v6642_v58 }
 0x9a9   : > { %v14540_v7 = vpop.f32.mrb[199].mxu0  ;;  %v6646_v47 = vmul.f32 %v14535_v52, %v14535_v52 }
 0x9aa   : > { %v6644_v59 = vmul.f32 %v14540_v7, %v14540_v7  ;;  %10174 = vmatmul.mubr.msk.f32.gmra.mrb[228].mxu1 %vm457_vm0, %v14540_v7  ;;  %10237 = vmatprep.mubr.msk.f32.mxu0 %vm457_vm0, %v6643_v0 }
 0x9ab   : > { %10176 = vmatprep.mubr.msk.f32.mxu1 %vm457_vm0, %v14527_v36 }
 0x9ac   : > { %10238 = vmatmul.mubr.msk.f32.gmra.mrb[228].mxu0 %vm457_vm0, %v6644_v59 }
 0x9ad   : > { %10240 = vmatprep.mubr.msk.f32.mxu0 %vm457_vm0, %v6645_v11 }
 0x9ae   : > { %v14555_v18 = vpop.f32.mrb[200].mxu0  ;;  %10177 = vmatmul.mubr.msk.f32.gmra.mrb[230].mxu1 %vm457_vm0, %v14535_v52 }
 0x9af   : > { %v14559_v49 = vpop.f32.mrb[201].mxu0  ;;  %v6649_v46 = vmul.f32 %v14555_v18, %v14555_v18 }
 0x9b0   : > { %v6647_v25 = vmul.f32 %v14559_v49, %v14559_v49  ;;  %v14563_v30 = vpop.f32.mrb[202].mxu0  ;;  %10179 = vmatprep.mubr.msk.f32.mxu1 %vm457_vm0, %v14559_v49  ;;  %10241 = vmatmul.mubr.msk.f32.gmra.mrb[230].mxu0 %vm457_vm0, %v6646_v47 }
 0x9b1   : > { %v14568_v1 = vpop.f32.mrb[203].mxu0  ;;  %v6650_v15 = vmul.f32 %v14563_v30, %v14563_v30 }
 0x9b2   : > { %v6648_v12 = vmul.f32 %v14568_v1, %v14568_v1  ;;  %10180 = vmatmul.mubr.msk.f32.gmra.mrb[232].mxu1 %vm457_vm0, %v14568_v1  ;;  %10243 = vmatprep.mubr.msk.f32.mxu0 %vm457_vm0, %v6647_v25 }
 0x9b3   : > { %10182 = vmatprep.mubr.msk.f32.mxu1 %vm457_vm0, %v14555_v18 }
 0x9b4   : > { %10244 = vmatmul.mubr.msk.f32.gmra.mrb[232].mxu0 %vm457_vm0, %v6648_v12 }
 0x9b5   : > { %10246 = vmatprep.mubr.msk.f32.mxu0 %vm457_vm0, %v6649_v46 }
 0x9b6   : > { %v14583_v19 = vpop.f32.mrb[204].mxu0  ;;  %10183 = vmatmul.mubr.msk.f32.gmra.mrb[234].mxu1 %vm457_vm0, %v14563_v30 }
 0x9b7   : > { %v14587_v14 = vpop.f32.mrb[205].mxu0  ;;  %v6653_v62 = vmul.f32 %v14583_v19, %v14583_v19 }
 0x9b8   : > { %v6651_v32 = vmul.f32 %v14587_v14, %v14587_v14  ;;  %v14591_v61 = vpop.f32.mrb[206].mxu0  ;;  %10185 = vmatprep.mubr.msk.f32.mxu1 %vm457_vm0, %v14587_v14  ;;  %10247 = vmatmul.mubr.msk.f32.gmra.mrb[234].mxu0 %vm457_vm0, %v6650_v15 }
 0x9b9   : > { %v14596_v29 = vpop.f32.mrb[207].mxu0  ;;  %v6654_v45 = vmul.f32 %v14591_v61, %v14591_v61 }
 0x9ba   : > { %v6652_v39 = vmul.f32 %v14596_v29, %v14596_v29  ;;  %10186 = vmatmul.mubr.msk.f32.gmra.mrb[236].mxu1 %vm457_vm0, %v14596_v29  ;;  %10249 = vmatprep.mubr.msk.f32.mxu0 %vm457_vm0, %v6651_v32 }
 0x9bb   : > { %10188 = vmatprep.mubr.msk.f32.mxu1 %vm457_vm0, %v14583_v19 }
 0x9bc   : > { %10250 = vmatmul.mubr.msk.f32.gmra.mrb[236].mxu0 %vm457_vm0, %v6652_v39 }
 0x9bd   : > { %10252 = vmatprep.mubr.msk.f32.mxu0 %vm457_vm0, %v6653_v62 }
 0x9be   : > { %10189 = vmatmul.mubr.msk.f32.gmra.mrb[238].mxu1 %vm457_vm0, %v14591_v61 }
 0x9c0   : > { %10253 = vmatmul.mubr.msk.f32.gmra.mrb[238].mxu0 %vm457_vm0, %v6654_v45 }
 0xa1d   : > { %v10145_v42 = vpop.f32.mrb[208].mxu1 }
 0xa1e   : > { %v6592_v44 = vmul.f32 0.03125, %v10145_v42  ;;  %v6432_v35 = vpop.f32.mrb[209].mxu1 }
 0xa1f   : > { %v6591_v53 = vmul.f32 0.03125, %v6432_v35  ;;  %v10209_v9 = vpop.f32.mrb[208].mxu0  ;;  %v14621_v35 = vld [vmem:[%s15329_s4 + $0x3] ss:$0 sm:$0xff] }
 0xa20   : > { %v7009_v24 = vmul.f32 %v6592_v44, %v6592_v44  ;;  %v7105_v13 = vsub.f32 %v14393_v51, %v6592_v44  ;;  %v6977_v41 = vmul.f32 0.03125, %v10209_v9  ;;  %v6817_v55 = vpop.f32.mrb[209].mxu0  ;;  %v14626_v9 = vld [vmem:[%s15330_s5 + $0x3] ss:$0 sm:$0xff] }
 0xa21   : > { %v7008_v38 = vmul.f32 %v6591_v53, %v6591_v53  ;;  %v7104_v56 = vsub.f32 %v14385_v34, %v6591_v53  ;;  %v6976_v23 = vmul.f32 0.03125, %v6817_v55  ;;  %v10148_v21 = vpop.f32.mrb[210].mxu1 }
 0xa22   : > { %v7041_v37 = vsub.f32 %v6977_v41, %v7009_v24  ;;  %v6594_v50 = vmul.f32 0.03125, %v10148_v21  ;;  %v6442_v10 = vpop.f32.mrb[211].mxu1 }
 0xa23   : > { %v7040_v4 = vsub.f32 %v6976_v23, %v7008_v38  ;;  %v6593_v31 = vmul.f32 0.03125, %v6442_v10  ;;  %v10212_v5 = vpop.f32.mrb[210].mxu0 }
 0xa24   : > { %v7073_v58 = vmax.f32 %v7041_v37, 0.0  ;;  %v7011_v0 = vmul.f32 %v6594_v50, %v6594_v50  ;;  %v7107_v59 = vsub.f32 %v14389_v16, %v6594_v50  ;;  %v6979_v11 = vmul.f32 0.03125, %v10212_v5  ;;  %v6827_v47 = vpop.f32.mrb[211].mxu0  ;;  %v15795_v5 = vld [vmem:[#allocation34_spill] sm:$0xff] }
 0xa25   : > { %v7072_v51 = vmax.f32 %v7040_v4, 0.0  ;;  %v7010_v25 = vmul.f32 %v6593_v31, %v6593_v31  ;;  %v7106_v12 = vsub.f32 %v14383_v33, %v6593_v31  ;;  %v6978_v46 = vmul.f32 0.03125, %v6827_v47  ;;  %v15794_v4 = vld [vmem:[#allocation35_spill] sm:$0xff] }
 0xa26   : > { %v7137_v34 = vadd.f32 1e-05, %v7073_v58  ;;  %v7043_v15 = vsub.f32 %v6979_v11, %v7011_v0 }
 0xa27   : > { %v7136_v32 = vadd.f32 1e-05, %v7072_v51  ;;  %v7042_v39 = vsub.f32 %v6978_v46, %v7010_v25  ;;  %v15796_v46 = vld [vmem:[#allocation37_spill] sm:$0xff] }
 0xa28   : > { %11014 = vrsqrt.f32 %v7137_v34  ;;  %v7075_v62 = vmax.f32 %v7043_v15, 0.0 }
 0xa29   : > { %11016 = vrsqrt.f32 %v7136_v32  ;;  %v7074_v45 = vmax.f32 %v7042_v39, 0.0  ;;  %v15797_v39 = vld [vmem:[#allocation36_spill] sm:$0xff] }
 0xa2a   : > { %v7139_v42 = vadd.f32 1e-05, %v7075_v62 }
 0xa2b   : > { %v7138_v44 = vadd.f32 1e-05, %v7074_v45 }
 0xa2c   : > { %11018 = vrsqrt.f32 %v7139_v42 }
 0xa2d   : > { %11020 = vrsqrt.f32 %v7138_v44 }
 0xa32   : > { %v11015_v16 = vpop.eup %11014 }
 0xa33   : > { %v11017_v33 = vpop.eup %11016  ;;  %v7201_v53 = vmul.f32 %v11015_v16, %v7105_v13 }
 0xa34   : > { %v7200_v24 = vmul.f32 %v11017_v33, %v7104_v56 }
 0xa35   : > { %v7241_v41 = vmul.f32 %v14621_v35, %v7201_v53 }
 0xa36   : > { %v11019_v55 = vpop.eup %11018  ;;  %v7240_v38 = vmul.f32 %v14621_v35, %v7200_v24 }
 0xa37   : > { %v11021_v23 = vpop.eup %11020  ;;  %v7281_v21 = vadd.f32 %v14626_v9, %v7241_v41  ;;  %v7203_v37 = vmul.f32 %v11019_v55, %v7107_v59 }
 0xa38   : > { %v7202_v50 = vmul.f32 %v11021_v23, %v7106_v12  ;;  %v7280_v10 = vadd.f32 %v14626_v9, %v7240_v38 }
 0xa39   : > { %v14633_v13 = vadd.f32 %v7281_v21, %v15794_v4  ;;  %v7243_v31 = vmul.f32 %v14621_v35, %v7203_v37 }
 0xa3a   : > { %v14637_v58 = vadd.f32 %v7280_v10, %v15795_v5  ;;  %v7242_v56 = vmul.f32 %v14621_v35, %v7202_v50 }
 0xa3b   : > { %v7283_v0 = vadd.f32 %v14626_v9, %v7243_v31  ;;  %v7345_v12 = vmul.f32 %v14633_v13, %v14633_v13 }
 0xa3c   : > { %v10151_v11 = vpop.f32.mrb[212].mxu1  ;;  %v7344_v47 = vmul.f32 %v14637_v58, %v14637_v58  ;;  %v7282_v59 = vadd.f32 %v14626_v9, %v7242_v56 }
 0xa3d   : > { %v6596_v51 = vmul.f32 0.03125, %v10151_v11  ;;  %v6452_v25 = vpop.f32.mrb[213].mxu1  ;;  %v14647_v34 = vadd.f32 %v7283_v0, %v15796_v46 }
 0xa3e   : > { %v6595_v15 = vmul.f32 0.03125, %v6452_v25  ;;  %v10215_v32 = vpop.f32.mrb[212].mxu0  ;;  %10271 = vmatprep.mubr.msk.f32.mxu1 %vm457_vm0, %v7344_v47  ;;  %v14651_v62 = vadd.f32 %v7282_v59, %v15797_v39  ;;  %v10611_v25 = vld [vmem:[%s15326_s1 + $0x88] sm:$0xff]  }
 0xa3f   : > { %v7013_v45 = vmul.f32 %v6596_v51, %v6596_v51  ;;  %v7109_v42 = vsub.f32 %v14428_v26, %v6596_v51  ;;  %v6981_v44 = vmul.f32 0.03125, %v10215_v32  ;;  %v6837_v16 = vpop.f32.mrb[213].mxu0  ;;  %10272 = vmatmul.mubr.msk.f32.vlgmr.msra.gmra.mrb[240].mxu1 %vm457_vm0, %v7345_v12  ;;  %v7347_v37 = vmul.f32 %v14647_v34, %v14647_v34  ;;  %v10610_v51 = vld [vmem:[%s15326_s1 + $0x80] sm:$0xff]  }
 0xa40   : > { %v7012_v33 = vmul.f32 %v6595_v15, %v6595_v15  ;;  %v7108_v53 = vsub.f32 %v14420_v54, %v6595_v15  ;;  %v6980_v24 = vmul.f32 0.03125, %v6837_v16  ;;  %v10154_v41 = vpop.f32.mrb[214].mxu1  ;;  %v7346_v55 = vmul.f32 %v14651_v62, %v14651_v62  ;;  %10319 = vmatprep.subr.bf16.mxu0 %v10610_v51 }
 0xa41   : > { %v7045_v38 = vsub.f32 %v6981_v44, %v7013_v45  ;;  %v6598_v23 = vmul.f32 0.03125, %v10154_v41  ;;  %v6462_v21 = vpop.f32.mrb[215].mxu1  ;;  %10320 = vmatpush3.bf16.msra.mxu0 %v10610_v51 }
 0xa42   : > { %v7044_v50 = vsub.f32 %v6980_v24, %v7012_v33  ;;  %v6597_v26 = vmul.f32 0.03125, %v6462_v21  ;;  %v10218_v10 = vpop.f32.mrb[214].mxu0  ;;  %10274 = vmatprep.mubr.msk.f32.mxu1 %vm457_vm0, %v7346_v55  ;;  %10321 = vmatprep.subr.bf16.mxu0 %v10611_v25 }
 0xa43   : > { %v7077_v4 = vmax.f32 %v7045_v38, 0.0  ;;  %v7015_v31 = vmul.f32 %v6598_v23, %v6598_v23  ;;  %v7111_v54 = vsub.f32 %v14424_v63, %v6598_v23  ;;  %v6983_v5 = vmul.f32 0.03125, %v10218_v10  ;;  %v6847_v56 = vpop.f32.mrb[215].mxu0  ;;  %10275 = vmatmul.mubr.msk.f32.gmra.mrb[242].mxu1 %vm457_vm0, %v7347_v37 }
 0xa44   : > { %v7076_v0 = vmax.f32 %v7044_v50, 0.0  ;;  %v7014_v11 = vmul.f32 %v6597_v26, %v6597_v26  ;;  %v7110_v47 = vsub.f32 %v14418_v20, %v6597_v26  ;;  %v6982_v59 = vmul.f32 0.03125, %v6847_v56  ;;  %v10612_v20 = vld [vmem:[%s15326_s1 + $0x90] sm:$0xff]  }
 0xa45   : > { %v7141_v12 = vadd.f32 1e-05, %v7077_v4  ;;  %v7047_v46 = vsub.f32 %v6983_v5, %v7015_v31  ;;  %10322 = vmatpush3.bf16.msra.mxu0 %v10611_v25  ;;  %v15798_v4 = vld [vmem:[#allocation39_spill] sm:$0xff] }
 0xa46   : > { %v7140_v63 = vadd.f32 1e-05, %v7076_v0  ;;  %v7046_v15 = vsub.f32 %v6982_v59, %v7014_v11  ;;  %10323 = vmatprep.subr.bf16.mxu0 %v10612_v20 }
 0xa47   : > { %11022 = vrsqrt.f32 %v7141_v12  ;;  %v7079_v32 = vmax.f32 %v7047_v46, 0.0 }
 0xa48   : > { %11024 = vrsqrt.f32 %v7140_v63  ;;  %v7078_v39 = vmax.f32 %v7046_v15, 0.0 }
 0xa49   : > { %v7143_v45 = vadd.f32 1e-05, %v7079_v32  ;;  %10324 = vmatpush3.bf16.msra.mxu0 %v10612_v20  ;;  %v15802_v20 = vld [vmem:[#allocation25_spill] sm:$0xff] }
 0xa4a   : > { %v7142_v44 = vadd.f32 1e-05, %v7078_v39 }
 0xa4b   : > { %11026 = vrsqrt.f32 %v7143_v45 }
 0xa4c   : > { %11028 = vrsqrt.f32 %v7142_v44 }
 0xa51   : > { %v11023_v16 = vpop.eup %11022 }
 0xa52   : > { %v11025_v33 = vpop.eup %11024  ;;  %v7205_v24 = vmul.f32 %v11023_v16, %v7109_v42  ;;  %v15800_v42 = vld [vmem:[#allocation38_spill] sm:$0xff] }
 0xa53   : > { %v7204_v41 = vmul.f32 %v11025_v33, %v7108_v53 }
 0xa54   : > { %v7245_v55 = vmul.f32 %v14621_v35, %v7205_v24 }
 0xa55   : > { %v11027_v38 = vpop.eup %11026  ;;  %v7244_v23 = vmul.f32 %v14621_v35, %v7204_v41  ;;  %v15804_v41 = vld [vmem:[#allocation17_spill] sm:$0xff] }
 0xa56   : > { %v11029_v21 = vpop.eup %11028  ;;  %v7207_v37 = vmul.f32 %v11027_v38, %v7111_v54  ;;  %v7285_v50 = vadd.f32 %v14626_v9, %v7245_v55 }
 0xa57   : > { %v7206_v26 = vmul.f32 %v11029_v21, %v7110_v47  ;;  %v7284_v10 = vadd.f32 %v14626_v9, %v7244_v23 }
 0xa58   : > { %v14678_v31 = vadd.f32 %v7285_v50, %v15798_v4  ;;  %v7247_v5 = vmul.f32 %v14621_v35, %v7207_v37 }
 0xa59   : > { %v14682_v53 = vadd.f32 %v7284_v10, %v15800_v42  ;;  %v7246_v0 = vmul.f32 %v14621_v35, %v7206_v26 }
 0xa5a   : > { %15799 = vst [vmem:[#allocation55_spill] sm:$0xff] %v14678_v31  ;;  %v7287_v54 = vadd.f32 %v14626_v9, %v7247_v5  ;;  %v7349_v12 = vmul.f32 %v14678_v31, %v14678_v31 }
 0xa5b   : > { %15801 = vst [vmem:[#allocation45_spill] sm:$0xff] %v14682_v53  ;;  %v7348_v25 = vmul.f32 %v14682_v53, %v14682_v53  ;;  %v7286_v46 = vadd.f32 %v14626_v9, %v7246_v0 }
 0xa5c   : > { %v14700_v45 = vadd.f32 %v7287_v54, %v15802_v20 }
 0xa5d   : > { %10277 = vmatprep.mubr.msk.f32.mxu1 %vm457_vm0, %v7348_v25  ;;  %v14708_v55 = vadd.f32 %v7286_v46, %v15804_v41 }
 0xa5e   : > { %v10157_v56 = vpop.f32.mrb[216].mxu1  ;;  %15803 = vst [vmem:[#allocation56_spill] sm:$0xff] %v14700_v45  ;;  %10278 = vmatmul.mubr.msk.f32.gmra.mrb[244].mxu1 %vm457_vm0, %v7349_v12  ;;  %v7351_v4 = vmul.f32 %v14700_v45, %v14700_v45 }
 0xa5f   : > { %v14685_v11 = vmul.f32 0.03125, %v10157_v56  ;;  %v6472_v59 = vpop.f32.mrb[217].mxu1  ;;  %15805 = vst [vmem:[#allocation58_spill] sm:$0xff] %v14708_v55  ;;  %v7350_v10 = vmul.f32 %v14708_v55, %v14708_v55 }
 0xa60   : > { %v14688_v51 = vmul.f32 0.03125, %v6472_v59  ;;  %v10221_v47 = vpop.f32.mrb[216].mxu0 }
 0xa61   : > { %v7017_v63 = vmul.f32 %v14685_v11, %v14685_v11  ;;  %v7113_v15 = vsub.f32 %v14456_v40, %v14685_v11  ;;  %v6985_v32 = vmul.f32 0.03125, %v10221_v47  ;;  %v6857_v39 = vpop.f32.mrb[217].mxu0  ;;  %10280 = vmatprep.mubr.msk.f32.mxu1 %vm457_vm0, %v7350_v10 }
 0xa62   : > { %v7016_v44 = vmul.f32 %v14688_v51, %v14688_v51  ;;  %v7112_v16 = vsub.f32 %v14448_v17, %v14688_v51  ;;  %v6984_v33 = vmul.f32 0.03125, %v6857_v39  ;;  %v10160_v24 = vpop.f32.mrb[218].mxu1  ;;  %10281 = vmatmul.mubr.msk.f32.gmra.mrb[246].mxu1 %vm457_vm0, %v7351_v4 }
 0xa63   : > { %v7049_v38 = vsub.f32 %v6985_v32, %v7017_v63  ;;  %v14710_v23 = vmul.f32 0.03125, %v10160_v24  ;;  %v6482_v21 = vpop.f32.mrb[219].mxu1 }
 0xa64   : > { %v7048_v37 = vsub.f32 %v6984_v33, %v7016_v44  ;;  %v14713_v50 = vmul.f32 0.03125, %v6482_v21  ;;  %v10224_v26 = vpop.f32.mrb[218].mxu0 }
 0xa65   : > { %v7081_v5 = vmax.f32 %v7049_v38, 0.0  ;;  %v7019_v56 = vmul.f32 %v14710_v23, %v14710_v23  ;;  %v7115_v42 = vsub.f32 %v14452_v48, %v14710_v23  ;;  %v6987_v0 = vmul.f32 0.03125, %v10224_v26  ;;  %v6867_v59 = vpop.f32.mrb[219].mxu0 }
 0xa66   : > { %v7080_v54 = vmax.f32 %v7048_v37, 0.0  ;;  %v7018_v47 = vmul.f32 %v14713_v50, %v14713_v50  ;;  %v6986_v12 = vmul.f32 0.03125, %v6867_v59 }
 0xa67   : > { %v7145_v46 = vadd.f32 1e-05, %v7081_v5  ;;  %v7051_v63 = vsub.f32 %v6987_v0, %v7019_v56 }
 0xa68   : > { %v7144_v32 = vadd.f32 1e-05, %v7080_v54  ;;  %v7050_v39 = vsub.f32 %v6986_v12, %v7018_v47 }
 0xa69   : > { %11030 = vrsqrt.f32 %v7145_v46  ;;  %v7083_v20 = vmax.f32 %v7051_v63, 0.0 }
 0xa6a   : > { %11032 = vrsqrt.f32 %v7144_v32  ;;  %v7082_v44 = vmax.f32 %v7050_v39, 0.0 }
 0xa6b   : > { %v10163_v33 = vpop.f32.mrb[220].mxu1  ;;  %v7147_v24 = vadd.f32 1e-05, %v7083_v20 }
 0xa6c   : > { %v14729_v41 = vmul.f32 0.03125, %v10163_v33  ;;  %v6492_v38 = vpop.f32.mrb[221].mxu1  ;;  %v7146_v21 = vadd.f32 1e-05, %v7082_v44 }
 0xa6d   : > { %v14731_v37 = vmul.f32 0.03125, %v6492_v38  ;;  %v10227_v26 = vpop.f32.mrb[220].mxu0  ;;  %11034 = vrsqrt.f32 %v7147_v24 }
 0xa6e   : > { %v7021_v10 = vmul.f32 %v14729_v41, %v14729_v41  ;;  %v6989_v5 = vmul.f32 0.03125, %v10227_v26  ;;  %v6877_v56 = vpop.f32.mrb[221].mxu0  ;;  %11036 = vrsqrt.f32 %v7146_v21 }
 0xa6f   : > { %v7020_v0 = vmul.f32 %v14731_v37, %v14731_v37  ;;  %v6988_v54 = vmul.f32 0.03125, %v6877_v56  ;;  %v10166_v47 = vpop.f32.mrb[222].mxu1 }
 0xa70   : > { %v7053_v12 = vsub.f32 %v6989_v5, %v7021_v10  ;;  %v14741_v46 = vmul.f32 0.03125, %v10166_v47  ;;  %v6502_v63 = vpop.f32.mrb[223].mxu1 }
 0xa71   : > { %v7052_v32 = vsub.f32 %v6988_v54, %v7020_v0  ;;  %v14743_v39 = vmul.f32 0.03125, %v6502_v63  ;;  %v10230_v20 = vpop.f32.mrb[222].mxu0 }
 0xa72   : > { %v7085_v44 = vmax.f32 %v7053_v12, 0.0  ;;  %v7023_v33 = vmul.f32 %v14741_v46, %v14741_v46  ;;  %v6991_v38 = vmul.f32 0.03125, %v10230_v20  ;;  %v6887_v21 = vpop.f32.mrb[223].mxu0 }
 0xa73   : > { %v7084_v26 = vmax.f32 %v7052_v32, 0.0  ;;  %v7022_v10 = vmul.f32 %v14743_v39, %v14743_v39  ;;  %v6990_v56 = vmul.f32 0.03125, %v6887_v21  ;;  %v11031_v0 = vpop.eup %11030 }
 0xa74   : > { %v7149_v54 = vadd.f32 1e-05, %v7085_v44  ;;  %v7055_v47 = vsub.f32 %v6991_v38, %v7023_v33  ;;  %v11033_v63 = vpop.eup %11032  ;;  %v7209_v59 = vmul.f32 %v11031_v0, %v7113_v15 }
 0xa75   : > { %v10169_v12 = vpop.f32.mrb[224].mxu1  ;;  %v7148_v24 = vadd.f32 1e-05, %v7084_v26  ;;  %v7054_v20 = vsub.f32 %v6990_v56, %v7022_v10  ;;  %v7208_v25 = vmul.f32 %v11033_v63, %v7112_v16  ;;  %v15806_v63 = vsub.f32 %v14446_v57, %v14713_v50 }
 0xa76   : > { %v14756_v4 = vmul.f32 0.03125, %v10169_v12  ;;  %v6512_v32 = vpop.f32.mrb[225].mxu1  ;;  %11038 = vrsqrt.f32 %v7149_v54  ;;  %v7087_v21 = vmax.f32 %v7055_v47, 0.0 }
 0xa77   : > { %v14761_v5 = vmul.f32 0.03125, %v6512_v32  ;;  %v10233_v44 = vpop.f32.mrb[224].mxu0  ;;  %11040 = vrsqrt.f32 %v7148_v24  ;;  %v7086_v33 = vmax.f32 %v7054_v20, 0.0  ;;  %v11035_v38 = vpop.eup %11034 }
 0xa78   : > { %v7025_v40 = vmul.f32 %v14756_v4, %v14756_v4  ;;  %v6897_v15 = vpop.f32.mrb[225].mxu0  ;;  %v7151_v26 = vadd.f32 1e-05, %v7087_v21  ;;  %v6993_v16 = vmul.f32 0.03125, %v10233_v44  ;;  %v11037_v56 = vpop.eup %11036  ;;  %v14774_v24 = vmul.f32 %v11035_v38, %v7115_v42 }
 0xa79   : > { %v7024_v17 = vmul.f32 %v14761_v5, %v14761_v5  ;;  %v10172_v10 = vpop.f32.mrb[226].mxu1  ;;  %v7150_v0 = vadd.f32 1e-05, %v7086_v33  ;;  %v6992_v54 = vmul.f32 0.03125, %v6897_v15  ;;  %v14781_v20 = vmul.f32 %v11037_v56, %v15806_v63 }
 0xa7a   : > { %v14776_v47 = vmul.f32 0.03125, %v10172_v10  ;;  %v6522_v12 = vpop.f32.mrb[227].mxu1  ;;  %11042 = vrsqrt.f32 %v7151_v26  ;;  %v7057_v32 = vsub.f32 %v6993_v16, %v7025_v40  ;;  %v7248_v10 = vmul.f32 %v14621_v35, %v7208_v25 }
 0xa7b   : > { %v14783_v21 = vmul.f32 0.03125, %v6522_v12  ;;  %v10236_v44 = vpop.f32.mrb[226].mxu0  ;;  %11044 = vrsqrt.f32 %v7150_v0  ;;  %v7056_v51 = vsub.f32 %v6992_v54, %v7024_v17  ;;  %v14799_v63 = vmul.f32 %v14621_v35, %v7209_v59 }
 0xa7c   : > { %v7027_v48 = vmul.f32 %v14776_v47, %v14776_v47  ;;  %v6907_v42 = vpop.f32.mrb[227].mxu0  ;;  %v7089_v33 = vmax.f32 %v7057_v32, 0.0  ;;  %v6995_v40 = vmul.f32 0.03125, %v10236_v44 }
 0xa7d   : > { %v7026_v57 = vmul.f32 %v14783_v21, %v14783_v21  ;;  %v10175_v15 = vpop.f32.mrb[228].mxu1  ;;  %v7088_v38 = vmax.f32 %v7056_v51, 0.0  ;;  %v6994_v26 = vmul.f32 0.03125, %v6907_v42 }
 0xa7e   : > { %v14793_v16 = vmul.f32 0.03125, %v10175_v15  ;;  %v6532_v17 = vpop.f32.mrb[229].mxu1  ;;  %v7153_v56 = vadd.f32 1e-05, %v7089_v33  ;;  %v7059_v0 = vsub.f32 %v6995_v40, %v7027_v48 }
 0xa7f   : > { %v14796_v54 = vmul.f32 0.03125, %v6532_v17  ;;  %v10239_v12 = vpop.f32.mrb[228].mxu0  ;;  %v7152_v32 = vadd.f32 1e-05, %v7088_v38  ;;  %v7058_v23 = vsub.f32 %v6994_v26, %v7026_v57  ;;  %v15807_v57 = vsub.f32 %v14484_v43, %v14729_v41 }
 0xa80   : > { %v7029_v44 = vmul.f32 %v14793_v16, %v14793_v16  ;;  %v6917_v42 = vpop.f32.mrb[229].mxu0  ;;  %v11039_v15 = vpop.eup %11038  ;;  %11046 = vrsqrt.f32 %v7153_v56  ;;  %v7091_v25 = vmax.f32 %v7059_v0, 0.0  ;;  %v6997_v17 = vmul.f32 0.03125, %v10239_v12 }
 0xa81   : > { %v7028_v48 = vmul.f32 %v14796_v54, %v14796_v54  ;;  %v10178_v59 = vpop.f32.mrb[230].mxu1  ;;  %v11041_v40 = vpop.eup %11040  ;;  %v14812_v38 = vmul.f32 %v11039_v15, %v15807_v57  ;;  %11048 = vrsqrt.f32 %v7152_v32  ;;  %v7090_v26 = vmax.f32 %v7058_v23, 0.0 }
 0xa82   : > { %v6542_v51 = vpop.f32.mrb[231].mxu1  ;;  %v15808_v56 = vsub.f32 %v14476_v60, %v14731_v37  ;;  %v7155_v50 = vadd.f32 1e-05, %v7091_v25  ;;  %v6996_v11 = vmul.f32 0.03125, %v6917_v42  ;;  %v14819_v55 = vmul.f32 0.03125, %v10178_v59 }
 0xa83   : > { %v10242_v33 = vpop.f32.mrb[230].mxu0  ;;  %v7154_v45 = vadd.f32 1e-05, %v7090_v26  ;;  %v7061_v53 = vsub.f32 %v6997_v17, %v7029_v44  ;;  %v14821_v31 = vmul.f32 0.03125, %v6542_v51  ;;  %v15809_v15 = vsub.f32 %v14480_v6, %v14741_v46 }
 0xa84   : > { %v14817_v0 = vmul.f32 %v11041_v40, %v15808_v56  ;;  %v6999_v43 = vmul.f32 0.03125, %v10242_v33  ;;  %v6927_v41 = vpop.f32.mrb[231].mxu0  ;;  %v11043_v32 = vpop.eup %11042  ;;  %11050 = vrsqrt.f32 %v7155_v50  ;;  %v7060_v23 = vsub.f32 %v6996_v11, %v7028_v48 }
 0xa85   : > { %v7031_v12 = vmul.f32 %v14819_v55, %v14819_v55  ;;  %v10181_v37 = vpop.f32.mrb[232].mxu1  ;;  %v11045_v42 = vpop.eup %11044  ;;  %v14830_v25 = vmul.f32 %v11043_v32, %v15809_v15  ;;  %11052 = vrsqrt.f32 %v7154_v45  ;;  %v7093_v44 = vmax.f32 %v7061_v53, 0.0 }
 0xa86   : > { %v7030_v51 = vmul.f32 %v14821_v31, %v14821_v31  ;;  %v6552_v50 = vpop.f32.mrb[233].mxu1  ;;  %v15810_v11 = vsub.f32 %v14474_v27, %v14743_v39  ;;  %v7092_v33 = vmax.f32 %v7060_v23, 0.0  ;;  %v6998_v46 = vmul.f32 0.03125, %v6927_v41 }
 0xa87   : > { %v7063_v40 = vsub.f32 %v6999_v43, %v7031_v12  ;;  %v10245_v57 = vpop.f32.mrb[232].mxu0  ;;  %v7157_v6 = vadd.f32 1e-05, %v7093_v44  ;;  %v14841_v26 = vmul.f32 0.03125, %v10181_v37  ;;  %v14843_v53 = vmul.f32 0.03125, %v6552_v50 }
 0xa88   : > { %v14837_v48 = vmul.f32 %v11045_v42, %v15810_v11  ;;  %v6937_v45 = vpop.f32.mrb[233].mxu0  ;;  %v7156_v17 = vadd.f32 1e-05, %v7092_v33  ;;  %v7288_v32 = vadd.f32 %v14626_v9, %v7248_v10  ;;  %v7001_v27 = vmul.f32 0.03125, %v10245_v57 }
 0xa89   : > { %v7095_v56 = vmax.f32 %v7063_v40, 0.0  ;;  %v10184_v39 = vpop.f32.mrb[234].mxu1  ;;  %11054 = vrsqrt.f32 %v7157_v6  ;;  %v7062_v23 = vsub.f32 %v6998_v46, %v7030_v51  ;;  %v7033_v42 = vmul.f32 %v14841_v26, %v14841_v26  ;;  %v15812_v40 = vld [vmem:[#allocation22_spill] sm:$0xff] }
 0xa8a   : > { %v6562_v41 = vpop.f32.mrb[235].mxu1  ;;  %v11047_v12 = vpop.eup %11046  ;;  %11056 = vrsqrt.f32 %v7156_v17  ;;  %v7032_v15 = vmul.f32 %v14843_v53, %v14843_v53  ;;  %v15811_v51 = vsub.f32 %v14512_v8, %v14756_v4  ;;  %v14860_v57 = vadd.f32 %v7288_v32, %v15812_v40 }
 0xa8b   : > { %v7159_v37 = vadd.f32 1e-05, %v7095_v56  ;;  %v10248_v44 = vpop.f32.mrb[234].mxu0  ;;  %v11049_v50 = vpop.eup %11048  ;;  %v7094_v33 = vmax.f32 %v7062_v23, 0.0  ;;  %v7065_v6 = vsub.f32 %v7001_v27, %v7033_v42  ;;  %v15814_v17 = vsub.f32 %v14503_v2, %v14761_v5  ;;  %v15815_v27 = vld [vmem:[#allocation12_spill] sm:$0xff] }
 0xa8c   : > { %v14857_v11 = vmul.f32 %v11047_v12, %v15811_v51  ;;  %15813 = vst [vmem:[#allocation61_spill] sm:$0xff] %v14860_v57  ;;  %v6947_v46 = vpop.f32.mrb[235].mxu0  ;;  %v7289_v10 = vadd.f32 %v14626_v9, %v14799_v63  ;;  %v7000_v43 = vmul.f32 0.03125, %v6937_v45  ;;  %v7352_v4 = vmul.f32 %v14860_v57, %v14860_v57 }
 0xa8d   : > { %v14865_v56 = vmul.f32 %v11049_v50, %v15814_v17  ;;  %11058 = vrsqrt.f32 %v7159_v37  ;;  %v10187_v59 = vpop.f32.mrb[236].mxu1  ;;  %v7158_v8 = vadd.f32 1e-05, %v7094_v33  ;;  %v7097_v23 = vmax.f32 %v7065_v6, 0.0 }
 0xa8e   : > { %v6572_v32 = vpop.f32.mrb[237].mxu1  ;;  %v11051_v12 = vpop.eup %11050  ;;  %v14872_v42 = vadd.f32 %v7289_v10, %v15815_v27  ;;  %v7064_v51 = vsub.f32 %v7000_v43, %v7032_v15  ;;  %v14874_v2 = vmul.f32 0.03125, %v10184_v39  ;;  %v14876_v5 = vmul.f32 0.03125, %v6562_v41  ;;  %10283 = vmatprep.mubr.msk.f32.mxu1 %vm457_vm0, %v7352_v4 }
 0xa8f   : > { %v10251_v37 = vpop.f32.mrb[236].mxu0  ;;  %v11053_v50 = vpop.eup %11052  ;;  %v15816_v63 = vsub.f32 %v14508_v28, %v14776_v47  ;;  %11060 = vrsqrt.f32 %v7158_v8  ;;  %v7161_v33 = vadd.f32 1e-05, %v7097_v23  ;;  %v15817_v10 = vsub.f32 %v14501_v3, %v14783_v21  ;;  %v15820_v47 = vld [vmem:[#allocation27_spill] sm:$0xff] }
 0xa90   : > { %v6957_v40 = vpop.f32.mrb[237].mxu0  ;;  %v7353_v39 = vmul.f32 %v14872_v42, %v14872_v42  ;;  %v7096_v41 = vmax.f32 %v7064_v51, 0.0  ;;  %v7035_v15 = vmul.f32 %v14874_v2, %v14874_v2  ;;  %v7034_v6 = vmul.f32 %v14876_v5, %v14876_v5 }
 0xa91   : > { %v14881_v45 = vmul.f32 %v11051_v12, %v15816_v63  ;;  %v14887_v43 = vmul.f32 %v11053_v50, %v15817_v10  ;;  %v10190_v28 = vpop.f32.mrb[238].mxu1  ;;  %11062 = vrsqrt.f32 %v7161_v33  ;;  %v7250_v8 = vmul.f32 %v14621_v35, %v14781_v20 }
 0xa92   : > { %v6582_v17 = vpop.f32.mrb[239].mxu1  ;;  %10284 = vmatmul.mubr.msk.f32.gmra.mrb[248].mxu1 %vm457_vm0, %v7353_v39  ;;  %v7160_v3 = vadd.f32 1e-05, %v7096_v41  ;;  %v7003_v4 = vmul.f32 0.03125, %v10248_v44  ;;  %v7251_v27 = vmul.f32 %v14621_v35, %v14774_v24  ;;  %v7002_v51 = vmul.f32 0.03125, %v6947_v46 }
 0xa93   : > { %v14902_v23 = vpop.f32.mrb[238].mxu0  ;;  %v11055_v12 = vpop.eup %11054  ;;  %v14906_v50 = vmul.f32 0.03125, %v10187_v59  ;;  %v15818_v10 = vsub.f32 %v14540_v7, %v14793_v16  ;;  %v7290_v20 = vadd.f32 %v14626_v9, %v7250_v8  ;;  %v15819_v41 = vsub.f32 %v14531_v22, %v14796_v54 }
 0xa94   : > { %v14908_v63 = vpop.f32.mrb[239].mxu0  ;;  %v11057_v33 = vpop.eup %11056  ;;  %11064 = vrsqrt.f32 %v7160_v3  ;;  %v7067_v44 = vsub.f32 %v7003_v4, %v7035_v15  ;;  %v7291_v24 = vadd.f32 %v14626_v9, %v7251_v27  ;;  %v7066_v59 = vsub.f32 %v7002_v51, %v7034_v6  ;;  %v15822_v3 = vld [vmem:[#allocation14_spill] sm:$0xff] }
 0xa95   : > { %v14913_v39 = vmul.f32 %v11055_v12, %v15818_v10  ;;  %v14919_v21 = vmul.f32 %v11057_v33, %v15819_v41  ;;  %v14923_v60 = vadd.f32 %v7290_v20, %v15820_v47  ;;  %v7133_v7 = vsub.f32 %v14596_v29, %v14906_v50  ;;  %v15825_v41 = vld [vmem:[#allocation13_spill] sm:$0xff] }
 0xa96   : > { %v7099_v57 = vmax.f32 %v7067_v44, 0.0  ;;  %v15821_v16 = vsub.f32 %v14535_v52, %v14819_v55  ;;  %v14933_v22 = vadd.f32 %v7291_v24, %v15822_v3  ;;  %v7098_v54 = vmax.f32 %v7066_v59, 0.0 }
 0xa97   : > { %v11059_v46 = vpop.eup %11058  ;;  %v14935_v8 = vmul.f32 0.03125, %v6572_v32  ;;  %v7354_v6 = vmul.f32 %v14923_v60, %v14923_v60  ;;  %v7252_v4 = vmul.f32 %v14621_v35, %v14817_v0  ;;  %v7037_v55 = vmul.f32 %v14906_v50, %v14906_v50 }
 0xa98   : > { %v14930_v15 = vmul.f32 %v11059_v46, %v15821_v16  ;;  %v7163_v47 = vadd.f32 1e-05, %v7099_v57  ;;  %v7355_v27 = vmul.f32 %v14933_v22, %v14933_v22  ;;  %v7162_v52 = vadd.f32 1e-05, %v7098_v54 }
 0xa99   : > { %v11061_v12 = vpop.eup %11060  ;;  %v7036_v51 = vmul.f32 %v14935_v8, %v14935_v8  ;;  %v15823_v32 = vsub.f32 %v14527_v36, %v14821_v31  ;;  %10286 = vmatprep.mubr.msk.f32.mxu1 %vm457_vm0, %v7354_v6  ;;  %v7132_v0 = vsub.f32 %v14587_v14, %v14935_v8  ;;  %v7292_v57 = vadd.f32 %v14626_v9, %v7252_v4  ;;  %v15827_v4 = vld [vmem:[#allocation29_spill] sm:$0xff] }
 0xa9a   : > { %11066 = vrsqrt.f32 %v7163_v47  ;;  %10287 = vmatmul.mubr.msk.f32.gmra.mrb[250].mxu1 %vm457_vm0, %v7355_v27  ;;  %v7005_v20 = vmul.f32 0.03125, %v10251_v37  ;;  %v7253_v44 = vmul.f32 %v14621_v35, %v14812_v38  ;;  %v15824_v36 = vsub.f32 %v14568_v1, %v14841_v26 }
 0xa9b   : > { %v14950_v33 = vmul.f32 %v11061_v12, %v15823_v32  ;;  %v11063_v10 = vpop.eup %11062  ;;  %11068 = vrsqrt.f32 %v7162_v52  ;;  %v14965_v24 = vadd.f32 %v7292_v57, %v15825_v41  ;;  %v7004_v59 = vmul.f32 0.03125, %v6957_v40 }
 0xa9c   : > { %v14962_v31 = vmul.f32 %v11063_v10, %v15824_v36  ;;  %v14967_v46 = vmul.f32 0.03125, %v10190_v28  ;;  %v7069_v16 = vsub.f32 %v7005_v20, %v7037_v55  ;;  %v7293_v3 = vadd.f32 %v14626_v9, %v7253_v44  ;;  %v15828_v36 = vld [vmem:[#allocation23_spill] sm:$0xff] }
 0xa9d   : > { %v14970_v54 = vmul.f32 0.03125, %v6582_v17  ;;  %v7254_v37 = vmul.f32 %v14621_v35, %v14837_v48  ;;  %v7257_v1 = vmul.f32 %v14621_v35, %v14857_v11  ;;  %v7356_v26 = vmul.f32 %v14965_v24, %v14965_v24 }
 0xa9e   : > { %v11065_v38 = vpop.eup %11064  ;;  %v7068_v6 = vsub.f32 %v7004_v59, %v7036_v51  ;;  %v7039_v40 = vmul.f32 %v14967_v46, %v14967_v46  ;;  %v15826_v28 = vsub.f32 %v14559_v49, %v14843_v53  ;;  %v7101_v17 = vmax.f32 %v7069_v16, 0.0 }
 0xa9f   : > { %v14984_v12 = vadd.f32 %v7293_v3, %v15827_v4  ;;  %v7135_v48 = vsub.f32 %v14591_v61, %v14967_v46  ;;  %v7259_v11 = vmul.f32 %v14621_v35, %v14881_v45  ;;  %10289 = vmatprep.mubr.msk.f32.mxu1 %vm457_vm0, %v7356_v26  ;;  %v7038_v52 = vmul.f32 %v14970_v54, %v14970_v54 }
 0xaa0   : > { %v7224_v47 = vmul.f32 %v11065_v38, %v15826_v28  ;;  %v7100_v27 = vmax.f32 %v7068_v6, 0.0  ;;  %v7134_v49 = vsub.f32 %v14583_v19, %v14970_v54  ;;  %v7165_v53 = vadd.f32 1e-05, %v7101_v17  ;;  %v15831_v28 = vld [vmem:[#allocation26_spill] sm:$0xff]  ;;  %v15842_v54 = vld [vmem:[#allocation32_spill] sm:$0xff] }
 0xaa1   : > { %v7357_v55 = vmul.f32 %v14984_v12, %v14984_v12  ;;  %v7294_v51 = vadd.f32 %v14626_v9, %v7254_v37  ;;  %v7007_v32 = vmul.f32 0.03125, %v14902_v23  ;;  %v7255_v45 = vmul.f32 %v14621_v35, %v14830_v25 }
 0xaa2   : > { %v7164_v57 = vadd.f32 1e-05, %v7100_v27  ;;  %v7006_v10 = vmul.f32 0.03125, %v14908_v63  ;;  %v7256_v20 = vmul.f32 %v14621_v35, %v14865_v56  ;;  %v7297_v44 = vadd.f32 %v14626_v9, %v7257_v1  ;;  %v15832_v27 = vld [vmem:[#allocation15_spill] sm:$0xff] }
 0xaa3   : > { %11070 = vrsqrt.f32 %v7165_v53  ;;  %10290 = vmatmul.mubr.msk.f32.gmra.mrb[252].mxu1 %vm457_vm0, %v7357_v55  ;;  %v15007_v41 = vadd.f32 %v7294_v51, %v15828_v36  ;;  %v7071_v59 = vsub.f32 %v7007_v32, %v7039_v40  ;;  %v7295_v23 = vadd.f32 %v14626_v9, %v7255_v45 }
 0xaa4   : > { %v11067_v16 = vpop.eup %11066  ;;  %11072 = vrsqrt.f32 %v7164_v57  ;;  %v7070_v3 = vsub.f32 %v7006_v10, %v7038_v52  ;;  %v7296_v25 = vadd.f32 %v14626_v9, %v7256_v20  ;;  %v7299_v37 = vadd.f32 %v14626_v9, %v7259_v11  ;;  %v15834_v20 = vld [vmem:[#allocation19_spill] sm:$0xff] }
 0xaa5   : > { %v11069_v63 = vpop.eup %11068  ;;  %v15829_v56 = vsub.f32 %v14563_v30, %v14874_v2  ;;  %v7358_v1 = vmul.f32 %v15007_v41, %v15007_v41  ;;  %v7103_v26 = vmax.f32 %v7071_v59, 0.0  ;;  %v15830_v6 = vsub.f32 %v14555_v18, %v14876_v5  ;;  %v15833_v2 = vld [vmem:[#allocation16_spill] sm:$0xff]  ;;  %v15835_v59 = vld [vmem:[#allocation31_spill] sm:$0xff] }
 0xaa6   : > { %v15021_v17 = vadd.f32 %v7295_v23, %v15831_v28  ;;  %v7102_v4 = vmax.f32 %v7070_v3, 0.0  ;;  %v15024_v52 = vadd.f32 %v7296_v25, %v15832_v27  ;;  %v7261_v11 = vmul.f32 %v14621_v35, %v14913_v39  ;;  %v15836_v23 = vld [vmem:[#allocation30_spill] sm:$0xff] }
 0xaa7   : > { %v7227_v38 = vmul.f32 %v11067_v16, %v15829_v56  ;;  %v7226_v40 = vmul.f32 %v11069_v63, %v15830_v6  ;;  %10292 = vmatprep.mubr.msk.f32.mxu1 %vm457_vm0, %v7358_v1  ;;  %v7167_v30 = vadd.f32 1e-05, %v7103_v26  ;;  %v15030_v53 = vadd.f32 %v7297_v44, %v15833_v2  ;;  %v15837_v6 = vld [vmem:[#allocation18_spill] sm:$0xff] }
 0xaa8   : > { %v7258_v18 = vmul.f32 %v14621_v35, %v14887_v43  ;;  %v7359_v5 = vmul.f32 %v15021_v17, %v15021_v17  ;;  %v7166_v55 = vadd.f32 1e-05, %v7102_v4  ;;  %v7360_v51 = vmul.f32 %v15024_v52, %v15024_v52  ;;  %v15839_v4 = vld [vmem:[#allocation28_spill] sm:$0xff] }
 0xaa9   : > { %v7260_v32 = vmul.f32 %v14621_v35, %v14919_v21  ;;  %11074 = vrsqrt.f32 %v7167_v30  ;;  %v7262_v43 = vmul.f32 %v14621_v35, %v14950_v33  ;;  %v7301_v45 = vadd.f32 %v14626_v9, %v7261_v11 }
 0xaaa   : > { %v7298_v39 = vadd.f32 %v14626_v9, %v7258_v18  ;;  %10293 = vmatmul.mubr.msk.f32.gmra.mrb[254].mxu1 %vm457_vm0, %v7359_v5  ;;  %11076 = vrsqrt.f32 %v7166_v55  ;;  %v7263_v10 = vmul.f32 %v14621_v35, %v14930_v15  ;;  %v7264_v44 = vmul.f32 %v14621_v35, %v7224_v47 }
 0xaab   : > { %v7300_v57 = vadd.f32 %v14626_v9, %v7260_v32  ;;  %10295 = vmatprep.mubr.msk.f32.mxu1 %vm457_vm0, %v7360_v51  ;;  %v7361_v36 = vmul.f32 %v15030_v53, %v15030_v53  ;;  %v15056_v16 = vadd.f32 %v7299_v37, %v15835_v59  ;;  %v7302_v3 = vadd.f32 %v14626_v9, %v7262_v43  ;;  %v15840_v51 = vld [vmem:[#allocation21_spill] sm:$0xff] }
 0xaac   : > { %v15050_v21 = vadd.f32 %v7298_v39, %v15834_v20  ;;  %v7265_v56 = vmul.f32 %v14621_v35, %v14962_v31  ;;  %v7266_v37 = vmul.f32 %v14621_v35, %v7226_v40  ;;  %v7304_v31 = vadd.f32 %v14626_v9, %v7264_v44  ;;  %v15843_v20 = vld [vmem:[#allocation42_spill] sm:$0xff] }
 0xaad   : > { %v15059_v33 = vadd.f32 %v7300_v57, %v15836_v23  ;;  %v11071_v25 = vpop.eup %11070  ;;  %v15078_v28 = vadd.f32 %v7302_v3, %v15837_v6  ;;  %v7303_v29 = vadd.f32 %v14626_v9, %v7263_v10  ;;  %v7363_v50 = vmul.f32 %v15056_v16, %v15056_v16  ;;  %v15841_v57 = vld [vmem:[#allocation40_spill] sm:$0xff] }
 0xaae   : > { %v7362_v15 = vmul.f32 %v15050_v21, %v15050_v21  ;;  %v11073_v63 = vpop.eup %11072  ;;  %v7229_v47 = vmul.f32 %v11071_v25, %v7133_v7  ;;  %10296 = vmatmul.mubr.msk.f32.gmra.mrb[0].mxu1 %vm457_vm0, %v7361_v36  ;;  %v15838_v7 = vld [vmem:[#allocation20_spill] sm:$0xff]  ;;  %v7305_v14 = vadd.f32 %v14626_v9, %v7265_v56  ;;  %v15093_v27 = vadd.f32 %v7304_v31, %v15839_v4  ;;  %v15844_v25 = vld [vmem:[#allocation33_spill] sm:$0xff] }
 0xaaf   : > { %v7228_v1 = vmul.f32 %v11073_v63, %v7132_v0  ;;  %v7364_v26 = vmul.f32 %v15059_v33, %v15059_v33  ;;  %v15085_v40 = vadd.f32 %v7301_v45, %v15838_v7  ;;  %v7366_v0 = vmul.f32 %v15078_v28, %v15078_v28  ;;  %v15845_v56 = vld [vmem:[#allocation44_spill] sm:$0xff] }
 0xab0   : > { %10298 = vmatprep.mubr.msk.f32.mxu1 %vm457_vm0, %v7362_v15  ;;  %v7306_v11 = vadd.f32 %v14626_v9, %v7266_v37  ;;  %v7267_v18 = vmul.f32 %v14621_v35, %v7227_v38  ;;  %v15104_v32 = vadd.f32 %v7303_v29, %v15840_v51  ;;  %v7368_v38 = vmul.f32 %v15093_v27, %v15093_v27  ;;  %v15847_v29 = vld [vmem:[#allocation43_spill] sm:$0xff]  ;;  %v10613_v7 = vld [vmem:[%s15326_s1 + $0x98] sm:$0xff]  }
 0xab1   : > { %v7268_v30 = vmul.f32 %v14621_v35, %v7228_v1  ;;  %v7365_v55 = vmul.f32 %v15085_v40, %v15085_v40  ;;  %v7269_v45 = vmul.f32 %v14621_v35, %v7229_v47  ;;  %v15846_v1 = vld [vmem:[#allocation41_spill] sm:$0xff]  ;;  %10325 = vmatprep.subr.bf16.mxu0 %v10613_v7 }
 0xab2   : > { %10299 = vmatmul.mubr.msk.f32.gmra.mrb[2].mxu1 %vm457_vm0, %v7363_v50  ;;  %v15114_v61 = vadd.f32 %v7306_v11, %v15841_v57  ;;  %v7307_v43 = vadd.f32 %v14626_v9, %v7267_v18  ;;  %v7367_v19 = vmul.f32 %v15104_v32, %v15104_v32  ;;  %10326 = vmatpush3.bf16.msra.mxu0 %v10613_v7 }
 0xab3   : > { %v11075_v8 = vpop.eup %11074  ;;  %10301 = vmatprep.mubr.msk.f32.mxu1 %vm457_vm0, %v7364_v26  ;;  %v7308_v46 = vadd.f32 %v14626_v9, %v7268_v30  ;;  %v7309_v59 = vadd.f32 %v14626_v9, %v7269_v45  ;;  %v15170_v30 = vstv %s8780_s25 }
 0xab4   : > { %v11077_v2 = vpop.eup %11076  ;;  %v7231_v5 = vmul.f32 %v11075_v8, %v7135_v48  ;;  %v7370_v10 = vmul.f32 %v15114_v61, %v15114_v61  ;;  %v15138_v15 = vadd.f32 %v7307_v43, %v15844_v25 }
 0xab5   : > { %v7230_v39 = vmul.f32 %v11077_v2, %v7134_v49  ;;  %v15123_v49 = vadd.f32 %v7305_v14, %v15842_v54  ;;  %v15130_v44 = vadd.f32 %v7308_v46, %v15843_v20  ;;  %v15151_v26 = vadd.f32 %v7309_v59, %v15846_v1 }
 0xab6   : > { %10302 = vmatmul.mubr.msk.f32.gmra.mrb[4].mxu1 %vm457_vm0, %v7365_v55  ;;  %v7271_v23 = vmul.f32 %v14621_v35, %v7231_v5 }
 0xab7   : > { %10304 = vmatprep.mubr.msk.f32.mxu1 %vm457_vm0, %v7366_v0  ;;  %v7270_v48 = vmul.f32 %v14621_v35, %v7230_v39  ;;  %v7369_v3 = vmul.f32 %v15123_v49, %v15123_v49  ;;  %v7372_v63 = vmul.f32 %v15130_v44, %v15130_v44  ;;  %v7371_v35 = vmul.f32 %v15138_v15, %v15138_v15 }
 0xab8   : > { %v7311_v37 = vadd.f32 %v14626_v9, %v7271_v23  ;;  %v7373_v31 = vmul.f32 %v15151_v26, %v15151_v26 }
 0xab9   : > { %v7310_v36 = vadd.f32 %v14626_v9, %v7270_v48 }
 0xaba   : > { %10305 = vmatmul.mubr.msk.f32.gmra.mrb[6].mxu1 %vm457_vm0, %v7367_v19  ;;  %v15160_v50 = vadd.f32 %v7311_v37, %v15847_v29 }
 0xabb   : > { %10307 = vmatprep.mubr.msk.f32.mxu1 %vm457_vm0, %v7368_v38  ;;  %v15145_v47 = vadd.f32 %v7310_v36, %v15845_v56 }
 0xabc   : > { %v7375_v9 = vmul.f32 %v15160_v50, %v15160_v50 }
 0xabd   : > { %v7374_v6 = vmul.f32 %v15145_v47, %v15145_v47 }
 0xabe   : > { %10308 = vmatmul.mubr.msk.f32.gmra.mrb[8].mxu1 %vm457_vm0, %v7369_v3 }
 0xabf   : > { %10310 = vmatprep.mubr.msk.f32.mxu1 %vm457_vm0, %v7370_v10 }
 0xac2   : > { %10311 = vmatmul.mubr.msk.f32.gmra.mrb[10].mxu1 %vm457_vm0, %v7371_v35 }
 0xac3   : > { %10313 = vmatprep.mubr.msk.f32.mxu1 %vm457_vm0, %v7372_v63 }
 0xac6   : > { %10314 = vmatmul.mubr.msk.f32.gmra.mrb[12].mxu1 %vm457_vm0, %v7373_v31 }
 0xac7   : > { %10316 = vmatprep.mubr.msk.f32.mxu1 %vm457_vm0, %v7374_v6 }
 0xaca   : > { %10317 = vmatmul.mubr.msk.f32.gmra.mrb[14].mxu1 %vm457_vm0, %v7375_v9 }
 0xb12   : > { %v10273_v14 = vpop.f32.mrb[240].mxu1 }
 0xb13   : > { %11078 = vrsqrt.f32 %v10273_v14  ;;  %v7538_v8 = vpop.f32.mrb[241].mxu1 }
 0xb14   : > { %11080 = vrsqrt.f32 %v7538_v8 }
 0xb16   : > { %v10276_v0 = vpop.f32.mrb[242].mxu1 }
 0xb17   : > { %11082 = vrsqrt.f32 %v10276_v0  ;;  %v7548_v4 = vpop.f32.mrb[243].mxu1 }
 0xb18   : > { %11084 = vrsqrt.f32 %v7548_v4 }
 0xb1d   : > { %v11079_v11 = vpop.eup %11078 }
 0xb1e   : > { %v11081_v2 = vpop.eup %11080  ;;  %v7730_v18 = vmul.f32 %v11079_v11, %v10273_v14 }
 0xb1f   : > { %v7729_v5 = vmul.f32 %v11081_v2, %v7538_v8 }
 0xb20   : > { %v7764_v55 = vsub.f32 %v7730_v18, %v15170_v30 }
 0xb21   : > { %v11083_v51 = vpop.eup %11082  ;;  %v7763_v39 = vsub.f32 %v7729_v5, %v15170_v30 }
 0xb22   : > { %v11085_v38 = vpop.eup %11084  ;;  %v7796_v57 = vmax.f32 %v7764_v55, 0.0  ;;  %v7732_v46 = vmul.f32 %v11083_v51, %v10276_v0 }
 0xb23   : > { %v7795_v48 = vmax.f32 %v7763_v39, 0.0  ;;  %v7731_v43 = vmul.f32 %v11085_v38, %v7548_v4  ;;  %v15848_v39 = vld [vmem:[#allocation55_spill] sm:$0xff] }
 0xb24   : > { %v7828_v45 = vmul.f32 %v11079_v11, %v7796_v57  ;;  %v7766_v19 = vsub.f32 %v7732_v46, %v15170_v30  ;;  %v15849_v46 = vld [vmem:[#allocation45_spill] sm:$0xff] }
 0xb25   : > { %v7827_v54 = vmul.f32 %v11081_v2, %v7795_v48  ;;  %v7765_v10 = vsub.f32 %v7731_v43, %v15170_v30 }
 0xb26   : > { %v7860_v20 = vmul.f32 %v7828_v45, %v14633_v13  ;;  %v7798_v36 = vmax.f32 %v7766_v19, 0.0 }
 0xb27   : > { %v7859_v59 = vmul.f32 %v7827_v54, %v14637_v58  ;;  %v7797_v23 = vmax.f32 %v7765_v10, 0.0  ;;  %v15850_v10 = vld [vmem:[#allocation56_spill] sm:$0xff] }
 0xb28   : > { %v7830_v3 = vmul.f32 %v11083_v51, %v7798_v36  ;;  %v15851_v36 = vld [vmem:[#allocation58_spill] sm:$0xff] }
 0xb29   : > { %v7829_v25 = vmul.f32 %v11085_v38, %v7797_v23  ;;  %v7891_v63 = vpack.c.bf16 %v7860_v20, %v7859_v59 }
 0xb2a   : > { %v7862_v56 = vmul.f32 %v7830_v3, %v14647_v34 }
 0xb2b   : > { %v7861_v37 = vmul.f32 %v7829_v25, %v14651_v62  ;;  %10327 = vmatprep.mubr.msk.bf16.mxu0 %vm457_vm0, %v7891_v63 }
 0xb2d   : > { %v7892_v35 = vpack.c.bf16 %v7862_v56, %v7861_v37 }
 0xb2f   : > { %10328 = vmatmul.mubr.msk.bf16.vlgmr.msra.gmra.mrb[240].mxu0 %vm457_vm0, %v7892_v35 }
 0xb31   : > { %v10279_v1 = vpop.f32.mrb[244].mxu1 }
 0xb32   : > { %11086 = vrsqrt.f32 %v10279_v1  ;;  %v7558_v6 = vpop.f32.mrb[245].mxu1 }
 0xb33   : > { %11088 = vrsqrt.f32 %v7558_v6 }
 0xb35   : > { %v10282_v13 = vpop.f32.mrb[246].mxu1 }
 0xb36   : > { %11090 = vrsqrt.f32 %v10282_v13  ;;  %v7568_v58 = vpop.f32.mrb[247].mxu1 }
 0xb37   : > { %11092 = vrsqrt.f32 %v7568_v58 }
 0xb3c   : > { %v11087_v31 = vpop.eup %11086 }
 0xb3d   : > { %v11089_v29 = vpop.eup %11088  ;;  %v7734_v9 = vmul.f32 %v11087_v31, %v10279_v1 }
 0xb3e   : > { %v7733_v7 = vmul.f32 %v11089_v29, %v7558_v6 }
 0xb3f   : > { %v7768_v34 = vsub.f32 %v7734_v9, %v15170_v30 }
 0xb40   : > { %v11091_v62 = vpop.eup %11090  ;;  %v7767_v14 = vsub.f32 %v7733_v7, %v15170_v30 }
 0xb41   : > { %v11093_v8 = vpop.eup %11092  ;;  %v7800_v0 = vmax.f32 %v7768_v34, 0.0  ;;  %v7736_v4 = vmul.f32 %v11091_v62, %v10282_v13 }
 0xb42   : > { %v7799_v11 = vmax.f32 %v7767_v14, 0.0  ;;  %v7735_v2 = vmul.f32 %v11093_v8, %v7568_v58 }
 0xb43   : > { %v7832_v18 = vmul.f32 %v11087_v31, %v7800_v0  ;;  %v7770_v5 = vsub.f32 %v7736_v4, %v15170_v30  ;;  %v15852_v4 = vld [vmem:[#allocation61_spill] sm:$0xff] }
 0xb44   : > { %v7831_v55 = vmul.f32 %v11089_v29, %v7799_v11  ;;  %v7769_v51 = vsub.f32 %v7735_v2, %v15170_v30 }
 0xb45   : > { %v7864_v38 = vmul.f32 %v7832_v18, %v15848_v39  ;;  %v7802_v57 = vmax.f32 %v7770_v5, 0.0 }
 0xb46   : > { %v7863_v48 = vmul.f32 %v7831_v55, %v15849_v46  ;;  %v7801_v43 = vmax.f32 %v7769_v51, 0.0 }
 0xb47   : > { %v7834_v45 = vmul.f32 %v11091_v62, %v7802_v57 }
 0xb48   : > { %v7833_v19 = vmul.f32 %v11093_v8, %v7801_v43  ;;  %v7893_v54 = vpack.c.bf16 %v7864_v38, %v7863_v48 }
 0xb49   : > { %v7866_v20 = vmul.f32 %v7834_v45, %v15850_v10 }
 0xb4a   : > { %v7865_v59 = vmul.f32 %v7833_v19, %v15851_v36  ;;  %10331 = vmatprep.mubr.msk.bf16.mxu0 %vm457_vm0, %v7893_v54 }
 0xb4c   : > { %v7894_v23 = vpack.c.bf16 %v7866_v20, %v7865_v59 }
 0xb4e   : > { %10332 = vmatmul.mubr.msk.bf16.gmra.mrb[244].mxu0 %vm457_vm0, %v7894_v23 }
 0xb65   : > { %v10285_v3 = vpop.f32.mrb[248].mxu1 }
 0xb66   : > { %11094 = vrsqrt.f32 %v10285_v3  ;;  %v7578_v25 = vpop.f32.mrb[249].mxu1 }
 0xb67   : > { %11096 = vrsqrt.f32 %v7578_v25 }
 0xb6d   : > { %v10288_v63 = vpop.f32.mrb[250].mxu1 }
 0xb6e   : > { %11098 = vrsqrt.f32 %v10288_v63  ;;  %v7588_v56 = vpop.f32.mrb[251].mxu1 }
 0xb6f   : > { %11100 = vrsqrt.f32 %v7588_v56 }
 0xb70   : > { %v11095_v37 = vpop.eup %11094 }
 0xb71   : > { %v11097_v35 = vpop.eup %11096  ;;  %v7738_v1 = vmul.f32 %v11095_v37, %v10285_v3 }
 0xb72   : > { %v7737_v6 = vmul.f32 %v11097_v35, %v7578_v25 }
 0xb73   : > { %v7772_v13 = vsub.f32 %v7738_v1, %v15170_v30 }
 0xb74   : > { %v7771_v58 = vsub.f32 %v7737_v6, %v15170_v30 }
 0xb75   : > { %v7804_v31 = vmax.f32 %v7772_v13, 0.0 }
 0xb76   : > { %v7803_v29 = vmax.f32 %v7771_v58, 0.0  ;;  %v10291_v9 = vpop.f32.mrb[252].mxu1 }
 0xb77   : > { %v7836_v7 = vmul.f32 %v11095_v37, %v7804_v31  ;;  %11102 = vrsqrt.f32 %v10291_v9  ;;  %v7598_v34 = vpop.f32.mrb[253].mxu1 }
 0xb78   : > { %v7835_v62 = vmul.f32 %v11097_v35, %v7803_v29  ;;  %11104 = vrsqrt.f32 %v7598_v34  ;;  %v11099_v14 = vpop.eup %11098 }
 0xb79   : > { %v7868_v8 = vmul.f32 %v7836_v7, %v14872_v42  ;;  %v11101_v0 = vpop.eup %11100  ;;  %v7740_v2 = vmul.f32 %v11099_v14, %v10288_v63 }
 0xb7a   : > { %v7867_v11 = vmul.f32 %v7835_v62, %v15852_v4  ;;  %v7739_v18 = vmul.f32 %v11101_v0, %v7588_v56 }
 0xb7b   : > { %v7774_v5 = vsub.f32 %v7740_v2, %v15170_v30 }
 0xb7c   : > { %v7895_v55 = vpack.c.bf16 %v7868_v8, %v7867_v11  ;;  %v7773_v51 = vsub.f32 %v7739_v18, %v15170_v30 }
 0xb7d   : > { %v10294_v39 = vpop.f32.mrb[254].mxu1  ;;  %v7806_v38 = vmax.f32 %v7774_v5, 0.0 }
 0xb7e   : > { %11106 = vrsqrt.f32 %v10294_v39  ;;  %v7608_v57 = vpop.f32.mrb[255].mxu1  ;;  %10335 = vmatprep.mubr.msk.bf16.mxu0 %vm457_vm0, %v7895_v55  ;;  %v7805_v46 = vmax.f32 %v7773_v51, 0.0 }
 0xb7f   : > { %11108 = vrsqrt.f32 %v7608_v57  ;;  %v7838_v48 = vmul.f32 %v11099_v14, %v7806_v38 }
 0xb80   : > { %v7837_v43 = vmul.f32 %v11101_v0, %v7805_v46 }
 0xb81   : > { %v11103_v42 = vpop.eup %11102  ;;  %v10297_v45 = vpop.f32.mrb[0].mxu1  ;;  %v7870_v54 = vmul.f32 %v7838_v48, %v14933_v22 }
 0xb82   : > { %v11105_v19 = vpop.eup %11104  ;;  %v7742_v10 = vmul.f32 %v11103_v42, %v10291_v9  ;;  %11110 = vrsqrt.f32 %v10297_v45  ;;  %v7618_v20 = vpop.f32.mrb[1].mxu1  ;;  %v7869_v36 = vmul.f32 %v7837_v43, %v14923_v60 }
 0xb83   : > { %v7741_v59 = vmul.f32 %v11105_v19, %v7598_v34  ;;  %11112 = vrsqrt.f32 %v7618_v20 }
 0xb84   : > { %v7776_v23 = vsub.f32 %v7742_v10, %v15170_v30  ;;  %v7896_v63 = vpack.c.bf16 %v7870_v54, %v7869_v36 }
 0xb85   : > { %v7775_v3 = vsub.f32 %v7741_v59, %v15170_v30  ;;  %v10300_v25 = vpop.f32.mrb[2].mxu1 }
 0xb86   : > { %v7808_v56 = vmax.f32 %v7776_v23, 0.0  ;;  %11114 = vrsqrt.f32 %v10300_v25  ;;  %v7628_v37 = vpop.f32.mrb[3].mxu1  ;;  %10336 = vmatmul.mubr.msk.bf16.gmra.mrb[248].mxu0 %vm457_vm0, %v7896_v63 }
 0xb87   : > { %v7807_v35 = vmax.f32 %v7775_v3, 0.0  ;;  %11116 = vrsqrt.f32 %v7628_v37 }
 0xb88   : > { %v11107_v22 = vpop.eup %11106  ;;  %v7840_v1 = vmul.f32 %v11103_v42, %v7808_v56 }
 0xb89   : > { %v11109_v6 = vpop.eup %11108  ;;  %v7839_v13 = vmul.f32 %v11105_v19, %v7807_v35  ;;  %v7744_v60 = vmul.f32 %v11107_v22, %v10294_v39  ;;  %v10303_v58 = vpop.f32.mrb[4].mxu1 }
 0xb8a   : > { %v7872_v31 = vmul.f32 %v7840_v1, %v14984_v12  ;;  %v7743_v29 = vmul.f32 %v11109_v6, %v7608_v57  ;;  %11118 = vrsqrt.f32 %v10303_v58  ;;  %v7638_v9 = vpop.f32.mrb[5].mxu1 }
 0xb8b   : > { %v7871_v7 = vmul.f32 %v7839_v13, %v14965_v24  ;;  %v7778_v34 = vsub.f32 %v7744_v60, %v15170_v30  ;;  %11120 = vrsqrt.f32 %v7638_v9 }
 0xb8c   : > { %v11111_v62 = vpop.eup %11110  ;;  %v7777_v14 = vsub.f32 %v7743_v29, %v15170_v30 }
 0xb8d   : > { %v11113_v8 = vpop.eup %11112  ;;  %v7810_v0 = vmax.f32 %v7778_v34, 0.0  ;;  %v7746_v4 = vmul.f32 %v11111_v62, %v10297_v45  ;;  %v10306_v11 = vpop.f32.mrb[6].mxu1  ;;  %v7897_v2 = vpack.c.bf16 %v7872_v31, %v7871_v7 }
 0xb8e   : > { %v7809_v18 = vmax.f32 %v7777_v14, 0.0  ;;  %v7745_v5 = vmul.f32 %v11113_v8, %v7618_v20  ;;  %11122 = vrsqrt.f32 %v10306_v11  ;;  %v7648_v12 = vpop.f32.mrb[7].mxu1 }
 0xb8f   : > { %v7842_v55 = vmul.f32 %v11107_v22, %v7810_v0  ;;  %v7780_v51 = vsub.f32 %v7746_v4, %v15170_v30  ;;  %11124 = vrsqrt.f32 %v7648_v12  ;;  %10339 = vmatprep.mubr.msk.bf16.mxu0 %vm457_vm0, %v7897_v2 }
 0xb90   : > { %v11115_v24 = vpop.eup %11114  ;;  %v7841_v39 = vmul.f32 %v11109_v6, %v7809_v18  ;;  %v7779_v38 = vsub.f32 %v7745_v5, %v15170_v30 }
 0xb91   : > { %v11117_v57 = vpop.eup %11116  ;;  %v7874_v46 = vmul.f32 %v7842_v55, %v15021_v17  ;;  %v7812_v48 = vmax.f32 %v7780_v51, 0.0  ;;  %v7748_v42 = vmul.f32 %v11115_v24, %v10300_v25  ;;  %v10309_v43 = vpop.f32.mrb[8].mxu1 }
 0xb92   : > { %v7873_v45 = vmul.f32 %v7841_v39, %v15007_v41  ;;  %v7811_v19 = vmax.f32 %v7779_v38, 0.0  ;;  %v7747_v54 = vmul.f32 %v11117_v57, %v7628_v37  ;;  %11126 = vrsqrt.f32 %v10309_v43  ;;  %v7658_v10 = vpop.f32.mrb[9].mxu1 }
 0xb93   : > { %v7844_v20 = vmul.f32 %v11111_v62, %v7812_v48  ;;  %v7782_v36 = vsub.f32 %v7748_v42, %v15170_v30  ;;  %11128 = vrsqrt.f32 %v7658_v10 }
 0xb94   : > { %v11119_v59 = vpop.eup %11118  ;;  %v7843_v23 = vmul.f32 %v11113_v8, %v7811_v19  ;;  %v7781_v3 = vsub.f32 %v7747_v54, %v15170_v30  ;;  %v7898_v63 = vpack.c.bf16 %v7874_v46, %v7873_v45 }
 0xb95   : > { %v11121_v56 = vpop.eup %11120  ;;  %v7876_v17 = vmul.f32 %v7844_v20, %v15030_v53  ;;  %v7814_v25 = vmax.f32 %v7782_v36, 0.0  ;;  %v7750_v35 = vmul.f32 %v11119_v59, %v10303_v58  ;;  %v10312_v22 = vpop.f32.mrb[10].mxu1 }
 0xb96   : > { %v7875_v41 = vmul.f32 %v7843_v23, %v15024_v52  ;;  %v7813_v37 = vmax.f32 %v7781_v3, 0.0  ;;  %v7749_v1 = vmul.f32 %v11121_v56, %v7638_v9  ;;  %11130 = vrsqrt.f32 %v10312_v22  ;;  %v7668_v6 = vpop.f32.mrb[11].mxu1  ;;  %10340 = vmatmul.mubr.msk.bf16.gmra.mrb[252].mxu0 %vm457_vm0, %v7898_v63 }
 0xb97   : > { %v7846_v13 = vmul.f32 %v11115_v24, %v7814_v25  ;;  %v7784_v60 = vsub.f32 %v7750_v35, %v15170_v30  ;;  %11132 = vrsqrt.f32 %v7668_v6 }
 0xb98   : > { %v11123_v31 = vpop.eup %11122  ;;  %v7845_v29 = vmul.f32 %v11117_v57, %v7813_v37  ;;  %v7783_v7 = vsub.f32 %v7749_v1, %v15170_v30  ;;  %v7899_v53 = vpack.c.bf16 %v7876_v17, %v7875_v41 }
 0xb99   : > { %v11125_v34 = vpop.eup %11124  ;;  %v7878_v58 = vmul.f32 %v7846_v13, %v15056_v16  ;;  %v7816_v62 = vmax.f32 %v7784_v60, 0.0  ;;  %v7752_v52 = vmul.f32 %v11123_v31, %v10306_v11  ;;  %v10315_v14 = vpop.f32.mrb[12].mxu1 }
 0xb9a   : > { %v7877_v9 = vmul.f32 %v7845_v29, %v15050_v21  ;;  %v7815_v8 = vmax.f32 %v7783_v7, 0.0  ;;  %v7751_v0 = vmul.f32 %v11125_v34, %v7648_v12  ;;  %11134 = vrsqrt.f32 %v10315_v14  ;;  %v7678_v4 = vpop.f32.mrb[13].mxu1  ;;  %10343 = vmatprep.mubr.msk.bf16.mxu0 %vm457_vm0, %v7899_v53 }
 0xb9b   : > { %v7848_v2 = vmul.f32 %v11119_v59, %v7816_v62  ;;  %v7786_v18 = vsub.f32 %v7752_v52, %v15170_v30  ;;  %11136 = vrsqrt.f32 %v7678_v4 }
 0xb9c   : > { %v11127_v5 = vpop.eup %11126  ;;  %v7900_v55 = vpack.c.bf16 %v7878_v58, %v7877_v9  ;;  %v7847_v51 = vmul.f32 %v11121_v56, %v7815_v8  ;;  %v7785_v16 = vsub.f32 %v7751_v0, %v15170_v30 }
 0xb9d   : > { %v11129_v24 = vpop.eup %11128  ;;  %v7880_v11 = vmul.f32 %v7848_v2, %v15085_v40  ;;  %v7818_v39 = vmax.f32 %v7786_v18, 0.0  ;;  %v7754_v21 = vmul.f32 %v11127_v5, %v10309_v43  ;;  %v10318_v38 = vpop.f32.mrb[14].mxu1 }
 0xb9e   : > { %v7879_v12 = vmul.f32 %v7847_v51, %v15059_v33  ;;  %v7817_v57 = vmax.f32 %v7785_v16, 0.0  ;;  %v7753_v46 = vmul.f32 %v11129_v24, %v7658_v10  ;;  %11138 = vrsqrt.f32 %v10318_v38  ;;  %v7688_v48 = vpop.f32.mrb[15].mxu1  ;;  %10344 = vmatmul.mubr.msk.bf16.gmra.mrb[0].mxu0 %vm457_vm0, %v7900_v55 }
 0xb9f   : > { %v7850_v42 = vmul.f32 %v11123_v31, %v7818_v39  ;;  %v7788_v45 = vsub.f32 %v7754_v21, %v15170_v30  ;;  %11140 = vrsqrt.f32 %v7688_v48 }
 0xba0   : > { %v11131_v19 = vpop.eup %11130  ;;  %v7849_v54 = vmul.f32 %v11125_v34, %v7817_v57  ;;  %v7787_v20 = vsub.f32 %v7753_v46, %v15170_v30  ;;  %v7901_v40 = vpack.c.bf16 %v7880_v11, %v7879_v12 }
 0xba1   : > { %v11133_v36 = vpop.eup %11132  ;;  %v7882_v43 = vmul.f32 %v7850_v42, %v15104_v32  ;;  %v7820_v59 = vmax.f32 %v7788_v45, 0.0  ;;  %v7756_v33 = vmul.f32 %v11131_v19, %v10312_v22 }
 0xba2   : > { %v7881_v10 = vmul.f32 %v7849_v54, %v15078_v28  ;;  %v7819_v23 = vmax.f32 %v7787_v20, 0.0  ;;  %v7755_v3 = vmul.f32 %v11133_v36, %v7668_v6  ;;  %10347 = vmatprep.mubr.msk.bf16.mxu0 %vm457_vm0, %v7901_v40 }
 0xba3   : > { %v7852_v63 = vmul.f32 %v11127_v5, %v7820_v59  ;;  %v7790_v56 = vsub.f32 %v7756_v33, %v15170_v30 }
 0xba4   : > { %v11135_v17 = vpop.eup %11134  ;;  %v7902_v25 = vpack.c.bf16 %v7882_v43, %v7881_v10  ;;  %v7851_v35 = vmul.f32 %v11129_v24, %v7819_v23  ;;  %v7789_v41 = vsub.f32 %v7755_v3, %v15170_v30 }
 0xba5   : > { %v11137_v37 = vpop.eup %11136  ;;  %v7884_v1 = vmul.f32 %v7852_v63, %v15123_v49  ;;  %v7822_v32 = vmax.f32 %v7790_v56, 0.0  ;;  %v7758_v13 = vmul.f32 %v11135_v17, %v10315_v14 }
 0xba6   : > { %v7883_v22 = vmul.f32 %v7851_v35, %v15093_v27  ;;  %v7821_v28 = vmax.f32 %v7789_v41, 0.0  ;;  %v7757_v60 = vmul.f32 %v11137_v37, %v7678_v4  ;;  %10348 = vmatmul.mubr.msk.bf16.gmra.mrb[4].mxu0 %vm457_vm0, %v7902_v25 }
 0xba7   : > { %v7854_v6 = vmul.f32 %v11131_v19, %v7822_v32  ;;  %v7792_v31 = vsub.f32 %v7758_v13, %v15170_v30 }
 0xba8   : > { %v11139_v29 = vpop.eup %11138  ;;  %v7853_v7 = vmul.f32 %v11133_v36, %v7821_v28  ;;  %v7791_v53 = vsub.f32 %v7757_v60, %v15170_v30  ;;  %v7903_v34 = vpack.c.bf16 %v7884_v1, %v7883_v22 }
 0xba9   : > { %v11141_v58 = vpop.eup %11140  ;;  %v7886_v62 = vmul.f32 %v7854_v6, %v15138_v15  ;;  %v7824_v49 = vmax.f32 %v7792_v31, 0.0  ;;  %v7760_v52 = vmul.f32 %v11139_v29, %v10318_v38 }
 0xbaa   : > { %v7885_v14 = vmul.f32 %v7853_v7, %v15114_v61  ;;  %v7823_v27 = vmax.f32 %v7791_v53, 0.0  ;;  %v7759_v9 = vmul.f32 %v11141_v58, %v7688_v48  ;;  %10351 = vmatprep.mubr.msk.bf16.mxu0 %vm457_vm0, %v7903_v34 }
 0xbab   : > { %v7856_v8 = vmul.f32 %v11135_v17, %v7824_v49  ;;  %v7794_v0 = vsub.f32 %v7760_v52, %v15170_v30 }
 0xbac   : > { %v7904_v4 = vpack.c.bf16 %v7886_v62, %v7885_v14  ;;  %v7855_v2 = vmul.f32 %v11137_v37, %v7823_v27  ;;  %v7793_v18 = vsub.f32 %v7759_v9, %v15170_v30 }
 0xbad   : > { %v7888_v5 = vmul.f32 %v7856_v8, %v15151_v26  ;;  %v7826_v55 = vmax.f32 %v7794_v0, 0.0 }
 0xbae   : > { %v7887_v15 = vmul.f32 %v7855_v2, %v15130_v44  ;;  %v7825_v51 = vmax.f32 %v7793_v18, 0.0  ;;  %10352 = vmatmul.mubr.msk.bf16.gmra.mrb[8].mxu0 %vm457_vm0, %v7904_v4 }
 0xbaf   : > { %v7858_v61 = vmul.f32 %v11139_v29, %v7826_v55 }
 0xbb0   : > { %v7857_v16 = vmul.f32 %v11141_v58, %v7825_v51  ;;  %v7905_v24 = vpack.c.bf16 %v7888_v5, %v7887_v15 }
 0xbb1   : > { %v7890_v11 = vmul.f32 %v7858_v61, %v15160_v50 }
 0xbb2   : > { %v7889_v39 = vmul.f32 %v7857_v16, %v15145_v47  ;;  %10355 = vmatprep.mubr.msk.bf16.mxu0 %vm457_vm0, %v7905_v24 }
 0xbb4   : > { %v7906_v21 = vpack.c.bf16 %v7890_v11, %v7889_v39 }
 0xbb6   : > { %10356 = vmatmul.mubr.msk.bf16.gmra.mrb[12].mxu0 %vm457_vm0, %v7906_v21 }
 0xc02   : > { %v10329_v44 = vpop.f32.mrb[240].mxu0 }
 0xc03   : > { %8151 = vst.msk [vmem:[%s15256_s29 + $0x10] sm:$0xff] %vm457_vm0, %v10329_v44  ;;  %v8022_v47 = vpop.f32.mrb[241].mxu0 }
 0xc04   : > { %8149 = vst.msk [vmem:[%s15256_s29] sm:$0xff] %vm457_vm0, %v8022_v47  ;;  %v10330_v26 = vpop.f32.mrb[242].mxu0 }
 0xc05   : > { %8152 = vst.msk [vmem:[%s15256_s29 + $0x18] sm:$0xff] %vm457_vm0, %v10330_v26  ;;  %v8025_v50 = vpop.f32.mrb[243].mxu0 }
 0xc06   : > { %8150 = vst.msk [vmem:[%s15256_s29 + $0x8] sm:$0xff] %vm457_vm0, %v8025_v50 }
 0xc21   : > { %v10333_v30 = vpop.f32.mrb[244].mxu0 }
 0xc22   : > { %8155 = vst.msk [vmem:[%s15256_s29 + $0x30] sm:$0xff] %vm457_vm0, %v10333_v30  ;;  %v8038_v38 = vpop.f32.mrb[245].mxu0 }
 0xc23   : > { %8153 = vst.msk [vmem:[%s15256_s29 + $0x20] sm:$0xff] %vm457_vm0, %v8038_v38  ;;  %v10334_v12 = vpop.f32.mrb[246].mxu0 }
 0xc24   : > { %8156 = vst.msk [vmem:[%s15256_s29 + $0x38] sm:$0xff] %vm457_vm0, %v10334_v12  ;;  %v8041_v57 = vpop.f32.mrb[247].mxu0 }
 0xc25   : > { %8154 = vst.msk [vmem:[%s15256_s29 + $0x28] sm:$0xff] %vm457_vm0, %v8041_v57 }
 0xc59   : > { %v10337_v46 = vpop.f32.mrb[248].mxu0 }
 0xc5a   : > { %8159 = vst.msk [vmem:[%s15256_s29 + $0x50] sm:$0xff] %vm457_vm0, %v10337_v46  ;;  %v8054_v48 = vpop.f32.mrb[249].mxu0 }
 0xc5b   : > { %8157 = vst.msk [vmem:[%s15256_s29 + $0x40] sm:$0xff] %vm457_vm0, %v8054_v48  ;;  %v10338_v42 = vpop.f32.mrb[250].mxu0 }
 0xc5c   : > { %8160 = vst.msk [vmem:[%s15256_s29 + $0x58] sm:$0xff] %vm457_vm0, %v10338_v42  ;;  %v8057_v45 = vpop.f32.mrb[251].mxu0 }
 0xc5d   : > { %8158 = vst.msk [vmem:[%s15256_s29 + $0x48] sm:$0xff] %vm457_vm0, %v8057_v45 }
 0xc69   : > { %v10341_v19 = vpop.f32.mrb[252].mxu0 }
 0xc6a   : > { %8163 = vst.msk [vmem:[%s15256_s29 + $0x70] sm:$0xff] %vm457_vm0, %v10341_v19  ;;  %v8070_v54 = vpop.f32.mrb[253].mxu0 }
 0xc6b   : > { %8161 = vst.msk [vmem:[%s15256_s29 + $0x60] sm:$0xff] %vm457_vm0, %v8070_v54  ;;  %v10342_v20 = vpop.f32.mrb[254].mxu0 }
 0xc6c   : > { %8164 = vst.msk [vmem:[%s15256_s29 + $0x78] sm:$0xff] %vm457_vm0, %v10342_v20  ;;  %v8073_v40 = vpop.f32.mrb[255].mxu0 }
 0xc6d   : > { %8162 = vst.msk [vmem:[%s15256_s29 + $0x68] sm:$0xff] %vm457_vm0, %v8073_v40 }
 0xc71   : > { %v10345_v36 = vpop.f32.mrb[0].mxu0 }
 0xc72   : > { %8167 = vst.msk [vmem:[%s15256_s29 + $0x90] sm:$0xff] %vm457_vm0, %v10345_v36  ;;  %v8086_v43 = vpop.f32.mrb[1].mxu0 }
 0xc73   : > { %8165 = vst.msk [vmem:[%s15256_s29 + $0x80] sm:$0xff] %vm457_vm0, %v8086_v43  ;;  %v10346_v59 = vpop.f32.mrb[2].mxu0 }
 0xc74   : > { %8168 = vst.msk [vmem:[%s15256_s29 + $0x98] sm:$0xff] %vm457_vm0, %v10346_v59  ;;  %v8089_v33 = vpop.f32.mrb[3].mxu0 }
 0xc75   : > { %8166 = vst.msk [vmem:[%s15256_s29 + $0x88] sm:$0xff] %vm457_vm0, %v8089_v33 }
 0xc79   : > { %v10349_v10 = vpop.f32.mrb[4].mxu0 }
 0xc7a   : > { %8171 = vst.msk [vmem:[%s15256_s29 + $0xb0] sm:$0xff] %vm457_vm0, %v10349_v10  ;;  %v8102_v23 = vpop.f32.mrb[5].mxu0 }
 0xc7b   : > { %8169 = vst.msk [vmem:[%s15256_s29 + $0xa0] sm:$0xff] %vm457_vm0, %v8102_v23  ;;  %v10350_v3 = vpop.f32.mrb[6].mxu0 }
 0xc7c   : > { %8172 = vst.msk [vmem:[%s15256_s29 + $0xb8] sm:$0xff] %vm457_vm0, %v10350_v3  ;;  %v8105_v63 = vpop.f32.mrb[7].mxu0 }
 0xc7d   : > { %8170 = vst.msk [vmem:[%s15256_s29 + $0xa8] sm:$0xff] %vm457_vm0, %v8105_v63 }
 0xc81   : > { %v10353_v56 = vpop.f32.mrb[8].mxu0 }
 0xc82   : > { %8175 = vst.msk [vmem:[%s15256_s29 + $0xd0] sm:$0xff] %vm457_vm0, %v10353_v56  ;;  %v8118_v17 = vpop.f32.mrb[9].mxu0 }
 0xc83   : > { %8173 = vst.msk [vmem:[%s15256_s29 + $0xc0] sm:$0xff] %vm457_vm0, %v8118_v17  ;;  %v10354_v25 = vpop.f32.mrb[10].mxu0 }
 0xc84   : > { %8176 = vst.msk [vmem:[%s15256_s29 + $0xd8] sm:$0xff] %vm457_vm0, %v10354_v25  ;;  %v8121_v35 = vpop.f32.mrb[11].mxu0 }
 0xc85   : > { %8174 = vst.msk [vmem:[%s15256_s29 + $0xc8] sm:$0xff] %vm457_vm0, %v8121_v35 }
 0xc89   : > { %v10357_v41 = vpop.f32.mrb[12].mxu0 }
 0xc8a   : > { %8179 = vst.msk [vmem:[%s15256_s29 + $0xf0] sm:$0xff] %vm457_vm0, %v10357_v41  ;;  %v8134_v37 = vpop.f32.mrb[13].mxu0 }
 0xc8b   : > { %8177 = vst.msk [vmem:[%s15256_s29 + $0xe0] sm:$0xff] %vm457_vm0, %v8134_v37  ;;  %v10358_v1 = vpop.f32.mrb[14].mxu0 }
 0xc8c   : > { %8180 = vst.msk [vmem:[%s15256_s29 + $0xf8] sm:$0xff] %vm457_vm0, %v10358_v1  ;;  %v8137_v32 = vpop.f32.mrb[15].mxu0 }
 0xc8d   : > { %8178 = vst.msk [vmem:[%s15256_s29 + $0xe8] sm:$0xff] %vm457_vm0, %v8137_v32 }
 0xc8e PF: > { %s18_s24 = sadd.s32 1, %s11183_s24  }
 0xc8f   : > { %p15_p1 = scmp.ge.s32.totalorder %s18_s24, 4  }
 0xc91   :  { %17 = sbr.rel (!%p15_p1) target bundleno = 1 (0x1), region = 93 }
 0xc98   :  { %8203 = vsyncpa [#allocation3], 1 }
 0xc99   :  { %8205 = vsyncpa [#allocation3 + $0x1], 1 }

</bundles_post_ra>
